<compile_context>
chip_gen: v7x
topology: tpu7x:2x2x1
jax: 0.10.0
libtpu: 0.0.40
codegen_flags: <defaults>
</compile_context>

<pallas_src>
import jax
import jax.numpy as jnp
from jax.experimental import pallas as pl
from jax.experimental.pallas import tpu as pltpu


B_TILE = 32  # samples per grid step (multiple of 8 -> sublane-aligned slices)


# ------------------------------ fused kernel ------------------------------ #

def _dilated_cnn_kernel(x_ref, n1_ref, b1_ref, m2_ref, b2_ref, v1_ref, fb1_ref,
                        fw2_ref, fb2_ref, fw3_ref, fb3_ref, o_ref, act1_s):
    """One batch tile per grid step.

    x_ref block: (32, bt, 96) with x_ref[i, b, j*3 + c] = input[b, c, i, j].
    All conv work is expressed as dense matmuls against precomputed banded
    matrices, so every slice below is a free leading-axis slice.
    """
    f32 = jnp.float32
    bt = x_ref.shape[1]

    # ---- conv1 + ReLU: (32, bt, 96) -> act1 (24, bt, 144), lanes = j*6+co --
    acc1 = jnp.zeros((24 * bt, 144), f32)
    for ki in range(5):
        xi = x_ref[2 * ki:2 * ki + 24, :, :]                   # (24, bt, 96)
        acc1 = acc1 + jnp.dot(xi.reshape(24 * bt, 96), n1_ref[ki],
                              preferred_element_type=f32)
    act1_s[...] = jnp.maximum(acc1 + b1_ref[...], 0.0).reshape(24, bt, 144)

    # ---- conv2 + ReLU: -> a2 (16*bt, 256), rows = i*bt+b, lanes = j*16+co --
    acc2 = jnp.zeros((16 * bt, 256), f32)
    for ki in range(5):
        ai = act1_s[2 * ki:2 * ki + 16, :, :]                  # (16, bt, 144)
        acc2 = acc2 + jnp.dot(ai.reshape(16 * bt, 144), m2_ref[ki],
                              preferred_element_type=f32)
    a2 = jnp.maximum(acc2 + b2_ref[...], 0.0)                  # (16*bt, 256)

    # ---- fc1 + ReLU: 16 dots of (bt,256)@(256,120); NCHW flatten is baked
    # into v1_ref in prepare_params, so no in-kernel relayout is needed. ----
    h = jnp.zeros((bt, 120), f32)
    for i in range(16):
        h = h + jnp.dot(a2[i * bt:(i + 1) * bt, :], v1_ref[i],
                        preferred_element_type=f32)
    h = jnp.maximum(h + fb1_ref[...], 0.0)                     # (bt, 120)

    # ---- fc2 + ReLU, fc3 (lane-dense row-vector biases) ----
    h = jnp.maximum(jnp.dot(h, fw2_ref[...], preferred_element_type=f32)
                    + fb2_ref[...], 0.0)                       # (bt, 84)
    o_ref[...] = (jnp.dot(h, fw3_ref[...], preferred_element_type=f32)
                  + fb3_ref[...])                              # (bt, 10)


# ------------------------- parameter preparation -------------------------- #

def init_params(key):
    """PyTorch-layout parameters with the same shapes as the nn.Module."""
    ks = jax.random.split(key, 10)
    scale = 0.05

    def n(k, shape):
        return (scale * jax.random.normal(k, shape)).astype(jnp.float32)

    return {
        "conv1_w": n(ks[0], (6, 3, 5, 5)),   "conv1_b": n(ks[1], (6,)),
        "conv2_w": n(ks[2], (16, 6, 5, 5)),  "conv2_b": n(ks[3], (16,)),
        "fc1_w":   n(ks[4], (120, 4096)),    "fc1_b":   n(ks[5], (120,)),
        "fc2_w":   n(ks[6], (84, 120)),      "fc2_b":   n(ks[7], (84,)),
        "fc3_w":   n(ks[8], (10, 84)),       "fc3_b":   n(ks[9], (10,)),
    }


def prepare_params(params):
    """One-time layout prep (zero per-forward cost).

    Builds banded 'shift-and-weight' matrices that fold the width taps (kj)
    and input channels of each dilated conv into a single contraction axis:
      n1[ki, jp*3+ci, j*6 +co] = conv1_w[co, ci, ki, kj]  iff jp == j + 2*kj
      m2[ki, jp*6+ci, j*16+co] = conv2_w[co, ci, ki, kj]  iff jp == j + 2*kj
    and regroups fc1's weight so the PyTorch NCHW flatten (col = c*256+i*16+j)
    is consumed directly from the kernel's (rows=(i,b), lanes=(j,c)) layout.
    """
    f32 = jnp.float32
    w1 = params["conv1_w"].astype(f32)     # (6,3,5,5)   OIHW
    w2 = params["conv2_w"].astype(f32)     # (16,6,5,5)  OIHW
    fc1_w = params["fc1_w"].astype(f32)    # (120,4096), col = c*256 + i*16 + j

    kj = jnp.arange(5)[:, None, None]
    s1 = (jnp.arange(32)[None, None, :] ==
          jnp.arange(24)[None, :, None] + 2 * kj).astype(f32)   # (5,24,32)
    n1 = jnp.einsum("abc,oika->kcibo", s1, w1).reshape(5, 96, 144)

    s2 = (jnp.arange(24)[None, None, :] ==
          jnp.arange(16)[None, :, None] + 2 * kj).astype(f32)   # (5,16,24)
    m2 = jnp.einsum("abc,oika->kcibo", s2, w2).reshape(5, 144, 256)

    # v1[i, j*16+co, n] = fc1_w[n, co*256 + i*16 + j]
    v1 = jnp.transpose(fc1_w.reshape(120, 16, 16, 16),
                       (2, 3, 1, 0)).reshape(16, 256, 120)

    return {
        "n1": n1,
        "b1": jnp.tile(params["conv1_b"].astype(f32), 24).reshape(1, 144),
        "m2": m2,
        "b2": jnp.tile(params["conv2_b"].astype(f32), 16).reshape(1, 256),
        "v1": v1,
        "fb1": params["fc1_b"].astype(f32).reshape(1, 120),
        "fw2": params["fc2_w"].astype(f32).T,                   # (120, 84)
        "fb2": params["fc2_b"].astype(f32).reshape(1, 84),
        "fw3": params["fc3_w"].astype(f32).T,                   # (84, 10)
        "fb3": params["fc3_b"].astype(f32).reshape(1, 10),
    }


# --------------------------------- forward -------------------------------- #

def dilated_cnn_forward(kparams, x):
    """x: (B, 3, 32, 32) float32 NCHW (as in PyTorch) -> (B, 10)."""
    B = x.shape[0]
    bt = B_TILE
    bp = ((B + bt - 1) // bt) * bt
    if bp != B:
        x = jnp.pad(x, ((0, bp - B), (0, 0), (0, 0), (0, 0)))
    # (B,3,32,32) -> (32, B, 96) with x_in[i, b, j*3+c] = x[b, c, i, j]:
    # image rows become the (freely sliceable) leading axis, batch sits on the
    # sublane axis, (width, channel) forms a dense 96-wide lane axis.
    x_in = jnp.transpose(x, (2, 0, 3, 1)).reshape(32, bp, 96)

    out = pl.pallas_call(
        _dilated_cnn_kernel,
        out_shape=jax.ShapeDtypeStruct((bp, 10), jnp.float32),
        grid=(bp // bt,),
        in_specs=[
            pl.BlockSpec((32, bt, 96),    lambda g: (0, g, 0)),   # input tile
            pl.BlockSpec((5, 96, 144),    lambda g: (0, 0, 0)),   # conv1 bands
            pl.BlockSpec((1, 144),        lambda g: (0, 0)),      # conv1 bias
            pl.BlockSpec((5, 144, 256),   lambda g: (0, 0, 0)),   # conv2 bands
            pl.BlockSpec((1, 256),        lambda g: (0, 0)),      # conv2 bias
            pl.BlockSpec((16, 256, 120),  lambda g: (0, 0, 0)),   # fc1 weight
            pl.BlockSpec((1, 120),        lambda g: (0, 0)),      # fc1 bias
            pl.BlockSpec((120, 84),       lambda g: (0, 0)),      # fc2 weight
            pl.BlockSpec((1, 84),         lambda g: (0, 0)),      # fc2 bias
            pl.BlockSpec((84, 10),        lambda g: (0, 0)),      # fc3 weight
            pl.BlockSpec((1, 10),         lambda g: (0, 0)),      # fc3 bias
        ],
        out_specs=pl.BlockSpec((bt, 10), lambda g: (g, 0)),
        scratch_shapes=[pltpu.VMEM((24, bt, 144), jnp.float32)],  # conv1 act
        compiler_params=pltpu.CompilerParams(
            dimension_semantics=("parallel",),
            vmem_limit_bytes=32 * 1024 * 1024),
    )(x_in, kparams["n1"], kparams["b1"], kparams["m2"], kparams["b2"],
      kparams["v1"], kparams["fb1"], kparams["fw2"], kparams["fb2"],
      kparams["fw3"], kparams["fb3"])
    return out[:B]


# ---------------------------- pure-JAX reference --------------------------- #

def _reference_forward(params, x):
    hp = jax.lax.Precision.HIGHEST

    def conv(x, w, b, d):
        y = jax.lax.conv_general_dilated(
            x, w, window_strides=(1, 1), padding="VALID",
            rhs_dilation=(d, d),
            dimension_numbers=("NCHW", "OIHW", "NCHW"),
            precision=hp)
        return jnp.maximum(y + b[None, :, None, None], 0.0)

    h = conv(x, params["conv1_w"], params["conv1_b"], 2)   # (B,6,24,24)
    h = conv(h, params["conv2_w"], params["conv2_b"], 2)   # (B,16,16,16)
    h = h.reshape(x.shape[0], 4096)                        # NCHW flatten
    h = jnp.maximum(jnp.dot(h, params["fc1_w"].T, precision=hp) + params["fc1_b"], 0.0)
    h = jnp.maximum(jnp.dot(h, params["fc2_w"].T, precision=hp) + params["fc2_b"], 0.0)
    h = jnp.dot(h, params["fc3_w"].T, precision=hp) + params["fc3_b"]
    return h


if __name__ == "__main__":
    key = jax.random.PRNGKey(0)
    k_param, k_x = jax.random.split(key)
    params = init_params(k_param)
    kparams = prepare_params(params)
    # view(-1, 4096) after two k=5, d=2 VALID convs implies (B, 3, 32, 32).
    x = jax.random.normal(k_x, (2, 3, 32, 32), dtype=jnp.float32)

    out = jax.jit(dilated_cnn_forward)(kparams, x)
    out = jax.block_until_ready(out)
    assert out.shape == (2, 10), out.shape

    ref = _reference_forward(params, x)
    assert jnp.allclose(out, ref, rtol=1e-2, atol=5e-3), \
        float(jnp.max(jnp.abs(out - ref)))

    print("KERNEL_OK")
</pallas_src>

<mosaic_0001>
module attributes {stable_mosaic.version = 11 : i64} {
  func.func @_dilated_cnn_kernel(%arg0: i32, %arg1: memref<32x32x96xf32, #tpu.memory_space<vmem>>, %arg2: memref<5x96x144xf32, #tpu.memory_space<vmem>>, %arg3: memref<1x144xf32, #tpu.memory_space<vmem>>, %arg4: memref<5x144x256xf32, #tpu.memory_space<vmem>>, %arg5: memref<1x256xf32, #tpu.memory_space<vmem>>, %arg6: memref<16x256x120xf32, #tpu.memory_space<vmem>>, %arg7: memref<1x120xf32, #tpu.memory_space<vmem>>, %arg8: memref<120x84xf32, #tpu.memory_space<vmem>>, %arg9: memref<1x84xf32, #tpu.memory_space<vmem>>, %arg10: memref<84x10xf32, #tpu.memory_space<vmem>>, %arg11: memref<1x10xf32, #tpu.memory_space<vmem>>, %arg12: memref<32x10xf32, #tpu.memory_space<vmem>>, %arg13: memref<24x32x144xf32, #tpu.memory_space<vmem>>) attributes {dimension_semantics = [#tpu.dimension_semantics<parallel>], iteration_bounds = array<i64: 1>, scalar_prefetch = 0 : i64, scratch_operands = 1 : i64, tpu.core_type = #tpu.core_type<tc>, window_params = [{transform_indices = @transform_0, window_bounds = array<i64: 32, 32, 96>}, {pipeline_mode = #tpu.pipeline_mode<synchronous>, transform_indices = @transform_1, window_bounds = array<i64: 5, 96, 144>}, {pipeline_mode = #tpu.pipeline_mode<synchronous>, transform_indices = @transform_2, window_bounds = array<i64: 1, 144>}, {pipeline_mode = #tpu.pipeline_mode<synchronous>, transform_indices = @transform_3, window_bounds = array<i64: 5, 144, 256>}, {pipeline_mode = #tpu.pipeline_mode<synchronous>, transform_indices = @transform_4, window_bounds = array<i64: 1, 256>}, {pipeline_mode = #tpu.pipeline_mode<synchronous>, transform_indices = @transform_5, window_bounds = array<i64: 16, 256, 120>}, {pipeline_mode = #tpu.pipeline_mode<synchronous>, transform_indices = @transform_6, window_bounds = array<i64: 1, 120>}, {pipeline_mode = #tpu.pipeline_mode<synchronous>, transform_indices = @transform_7, window_bounds = array<i64: 120, 84>}, {pipeline_mode = #tpu.pipeline_mode<synchronous>, transform_indices = @transform_8, window_bounds = array<i64: 1, 84>}, {pipeline_mode = #tpu.pipeline_mode<synchronous>, transform_indices = @transform_9, window_bounds = array<i64: 84, 10>}, {pipeline_mode = #tpu.pipeline_mode<synchronous>, transform_indices = @transform_10, window_bounds = array<i64: 1, 10>}, {transform_indices = @transform_11, window_bounds = array<i64: 32, 10>}]} {
    %cst = arith.constant 0.000000e+00 : f32
    %0 = vector.broadcast %cst : f32 to vector<768x144xf32>
    %c0 = arith.constant 0 : index
    %c0_0 = arith.constant 0 : index
    %c0_1 = arith.constant 0 : index
    %1 = vector.load %arg1[%c0, %c0_0, %c0_1] : memref<32x32x96xf32, #tpu.memory_space<vmem>>, vector<24x32x96xf32>
    %2 = vector.shape_cast %1 : vector<24x32x96xf32> to vector<768x96xf32>
    %c0_2 = arith.constant 0 : index
    %c0_3 = arith.constant 0 : index
    %c0_4 = arith.constant 0 : index
    %3 = vector.load %arg2[%c0_2, %c0_3, %c0_4] : memref<5x96x144xf32, #tpu.memory_space<vmem>>, vector<1x96x144xf32>
    %4 = vector.shape_cast %3 : vector<1x96x144xf32> to vector<96x144xf32>
    %cst_5 = arith.constant dense<0.000000e+00> : vector<768x144xf32>
    %5 = tpu.matmul %2, %4, %cst_5 {dimension_numbers = #tpu.dot_dimension_numbers<[1], [0], [0], [1], [0, 0, 1, 1], [], []>} : vector<768x96xf32>, vector<96x144xf32>, vector<768x144xf32> -> vector<768x144xf32>
    %6 = arith.addf %0, %5 : vector<768x144xf32>
    %c2 = arith.constant 2 : index
    %c0_6 = arith.constant 0 : index
    %c0_7 = arith.constant 0 : index
    %7 = vector.load %arg1[%c2, %c0_6, %c0_7] : memref<32x32x96xf32, #tpu.memory_space<vmem>>, vector<24x32x96xf32>
    %8 = vector.shape_cast %7 : vector<24x32x96xf32> to vector<768x96xf32>
    %c1 = arith.constant 1 : index
    %c0_8 = arith.constant 0 : index
    %c0_9 = arith.constant 0 : index
    %9 = vector.load %arg2[%c1, %c0_8, %c0_9] : memref<5x96x144xf32, #tpu.memory_space<vmem>>, vector<1x96x144xf32>
    %10 = vector.shape_cast %9 : vector<1x96x144xf32> to vector<96x144xf32>
    %cst_10 = arith.constant dense<0.000000e+00> : vector<768x144xf32>
    %11 = tpu.matmul %8, %10, %cst_10 {dimension_numbers = #tpu.dot_dimension_numbers<[1], [0], [0], [1], [0, 0, 1, 1], [], []>} : vector<768x96xf32>, vector<96x144xf32>, vector<768x144xf32> -> vector<768x144xf32>
    %12 = arith.addf %6, %11 : vector<768x144xf32>
    %c4 = arith.constant 4 : index
    %c0_11 = arith.constant 0 : index
    %c0_12 = arith.constant 0 : index
    %13 = vector.load %arg1[%c4, %c0_11, %c0_12] : memref<32x32x96xf32, #tpu.memory_space<vmem>>, vector<24x32x96xf32>
    %14 = vector.shape_cast %13 : vector<24x32x96xf32> to vector<768x96xf32>
    %c2_13 = arith.constant 2 : index
    %c0_14 = arith.constant 0 : index
    %c0_15 = arith.constant 0 : index
    %15 = vector.load %arg2[%c2_13, %c0_14, %c0_15] : memref<5x96x144xf32, #tpu.memory_space<vmem>>, vector<1x96x144xf32>
    %16 = vector.shape_cast %15 : vector<1x96x144xf32> to vector<96x144xf32>
    %cst_16 = arith.constant dense<0.000000e+00> : vector<768x144xf32>
    %17 = tpu.matmul %14, %16, %cst_16 {dimension_numbers = #tpu.dot_dimension_numbers<[1], [0], [0], [1], [0, 0, 1, 1], [], []>} : vector<768x96xf32>, vector<96x144xf32>, vector<768x144xf32> -> vector<768x144xf32>
    %18 = arith.addf %12, %17 : vector<768x144xf32>
    %c6 = arith.constant 6 : index
    %c0_17 = arith.constant 0 : index
    %c0_18 = arith.constant 0 : index
    %19 = vector.load %arg1[%c6, %c0_17, %c0_18] : memref<32x32x96xf32, #tpu.memory_space<vmem>>, vector<24x32x96xf32>
    %20 = vector.shape_cast %19 : vector<24x32x96xf32> to vector<768x96xf32>
    %c3 = arith.constant 3 : index
    %c0_19 = arith.constant 0 : index
    %c0_20 = arith.constant 0 : index
    %21 = vector.load %arg2[%c3, %c0_19, %c0_20] : memref<5x96x144xf32, #tpu.memory_space<vmem>>, vector<1x96x144xf32>
    %22 = vector.shape_cast %21 : vector<1x96x144xf32> to vector<96x144xf32>
    %cst_21 = arith.constant dense<0.000000e+00> : vector<768x144xf32>
    %23 = tpu.matmul %20, %22, %cst_21 {dimension_numbers = #tpu.dot_dimension_numbers<[1], [0], [0], [1], [0, 0, 1, 1], [], []>} : vector<768x96xf32>, vector<96x144xf32>, vector<768x144xf32> -> vector<768x144xf32>
    %24 = arith.addf %18, %23 : vector<768x144xf32>
    %c8 = arith.constant 8 : index
    %c0_22 = arith.constant 0 : index
    %c0_23 = arith.constant 0 : index
    %25 = vector.load %arg1[%c8, %c0_22, %c0_23] : memref<32x32x96xf32, #tpu.memory_space<vmem>>, vector<24x32x96xf32>
    %26 = vector.shape_cast %25 : vector<24x32x96xf32> to vector<768x96xf32>
    %c4_24 = arith.constant 4 : index
    %c0_25 = arith.constant 0 : index
    %c0_26 = arith.constant 0 : index
    %27 = vector.load %arg2[%c4_24, %c0_25, %c0_26] : memref<5x96x144xf32, #tpu.memory_space<vmem>>, vector<1x96x144xf32>
    %28 = vector.shape_cast %27 : vector<1x96x144xf32> to vector<96x144xf32>
    %cst_27 = arith.constant dense<0.000000e+00> : vector<768x144xf32>
    %29 = tpu.matmul %26, %28, %cst_27 {dimension_numbers = #tpu.dot_dimension_numbers<[1], [0], [0], [1], [0, 0, 1, 1], [], []>} : vector<768x96xf32>, vector<96x144xf32>, vector<768x144xf32> -> vector<768x144xf32>
    %30 = arith.addf %24, %29 : vector<768x144xf32>
    %c0_28 = arith.constant 0 : index
    %c0_29 = arith.constant 0 : index
    %31 = vector.load %arg3[%c0_28, %c0_29] : memref<1x144xf32, #tpu.memory_space<vmem>>, vector<1x144xf32>
    %32 = vector.broadcast %31 : vector<1x144xf32> to vector<768x144xf32>
    %33 = arith.addf %30, %32 : vector<768x144xf32>
    %cst_30 = arith.constant 0.000000e+00 : f32
    %34 = vector.broadcast %cst_30 : f32 to vector<768x144xf32>
    %35 = arith.maximumf %33, %34 : vector<768x144xf32>
    %36 = vector.shape_cast %35 : vector<768x144xf32> to vector<24x32x144xf32>
    %c0_31 = arith.constant 0 : index
    %c0_32 = arith.constant 0 : index
    %c0_33 = arith.constant 0 : index
    %37 = vector.load %arg13[%c0_31, %c0_32, %c0_33] : memref<24x32x144xf32, #tpu.memory_space<vmem>>, vector<24x32x144xf32>
    tpu.vector_store %arg13[%c0_31, %c0_32, %c0_33], %36 {strides = array<i32>} : memref<24x32x144xf32, #tpu.memory_space<vmem>>, vector<24x32x144xf32>,
    %cst_34 = arith.constant 0.000000e+00 : f32
    %38 = vector.broadcast %cst_34 : f32 to vector<512x256xf32>
    %c0_35 = arith.constant 0 : index
    %c0_36 = arith.constant 0 : index
    %c0_37 = arith.constant 0 : index
    %39 = vector.load %arg13[%c0_35, %c0_36, %c0_37] : memref<24x32x144xf32, #tpu.memory_space<vmem>>, vector<16x32x144xf32>
    %40 = vector.shape_cast %39 : vector<16x32x144xf32> to vector<512x144xf32>
    %c0_38 = arith.constant 0 : index
    %c0_39 = arith.constant 0 : index
    %c0_40 = arith.constant 0 : index
    %41 = vector.load %arg4[%c0_38, %c0_39, %c0_40] : memref<5x144x256xf32, #tpu.memory_space<vmem>>, vector<1x144x256xf32>
    %42 = vector.shape_cast %41 : vector<1x144x256xf32> to vector<144x256xf32>
    %cst_41 = arith.constant dense<0.000000e+00> : vector<512x256xf32>
    %43 = tpu.matmul %40, %42, %cst_41 {dimension_numbers = #tpu.dot_dimension_numbers<[1], [0], [0], [1], [0, 0, 1, 1], [], []>} : vector<512x144xf32>, vector<144x256xf32>, vector<512x256xf32> -> vector<512x256xf32>
    %44 = arith.addf %38, %43 : vector<512x256xf32>
    %c2_42 = arith.constant 2 : index
    %c0_43 = arith.constant 0 : index
    %c0_44 = arith.constant 0 : index
    %45 = vector.load %arg13[%c2_42, %c0_43, %c0_44] : memref<24x32x144xf32, #tpu.memory_space<vmem>>, vector<16x32x144xf32>
    %46 = vector.shape_cast %45 : vector<16x32x144xf32> to vector<512x144xf32>
    %c1_45 = arith.constant 1 : index
    %c0_46 = arith.constant 0 : index
    %c0_47 = arith.constant 0 : index
    %47 = vector.load %arg4[%c1_45, %c0_46, %c0_47] : memref<5x144x256xf32, #tpu.memory_space<vmem>>, vector<1x144x256xf32>
    %48 = vector.shape_cast %47 : vector<1x144x256xf32> to vector<144x256xf32>
    %cst_48 = arith.constant dense<0.000000e+00> : vector<512x256xf32>
    %49 = tpu.matmul %46, %48, %cst_48 {dimension_numbers = #tpu.dot_dimension_numbers<[1], [0], [0], [1], [0, 0, 1, 1], [], []>} : vector<512x144xf32>, vector<144x256xf32>, vector<512x256xf32> -> vector<512x256xf32>
    %50 = arith.addf %44, %49 : vector<512x256xf32>
    %c4_49 = arith.constant 4 : index
    %c0_50 = arith.constant 0 : index
    %c0_51 = arith.constant 0 : index
    %51 = vector.load %arg13[%c4_49, %c0_50, %c0_51] : memref<24x32x144xf32, #tpu.memory_space<vmem>>, vector<16x32x144xf32>
    %52 = vector.shape_cast %51 : vector<16x32x144xf32> to vector<512x144xf32>
    %c2_52 = arith.constant 2 : index
    %c0_53 = arith.constant 0 : index
    %c0_54 = arith.constant 0 : index
    %53 = vector.load %arg4[%c2_52, %c0_53, %c0_54] : memref<5x144x256xf32, #tpu.memory_space<vmem>>, vector<1x144x256xf32>
    %54 = vector.shape_cast %53 : vector<1x144x256xf32> to vector<144x256xf32>
    %cst_55 = arith.constant dense<0.000000e+00> : vector<512x256xf32>
    %55 = tpu.matmul %52, %54, %cst_55 {dimension_numbers = #tpu.dot_dimension_numbers<[1], [0], [0], [1], [0, 0, 1, 1], [], []>} : vector<512x144xf32>, vector<144x256xf32>, vector<512x256xf32> -> vector<512x256xf32>
    %56 = arith.addf %50, %55 : vector<512x256xf32>
    %c6_56 = arith.constant 6 : index
    %c0_57 = arith.constant 0 : index
    %c0_58 = arith.constant 0 : index
    %57 = vector.load %arg13[%c6_56, %c0_57, %c0_58] : memref<24x32x144xf32, #tpu.memory_space<vmem>>, vector<16x32x144xf32>
    %58 = vector.shape_cast %57 : vector<16x32x144xf32> to vector<512x144xf32>
    %c3_59 = arith.constant 3 : index
    %c0_60 = arith.constant 0 : index
    %c0_61 = arith.constant 0 : index
    %59 = vector.load %arg4[%c3_59, %c0_60, %c0_61] : memref<5x144x256xf32, #tpu.memory_space<vmem>>, vector<1x144x256xf32>
    %60 = vector.shape_cast %59 : vector<1x144x256xf32> to vector<144x256xf32>
    %cst_62 = arith.constant dense<0.000000e+00> : vector<512x256xf32>
    %61 = tpu.matmul %58, %60, %cst_62 {dimension_numbers = #tpu.dot_dimension_numbers<[1], [0], [0], [1], [0, 0, 1, 1], [], []>} : vector<512x144xf32>, vector<144x256xf32>, vector<512x256xf32> -> vector<512x256xf32>
    %62 = arith.addf %56, %61 : vector<512x256xf32>
    %c8_63 = arith.constant 8 : index
    %c0_64 = arith.constant 0 : index
    %c0_65 = arith.constant 0 : index
    %63 = vector.load %arg13[%c8_63, %c0_64, %c0_65] : memref<24x32x144xf32, #tpu.memory_space<vmem>>, vector<16x32x144xf32>
    %64 = vector.shape_cast %63 : vector<16x32x144xf32> to vector<512x144xf32>
    %c4_66 = arith.constant 4 : index
    %c0_67 = arith.constant 0 : index
    %c0_68 = arith.constant 0 : index
    %65 = vector.load %arg4[%c4_66, %c0_67, %c0_68] : memref<5x144x256xf32, #tpu.memory_space<vmem>>, vector<1x144x256xf32>
    %66 = vector.shape_cast %65 : vector<1x144x256xf32> to vector<144x256xf32>
    %cst_69 = arith.constant dense<0.000000e+00> : vector<512x256xf32>
    %67 = tpu.matmul %64, %66, %cst_69 {dimension_numbers = #tpu.dot_dimension_numbers<[1], [0], [0], [1], [0, 0, 1, 1], [], []>} : vector<512x144xf32>, vector<144x256xf32>, vector<512x256xf32> -> vector<512x256xf32>
    %68 = arith.addf %62, %67 : vector<512x256xf32>
    %c0_70 = arith.constant 0 : index
    %c0_71 = arith.constant 0 : index
    %69 = vector.load %arg5[%c0_70, %c0_71] : memref<1x256xf32, #tpu.memory_space<vmem>>, vector<1x256xf32>
    %70 = vector.broadcast %69 : vector<1x256xf32> to vector<512x256xf32>
    %71 = arith.addf %68, %70 : vector<512x256xf32>
    %cst_72 = arith.constant 0.000000e+00 : f32
    %72 = vector.broadcast %cst_72 : f32 to vector<512x256xf32>
    %73 = arith.maximumf %71, %72 : vector<512x256xf32>
    %cst_73 = arith.constant 0.000000e+00 : f32
    %74 = vector.broadcast %cst_73 : f32 to vector<32x120xf32>
    %75 = vector.extract_strided_slice %73 {offsets = [0, 0], sizes = [32, 256], strides = [1, 1]} : vector<512x256xf32> to vector<32x256xf32>
    %c0_74 = arith.constant 0 : index
    %c0_75 = arith.constant 0 : index
    %c0_76 = arith.constant 0 : index
    %76 = vector.load %arg6[%c0_74, %c0_75, %c0_76] : memref<16x256x120xf32, #tpu.memory_space<vmem>>, vector<1x256x120xf32>
    %77 = vector.shape_cast %76 : vector<1x256x120xf32> to vector<256x120xf32>
    %cst_77 = arith.constant dense<0.000000e+00> : vector<32x120xf32>
    %78 = tpu.matmul %75, %77, %cst_77 {dimension_numbers = #tpu.dot_dimension_numbers<[1], [0], [0], [1], [0, 0, 1, 1], [], []>} : vector<32x256xf32>, vector<256x120xf32>, vector<32x120xf32> -> vector<32x120xf32>
    %79 = arith.addf %74, %78 : vector<32x120xf32>
    %80 = vector.extract_strided_slice %73 {offsets = [32, 0], sizes = [32, 256], strides = [1, 1]} : vector<512x256xf32> to vector<32x256xf32>
    %c1_78 = arith.constant 1 : index
    %c0_79 = arith.constant 0 : index
    %c0_80 = arith.constant 0 : index
    %81 = vector.load %arg6[%c1_78, %c0_79, %c0_80] : memref<16x256x120xf32, #tpu.memory_space<vmem>>, vector<1x256x120xf32>
    %82 = vector.shape_cast %81 : vector<1x256x120xf32> to vector<256x120xf32>
    %cst_81 = arith.constant dense<0.000000e+00> : vector<32x120xf32>
    %83 = tpu.matmul %80, %82, %cst_81 {dimension_numbers = #tpu.dot_dimension_numbers<[1], [0], [0], [1], [0, 0, 1, 1], [], []>} : vector<32x256xf32>, vector<256x120xf32>, vector<32x120xf32> -> vector<32x120xf32>
    %84 = arith.addf %79, %83 : vector<32x120xf32>
    %85 = vector.extract_strided_slice %73 {offsets = [64, 0], sizes = [32, 256], strides = [1, 1]} : vector<512x256xf32> to vector<32x256xf32>
    %c2_82 = arith.constant 2 : index
    %c0_83 = arith.constant 0 : index
    %c0_84 = arith.constant 0 : index
    %86 = vector.load %arg6[%c2_82, %c0_83, %c0_84] : memref<16x256x120xf32, #tpu.memory_space<vmem>>, vector<1x256x120xf32>
    %87 = vector.shape_cast %86 : vector<1x256x120xf32> to vector<256x120xf32>
    %cst_85 = arith.constant dense<0.000000e+00> : vector<32x120xf32>
    %88 = tpu.matmul %85, %87, %cst_85 {dimension_numbers = #tpu.dot_dimension_numbers<[1], [0], [0], [1], [0, 0, 1, 1], [], []>} : vector<32x256xf32>, vector<256x120xf32>, vector<32x120xf32> -> vector<32x120xf32>
    %89 = arith.addf %84, %88 : vector<32x120xf32>
    %90 = vector.extract_strided_slice %73 {offsets = [96, 0], sizes = [32, 256], strides = [1, 1]} : vector<512x256xf32> to vector<32x256xf32>
    %c3_86 = arith.constant 3 : index
    %c0_87 = arith.constant 0 : index
    %c0_88 = arith.constant 0 : index
    %91 = vector.load %arg6[%c3_86, %c0_87, %c0_88] : memref<16x256x120xf32, #tpu.memory_space<vmem>>, vector<1x256x120xf32>
    %92 = vector.shape_cast %91 : vector<1x256x120xf32> to vector<256x120xf32>
    %cst_89 = arith.constant dense<0.000000e+00> : vector<32x120xf32>
    %93 = tpu.matmul %90, %92, %cst_89 {dimension_numbers = #tpu.dot_dimension_numbers<[1], [0], [0], [1], [0, 0, 1, 1], [], []>} : vector<32x256xf32>, vector<256x120xf32>, vector<32x120xf32> -> vector<32x120xf32>
    %94 = arith.addf %89, %93 : vector<32x120xf32>
    %95 = vector.extract_strided_slice %73 {offsets = [128, 0], sizes = [32, 256], strides = [1, 1]} : vector<512x256xf32> to vector<32x256xf32>
    %c4_90 = arith.constant 4 : index
    %c0_91 = arith.constant 0 : index
    %c0_92 = arith.constant 0 : index
    %96 = vector.load %arg6[%c4_90, %c0_91, %c0_92] : memref<16x256x120xf32, #tpu.memory_space<vmem>>, vector<1x256x120xf32>
    %97 = vector.shape_cast %96 : vector<1x256x120xf32> to vector<256x120xf32>
    %cst_93 = arith.constant dense<0.000000e+00> : vector<32x120xf32>
    %98 = tpu.matmul %95, %97, %cst_93 {dimension_numbers = #tpu.dot_dimension_numbers<[1], [0], [0], [1], [0, 0, 1, 1], [], []>} : vector<32x256xf32>, vector<256x120xf32>, vector<32x120xf32> -> vector<32x120xf32>
    %99 = arith.addf %94, %98 : vector<32x120xf32>
    %100 = vector.extract_strided_slice %73 {offsets = [160, 0], sizes = [32, 256], strides = [1, 1]} : vector<512x256xf32> to vector<32x256xf32>
    %c5 = arith.constant 5 : index
    %c0_94 = arith.constant 0 : index
    %c0_95 = arith.constant 0 : index
    %101 = vector.load %arg6[%c5, %c0_94, %c0_95] : memref<16x256x120xf32, #tpu.memory_space<vmem>>, vector<1x256x120xf32>
    %102 = vector.shape_cast %101 : vector<1x256x120xf32> to vector<256x120xf32>
    %cst_96 = arith.constant dense<0.000000e+00> : vector<32x120xf32>
    %103 = tpu.matmul %100, %102, %cst_96 {dimension_numbers = #tpu.dot_dimension_numbers<[1], [0], [0], [1], [0, 0, 1, 1], [], []>} : vector<32x256xf32>, vector<256x120xf32>, vector<32x120xf32> -> vector<32x120xf32>
    %104 = arith.addf %99, %103 : vector<32x120xf32>
    %105 = vector.extract_strided_slice %73 {offsets = [192, 0], sizes = [32, 256], strides = [1, 1]} : vector<512x256xf32> to vector<32x256xf32>
    %c6_97 = arith.constant 6 : index
    %c0_98 = arith.constant 0 : index
    %c0_99 = arith.constant 0 : index
    %106 = vector.load %arg6[%c6_97, %c0_98, %c0_99] : memref<16x256x120xf32, #tpu.memory_space<vmem>>, vector<1x256x120xf32>
    %107 = vector.shape_cast %106 : vector<1x256x120xf32> to vector<256x120xf32>
    %cst_100 = arith.constant dense<0.000000e+00> : vector<32x120xf32>
    %108 = tpu.matmul %105, %107, %cst_100 {dimension_numbers = #tpu.dot_dimension_numbers<[1], [0], [0], [1], [0, 0, 1, 1], [], []>} : vector<32x256xf32>, vector<256x120xf32>, vector<32x120xf32> -> vector<32x120xf32>
    %109 = arith.addf %104, %108 : vector<32x120xf32>
    %110 = vector.extract_strided_slice %73 {offsets = [224, 0], sizes = [32, 256], strides = [1, 1]} : vector<512x256xf32> to vector<32x256xf32>
    %c7 = arith.constant 7 : index
    %c0_101 = arith.constant 0 : index
    %c0_102 = arith.constant 0 : index
    %111 = vector.load %arg6[%c7, %c0_101, %c0_102] : memref<16x256x120xf32, #tpu.memory_space<vmem>>, vector<1x256x120xf32>
    %112 = vector.shape_cast %111 : vector<1x256x120xf32> to vector<256x120xf32>
    %cst_103 = arith.constant dense<0.000000e+00> : vector<32x120xf32>
    %113 = tpu.matmul %110, %112, %cst_103 {dimension_numbers = #tpu.dot_dimension_numbers<[1], [0], [0], [1], [0, 0, 1, 1], [], []>} : vector<32x256xf32>, vector<256x120xf32>, vector<32x120xf32> -> vector<32x120xf32>
    %114 = arith.addf %109, %113 : vector<32x120xf32>
    %115 = vector.extract_strided_slice %73 {offsets = [256, 0], sizes = [32, 256], strides = [1, 1]} : vector<512x256xf32> to vector<32x256xf32>
    %c8_104 = arith.constant 8 : index
    %c0_105 = arith.constant 0 : index
    %c0_106 = arith.constant 0 : index
    %116 = vector.load %arg6[%c8_104, %c0_105, %c0_106] : memref<16x256x120xf32, #tpu.memory_space<vmem>>, vector<1x256x120xf32>
    %117 = vector.shape_cast %116 : vector<1x256x120xf32> to vector<256x120xf32>
    %cst_107 = arith.constant dense<0.000000e+00> : vector<32x120xf32>
    %118 = tpu.matmul %115, %117, %cst_107 {dimension_numbers = #tpu.dot_dimension_numbers<[1], [0], [0], [1], [0, 0, 1, 1], [], []>} : vector<32x256xf32>, vector<256x120xf32>, vector<32x120xf32> -> vector<32x120xf32>
    %119 = arith.addf %114, %118 : vector<32x120xf32>
    %120 = vector.extract_strided_slice %73 {offsets = [288, 0], sizes = [32, 256], strides = [1, 1]} : vector<512x256xf32> to vector<32x256xf32>
    %c9 = arith.constant 9 : index
    %c0_108 = arith.constant 0 : index
    %c0_109 = arith.constant 0 : index
    %121 = vector.load %arg6[%c9, %c0_108, %c0_109] : memref<16x256x120xf32, #tpu.memory_space<vmem>>, vector<1x256x120xf32>
    %122 = vector.shape_cast %121 : vector<1x256x120xf32> to vector<256x120xf32>
    %cst_110 = arith.constant dense<0.000000e+00> : vector<32x120xf32>
    %123 = tpu.matmul %120, %122, %cst_110 {dimension_numbers = #tpu.dot_dimension_numbers<[1], [0], [0], [1], [0, 0, 1, 1], [], []>} : vector<32x256xf32>, vector<256x120xf32>, vector<32x120xf32> -> vector<32x120xf32>
    %124 = arith.addf %119, %123 : vector<32x120xf32>
    %125 = vector.extract_strided_slice %73 {offsets = [320, 0], sizes = [32, 256], strides = [1, 1]} : vector<512x256xf32> to vector<32x256xf32>
    %c10 = arith.constant 10 : index
    %c0_111 = arith.constant 0 : index
    %c0_112 = arith.constant 0 : index
    %126 = vector.load %arg6[%c10, %c0_111, %c0_112] : memref<16x256x120xf32, #tpu.memory_space<vmem>>, vector<1x256x120xf32>
    %127 = vector.shape_cast %126 : vector<1x256x120xf32> to vector<256x120xf32>
    %cst_113 = arith.constant dense<0.000000e+00> : vector<32x120xf32>
    %128 = tpu.matmul %125, %127, %cst_113 {dimension_numbers = #tpu.dot_dimension_numbers<[1], [0], [0], [1], [0, 0, 1, 1], [], []>} : vector<32x256xf32>, vector<256x120xf32>, vector<32x120xf32> -> vector<32x120xf32>
    %129 = arith.addf %124, %128 : vector<32x120xf32>
    %130 = vector.extract_strided_slice %73 {offsets = [352, 0], sizes = [32, 256], strides = [1, 1]} : vector<512x256xf32> to vector<32x256xf32>
    %c11 = arith.constant 11 : index
    %c0_114 = arith.constant 0 : index
    %c0_115 = arith.constant 0 : index
    %131 = vector.load %arg6[%c11, %c0_114, %c0_115] : memref<16x256x120xf32, #tpu.memory_space<vmem>>, vector<1x256x120xf32>
    %132 = vector.shape_cast %131 : vector<1x256x120xf32> to vector<256x120xf32>
    %cst_116 = arith.constant dense<0.000000e+00> : vector<32x120xf32>
    %133 = tpu.matmul %130, %132, %cst_116 {dimension_numbers = #tpu.dot_dimension_numbers<[1], [0], [0], [1], [0, 0, 1, 1], [], []>} : vector<32x256xf32>, vector<256x120xf32>, vector<32x120xf32> -> vector<32x120xf32>
    %134 = arith.addf %129, %133 : vector<32x120xf32>
    %135 = vector.extract_strided_slice %73 {offsets = [384, 0], sizes = [32, 256], strides = [1, 1]} : vector<512x256xf32> to vector<32x256xf32>
    %c12 = arith.constant 12 : index
    %c0_117 = arith.constant 0 : index
    %c0_118 = arith.constant 0 : index
    %136 = vector.load %arg6[%c12, %c0_117, %c0_118] : memref<16x256x120xf32, #tpu.memory_space<vmem>>, vector<1x256x120xf32>
    %137 = vector.shape_cast %136 : vector<1x256x120xf32> to vector<256x120xf32>
    %cst_119 = arith.constant dense<0.000000e+00> : vector<32x120xf32>
    %138 = tpu.matmul %135, %137, %cst_119 {dimension_numbers = #tpu.dot_dimension_numbers<[1], [0], [0], [1], [0, 0, 1, 1], [], []>} : vector<32x256xf32>, vector<256x120xf32>, vector<32x120xf32> -> vector<32x120xf32>
    %139 = arith.addf %134, %138 : vector<32x120xf32>
    %140 = vector.extract_strided_slice %73 {offsets = [416, 0], sizes = [32, 256], strides = [1, 1]} : vector<512x256xf32> to vector<32x256xf32>
    %c13 = arith.constant 13 : index
    %c0_120 = arith.constant 0 : index
    %c0_121 = arith.constant 0 : index
    %141 = vector.load %arg6[%c13, %c0_120, %c0_121] : memref<16x256x120xf32, #tpu.memory_space<vmem>>, vector<1x256x120xf32>
    %142 = vector.shape_cast %141 : vector<1x256x120xf32> to vector<256x120xf32>
    %cst_122 = arith.constant dense<0.000000e+00> : vector<32x120xf32>
    %143 = tpu.matmul %140, %142, %cst_122 {dimension_numbers = #tpu.dot_dimension_numbers<[1], [0], [0], [1], [0, 0, 1, 1], [], []>} : vector<32x256xf32>, vector<256x120xf32>, vector<32x120xf32> -> vector<32x120xf32>
    %144 = arith.addf %139, %143 : vector<32x120xf32>
    %145 = vector.extract_strided_slice %73 {offsets = [448, 0], sizes = [32, 256], strides = [1, 1]} : vector<512x256xf32> to vector<32x256xf32>
    %c14 = arith.constant 14 : index
    %c0_123 = arith.constant 0 : index
    %c0_124 = arith.constant 0 : index
    %146 = vector.load %arg6[%c14, %c0_123, %c0_124] : memref<16x256x120xf32, #tpu.memory_space<vmem>>, vector<1x256x120xf32>
    %147 = vector.shape_cast %146 : vector<1x256x120xf32> to vector<256x120xf32>
    %cst_125 = arith.constant dense<0.000000e+00> : vector<32x120xf32>
    %148 = tpu.matmul %145, %147, %cst_125 {dimension_numbers = #tpu.dot_dimension_numbers<[1], [0], [0], [1], [0, 0, 1, 1], [], []>} : vector<32x256xf32>, vector<256x120xf32>, vector<32x120xf32> -> vector<32x120xf32>
    %149 = arith.addf %144, %148 : vector<32x120xf32>
    %150 = vector.extract_strided_slice %73 {offsets = [480, 0], sizes = [32, 256], strides = [1, 1]} : vector<512x256xf32> to vector<32x256xf32>
    %c15 = arith.constant 15 : index
    %c0_126 = arith.constant 0 : index
    %c0_127 = arith.constant 0 : index
    %151 = vector.load %arg6[%c15, %c0_126, %c0_127] : memref<16x256x120xf32, #tpu.memory_space<vmem>>, vector<1x256x120xf32>
    %152 = vector.shape_cast %151 : vector<1x256x120xf32> to vector<256x120xf32>
    %cst_128 = arith.constant dense<0.000000e+00> : vector<32x120xf32>
    %153 = tpu.matmul %150, %152, %cst_128 {dimension_numbers = #tpu.dot_dimension_numbers<[1], [0], [0], [1], [0, 0, 1, 1], [], []>} : vector<32x256xf32>, vector<256x120xf32>, vector<32x120xf32> -> vector<32x120xf32>
    %154 = arith.addf %149, %153 : vector<32x120xf32>
    %c0_129 = arith.constant 0 : index
    %c0_130 = arith.constant 0 : index
    %155 = vector.load %arg7[%c0_129, %c0_130] : memref<1x120xf32, #tpu.memory_space<vmem>>, vector<1x120xf32>
    %156 = vector.broadcast %155 : vector<1x120xf32> to vector<32x120xf32>
    %157 = arith.addf %154, %156 : vector<32x120xf32>
    %cst_131 = arith.constant 0.000000e+00 : f32
    %158 = vector.broadcast %cst_131 : f32 to vector<32x120xf32>
    %159 = arith.maximumf %157, %158 : vector<32x120xf32>
    %c0_132 = arith.constant 0 : index
    %c0_133 = arith.constant 0 : index
    %160 = vector.load %arg8[%c0_132, %c0_133] : memref<120x84xf32, #tpu.memory_space<vmem>>, vector<120x84xf32>
    %cst_134 = arith.constant dense<0.000000e+00> : vector<32x84xf32>
    %161 = tpu.matmul %159, %160, %cst_134 {dimension_numbers = #tpu.dot_dimension_numbers<[1], [0], [0], [1], [0, 0, 1, 1], [], []>} : vector<32x120xf32>, vector<120x84xf32>, vector<32x84xf32> -> vector<32x84xf32>
    %c0_135 = arith.constant 0 : index
    %c0_136 = arith.constant 0 : index
    %162 = vector.load %arg9[%c0_135, %c0_136] : memref<1x84xf32, #tpu.memory_space<vmem>>, vector<1x84xf32>
    %163 = vector.broadcast %162 : vector<1x84xf32> to vector<32x84xf32>
    %164 = arith.addf %161, %163 : vector<32x84xf32>
    %cst_137 = arith.constant 0.000000e+00 : f32
    %165 = vector.broadcast %cst_137 : f32 to vector<32x84xf32>
    %166 = arith.maximumf %164, %165 : vector<32x84xf32>
    %c0_138 = arith.constant 0 : index
    %c0_139 = arith.constant 0 : index
    %167 = vector.load %arg10[%c0_138, %c0_139] : memref<84x10xf32, #tpu.memory_space<vmem>>, vector<84x10xf32>
    %cst_140 = arith.constant dense<0.000000e+00> : vector<32x10xf32>
    %168 = tpu.matmul %166, %167, %cst_140 {dimension_numbers = #tpu.dot_dimension_numbers<[1], [0], [0], [1], [0, 0, 1, 1], [], []>} : vector<32x84xf32>, vector<84x10xf32>, vector<32x10xf32> -> vector<32x10xf32>
    %c0_141 = arith.constant 0 : index
    %c0_142 = arith.constant 0 : index
    %169 = vector.load %arg11[%c0_141, %c0_142] : memref<1x10xf32, #tpu.memory_space<vmem>>, vector<1x10xf32>
    %170 = vector.broadcast %169 : vector<1x10xf32> to vector<32x10xf32>
    %171 = arith.addf %168, %170 : vector<32x10xf32>
    %c0_143 = arith.constant 0 : index
    %c0_144 = arith.constant 0 : index
    %172 = vector.load %arg12[%c0_143, %c0_144] : memref<32x10xf32, #tpu.memory_space<vmem>>, vector<32x10xf32>
    tpu.vector_store %arg12[%c0_143, %c0_144], %171 {strides = array<i32>} : memref<32x10xf32, #tpu.memory_space<vmem>>, vector<32x10xf32>,
    return
  }
  func.func @transform_0(%arg0: i32) -> (i32, i32, i32) {
    %c0_i32 = arith.constant 0 : i32
    %c0_i32_0 = arith.constant 0 : i32
    %c0_i32_1 = arith.constant 0 : i32
    return %c0_i32, %arg0, %c0_i32_0 : i32, i32, i32
  }
  func.func @transform_1(%arg0: i32) -> (i32, i32, i32) {
    %c0_i32 = arith.constant 0 : i32
    %c0_i32_0 = arith.constant 0 : i32
    %c0_i32_1 = arith.constant 0 : i32
    %c0_i32_2 = arith.constant 0 : i32
    return %c0_i32, %c0_i32_0, %c0_i32_1 : i32, i32, i32
  }
  func.func @transform_2(%arg0: i32) -> (i32, i32) {
    %c0_i32 = arith.constant 0 : i32
    %c0_i32_0 = arith.constant 0 : i32
    %c0_i32_1 = arith.constant 0 : i32
    return %c0_i32, %c0_i32_0 : i32, i32
  }
  func.func @transform_3(%arg0: i32) -> (i32, i32, i32) {
    %c0_i32 = arith.constant 0 : i32
    %c0_i32_0 = arith.constant 0 : i32
    %c0_i32_1 = arith.constant 0 : i32
    %c0_i32_2 = arith.constant 0 : i32
    return %c0_i32, %c0_i32_0, %c0_i32_1 : i32, i32, i32
  }
  func.func @transform_4(%arg0: i32) -> (i32, i32) {
    %c0_i32 = arith.constant 0 : i32
    %c0_i32_0 = arith.constant 0 : i32
    %c0_i32_1 = arith.constant 0 : i32
    return %c0_i32, %c0_i32_0 : i32, i32
  }
  func.func @transform_5(%arg0: i32) -> (i32, i32, i32) {
    %c0_i32 = arith.constant 0 : i32
    %c0_i32_0 = arith.constant 0 : i32
    %c0_i32_1 = arith.constant 0 : i32
    %c0_i32_2 = arith.constant 0 : i32
    return %c0_i32, %c0_i32_0, %c0_i32_1 : i32, i32, i32
  }
  func.func @transform_6(%arg0: i32) -> (i32, i32) {
    %c0_i32 = arith.constant 0 : i32
    %c0_i32_0 = arith.constant 0 : i32
    %c0_i32_1 = arith.constant 0 : i32
    return %c0_i32, %c0_i32_0 : i32, i32
  }
  func.func @transform_7(%arg0: i32) -> (i32, i32) {
    %c0_i32 = arith.constant 0 : i32
    %c0_i32_0 = arith.constant 0 : i32
    %c0_i32_1 = arith.constant 0 : i32
    return %c0_i32, %c0_i32_0 : i32, i32
  }
  func.func @transform_8(%arg0: i32) -> (i32, i32) {
    %c0_i32 = arith.constant 0 : i32
    %c0_i32_0 = arith.constant 0 : i32
    %c0_i32_1 = arith.constant 0 : i32
    return %c0_i32, %c0_i32_0 : i32, i32
  }
  func.func @transform_9(%arg0: i32) -> (i32, i32) {
    %c0_i32 = arith.constant 0 : i32
    %c0_i32_0 = arith.constant 0 : i32
    %c0_i32_1 = arith.constant 0 : i32
    return %c0_i32, %c0_i32_0 : i32, i32
  }
  func.func @transform_10(%arg0: i32) -> (i32, i32) {
    %c0_i32 = arith.constant 0 : i32
    %c0_i32_0 = arith.constant 0 : i32
    %c0_i32_1 = arith.constant 0 : i32
    return %c0_i32, %c0_i32_0 : i32, i32
  }
  func.func @transform_11(%arg0: i32) -> (i32, i32) {
    %c0_i32 = arith.constant 0 : i32
    %c0_i32_0 = arith.constant 0 : i32
    return %arg0, %c0_i32 : i32, i32
  }
}

</mosaic_0001>

<bundles_post_ra>
// kernel: dilated_cnn_forward.1
= control target key start
LH: loop header
LB: loop body
LE: loop exit
PB: predicated region body
PF: predicated region fallthrough
CT: control target
= control target key end

     0   :  { %v25601_v3 = vmov 0.0   ;;  %vm280_vm0 = vcmask 785408   ;;  %vm6265_vm1 = vcmask 130048   ;;  %vm13122_vm2 = vcmask 982016   ;;  %s25565_s1 = inlined_call_operand.vmem [shape: f32[5,96,144], index: 1, kind: input, shape index: {}]   ;;  %s25566_s0 = inlined_call_operand.vmem [shape: f32[32,32,96], index: 0, kind: input, shape index: {}]   ;;  %s25567_s3 = inlined_call_operand.vmem [shape: f32[5,144,256], index: 3, kind: input, shape index: {}]   ;;  %s25568_s2 = inlined_call_operand.vmem [shape: f32[1,144], index: 2, kind: input, shape index: {}]   ;;  %s25569_s5 = inlined_call_operand.vmem [shape: f32[16,256,120], index: 5, kind: input, shape index: {}]   ;;  %s25570_s4 = inlined_call_operand.vmem [shape: f32[1,256], index: 4, kind: input, shape index: {}]   ;;  %s25571_s7 = inlined_call_operand.vmem [shape: f32[120,84], index: 7, kind: input, shape index: {}]   ;;  %s25572_s9 = inlined_call_operand.vmem [shape: f32[84,10], index: 9, kind: input, shape index: {}]   ;;  %s25573_s6 = inlined_call_operand.vmem [shape: f32[1,120], index: 6, kind: input, shape index: {}]   ;;  %s25574_s8 = inlined_call_operand.vmem [shape: f32[1,84], index: 8, kind: input, shape index: {}]   ;;  %s25575_s10 = inlined_call_operand.vmem [shape: f32[1,10], index: 10, kind: input, shape index: {}]   ;;  %s25576_s11 = inlined_call_operand.vmem [shape: f32[32,10], index: 11, kind: output, shape index: {}]  }
   0x1   :  { %v13450_v0 = vld [vmem:[%s25565_s1 + $0xc8] sm:$0xff]  ;;  %v13452_v1 = vld [vmem:[%s25565_s1 + $0xd8] sm:$0xff]  ;;  %v13449_v2 = vld [vmem:[%s25565_s1 + $0xc0] sm:$0xff]  ;;  %633 = vmatprep.mubr.f32.mxu0 %v25601_v3  ;;  %1137 = vmatprep.mubr.f32.mxu1 %v25601_v3  ;;  %vm13255_vm3 = vcmask 1043456   ;;  %vm13242_vm4 = vcmask 687104   ;;  %vm13344_vm5 = vcmask 80896  }
   0x2   :  { %v16071_v4 = vpack.c.bf16 %v13452_v1, %v13450_v0  ;;  %v13451_v5 = vld [vmem:[%s25565_s1 + $0xd0] sm:$0xff]  ;;  %v13454_v6 = vld [vmem:[%s25565_s1 + $0xe8] sm:$0xff]  ;;  %v13456_v7 = vld [vmem:[%s25565_s1 + $0xf8] sm:$0xff] }
   0x3   :  { %v16073_v8 = vpack.c.bf16 %v13451_v5, %v13449_v2  ;;  %v16075_v9 = vpack.c.bf16 %v13456_v7, %v13454_v6  ;;  %v13453_v10 = vld [vmem:[%s25565_s1 + $0xe0] sm:$0xff]  ;;  %v13455_v11 = vld [vmem:[%s25565_s1 + $0xf0] sm:$0xff]  ;;  %v13458_v12 = vld [vmem:[%s25565_s1 + $0x108] sm:$0xff] }
   0x4   :  { %16072 = vmatprep.subr.bf16.mxu0 %v16071_v4  ;;  %v13460_v13 = vld [vmem:[%s25565_s1 + $0x118] sm:$0xff]  ;;  %16931 = vmatprep.subr.bf16.mxu1 %v16071_v4  ;;  %v16077_v14 = vpack.c.bf16 %v13455_v11, %v13453_v10  ;;  %v13457_v16 = vld [vmem:[%s25565_s1 + $0x100] sm:$0xff]  ;;  %v13459_v17 = vld [vmem:[%s25565_s1 + $0x110] sm:$0xff] }
   0x5   :  { %16074 = vmatpush1.bf16.msra.mxu0 %v16073_v8  ;;  %16937 = vmatpush1.bf16.msra.mxu1 %v16073_v8  ;;  %v16079_v15 = vpack.c.bf16 %v13460_v13, %v13458_v12  ;;  %v13462_v18 = vld [vmem:[%s25565_s1 + $0x128] sm:$0xff]  ;;  %v13464_v19 = vld [vmem:[%s25565_s1 + $0x138] sm:$0xff]  ;;  %v16081_v20 = vpack.c.bf16 %v13459_v17, %v13457_v16  ;;  %v13461_v22 = vld [vmem:[%s25565_s1 + $0x120] sm:$0xff] }
   0x6   :  { %16076 = vmatprep.subr.bf16.mxu0 %v16075_v9  ;;  %16932 = vmatprep.subr.bf16.mxu1 %v16075_v9  ;;  %v16083_v21 = vpack.c.bf16 %v13464_v19, %v13462_v18  ;;  %v13463_v23 = vld [vmem:[%s25565_s1 + $0x130] sm:$0xff]  ;;  %v13466_v24 = vld [vmem:[%s25565_s1 + $0x148] sm:$0xff]  ;;  %v13468_v25 = vld [vmem:[%s25565_s1 + $0x158] sm:$0xff] }
   0x7   :  { %v16085_v26 = vpack.c.bf16 %v13463_v23, %v13461_v22  ;;  %v16087_v27 = vpack.c.bf16 %v13468_v25, %v13466_v24  ;;  %v13465_v28 = vld [vmem:[%s25565_s1 + $0x140] sm:$0xff]  ;;  %v13467_v29 = vld [vmem:[%s25565_s1 + $0x150] sm:$0xff]  ;;  %v13470_v30 = vld [vmem:[%s25565_s1 + $0x168] sm:$0xff] }
   0x8   :  { %v13472_v31 = vld [vmem:[%s25565_s1 + $0x178] sm:$0xff]  ;;  %v16089_v32 = vpack.c.bf16 %v13467_v29, %v13465_v28  ;;  %v13469_v34 = vld [vmem:[%s25565_s1 + $0x160] sm:$0xff]  ;;  %v13471_v35 = vld [vmem:[%s25565_s1 + $0x170] sm:$0xff] }
   0x9   :  { %16078 = vmatpush1.bf16.msra.mxu0 %v16077_v14  ;;  %16938 = vmatpush1.bf16.msra.mxu1 %v16077_v14  ;;  %v16091_v33 = vpack.c.bf16 %v13472_v31, %v13470_v30  ;;  %v135_v36 = vld [vmem:[%s25565_s1 + $0x8] sm:$0xff]  ;;  %v137_v37 = vld [vmem:[%s25565_s1 + $0x18] sm:$0xff]  ;;  %v16093_v38 = vpack.c.bf16 %v13471_v35, %v13469_v34  ;;  %v134_v40 = vld [vmem:[%s25565_s1] sm:$0xff] }
   0xa   :  { %16080 = vmatprep.subr.bf16.mxu0 %v16079_v15  ;;  %16933 = vmatprep.subr.bf16.mxu1 %v16079_v15  ;;  %v16095_v39 = vpack.c.bf16 %v137_v37, %v135_v36  ;;  %v136_v41 = vld [vmem:[%s25565_s1 + $0x10] sm:$0xff]  ;;  %v139_v42 = vld [vmem:[%s25565_s1 + $0x28] sm:$0xff]  ;;  %v141_v43 = vld [vmem:[%s25565_s1 + $0x38] sm:$0xff] }
   0xb   :  { %v18380_v44 = vld [vmem:[%s25566_s0 + $0x40] sm:$0xff]  ;;  %v16097_v45 = vpack.c.bf16 %v136_v41, %v134_v40  ;;  %v16099_v46 = vpack.c.bf16 %v141_v43, %v139_v42  ;;  %v140_v48 = vld [vmem:[%s25565_s1 + $0x30] sm:$0xff]  ;;  %v143_v49 = vld [vmem:[%s25565_s1 + $0x48] sm:$0xff] }
   0xc   :  { %v138_v47 = vld [vmem:[%s25565_s1 + $0x20] sm:$0xff]  ;;  %v145_v50 = vld [vmem:[%s25565_s1 + $0x58] sm:$0xff]  ;;  %v18400_v51 = vld [vmem:[%s25566_s0 + $0x48] sm:$0xff] }
   0xd   :  { %16082 = vmatpush1.bf16.msra.mxu0 %v16081_v20  ;;  %16939 = vmatpush1.bf16.msra.mxu1 %v16081_v20  ;;  %v16101_v52 = vpack.c.bf16 %v140_v48, %v138_v47  ;;  %v16103_v53 = vpack.c.bf16 %v145_v50, %v143_v49  ;;  %v142_v54 = vld [vmem:[%s25565_s1 + $0x40] sm:$0xff]  ;;  %v144_v55 = vld [vmem:[%s25565_s1 + $0x50] sm:$0xff]  ;;  %v18422_v58 = vld [vmem:[%s25566_s0 + $0x58] sm:$0xff] }
   0xe   :  { %16084 = vmatprep.subr.bf16.mxu0 %v16083_v21  ;;  %16934 = vmatprep.subr.bf16.mxu1 %v16083_v21  ;;  %v18414_v56 = vld [vmem:[%s25566_s0 + $0x50] sm:$0xff]  ;;  %v16105_v57 = vpack.c.bf16 %v144_v55, %v142_v54  ;;  %v18430_v59 = vld [vmem:[%s25566_s0 + $0x60] sm:$0xff]  ;;  %v18438_v60 = vld [vmem:[%s25566_s0 + $0x68] sm:$0xff] }
   0xf   :  { %v18446_v61 = vld [vmem:[%s25566_s0 + $0x70] sm:$0xff]  ;;  %v18454_v62 = vld [vmem:[%s25566_s0 + $0x78] sm:$0xff]  ;;  %v18462_v63 = vld [vmem:[%s25566_s0 + $0x80] sm:$0xff] }
  0x10   :  { %v18470_v0 = vld [vmem:[%s25566_s0 + $0x88] sm:$0xff]  ;;  %v18478_v1 = vld [vmem:[%s25566_s0 + $0x90] sm:$0xff]  ;;  %v149_v4 = vld [vmem:[%s25565_s1 + $0x78] sm:$0xff] }
  0x11   :  { %16086 = vmatpush1.bf16.msra.mxu0 %v16085_v26  ;;  %16940 = vmatpush1.bf16.msra.mxu1 %v16085_v26  ;;  %v147_v2 = vld [vmem:[%s25565_s1 + $0x68] sm:$0xff]  ;;  %v146_v5 = vld [vmem:[%s25565_s1 + $0x60] sm:$0xff]  ;;  %v18495_v6 = vld [vmem:[%s25566_s0 + $0x98] sm:$0xff] }
  0x12   :  { %16088 = vmatprep.subr.bf16.mxu0 %v16087_v27  ;;  %16935 = vmatprep.subr.bf16.mxu1 %v16087_v27  ;;  %v16107_v7 = vpack.c.bf16 %v149_v4, %v147_v2  ;;  %v148_v8 = vld [vmem:[%s25565_s1 + $0x70] sm:$0xff]  ;;  %v18506_v10 = vld [vmem:[%s25566_s0 + $0xa0] sm:$0xff]  ;;  %v18514_v11 = vld [vmem:[%s25566_s0 + $0xa8] sm:$0xff] }
  0x13   :  { %v16109_v9 = vpack.c.bf16 %v148_v8, %v146_v5  ;;  %v18522_v12 = vld [vmem:[%s25566_s0 + $0xb0] sm:$0xff]  ;;  %v18530_v13 = vld [vmem:[%s25566_s0 + $0xb8] sm:$0xff]  ;;  %v18538_v14 = vld [vmem:[%s25566_s0 + $0xc0] sm:$0xff] }
  0x14   :  { %v18546_v15 = vld [vmem:[%s25566_s0 + $0xc8] sm:$0xff]  ;;  %v18554_v16 = vld [vmem:[%s25566_s0 + $0xd0] sm:$0xff]  ;;  %v18562_v17 = vld [vmem:[%s25566_s0 + $0xd8] sm:$0xff] }
  0x15   :  { %16090 = vmatpush1.bf16.msra.mxu0 %v16089_v32  ;;  %16941 = vmatpush1.bf16.msra.mxu1 %v16089_v32  ;;  %v18570_v18 = vld [vmem:[%s25566_s0 + $0xe0] sm:$0xff]  ;;  %v18578_v19 = vld [vmem:[%s25566_s0 + $0xe8] sm:$0xff]  ;;  %v18586_v20 = vld [vmem:[%s25566_s0 + $0xf0] sm:$0xff] }
  0x16   :  { %16092 = vmatprep.subr.bf16.mxu0 %v16091_v33  ;;  %16936 = vmatprep.subr.bf16.mxu1 %v16091_v33  ;;  %v18594_v21 = vld [vmem:[%s25566_s0 + $0xf8] sm:$0xff]  ;;  %v18602_v22 = vld [vmem:[%s25566_s0 + $0x100] sm:$0xff]  ;;  %v151_v23 = vld [vmem:[%s25565_s1 + $0x88] sm:$0xff] }
  0x17   :  { %v153_v24 = vld [vmem:[%s25565_s1 + $0x98] sm:$0xff]  ;;  %v150_v25 = vld [vmem:[%s25565_s1 + $0x80] sm:$0xff]  ;;  %v18619_v26 = vld [vmem:[%s25566_s0 + $0x108] sm:$0xff] }
  0x18   :  { %v16111_v27 = vpack.c.bf16 %v153_v24, %v151_v23  ;;  %v152_v28 = vld [vmem:[%s25565_s1 + $0x90] sm:$0xff]  ;;  %v18638_v31 = vld [vmem:[%s25566_s0 + $0x118] sm:$0xff]  ;;  %v18646_v32 = vld [vmem:[%s25566_s0 + $0x120] sm:$0xff] }
  0x19   :  { %16094 = vmatpush1.bf16.msra.mxu0 %v16093_v38  ;;  %16942 = vmatpush1.bf16.msra.mxu1 %v16093_v38  ;;  %v16113_v29 = vpack.c.bf16 %v152_v28, %v150_v25  ;;  %v18630_v30 = vld [vmem:[%s25566_s0 + $0x110] sm:$0xff]  ;;  %v18654_v33 = vld [vmem:[%s25566_s0 + $0x128] sm:$0xff]  ;;  %v18670_v35 = vld [vmem:[%s25566_s0 + $0x138] sm:$0xff] }
  0x1a   :  { %16096 = vmatprep.subr.bf16.mxu0 %v16095_v39  ;;  %v18662_v34 = vld [vmem:[%s25566_s0 + $0x130] sm:$0xff]  ;;  %v18678_v36 = vld [vmem:[%s25566_s0 + $0x140] sm:$0xff]  ;;  %v18686_v37 = vld [vmem:[%s25566_s0 + $0x148] sm:$0xff] }
  0x1b   :  { %v18694_v38 = vld [vmem:[%s25566_s0 + $0x150] sm:$0xff]  ;;  %v18702_v39 = vld [vmem:[%s25566_s0 + $0x158] sm:$0xff]  ;;  %v18710_v40 = vld [vmem:[%s25566_s0 + $0x160] sm:$0xff] }
  0x1c   :  { %13473 = vmatmul.mubr.msk.f32.vlgmr.msra.gmra.mrb[0].mxu0 %vm280_vm0, %v18380_v44  ;;  %v18718_v41 = vld [vmem:[%s25566_s0 + $0x168] sm:$0xff]  ;;  %v18726_v42 = vld [vmem:[%s25566_s0 + $0x170] sm:$0xff]  ;;  %v18743_v47 = vld [vmem:[%s25566_s0 + $0x178] sm:$0xff] }
  0x1d   :  { %16098 = vmatpush1.bf16.msra.mxu0 %v16097_v45  ;;  %639 = vmatprep.mubr.f32.mxu0 %v25601_v3  ;;  %v155_v43 = vld [vmem:[%s25565_s1 + $0xa8] sm:$0xff]  ;;  %v157_v45 = vld [vmem:[%s25565_s1 + $0xb8] sm:$0xff]  ;;  %v156_v49 = vld [vmem:[%s25565_s1 + $0xb0] sm:$0xff] }
  0x1e   :  { %16100 = vmatprep.subr.bf16.mxu0 %v16099_v46  ;;  %v154_v46 = vld [vmem:[%s25565_s1 + $0xa0] sm:$0xff]  ;;  %v16115_v48 = vpack.c.bf16 %v157_v45, %v155_v43  ;;  %v18770_v54 = vld [vmem:[%s25566_s0 + $0x190] sm:$0xff]  ;;  %v18778_v55 = vld [vmem:[%s25566_s0 + $0x198] sm:$0xff] }
  0x1f   :  { %v16117_v50 = vpack.c.bf16 %v156_v49, %v154_v46  ;;  %v18794_v2 = vld [vmem:[%s25566_s0 + $0x1a8] sm:$0xff]  ;;  %v18802_v4 = vld [vmem:[%s25566_s0 + $0x1b0] sm:$0xff]  ;;  %v18810_v5 = vld [vmem:[%s25566_s0 + $0x1b8] sm:$0xff] }
  0x20   :  { %13474 = vmatmul.mubr.msk.f32.gmra.mrb[2].mxu0 %vm280_vm0, %v18400_v51  ;;  %v18826_v8 = vld [vmem:[%s25566_s0 + $0x1c8] sm:$0xff]  ;;  %v18842_v23 = vld [vmem:[%s25566_s0 + $0x1d8] sm:$0xff]  ;;  %v18850_v24 = vld [vmem:[%s25566_s0 + $0x1e0] sm:$0xff] }
  0x21   :  { %645 = vmatprep.mubr.f32.mxu0 %v25601_v3  ;;  %16102 = vmatpush1.bf16.msra.mxu0 %v16101_v52  ;;  %v18754_v52 = vld [vmem:[%s25566_s0 + $0x180] sm:$0xff]  ;;  %25719 = vst [vmem:[#allocation3_spill] sm:$0xff] %v18850_v24  ;;  %v13762_v25 = vld [vmem:[%s25565_s1 + $0x188] sm:$0xff]  ;;  %v18872_v43 = vld [vmem:[%s25566_s0 + $0x1f0] sm:$0xff] }
  0x22   :  { %16104 = vmatprep.subr.bf16.mxu0 %v16103_v53  ;;  %v18762_v53 = vld [vmem:[%s25566_s0 + $0x188] sm:$0xff]  ;;  %25721 = vst [vmem:[#allocation5_spill] sm:$0xff] %v18872_v43  ;;  %v18880_v45 = vld [vmem:[%s25566_s0 + $0x1f8] sm:$0xff]  ;;  %v18888_v46 = vld [vmem:[%s25566_s0 + $0x200] sm:$0xff] }
  0x23   :  { %v18864_v28 = vld [vmem:[%s25566_s0 + $0x1e8] sm:$0xff]  ;;  %25722 = vst [vmem:[#allocation6_spill] sm:$0xff] %v18880_v45  ;;  %25723 = vst [vmem:[#allocation7_spill] sm:$0xff] %v18888_v46  ;;  %v18904_v49 = vld [vmem:[%s25566_s0 + $0x210] sm:$0xff] }
  0x24   :  { %13475 = vmatmul.mubr.msk.f32.gmra.mrb[4].mxu0 %vm280_vm0, %v18414_v56  ;;  %25720 = vst [vmem:[#allocation4_spill] sm:$0xff] %v18864_v28  ;;  %25725 = vst [vmem:[#allocation9_spill] sm:$0xff] %v18904_v49 }
  0x25   :  { %651 = vmatprep.mubr.f32.mxu0 %v25601_v3  ;;  %16106 = vmatpush1.bf16.msra.mxu0 %v16105_v57  ;;  %v18786_v57 = vld [vmem:[%s25566_s0 + $0x1a0] sm:$0xff] }
  0x26   :  { %16108 = vmatprep.subr.bf16.mxu0 %v16107_v7  ;;  %v18818_v7 = vld [vmem:[%s25566_s0 + $0x1c0] sm:$0xff] }
  0x28   :  { %13476 = vmatmul.mubr.msk.f32.gmra.mrb[6].mxu0 %vm280_vm0, %v18422_v58 }
  0x29   :  { %657 = vmatprep.mubr.f32.mxu0 %v25601_v3  ;;  %16110 = vmatpush1.bf16.msra.mxu0 %v16109_v9  ;;  %v18834_v9 = vld [vmem:[%s25566_s0 + $0x1d0] sm:$0xff] }
  0x2a   :  { %16112 = vmatprep.subr.bf16.mxu0 %v16111_v27  ;;  %v13764_v27 = vld [vmem:[%s25565_s1 + $0x198] sm:$0xff] }
  0x2c   :  { %13477 = vmatmul.mubr.msk.f32.gmra.mrb[8].mxu0 %vm280_vm0, %v18430_v59 }
  0x2d   :  { %663 = vmatprep.mubr.f32.mxu0 %v25601_v3  ;;  %16114 = vmatpush1.bf16.msra.mxu0 %v16113_v29  ;;  %v16119_v29 = vpack.c.bf16 %v13764_v27, %v13762_v25  ;;  %v18920_v25 = vld [vmem:[%s25566_s0 + $0x220] sm:$0xff]  ;;  %v18928_v27 = vld [vmem:[%s25566_s0 + $0x228] sm:$0xff] }
  0x2e   :  { %16116 = vmatprep.subr.bf16.mxu0 %v16115_v48  ;;  %v18896_v48 = vld [vmem:[%s25566_s0 + $0x208] sm:$0xff]  ;;  %25727 = vst [vmem:[#allocation11_spill] sm:$0xff] %v18920_v25  ;;  %25728 = vst [vmem:[#allocation12_spill] sm:$0xff] %v18928_v27 }
  0x2f   :  { %25724 = vst [vmem:[#allocation8_spill] sm:$0xff] %v18896_v48 }
  0x30   :  { %13478 = vmatmul.mubr.msk.f32.gmra.mrb[10].mxu0 %vm280_vm0, %v18438_v60 }
  0x31   :  { %669 = vmatprep.mubr.f32.mxu0 %v25601_v3  ;;  %16118 = vmatpush1.bf16.msra.mxu0 %v16117_v50  ;;  %v18912_v50 = vld [vmem:[%s25566_s0 + $0x218] sm:$0xff] }
  0x32   :  { %16120 = vmatprep.subr.bf16.mxu0 %v16119_v29  ;;  %25726 = vst [vmem:[#allocation10_spill] sm:$0xff] %v18912_v50  ;;  %v18936_v29 = vld [vmem:[%s25566_s0 + $0x230] sm:$0xff] }
  0x33   :  { %25729 = vst [vmem:[#allocation13_spill] sm:$0xff] %v18936_v29 }
  0x34   :  { %13479 = vmatmul.mubr.msk.f32.gmra.mrb[12].mxu0 %vm280_vm0, %v18446_v61 }
  0x35   :  { %675 = vmatprep.mubr.f32.mxu0 %v25601_v3 }
  0x38   :  { %13480 = vmatmul.mubr.msk.f32.gmra.mrb[14].mxu0 %vm280_vm0, %v18454_v62 }
  0x39   :  { %681 = vmatprep.mubr.f32.mxu0 %v25601_v3 }
  0x3c   :  { %13481 = vmatmul.mubr.msk.f32.gmra.mrb[16].mxu0 %vm280_vm0, %v18462_v63 }
  0x3d   :  { %687 = vmatprep.mubr.f32.mxu0 %v25601_v3 }
  0x40   :  { %13482 = vmatmul.mubr.msk.f32.gmra.mrb[18].mxu0 %vm280_vm0, %v18470_v0 }
  0x41   :  { %693 = vmatprep.mubr.f32.mxu0 %v25601_v3 }
  0x44   :  { %13483 = vmatmul.mubr.msk.f32.gmra.mrb[20].mxu0 %vm280_vm0, %v18478_v1 }
  0x45   :  { %699 = vmatprep.mubr.f32.mxu0 %v25601_v3 }
  0x48   :  { %13484 = vmatmul.mubr.msk.f32.gmra.mrb[22].mxu0 %vm280_vm0, %v18495_v6 }
  0x49   :  { %705 = vmatprep.mubr.f32.mxu0 %v25601_v3 }
  0x4c   :  { %13485 = vmatmul.mubr.msk.f32.gmra.mrb[24].mxu0 %vm280_vm0, %v18506_v10 }
  0x4d   :  { %711 = vmatprep.mubr.f32.mxu0 %v25601_v3 }
  0x50   :  { %13486 = vmatmul.mubr.msk.f32.gmra.mrb[26].mxu0 %vm280_vm0, %v18514_v11 }
  0x51   :  { %717 = vmatprep.mubr.f32.mxu0 %v25601_v3 }
  0x54   :  { %13487 = vmatmul.mubr.msk.f32.gmra.mrb[28].mxu0 %vm280_vm0, %v18522_v12 }
  0x55   :  { %723 = vmatprep.mubr.f32.mxu0 %v25601_v3 }
  0x58   :  { %13488 = vmatmul.mubr.msk.f32.gmra.mrb[30].mxu0 %vm280_vm0, %v18530_v13 }
  0x59   :  { %729 = vmatprep.mubr.f32.mxu0 %v25601_v3 }
  0x5c   :  { %13489 = vmatmul.mubr.msk.f32.gmra.mrb[32].mxu0 %vm280_vm0, %v18538_v14 }
  0x5d   :  { %735 = vmatprep.mubr.f32.mxu0 %v25601_v3 }
  0x60   :  { %13490 = vmatmul.mubr.msk.f32.gmra.mrb[34].mxu0 %vm280_vm0, %v18546_v15 }
  0x61   :  { %741 = vmatprep.mubr.f32.mxu0 %v25601_v3 }
  0x64   :  { %13491 = vmatmul.mubr.msk.f32.gmra.mrb[36].mxu0 %vm280_vm0, %v18554_v16 }
  0x65   :  { %747 = vmatprep.mubr.f32.mxu0 %v25601_v3 }
  0x68   :  { %13492 = vmatmul.mubr.msk.f32.gmra.mrb[38].mxu0 %vm280_vm0, %v18562_v17 }
  0x69   :  { %753 = vmatprep.mubr.f32.mxu0 %v25601_v3 }
  0x6c   :  { %13493 = vmatmul.mubr.msk.f32.gmra.mrb[40].mxu0 %vm280_vm0, %v18570_v18 }
  0x6d   :  { %759 = vmatprep.mubr.f32.mxu0 %v25601_v3 }
  0x70   :  { %13494 = vmatmul.mubr.msk.f32.gmra.mrb[42].mxu0 %vm280_vm0, %v18578_v19 }
  0x71   :  { %765 = vmatprep.mubr.f32.mxu0 %v25601_v3 }
  0x74   :  { %13495 = vmatmul.mubr.msk.f32.gmra.mrb[44].mxu0 %vm280_vm0, %v18586_v20 }
  0x75   :  { %771 = vmatprep.mubr.f32.mxu0 %v25601_v3 }
  0x78   :  { %13496 = vmatmul.mubr.msk.f32.gmra.mrb[46].mxu0 %vm280_vm0, %v18594_v21 }
  0x79   :  { %777 = vmatprep.mubr.f32.mxu0 %v25601_v3 }
  0x7c   :  { %13497 = vmatmul.mubr.msk.f32.gmra.mrb[48].mxu0 %vm280_vm0, %v18602_v22 }
  0x7d   :  { %783 = vmatprep.mubr.f32.mxu0 %v25601_v3 }
  0x80   :  { %13498 = vmatmul.mubr.msk.f32.gmra.mrb[50].mxu0 %vm280_vm0, %v18619_v26 }
  0x81   :  { %789 = vmatprep.mubr.f32.mxu0 %v25601_v3 }
  0x84   :  { %13499 = vmatmul.mubr.msk.f32.gmra.mrb[52].mxu0 %vm280_vm0, %v18630_v30 }
  0x85   :  { %795 = vmatprep.mubr.f32.mxu0 %v25601_v3 }
  0x88   :  { %13500 = vmatmul.mubr.msk.f32.gmra.mrb[54].mxu0 %vm280_vm0, %v18638_v31 }
  0x89   :  { %801 = vmatprep.mubr.f32.mxu0 %v25601_v3 }
  0x8c   :  { %13501 = vmatmul.mubr.msk.f32.gmra.mrb[56].mxu0 %vm280_vm0, %v18646_v32 }
  0x8d   :  { %807 = vmatprep.mubr.f32.mxu0 %v25601_v3 }
  0x90   :  { %13502 = vmatmul.mubr.msk.f32.gmra.mrb[58].mxu0 %vm280_vm0, %v18654_v33 }
  0x91   :  { %813 = vmatprep.mubr.f32.mxu0 %v25601_v3 }
  0x94   :  { %13503 = vmatmul.mubr.msk.f32.gmra.mrb[60].mxu0 %vm280_vm0, %v18662_v34 }
  0x95   :  { %819 = vmatprep.mubr.f32.mxu0 %v25601_v3 }
  0x98   :  { %13504 = vmatmul.mubr.msk.f32.gmra.mrb[62].mxu0 %vm280_vm0, %v18670_v35 }
  0x99   :  { %825 = vmatprep.mubr.f32.mxu0 %v25601_v3 }
  0x9c   :  { %13505 = vmatmul.mubr.msk.f32.gmra.mrb[64].mxu0 %vm280_vm0, %v18678_v36 }
  0x9d   :  { %831 = vmatprep.mubr.f32.mxu0 %v25601_v3 }
  0xa0   :  { %13506 = vmatmul.mubr.msk.f32.gmra.mrb[66].mxu0 %vm280_vm0, %v18686_v37 }
  0xa1   :  { %837 = vmatprep.mubr.f32.mxu0 %v25601_v3 }
  0xa4   :  { %13507 = vmatmul.mubr.msk.f32.gmra.mrb[68].mxu0 %vm280_vm0, %v18694_v38 }
  0xa5   :  { %843 = vmatprep.mubr.f32.mxu0 %v25601_v3 }
  0xa8   :  { %13508 = vmatmul.mubr.msk.f32.gmra.mrb[70].mxu0 %vm280_vm0, %v18702_v39 }
  0xa9   :  { %849 = vmatprep.mubr.f32.mxu0 %v25601_v3 }
  0xac   :  { %13509 = vmatmul.mubr.msk.f32.gmra.mrb[72].mxu0 %vm280_vm0, %v18710_v40 }
  0xad   :  { %855 = vmatprep.mubr.f32.mxu0 %v25601_v3 }
  0xb0   :  { %13510 = vmatmul.mubr.msk.f32.gmra.mrb[74].mxu0 %vm280_vm0, %v18718_v41 }
  0xb1   :  { %861 = vmatprep.mubr.f32.mxu0 %v25601_v3 }
  0xb4   :  { %13511 = vmatmul.mubr.msk.f32.gmra.mrb[76].mxu0 %vm280_vm0, %v18726_v42 }
  0xb5   :  { %867 = vmatprep.mubr.f32.mxu0 %v25601_v3 }
  0xb8   :  { %13512 = vmatmul.mubr.msk.f32.gmra.mrb[78].mxu0 %vm280_vm0, %v18743_v47 }
  0xb9   :  { %873 = vmatprep.mubr.f32.mxu0 %v25601_v3 }
  0xbc   :  { %13513 = vmatmul.mubr.msk.f32.gmra.mrb[80].mxu0 %vm280_vm0, %v18754_v52 }
  0xbd   :  { %879 = vmatprep.mubr.f32.mxu0 %v25601_v3 }
  0xc0   :  { %13514 = vmatmul.mubr.msk.f32.gmra.mrb[82].mxu0 %vm280_vm0, %v18762_v53 }
  0xc1   :  { %885 = vmatprep.mubr.f32.mxu0 %v25601_v3 }
  0xc4   :  { %13515 = vmatmul.mubr.msk.f32.gmra.mrb[84].mxu0 %vm280_vm0, %v18770_v54 }
  0xc5   :  { %891 = vmatprep.mubr.f32.mxu0 %v25601_v3 }
  0xc8   :  { %13516 = vmatmul.mubr.msk.f32.gmra.mrb[86].mxu0 %vm280_vm0, %v18778_v55 }
  0xc9   :  { %897 = vmatprep.mubr.f32.mxu0 %v25601_v3 }
  0xcc   :  { %13517 = vmatmul.mubr.msk.f32.gmra.mrb[88].mxu0 %vm280_vm0, %v18786_v57 }
  0xcd   :  { %903 = vmatprep.mubr.f32.mxu0 %v25601_v3 }
  0xd0   :  { %13518 = vmatmul.mubr.msk.f32.gmra.mrb[90].mxu0 %vm280_vm0, %v18794_v2 }
  0xd1   :  { %909 = vmatprep.mubr.f32.mxu0 %v25601_v3 }
  0xd4   :  { %13519 = vmatmul.mubr.msk.f32.gmra.mrb[92].mxu0 %vm280_vm0, %v18802_v4 }
  0xd5   :  { %915 = vmatprep.mubr.f32.mxu0 %v25601_v3 }
  0xd8   :  { %13520 = vmatmul.mubr.msk.f32.gmra.mrb[94].mxu0 %vm280_vm0, %v18810_v5 }
  0xd9   :  { %921 = vmatprep.mubr.f32.mxu0 %v25601_v3 }
  0xdc   :  { %13521 = vmatmul.mubr.msk.f32.gmra.mrb[96].mxu0 %vm280_vm0, %v18818_v7 }
  0xdd   :  { %927 = vmatprep.mubr.f32.mxu0 %v25601_v3 }
  0xe0   :  { %13522 = vmatmul.mubr.msk.f32.gmra.mrb[98].mxu0 %vm280_vm0, %v18826_v8 }
  0xe1   :  { %933 = vmatprep.mubr.f32.mxu0 %v25601_v3 }
  0xe4   :  { %13523 = vmatmul.mubr.msk.f32.gmra.mrb[100].mxu0 %vm280_vm0, %v18834_v9 }
  0xe5   :  { %939 = vmatprep.mubr.f32.mxu0 %v25601_v3 }
  0xe8   :  { %13524 = vmatmul.mubr.msk.f32.gmra.mrb[102].mxu0 %vm280_vm0, %v18842_v23 }
  0xe9   :  { %945 = vmatprep.mubr.f32.mxu0 %v25601_v3 }
  0xec   :  { %13525 = vmatmul.mubr.msk.f32.gmra.mrb[104].mxu0 %vm280_vm0, %v18850_v24  ;;  %v13772_v24 = vld [vmem:[%s25565_s1 + $0x1d8] sm:$0xff] }
  0xed   :  { %951 = vmatprep.mubr.f32.mxu0 %v25601_v3 }
  0xf0   :  { %13526 = vmatmul.mubr.msk.f32.gmra.mrb[106].mxu0 %vm280_vm0, %v18864_v28  ;;  %v13767_v28 = vld [vmem:[%s25565_s1 + $0x1b0] sm:$0xff] }
  0xf1   :  { %957 = vmatprep.mubr.f32.mxu0 %v25601_v3 }
  0xf4   :  { %13527 = vmatmul.mubr.msk.f32.gmra.mrb[108].mxu0 %vm280_vm0, %v18872_v43  ;;  %v13765_v43 = vld [vmem:[%s25565_s1 + $0x1a0] sm:$0xff] }
  0xf5   :  { %963 = vmatprep.mubr.f32.mxu0 %v25601_v3 }
  0xf8   :  { %13528 = vmatmul.mubr.msk.f32.gmra.mrb[110].mxu0 %vm280_vm0, %v18880_v45 }
  0xf9   :  { %969 = vmatprep.mubr.f32.mxu0 %v25601_v3 }
  0xfc   :  { %13529 = vmatmul.mubr.msk.f32.gmra.mrb[112].mxu0 %vm280_vm0, %v18888_v46 }
  0xfd   :  { %975 = vmatprep.mubr.f32.mxu0 %v25601_v3 }
 0x100   :  { %13530 = vmatmul.mubr.msk.f32.gmra.mrb[114].mxu0 %vm280_vm0, %v18896_v48  ;;  %v38_v48 = vld [vmem:[%s25566_s0] sm:$0xff] }
 0x101   :  { %981 = vmatprep.mubr.f32.mxu0 %v25601_v3 }
 0x104   :  { %13531 = vmatmul.mubr.msk.f32.gmra.mrb[116].mxu0 %vm280_vm0, %v18904_v49  ;;  %v13766_v49 = vld [vmem:[%s25565_s1 + $0x1a8] sm:$0xff] }
 0x105   :  { %987 = vmatprep.mubr.f32.mxu0 %v25601_v3 }
 0x108   :  { %13532 = vmatmul.mubr.msk.f32.gmra.mrb[118].mxu0 %vm280_vm0, %v18912_v50  ;;  %v13763_v50 = vld [vmem:[%s25565_s1 + $0x190] sm:$0xff] }
 0x109   :  { %993 = vmatprep.mubr.f32.mxu0 %v25601_v3 }
 0x10c   :  { %13533 = vmatmul.mubr.msk.f32.gmra.mrb[120].mxu0 %vm280_vm0, %v18920_v25  ;;  %v18944_v25 = vld [vmem:[%s25566_s0 + $0x238] sm:$0xff] }
 0x10d   :  { %999 = vmatprep.mubr.f32.mxu0 %v25601_v3  ;;  %25730 = vst [vmem:[#allocation14_spill] sm:$0xff] %v18944_v25 }
 0x110   :  { %13534 = vmatmul.mubr.msk.f32.gmra.mrb[122].mxu0 %vm280_vm0, %v18928_v27  ;;  %v18952_v27 = vld [vmem:[%s25566_s0 + $0x240] sm:$0xff] }
 0x111   :  { %1005 = vmatprep.mubr.f32.mxu0 %v25601_v3  ;;  %25731 = vst [vmem:[#allocation15_spill] sm:$0xff] %v18952_v27 }
 0x114   :  { %13535 = vmatmul.mubr.msk.f32.gmra.mrb[124].mxu0 %vm280_vm0, %v18936_v29  ;;  %v18960_v29 = vld [vmem:[%s25566_s0 + $0x248] sm:$0xff] }
 0x115   :  { %1011 = vmatprep.mubr.f32.mxu0 %v25601_v3  ;;  %25732 = vst [vmem:[#allocation16_spill] sm:$0xff] %v18960_v29 }
 0x118   :  { %13536 = vmatmul.mubr.msk.f32.gmra.mrb[126].mxu0 %vm280_vm0, %v18944_v25  ;;  %v18968_v25 = vld [vmem:[%s25566_s0 + $0x250] sm:$0xff] }
 0x119   :  { %1017 = vmatprep.mubr.f32.mxu0 %v25601_v3  ;;  %25733 = vst [vmem:[#allocation17_spill] sm:$0xff] %v18968_v25 }
 0x11c   :  { %13537 = vmatmul.mubr.msk.f32.gmra.mrb[128].mxu0 %vm280_vm0, %v18952_v27  ;;  %v18976_v27 = vld [vmem:[%s25566_s0 + $0x258] sm:$0xff] }
 0x11d   :  { %1023 = vmatprep.mubr.f32.mxu0 %v25601_v3  ;;  %25734 = vst [vmem:[#allocation18_spill] sm:$0xff] %v18976_v27 }
 0x120   :  { %13538 = vmatmul.mubr.msk.f32.gmra.mrb[130].mxu0 %vm280_vm0, %v18960_v29  ;;  %v18984_v29 = vld [vmem:[%s25566_s0 + $0x260] sm:$0xff] }
 0x121   :  { %1029 = vmatprep.mubr.f32.mxu0 %v25601_v3  ;;  %25735 = vst [vmem:[#allocation19_spill] sm:$0xff] %v18984_v29 }
 0x124   :  { %13539 = vmatmul.mubr.msk.f32.gmra.mrb[132].mxu0 %vm280_vm0, %v18968_v25  ;;  %v18992_v25 = vld [vmem:[%s25566_s0 + $0x268] sm:$0xff] }
 0x125   :  { %1035 = vmatprep.mubr.f32.mxu0 %v25601_v3  ;;  %25736 = vst [vmem:[#allocation20_spill] sm:$0xff] %v18992_v25 }
 0x128   :  { %13540 = vmatmul.mubr.msk.f32.gmra.mrb[134].mxu0 %vm280_vm0, %v18976_v27  ;;  %v19000_v27 = vld [vmem:[%s25566_s0 + $0x270] sm:$0xff] }
 0x129   :  { %1041 = vmatprep.mubr.f32.mxu0 %v25601_v3  ;;  %25737 = vst [vmem:[#allocation21_spill] sm:$0xff] %v19000_v27 }
 0x12c   :  { %13541 = vmatmul.mubr.msk.f32.gmra.mrb[136].mxu0 %vm280_vm0, %v18984_v29  ;;  %v19008_v29 = vld [vmem:[%s25566_s0 + $0x278] sm:$0xff] }
 0x12d   :  { %1047 = vmatprep.mubr.f32.mxu0 %v25601_v3  ;;  %25738 = vst [vmem:[#allocation22_spill] sm:$0xff] %v19008_v29 }
 0x130   :  { %13542 = vmatmul.mubr.msk.f32.gmra.mrb[138].mxu0 %vm280_vm0, %v18992_v25  ;;  %v19016_v25 = vld [vmem:[%s25566_s0 + $0x280] sm:$0xff] }
 0x131   :  { %1053 = vmatprep.mubr.f32.mxu0 %v25601_v3  ;;  %25739 = vst [vmem:[#allocation23_spill] sm:$0xff] %v19016_v25 }
 0x134   :  { %13543 = vmatmul.mubr.msk.f32.gmra.mrb[140].mxu0 %vm280_vm0, %v19000_v27  ;;  %v19024_v27 = vld [vmem:[%s25566_s0 + $0x288] sm:$0xff] }
 0x135   :  { %1059 = vmatprep.mubr.f32.mxu0 %v25601_v3  ;;  %25740 = vst [vmem:[#allocation24_spill] sm:$0xff] %v19024_v27 }
 0x138   :  { %13544 = vmatmul.mubr.msk.f32.gmra.mrb[142].mxu0 %vm280_vm0, %v19008_v29  ;;  %v19032_v29 = vld [vmem:[%s25566_s0 + $0x290] sm:$0xff] }
 0x139   :  { %1065 = vmatprep.mubr.f32.mxu0 %v25601_v3  ;;  %25741 = vst [vmem:[#allocation25_spill] sm:$0xff] %v19032_v29 }
 0x13c   :  { %13545 = vmatmul.mubr.msk.f32.gmra.mrb[144].mxu0 %vm280_vm0, %v19016_v25  ;;  %v19040_v25 = vld [vmem:[%s25566_s0 + $0x298] sm:$0xff] }
 0x13d   :  { %1071 = vmatprep.mubr.f32.mxu0 %v25601_v3  ;;  %25742 = vst [vmem:[#allocation26_spill] sm:$0xff] %v19040_v25 }
 0x140   :  { %13546 = vmatmul.mubr.msk.f32.gmra.mrb[146].mxu0 %vm280_vm0, %v19024_v27  ;;  %v19048_v27 = vld [vmem:[%s25566_s0 + $0x2a0] sm:$0xff] }
 0x141   :  { %1077 = vmatprep.mubr.f32.mxu0 %v25601_v3  ;;  %25743 = vst [vmem:[#allocation27_spill] sm:$0xff] %v19048_v27 }
 0x144   :  { %13547 = vmatmul.mubr.msk.f32.gmra.mrb[148].mxu0 %vm280_vm0, %v19032_v29  ;;  %v19056_v29 = vld [vmem:[%s25566_s0 + $0x2a8] sm:$0xff] }
 0x145   :  { %1083 = vmatprep.mubr.f32.mxu0 %v25601_v3  ;;  %25744 = vst [vmem:[#allocation28_spill] sm:$0xff] %v19056_v29 }
 0x148   :  { %13548 = vmatmul.mubr.msk.f32.gmra.mrb[150].mxu0 %vm280_vm0, %v19040_v25  ;;  %v19064_v25 = vld [vmem:[%s25566_s0 + $0x2b0] sm:$0xff] }
 0x149   :  { %1089 = vmatprep.mubr.f32.mxu0 %v25601_v3  ;;  %25745 = vst [vmem:[#allocation29_spill] sm:$0xff] %v19064_v25 }
 0x14c   :  { %13549 = vmatmul.mubr.msk.f32.gmra.mrb[152].mxu0 %vm280_vm0, %v19048_v27  ;;  %v19072_v27 = vld [vmem:[%s25566_s0 + $0x2b8] sm:$0xff] }
 0x14d   :  { %1095 = vmatprep.mubr.f32.mxu0 %v25601_v3  ;;  %25746 = vst [vmem:[#allocation30_spill] sm:$0xff] %v19072_v27 }
 0x150   :  { %13550 = vmatmul.mubr.msk.f32.gmra.mrb[154].mxu0 %vm280_vm0, %v19056_v29  ;;  %v19080_v29 = vld [vmem:[%s25566_s0 + $0x2c0] sm:$0xff] }
 0x151   :  { %1101 = vmatprep.mubr.f32.mxu0 %v25601_v3  ;;  %25747 = vst [vmem:[#allocation31_spill] sm:$0xff] %v19080_v29 }
 0x154   :  { %13551 = vmatmul.mubr.msk.f32.gmra.mrb[156].mxu0 %vm280_vm0, %v19064_v25  ;;  %v19088_v25 = vld [vmem:[%s25566_s0 + $0x2c8] sm:$0xff] }
 0x155   :  { %1107 = vmatprep.mubr.f32.mxu0 %v25601_v3  ;;  %25748 = vst [vmem:[#allocation32_spill] sm:$0xff] %v19088_v25 }
 0x158   :  { %13552 = vmatmul.mubr.msk.f32.gmra.mrb[158].mxu0 %vm280_vm0, %v19072_v27  ;;  %v19096_v27 = vld [vmem:[%s25566_s0 + $0x2d0] sm:$0xff] }
 0x159   :  { %1113 = vmatprep.mubr.f32.mxu0 %v25601_v3  ;;  %25749 = vst [vmem:[#allocation33_spill] sm:$0xff] %v19096_v27 }
 0x15c   :  { %13553 = vmatmul.mubr.msk.f32.gmra.mrb[160].mxu0 %vm280_vm0, %v19080_v29  ;;  %v19104_v29 = vld [vmem:[%s25566_s0 + $0x2d8] sm:$0xff] }
 0x15d   :  { %1119 = vmatprep.mubr.f32.mxu0 %v25601_v3  ;;  %25750 = vst [vmem:[#allocation34_spill] sm:$0xff] %v19104_v29 }
 0x160   :  { %13554 = vmatmul.mubr.msk.f32.gmra.mrb[162].mxu0 %vm280_vm0, %v19088_v25  ;;  %v13761_v25 = vld [vmem:[%s25565_s1 + $0x180] sm:$0xff] }
 0x161   :  { %1125 = vmatprep.mubr.f32.mxu0 %v25601_v3  ;;  %v16121_v46 = vpack.c.bf16 %v13763_v50, %v13761_v25  ;;  %v13771_v25 = vld [vmem:[%s25565_s1 + $0x1d0] sm:$0xff] }
 0x164   :  { %13555 = vmatmul.mubr.msk.f32.gmra.mrb[164].mxu0 %vm280_vm0, %v19096_v27  ;;  %v25751_v27 = vmov 0.0  }
 0x165   :  { %1131 = vmatprep.mubr.f32.mxu0 %v25601_v3  ;;  %v13768_v3 = vld [vmem:[%s25565_s1 + $0x1b8] sm:$0xff] }
 0x166   :  { %v16123_v45 = vpack.c.bf16 %v13768_v3, %v13766_v49  ;;  %v39_v3 = vld [vmem:[%s25566_s0 + $0x8] sm:$0xff]  ;;  %v16125_v49 = vpack.c.bf16 %v13767_v28, %v13765_v43  ;;  %v42_v43 = vld [vmem:[%s25566_s0 + $0x20] sm:$0xff] }
 0x168   :  { %13556 = vmatmul.mubr.msk.f32.gmra.mrb[166].mxu0 %vm280_vm0, %v19104_v29  ;;  %v13770_v29 = vld [vmem:[%s25565_s1 + $0x1c8] sm:$0xff] }
 0x169   :  { %1562 = vmatprep.mubr.f32.mxu0 %v25751_v27  ;;  %v16127_v50 = vpack.c.bf16 %v13772_v24, %v13770_v29  ;;  %v41_v24 = vld [vmem:[%s25566_s0 + $0x18] sm:$0xff]  ;;  %v44_v29 = vld [vmem:[%s25566_s0 + $0x30] sm:$0xff] }
 0x16c   :  { %13569 = vmatmul.mubr.msk.f32.vlgmr.msra.gmra.mrb[0].mxu0 %vm280_vm0, %v38_v48  ;;  %v13769_v48 = vld [vmem:[%s25565_s1 + $0x1c0] sm:$0xff] }
 0x16d   :  { %16122 = vmatpush1.bf16.msra.mxu0 %v16121_v46  ;;  %1568 = vmatprep.mubr.f32.mxu0 %v25751_v27  ;;  %v40_v46 = vld [vmem:[%s25566_s0 + $0x10] sm:$0xff]  ;;  %v16129_v28 = vpack.c.bf16 %v13771_v25, %v13769_v48  ;;  %v19484_v48 = vld [vmem:[%s25566_s0 + $0x2e8] sm:$0xff] }
 0x16e   :  { %16124 = vmatprep.subr.bf16.mxu0 %v16123_v45  ;;  %v43_v45 = vld [vmem:[%s25566_s0 + $0x28] sm:$0xff]  ;;  %v19492_v25 = vld [vmem:[%s25566_s0 + $0x2f0] sm:$0xff] }
 0x170   :  { %13570 = vmatmul.mubr.msk.f32.gmra.mrb[2].mxu0 %vm280_vm0, %v39_v3  ;;  %v45_v3 = vld [vmem:[%s25566_s0 + $0x38] sm:$0xff] }
 0x171   :  { %1574 = vmatprep.mubr.f32.mxu0 %v25751_v27  ;;  %16126 = vmatpush1.bf16.msra.mxu0 %v16125_v49  ;;  %v25783_v49 = vld [vmem:[#allocation34_spill] sm:$0xff] }
 0x172   :  { %16128 = vmatprep.subr.bf16.mxu0 %v16127_v50  ;;  %v19476_v50 = vld [vmem:[%s25566_s0 + $0x2e0] sm:$0xff] }
 0x174   :  { %13571 = vmatmul.mubr.msk.f32.gmra.mrb[4].mxu0 %vm280_vm0, %v40_v46  ;;  %v19500_v46 = vld [vmem:[%s25566_s0 + $0x2f8] sm:$0xff] }
 0x175   :  { %1580 = vmatprep.mubr.f32.mxu0 %v25751_v27  ;;  %16130 = vmatpush1.bf16.msra.mxu0 %v16129_v28  ;;  %v13977_v28 = vld [vmem:[%s25565_s1 + $0x240] sm:$0xff] }
 0x178   :  { %13572 = vmatmul.mubr.msk.f32.gmra.mrb[6].mxu0 %vm280_vm0, %v41_v24  ;;  %v13979_v24 = vld [vmem:[%s25565_s1 + $0x250] sm:$0xff] }
 0x179   :  { %1586 = vmatprep.mubr.f32.mxu0 %v25751_v27 }
 0x17c   :  { %13573 = vmatmul.mubr.msk.f32.gmra.mrb[8].mxu0 %vm280_vm0, %v42_v43  ;;  %v13982_v43 = vld [vmem:[%s25565_s1 + $0x268] sm:$0xff] }
 0x17d   :  { %1592 = vmatprep.mubr.f32.mxu0 %v25751_v27 }
 0x180   :  { %13574 = vmatmul.mubr.msk.f32.gmra.mrb[10].mxu0 %vm280_vm0, %v43_v45  ;;  %v13984_v45 = vld [vmem:[%s25565_s1 + $0x278] sm:$0xff] }
 0x181   :  { %1598 = vmatprep.mubr.f32.mxu0 %v25751_v27 }
 0x184   :  { %13575 = vmatmul.mubr.msk.f32.gmra.mrb[12].mxu0 %vm280_vm0, %v44_v29  ;;  %v13665_v29 = vld [vmem:[%s25566_s0 + $0x80] sm:$0xff] }
 0x185   :  { %1604 = vmatprep.mubr.f32.mxu0 %v25751_v27 }
 0x188   :  { %13576 = vmatmul.mubr.msk.f32.gmra.mrb[14].mxu0 %vm280_vm0, %v45_v3  ;;  %v16145_v3 = vpack.c.bf16 %v13979_v24, %v13977_v28  ;;  %v13995_v28 = vld [vmem:[%s25565_s1 + $0x2d0] sm:$0xff] }
 0x189   :  { %1610 = vmatprep.mubr.f32.mxu0 %v25751_v27 }
 0x18c   :  { %13577 = vmatmul.mubr.msk.f32.gmra.mrb[16].mxu0 %vm280_vm0, %v18380_v44  ;;  %v13774_v44 = vld [vmem:[%s25565_s1 + $0x1e8] sm:$0xff] }
 0x18d   :  { %1616 = vmatprep.mubr.f32.mxu0 %v25751_v27 }
 0x190   :  { %13578 = vmatmul.mubr.msk.f32.gmra.mrb[18].mxu0 %vm280_vm0, %v18400_v51  ;;  %v13776_v51 = vld [vmem:[%s25565_s1 + $0x1f8] sm:$0xff] }
 0x191   :  { %1622 = vmatprep.mubr.f32.mxu0 %v25751_v27 }
 0x194   :  { %13579 = vmatmul.mubr.msk.f32.gmra.mrb[20].mxu0 %vm280_vm0, %v18414_v56  ;;  %v13773_v56 = vld [vmem:[%s25565_s1 + $0x1e0] sm:$0xff] }
 0x195   :  { %1628 = vmatprep.mubr.f32.mxu0 %v25751_v27 }
 0x198   :  { %13580 = vmatmul.mubr.msk.f32.gmra.mrb[22].mxu0 %vm280_vm0, %v18422_v58  ;;  %v16131_v58 = vpack.c.bf16 %v13776_v51, %v13774_v44  ;;  %v16147_v44 = vpack.c.bf16 %v13984_v45, %v13982_v43  ;;  %v13981_v51 = vld [vmem:[%s25565_s1 + $0x260] sm:$0xff]  ;;  %v19810_v43 = vld [vmem:[%s25566_s0 + $0x190] sm:$0xff]  ;;  %v19818_v45 = vld [vmem:[%s25566_s0 + $0x198] sm:$0xff] }
 0x199   :  { %1634 = vmatprep.mubr.f32.mxu0 %v25751_v27 }
 0x19a   :  { %16132 = vmatprep.subr.bf16.mxu0 %v16131_v58  ;;  %v13986_v58 = vld [vmem:[%s25565_s1 + $0x288] sm:$0xff] }
 0x19c   :  { %13581 = vmatmul.mubr.msk.f32.gmra.mrb[24].mxu0 %vm280_vm0, %v18430_v59  ;;  %v13775_v59 = vld [vmem:[%s25565_s1 + $0x1f0] sm:$0xff] }
 0x19d   :  { %1640 = vmatprep.mubr.f32.mxu0 %v25751_v27 }
 0x1a0   :  { %13582 = vmatmul.mubr.msk.f32.gmra.mrb[26].mxu0 %vm280_vm0, %v18438_v60  ;;  %v16133_v60 = vpack.c.bf16 %v13775_v59, %v13773_v56  ;;  %v13983_v56 = vld [vmem:[%s25565_s1 + $0x270] sm:$0xff]  ;;  %v13988_v59 = vld [vmem:[%s25565_s1 + $0x298] sm:$0xff] }
 0x1a1   :  { %1646 = vmatprep.mubr.f32.mxu0 %v25751_v27 }
 0x1a2   :  { %16134 = vmatpush1.bf16.msra.mxu0 %v16133_v60  ;;  %v13666_v60 = vld [vmem:[%s25566_s0 + $0x88] sm:$0xff] }
 0x1a4   :  { %13583 = vmatmul.mubr.msk.f32.gmra.mrb[28].mxu0 %vm280_vm0, %v18446_v61  ;;  %v13778_v61 = vld [vmem:[%s25565_s1 + $0x208] sm:$0xff] }
 0x1a5   :  { %1652 = vmatprep.mubr.f32.mxu0 %v25751_v27 }
 0x1a8   :  { %13584 = vmatmul.mubr.msk.f32.gmra.mrb[30].mxu0 %vm280_vm0, %v18454_v62  ;;  %v13780_v62 = vld [vmem:[%s25565_s1 + $0x218] sm:$0xff] }
 0x1a9   :  { %1658 = vmatprep.mubr.f32.mxu0 %v25751_v27 }
 0x1ac   :  { %13585 = vmatmul.mubr.msk.f32.gmra.mrb[32].mxu0 %vm280_vm0, %v18462_v63  ;;  %v13777_v63 = vld [vmem:[%s25565_s1 + $0x200] sm:$0xff] }
 0x1ad   :  { %1664 = vmatprep.mubr.f32.mxu0 %v25751_v27 }
 0x1b0   :  { %13586 = vmatmul.mubr.msk.f32.gmra.mrb[34].mxu0 %vm280_vm0, %v18470_v0  ;;  %v16135_v0 = vpack.c.bf16 %v13780_v62, %v13778_v61  ;;  %v16149_v61 = vpack.c.bf16 %v13983_v56, %v13981_v51  ;;  %v16151_v62 = vpack.c.bf16 %v13988_v59, %v13986_v58  ;;  %v19850_v51 = vld [vmem:[%s25566_s0 + $0x1b8] sm:$0xff]  ;;  %v19858_v56 = vld [vmem:[%s25566_s0 + $0x1c0] sm:$0xff]  ;;  %v19866_v58 = vld [vmem:[%s25566_s0 + $0x1c8] sm:$0xff] }
 0x1b1   :  { %1670 = vmatprep.mubr.f32.mxu0 %v25751_v27  ;;  %v19874_v59 = vld [vmem:[%s25566_s0 + $0x1d0] sm:$0xff] }
 0x1b2   :  { %16136 = vmatprep.subr.bf16.mxu0 %v16135_v0  ;;  %v13987_v0 = vld [vmem:[%s25565_s1 + $0x290] sm:$0xff] }
 0x1b4   :  { %13587 = vmatmul.mubr.msk.f32.gmra.mrb[36].mxu0 %vm280_vm0, %v18478_v1  ;;  %v13779_v1 = vld [vmem:[%s25565_s1 + $0x210] sm:$0xff] }
 0x1b5   :  { %1676 = vmatprep.mubr.f32.mxu0 %v25751_v27 }
 0x1b8   :  { %13588 = vmatmul.mubr.msk.f32.gmra.mrb[38].mxu0 %vm280_vm0, %v18495_v6  ;;  %v16137_v6 = vpack.c.bf16 %v13779_v1, %v13777_v63  ;;  %v13985_v63 = vld [vmem:[%s25565_s1 + $0x280] sm:$0xff]  ;;  %v13667_v1 = vld [vmem:[%s25566_s0 + $0x90] sm:$0xff] }
 0x1b9   :  { %1682 = vmatprep.mubr.f32.mxu0 %v25751_v27 }
 0x1ba   :  { %16138 = vmatpush1.bf16.msra.mxu0 %v16137_v6  ;;  %v16153_v6 = vpack.c.bf16 %v13987_v0, %v13985_v63  ;;  %v19906_v63 = vld [vmem:[%s25566_s0 + $0x1f0] sm:$0xff]  ;;  %v19914_v0 = vld [vmem:[%s25566_s0 + $0x1f8] sm:$0xff] }
 0x1bc   :  { %13589 = vmatmul.mubr.msk.f32.gmra.mrb[40].mxu0 %vm280_vm0, %v18506_v10  ;;  %v13782_v10 = vld [vmem:[%s25565_s1 + $0x228] sm:$0xff] }
 0x1bd   :  { %1688 = vmatprep.mubr.f32.mxu0 %v25751_v27 }
 0x1c0   :  { %13590 = vmatmul.mubr.msk.f32.gmra.mrb[42].mxu0 %vm280_vm0, %v18514_v11  ;;  %v13784_v11 = vld [vmem:[%s25565_s1 + $0x238] sm:$0xff] }
 0x1c1   :  { %1694 = vmatprep.mubr.f32.mxu0 %v25751_v27 }
 0x1c4   :  { %13591 = vmatmul.mubr.msk.f32.gmra.mrb[44].mxu0 %vm280_vm0, %v18522_v12  ;;  %v13781_v12 = vld [vmem:[%s25565_s1 + $0x220] sm:$0xff] }
 0x1c5   :  { %1700 = vmatprep.mubr.f32.mxu0 %v25751_v27 }
 0x1c8   :  { %13592 = vmatmul.mubr.msk.f32.gmra.mrb[46].mxu0 %vm280_vm0, %v18530_v13  ;;  %v16139_v13 = vpack.c.bf16 %v13784_v11, %v13782_v10  ;;  %v13668_v10 = vld [vmem:[%s25566_s0 + $0x98] sm:$0xff]  ;;  %v13669_v11 = vld [vmem:[%s25566_s0 + $0xa0] sm:$0xff] }
 0x1c9   :  { %1706 = vmatprep.mubr.f32.mxu0 %v25751_v27 }
 0x1ca   :  { %16140 = vmatprep.subr.bf16.mxu0 %v16139_v13  ;;  %v13671_v13 = vld [vmem:[%s25566_s0 + $0xb0] sm:$0xff] }
 0x1cc   :  { %13593 = vmatmul.mubr.msk.f32.gmra.mrb[48].mxu0 %vm280_vm0, %v18538_v14  ;;  %v13783_v14 = vld [vmem:[%s25565_s1 + $0x230] sm:$0xff] }
 0x1cd   :  { %1712 = vmatprep.mubr.f32.mxu0 %v25751_v27 }
 0x1d0   :  { %13594 = vmatmul.mubr.msk.f32.gmra.mrb[50].mxu0 %vm280_vm0, %v18546_v15  ;;  %v16141_v15 = vpack.c.bf16 %v13783_v14, %v13781_v12  ;;  %v13670_v12 = vld [vmem:[%s25566_s0 + $0xa8] sm:$0xff]  ;;  %v13672_v14 = vld [vmem:[%s25566_s0 + $0xb8] sm:$0xff] }
 0x1d1   :  { %1718 = vmatprep.mubr.f32.mxu0 %v25751_v27 }
 0x1d2   :  { %16142 = vmatpush1.bf16.msra.mxu0 %v16141_v15  ;;  %v19578_v15 = vld [vmem:[%s25566_s0 + $0xc0] sm:$0xff] }
 0x1d4   :  { %13595 = vmatmul.mubr.msk.f32.gmra.mrb[52].mxu0 %vm280_vm0, %v18554_v16  ;;  %v25752_v16 = vld [vmem:[#allocation3_spill] sm:$0xff] }
 0x1d5   :  { %1724 = vmatprep.mubr.f32.mxu0 %v25751_v27 }
 0x1d8   :  { %13596 = vmatmul.mubr.msk.f32.gmra.mrb[54].mxu0 %vm280_vm0, %v18562_v17  ;;  %v25753_v17 = vld [vmem:[#allocation4_spill] sm:$0xff] }
 0x1d9   :  { %1730 = vmatprep.mubr.f32.mxu0 %v25751_v27 }
 0x1dc   :  { %13597 = vmatmul.mubr.msk.f32.gmra.mrb[56].mxu0 %vm280_vm0, %v18570_v18  ;;  %v25754_v18 = vld [vmem:[#allocation5_spill] sm:$0xff] }
 0x1dd   :  { %1736 = vmatprep.mubr.f32.mxu0 %v25751_v27 }
 0x1e0   :  { %13598 = vmatmul.mubr.msk.f32.gmra.mrb[58].mxu0 %vm280_vm0, %v18578_v19  ;;  %v25755_v19 = vld [vmem:[#allocation6_spill] sm:$0xff] }
 0x1e1   :  { %1742 = vmatprep.mubr.f32.mxu0 %v25751_v27 }
 0x1e4   :  { %13599 = vmatmul.mubr.msk.f32.gmra.mrb[60].mxu0 %vm280_vm0, %v18586_v20  ;;  %v25756_v20 = vld [vmem:[#allocation7_spill] sm:$0xff] }
 0x1e5   :  { %1748 = vmatprep.mubr.f32.mxu0 %v25751_v27 }
 0x1e8   :  { %13600 = vmatmul.mubr.msk.f32.gmra.mrb[62].mxu0 %vm280_vm0, %v18594_v21  ;;  %v13978_v21 = vld [vmem:[%s25565_s1 + $0x248] sm:$0xff] }
 0x1e9   :  { %1754 = vmatprep.mubr.f32.mxu0 %v25751_v27 }
 0x1ec   :  { %13601 = vmatmul.mubr.msk.f32.gmra.mrb[64].mxu0 %vm280_vm0, %v18602_v22  ;;  %v13980_v22 = vld [vmem:[%s25565_s1 + $0x258] sm:$0xff] }
 0x1ed   :  { %1760 = vmatprep.mubr.f32.mxu0 %v25751_v27 }
 0x1f0   :  { %13602 = vmatmul.mubr.msk.f32.gmra.mrb[66].mxu0 %vm280_vm0, %v18619_v26  ;;  %v16143_v26 = vpack.c.bf16 %v13980_v22, %v13978_v21  ;;  %v19626_v21 = vld [vmem:[%s25566_s0 + $0xf0] sm:$0xff]  ;;  %v19634_v22 = vld [vmem:[%s25566_s0 + $0xf8] sm:$0xff] }
 0x1f1   :  { %1766 = vmatprep.mubr.f32.mxu0 %v25751_v27 }
 0x1f2   :  { %16144 = vmatprep.subr.bf16.mxu0 %v16143_v26  ;;  %v19642_v26 = vld [vmem:[%s25566_s0 + $0x100] sm:$0xff] }
 0x1f4   :  { %13603 = vmatmul.mubr.msk.f32.gmra.mrb[68].mxu0 %vm280_vm0, %v18630_v30  ;;  %v25757_v30 = vld [vmem:[#allocation8_spill] sm:$0xff] }
 0x1f5   :  { %1772 = vmatprep.mubr.f32.mxu0 %v25751_v27 }
 0x1f8   :  { %13604 = vmatmul.mubr.msk.f32.gmra.mrb[70].mxu0 %vm280_vm0, %v18638_v31  ;;  %v25758_v31 = vld [vmem:[#allocation9_spill] sm:$0xff] }
 0x1f9   :  { %1778 = vmatprep.mubr.f32.mxu0 %v25751_v27 }
 0x1fc   :  { %13605 = vmatmul.mubr.msk.f32.gmra.mrb[72].mxu0 %vm280_vm0, %v18646_v32  ;;  %v25759_v32 = vld [vmem:[#allocation10_spill] sm:$0xff] }
 0x1fd   :  { %1784 = vmatprep.mubr.f32.mxu0 %v25751_v27 }
 0x200   :  { %13606 = vmatmul.mubr.msk.f32.gmra.mrb[74].mxu0 %vm280_vm0, %v18654_v33  ;;  %v25760_v33 = vld [vmem:[#allocation11_spill] sm:$0xff] }
 0x201   :  { %1790 = vmatprep.mubr.f32.mxu0 %v25751_v27 }
 0x204   :  { %13607 = vmatmul.mubr.msk.f32.gmra.mrb[76].mxu0 %vm280_vm0, %v18662_v34  ;;  %v25761_v34 = vld [vmem:[#allocation12_spill] sm:$0xff] }
 0x205   :  { %1796 = vmatprep.mubr.f32.mxu0 %v25751_v27 }
 0x208   :  { %13608 = vmatmul.mubr.msk.f32.gmra.mrb[78].mxu0 %vm280_vm0, %v18670_v35  ;;  %v25762_v35 = vld [vmem:[#allocation13_spill] sm:$0xff] }
 0x209   :  { %1802 = vmatprep.mubr.f32.mxu0 %v25751_v27 }
 0x20c   :  { %13609 = vmatmul.mubr.msk.f32.gmra.mrb[80].mxu0 %vm280_vm0, %v18678_v36  ;;  %v25763_v36 = vld [vmem:[#allocation14_spill] sm:$0xff] }
 0x20d   :  { %1808 = vmatprep.mubr.f32.mxu0 %v25751_v27 }
 0x210   :  { %13610 = vmatmul.mubr.msk.f32.gmra.mrb[82].mxu0 %vm280_vm0, %v18686_v37  ;;  %v25764_v37 = vld [vmem:[#allocation15_spill] sm:$0xff] }
 0x211   :  { %1814 = vmatprep.mubr.f32.mxu0 %v25751_v27 }
 0x214   :  { %13611 = vmatmul.mubr.msk.f32.gmra.mrb[84].mxu0 %vm280_vm0, %v18694_v38  ;;  %v25765_v38 = vld [vmem:[#allocation16_spill] sm:$0xff] }
 0x215   :  { %1820 = vmatprep.mubr.f32.mxu0 %v25751_v27 }
 0x218   :  { %13612 = vmatmul.mubr.msk.f32.gmra.mrb[86].mxu0 %vm280_vm0, %v18702_v39  ;;  %v25766_v39 = vld [vmem:[#allocation17_spill] sm:$0xff] }
 0x219   :  { %1826 = vmatprep.mubr.f32.mxu0 %v25751_v27 }
 0x21c   :  { %13613 = vmatmul.mubr.msk.f32.gmra.mrb[88].mxu0 %vm280_vm0, %v18710_v40  ;;  %v25767_v40 = vld [vmem:[#allocation18_spill] sm:$0xff] }
 0x21d   :  { %1832 = vmatprep.mubr.f32.mxu0 %v25751_v27 }
 0x220   :  { %13614 = vmatmul.mubr.msk.f32.gmra.mrb[90].mxu0 %vm280_vm0, %v18718_v41  ;;  %v25768_v41 = vld [vmem:[#allocation19_spill] sm:$0xff] }
 0x221   :  { %1838 = vmatprep.mubr.f32.mxu0 %v25751_v27 }
 0x224   :  { %13615 = vmatmul.mubr.msk.f32.gmra.mrb[92].mxu0 %vm280_vm0, %v18726_v42  ;;  %v25769_v42 = vld [vmem:[#allocation20_spill] sm:$0xff] }
 0x225   :  { %1844 = vmatprep.mubr.f32.mxu0 %v25751_v27 }
 0x228   :  { %13616 = vmatmul.mubr.msk.f32.gmra.mrb[94].mxu0 %vm280_vm0, %v18743_v47  ;;  %v25770_v47 = vld [vmem:[#allocation21_spill] sm:$0xff] }
 0x229   :  { %1850 = vmatprep.mubr.f32.mxu0 %v25751_v27 }
 0x22c   :  { %13617 = vmatmul.mubr.msk.f32.gmra.mrb[96].mxu0 %vm280_vm0, %v18754_v52  ;;  %v25771_v52 = vld [vmem:[#allocation22_spill] sm:$0xff] }
 0x22d   :  { %1856 = vmatprep.mubr.f32.mxu0 %v25751_v27 }
 0x230   :  { %13618 = vmatmul.mubr.msk.f32.gmra.mrb[98].mxu0 %vm280_vm0, %v18762_v53  ;;  %v25772_v53 = vld [vmem:[#allocation23_spill] sm:$0xff] }
 0x231   :  { %1862 = vmatprep.mubr.f32.mxu0 %v25751_v27 }
 0x234   :  { %13619 = vmatmul.mubr.msk.f32.gmra.mrb[100].mxu0 %vm280_vm0, %v18770_v54  ;;  %v25773_v54 = vld [vmem:[#allocation24_spill] sm:$0xff] }
 0x235   :  { %1868 = vmatprep.mubr.f32.mxu0 %v25751_v27 }
 0x238   :  { %13620 = vmatmul.mubr.msk.f32.gmra.mrb[102].mxu0 %vm280_vm0, %v18778_v55  ;;  %v25774_v55 = vld [vmem:[#allocation25_spill] sm:$0xff] }
 0x239   :  { %1874 = vmatprep.mubr.f32.mxu0 %v25751_v27 }
 0x23c   :  { %13621 = vmatmul.mubr.msk.f32.gmra.mrb[104].mxu0 %vm280_vm0, %v18786_v57  ;;  %v25775_v57 = vld [vmem:[#allocation26_spill] sm:$0xff] }
 0x23d   :  { %1880 = vmatprep.mubr.f32.mxu0 %v25751_v27 }
 0x240   :  { %13622 = vmatmul.mubr.msk.f32.gmra.mrb[106].mxu0 %vm280_vm0, %v18794_v2  ;;  %v25776_v2 = vld [vmem:[#allocation27_spill] sm:$0xff] }
 0x241   :  { %1886 = vmatprep.mubr.f32.mxu0 %v25751_v27 }
 0x244   :  { %13623 = vmatmul.mubr.msk.f32.gmra.mrb[108].mxu0 %vm280_vm0, %v18802_v4  ;;  %v25777_v4 = vld [vmem:[#allocation28_spill] sm:$0xff] }
 0x245   :  { %1892 = vmatprep.mubr.f32.mxu0 %v25751_v27 }
 0x248   :  { %13624 = vmatmul.mubr.msk.f32.gmra.mrb[110].mxu0 %vm280_vm0, %v18810_v5  ;;  %v25778_v5 = vld [vmem:[#allocation29_spill] sm:$0xff] }
 0x249   :  { %1898 = vmatprep.mubr.f32.mxu0 %v25751_v27 }
 0x24c   :  { %13625 = vmatmul.mubr.msk.f32.gmra.mrb[112].mxu0 %vm280_vm0, %v18818_v7  ;;  %v25779_v7 = vld [vmem:[#allocation30_spill] sm:$0xff] }
 0x24d   :  { %1904 = vmatprep.mubr.f32.mxu0 %v25751_v27 }
 0x250   :  { %13626 = vmatmul.mubr.msk.f32.gmra.mrb[114].mxu0 %vm280_vm0, %v18826_v8  ;;  %v25780_v8 = vld [vmem:[#allocation31_spill] sm:$0xff] }
 0x251   :  { %1910 = vmatprep.mubr.f32.mxu0 %v25751_v27 }
 0x254   :  { %13627 = vmatmul.mubr.msk.f32.gmra.mrb[116].mxu0 %vm280_vm0, %v18834_v9  ;;  %v25781_v9 = vld [vmem:[#allocation32_spill] sm:$0xff] }
 0x255   :  { %1916 = vmatprep.mubr.f32.mxu0 %v25751_v27 }
 0x258   :  { %13628 = vmatmul.mubr.msk.f32.gmra.mrb[118].mxu0 %vm280_vm0, %v18842_v23  ;;  %v25782_v23 = vld [vmem:[#allocation33_spill] sm:$0xff] }
 0x259   :  { %1922 = vmatprep.mubr.f32.mxu0 %v25751_v27 }
 0x25c   :  { %13629 = vmatmul.mubr.msk.f32.gmra.mrb[120].mxu0 %vm280_vm0, %v25752_v16  ;;  %v19586_v16 = vld [vmem:[%s25566_s0 + $0xc8] sm:$0xff] }
 0x25d   :  { %1928 = vmatprep.mubr.f32.mxu0 %v25751_v27 }
 0x260   :  { %13630 = vmatmul.mubr.msk.f32.gmra.mrb[122].mxu0 %vm280_vm0, %v25753_v17  ;;  %v19594_v17 = vld [vmem:[%s25566_s0 + $0xd0] sm:$0xff] }
 0x261   :  { %1934 = vmatprep.mubr.f32.mxu0 %v25751_v27 }
 0x264   :  { %13631 = vmatmul.mubr.msk.f32.gmra.mrb[124].mxu0 %vm280_vm0, %v25754_v18  ;;  %v19602_v18 = vld [vmem:[%s25566_s0 + $0xd8] sm:$0xff] }
 0x265   :  { %1940 = vmatprep.mubr.f32.mxu0 %v25751_v27 }
 0x268   :  { %13632 = vmatmul.mubr.msk.f32.gmra.mrb[126].mxu0 %vm280_vm0, %v25755_v19  ;;  %v19610_v19 = vld [vmem:[%s25566_s0 + $0xe0] sm:$0xff] }
 0x269   :  { %1946 = vmatprep.mubr.f32.mxu0 %v25751_v27 }
 0x26c   :  { %13633 = vmatmul.mubr.msk.f32.gmra.mrb[128].mxu0 %vm280_vm0, %v25756_v20  ;;  %v19618_v20 = vld [vmem:[%s25566_s0 + $0xe8] sm:$0xff] }
 0x26d   :  { %1952 = vmatprep.mubr.f32.mxu0 %v25751_v27 }
 0x270   :  { %13634 = vmatmul.mubr.msk.f32.gmra.mrb[130].mxu0 %vm280_vm0, %v25757_v30  ;;  %v13990_v30 = vld [vmem:[%s25565_s1 + $0x2a8] sm:$0xff] }
 0x271   :  { %1958 = vmatprep.mubr.f32.mxu0 %v25751_v27 }
 0x274   :  { %13635 = vmatmul.mubr.msk.f32.gmra.mrb[132].mxu0 %vm280_vm0, %v25758_v31  ;;  %v13992_v31 = vld [vmem:[%s25565_s1 + $0x2b8] sm:$0xff] }
 0x275   :  { %1964 = vmatprep.mubr.f32.mxu0 %v25751_v27 }
 0x278   :  { %13636 = vmatmul.mubr.msk.f32.gmra.mrb[134].mxu0 %vm280_vm0, %v25759_v32  ;;  %v13989_v32 = vld [vmem:[%s25565_s1 + $0x2a0] sm:$0xff] }
 0x279   :  { %1970 = vmatprep.mubr.f32.mxu0 %v25751_v27 }
 0x27c   :  { %13637 = vmatmul.mubr.msk.f32.gmra.mrb[136].mxu0 %vm280_vm0, %v25760_v33  ;;  %v19659_v33 = vld [vmem:[%s25566_s0 + $0x108] sm:$0xff] }
 0x27d   :  { %1976 = vmatprep.mubr.f32.mxu0 %v25751_v27 }
 0x280   :  { %13638 = vmatmul.mubr.msk.f32.gmra.mrb[138].mxu0 %vm280_vm0, %v25761_v34  ;;  %v16155_v34 = vpack.c.bf16 %v13992_v31, %v13990_v30  ;;  %v19950_v31 = vld [vmem:[%s25566_s0 + $0x210] sm:$0xff] }
 0x281   :  { %1982 = vmatprep.mubr.f32.mxu0 %v25751_v27 }
 0x284   :  { %13639 = vmatmul.mubr.msk.f32.gmra.mrb[140].mxu0 %vm280_vm0, %v25762_v35  ;;  %v13991_v35 = vld [vmem:[%s25565_s1 + $0x2b0] sm:$0xff] }
 0x285   :  { %1988 = vmatprep.mubr.f32.mxu0 %v25751_v27 }
 0x288   :  { %13640 = vmatmul.mubr.msk.f32.gmra.mrb[142].mxu0 %vm280_vm0, %v25763_v36  ;;  %v16157_v36 = vpack.c.bf16 %v13991_v35, %v13989_v32  ;;  %v19958_v32 = vld [vmem:[%s25566_s0 + $0x218] sm:$0xff]  ;;  %v19974_v35 = vld [vmem:[%s25566_s0 + $0x228] sm:$0xff] }
 0x289   :  { %1994 = vmatprep.mubr.f32.mxu0 %v25751_v27 }
 0x28c   :  { %13641 = vmatmul.mubr.msk.f32.gmra.mrb[144].mxu0 %vm280_vm0, %v25764_v37  ;;  %v19670_v37 = vld [vmem:[%s25566_s0 + $0x110] sm:$0xff] }
 0x28d   :  { %2000 = vmatprep.mubr.f32.mxu0 %v25751_v27 }
 0x290   :  { %13642 = vmatmul.mubr.msk.f32.gmra.mrb[146].mxu0 %vm280_vm0, %v25765_v38  ;;  %v19678_v38 = vld [vmem:[%s25566_s0 + $0x118] sm:$0xff] }
 0x291   :  { %2006 = vmatprep.mubr.f32.mxu0 %v25751_v27 }
 0x294   :  { %13643 = vmatmul.mubr.msk.f32.gmra.mrb[148].mxu0 %vm280_vm0, %v25766_v39  ;;  %v19686_v39 = vld [vmem:[%s25566_s0 + $0x120] sm:$0xff] }
 0x295   :  { %2012 = vmatprep.mubr.f32.mxu0 %v25751_v27 }
 0x298   :  { %13644 = vmatmul.mubr.msk.f32.gmra.mrb[150].mxu0 %vm280_vm0, %v25767_v40  ;;  %v19694_v40 = vld [vmem:[%s25566_s0 + $0x128] sm:$0xff] }
 0x299   :  { %2018 = vmatprep.mubr.f32.mxu0 %v25751_v27 }
 0x29c   :  { %13645 = vmatmul.mubr.msk.f32.gmra.mrb[152].mxu0 %vm280_vm0, %v25768_v41  ;;  %v19702_v41 = vld [vmem:[%s25566_s0 + $0x130] sm:$0xff] }
 0x29d   :  { %2024 = vmatprep.mubr.f32.mxu0 %v25751_v27 }
 0x2a0   :  { %13646 = vmatmul.mubr.msk.f32.gmra.mrb[154].mxu0 %vm280_vm0, %v25769_v42  ;;  %v19710_v42 = vld [vmem:[%s25566_s0 + $0x138] sm:$0xff] }
 0x2a1   :  { %2030 = vmatprep.mubr.f32.mxu0 %v25751_v27 }
 0x2a4   :  { %13647 = vmatmul.mubr.msk.f32.gmra.mrb[156].mxu0 %vm280_vm0, %v25770_v47  ;;  %v19718_v47 = vld [vmem:[%s25566_s0 + $0x140] sm:$0xff] }
 0x2a5   :  { %2036 = vmatprep.mubr.f32.mxu0 %v25751_v27 }
 0x2a8   :  { %13648 = vmatmul.mubr.msk.f32.gmra.mrb[158].mxu0 %vm280_vm0, %v25771_v52  ;;  %v19726_v52 = vld [vmem:[%s25566_s0 + $0x148] sm:$0xff] }
 0x2a9   :  { %2042 = vmatprep.mubr.f32.mxu0 %v25751_v27 }
 0x2ac   :  { %13649 = vmatmul.mubr.msk.f32.gmra.mrb[160].mxu0 %vm280_vm0, %v25772_v53  ;;  %v19734_v53 = vld [vmem:[%s25566_s0 + $0x150] sm:$0xff] }
 0x2ad   :  { %2048 = vmatprep.mubr.f32.mxu0 %v25751_v27 }
 0x2b0   :  { %13650 = vmatmul.mubr.msk.f32.gmra.mrb[162].mxu0 %vm280_vm0, %v25773_v54  ;;  %v19742_v54 = vld [vmem:[%s25566_s0 + $0x158] sm:$0xff] }
 0x2b1   :  { %2054 = vmatprep.mubr.f32.mxu0 %v25751_v27 }
 0x2b4   :  { %13651 = vmatmul.mubr.msk.f32.gmra.mrb[164].mxu0 %vm280_vm0, %v25774_v55  ;;  %v19750_v55 = vld [vmem:[%s25566_s0 + $0x160] sm:$0xff] }
 0x2b5   :  { %2060 = vmatprep.mubr.f32.mxu0 %v25751_v27 }
 0x2b8   :  { %13652 = vmatmul.mubr.msk.f32.gmra.mrb[166].mxu0 %vm280_vm0, %v25775_v57  ;;  %v19758_v57 = vld [vmem:[%s25566_s0 + $0x168] sm:$0xff] }
 0x2b9   :  { %2066 = vmatprep.mubr.f32.mxu0 %v25751_v27 }
 0x2bc   :  { %13653 = vmatmul.mubr.msk.f32.gmra.mrb[168].mxu0 %vm280_vm0, %v25776_v2  ;;  %v19766_v2 = vld [vmem:[%s25566_s0 + $0x170] sm:$0xff] }
 0x2bd   :  { %2072 = vmatprep.mubr.f32.mxu0 %v25751_v27 }
 0x2c0   :  { %13654 = vmatmul.mubr.msk.f32.gmra.mrb[170].mxu0 %vm280_vm0, %v25777_v4  ;;  %v19774_v4 = vld [vmem:[%s25566_s0 + $0x178] sm:$0xff] }
 0x2c1   :  { %2078 = vmatprep.mubr.f32.mxu0 %v25751_v27 }
 0x2c4   :  { %13655 = vmatmul.mubr.msk.f32.gmra.mrb[172].mxu0 %vm280_vm0, %v25778_v5  ;;  %v19782_v5 = vld [vmem:[%s25566_s0 + $0x180] sm:$0xff] }
 0x2c5   :  { %2084 = vmatprep.mubr.f32.mxu0 %v25751_v27 }
 0x2c8   :  { %13656 = vmatmul.mubr.msk.f32.gmra.mrb[174].mxu0 %vm280_vm0, %v25779_v7  ;;  %v13994_v7 = vld [vmem:[%s25565_s1 + $0x2c8] sm:$0xff] }
 0x2c9   :  { %2090 = vmatprep.mubr.f32.mxu0 %v25751_v27 }
 0x2cc   :  { %13657 = vmatmul.mubr.msk.f32.gmra.mrb[176].mxu0 %vm280_vm0, %v25780_v8  ;;  %v13996_v8 = vld [vmem:[%s25565_s1 + $0x2d8] sm:$0xff] }
 0x2cd   :  { %2096 = vmatprep.mubr.f32.mxu0 %v25751_v27 }
 0x2d0   :  { %13658 = vmatmul.mubr.msk.f32.gmra.mrb[178].mxu0 %vm280_vm0, %v25781_v9  ;;  %v13993_v9 = vld [vmem:[%s25565_s1 + $0x2c0] sm:$0xff] }
 0x2d1   :  { %2102 = vmatprep.mubr.f32.mxu0 %v25751_v27  ;;  %v16161_v24 = vpack.c.bf16 %v13995_v28, %v13993_v9  ;;  %v20006_v9 = vld [vmem:[%s25566_s0 + $0x248] sm:$0xff]  ;;  %v20022_v28 = vld [vmem:[%s25566_s0 + $0x258] sm:$0xff] }
 0x2d4   :  { %13659 = vmatmul.mubr.msk.f32.gmra.mrb[180].mxu0 %vm280_vm0, %v25782_v23  ;;  %v19799_v23 = vld [vmem:[%s25566_s0 + $0x188] sm:$0xff] }
 0x2d5   :  { %2108 = vmatprep.mubr.f32.mxu0 %v25751_v27 }
 0x2d8   :  { %13660 = vmatmul.mubr.msk.f32.gmra.mrb[182].mxu0 %vm280_vm0, %v25783_v49  ;;  %v16159_v49 = vpack.c.bf16 %v13996_v8, %v13994_v7  ;;  %v19990_v7 = vld [vmem:[%s25566_s0 + $0x238] sm:$0xff]  ;;  %v19998_v8 = vld [vmem:[%s25566_s0 + $0x240] sm:$0xff] }
 0x2d9   :  { %2114 = vmatprep.mubr.f32.mxu0 %v25751_v27 }
 0x2dc   :  { %13661 = vmatmul.mubr.msk.f32.gmra.mrb[184].mxu0 %vm280_vm0, %v19476_v50 }
 0x2dd   :  { %2120 = vmatprep.mubr.f32.mxu0 %v25751_v27 }
 0x2e0   :  { %13662 = vmatmul.mubr.msk.f32.gmra.mrb[186].mxu0 %vm280_vm0, %v19484_v48 }
 0x2e1   :  { %2126 = vmatprep.mubr.f32.mxu0 %v25751_v27 }
 0x2e4   :  { %13663 = vmatmul.mubr.msk.f32.gmra.mrb[188].mxu0 %vm280_vm0, %v19492_v25 }
 0x2e5   :  { %2132 = vmatprep.mubr.f32.mxu0 %v25751_v27 }
 0x2e8   :  { %13664 = vmatmul.mubr.msk.f32.gmra.mrb[190].mxu0 %vm280_vm0, %v19500_v46 }
 0x2e9   :  { %2613 = vmatprep.mubr.f32.mxu0 %v25751_v27 }
 0x2ec   :  { %13785 = vmatmul.mubr.msk.f32.vlgmr.msra.gmra.mrb[0].mxu0 %vm280_vm0, %v13665_v29  ;;  %v19826_v29 = vld [vmem:[%s25566_s0 + $0x1a0] sm:$0xff] }
 0x2ed   :  { %16146 = vmatpush1.bf16.msra.mxu0 %v16145_v3  ;;  %2619 = vmatprep.mubr.f32.mxu0 %v25751_v27  ;;  %v19834_v3 = vld [vmem:[%s25566_s0 + $0x1a8] sm:$0xff] }
 0x2ee   :  { %16148 = vmatprep.subr.bf16.mxu0 %v16147_v44  ;;  %v19842_v44 = vld [vmem:[%s25566_s0 + $0x1b0] sm:$0xff] }
 0x2f0   :  { %13786 = vmatmul.mubr.msk.f32.gmra.mrb[2].mxu0 %vm280_vm0, %v13666_v60  ;;  %v19882_v60 = vld [vmem:[%s25566_s0 + $0x1d8] sm:$0xff] }
 0x2f1   :  { %2625 = vmatprep.mubr.f32.mxu0 %v25751_v27  ;;  %16150 = vmatpush1.bf16.msra.mxu0 %v16149_v61  ;;  %v19890_v61 = vld [vmem:[%s25566_s0 + $0x1e0] sm:$0xff] }
 0x2f2   :  { %16152 = vmatprep.subr.bf16.mxu0 %v16151_v62  ;;  %v19898_v62 = vld [vmem:[%s25566_s0 + $0x1e8] sm:$0xff] }
 0x2f4   :  { %13787 = vmatmul.mubr.msk.f32.gmra.mrb[4].mxu0 %vm280_vm0, %v13667_v1  ;;  %v19922_v1 = vld [vmem:[%s25566_s0 + $0x200] sm:$0xff] }
 0x2f5   :  { %2631 = vmatprep.mubr.f32.mxu0 %v25751_v27  ;;  %16154 = vmatpush1.bf16.msra.mxu0 %v16153_v6  ;;  %v13998_v6 = vld [vmem:[%s25565_s1 + $0x2e8] sm:$0xff] }
 0x2f6   :  { %16156 = vmatprep.subr.bf16.mxu0 %v16155_v34  ;;  %v19966_v34 = vld [vmem:[%s25566_s0 + $0x220] sm:$0xff] }
 0x2f8   :  { %13788 = vmatmul.mubr.msk.f32.gmra.mrb[6].mxu0 %vm280_vm0, %v13668_v10  ;;  %v14000_v10 = vld [vmem:[%s25565_s1 + $0x2f8] sm:$0xff] }
 0x2f9   :  { %2637 = vmatprep.mubr.f32.mxu0 %v25751_v27  ;;  %16158 = vmatpush1.bf16.msra.mxu0 %v16157_v36  ;;  %v19982_v36 = vld [vmem:[%s25566_s0 + $0x230] sm:$0xff] }
 0x2fa   :  { %16160 = vmatprep.subr.bf16.mxu0 %v16159_v49  ;;  %v20014_v49 = vld [vmem:[%s25566_s0 + $0x250] sm:$0xff] }
 0x2fc   :  { %13789 = vmatmul.mubr.msk.f32.gmra.mrb[8].mxu0 %vm280_vm0, %v13669_v11  ;;  %v13997_v11 = vld [vmem:[%s25565_s1 + $0x2e0] sm:$0xff] }
 0x2fd   :  { %2643 = vmatprep.mubr.f32.mxu0 %v25751_v27  ;;  %16162 = vmatpush1.bf16.msra.mxu0 %v16161_v24  ;;  %v20030_v24 = vld [vmem:[%s25566_s0 + $0x260] sm:$0xff] }
 0x300   :  { %13790 = vmatmul.mubr.msk.f32.gmra.mrb[10].mxu0 %vm280_vm0, %v13670_v12  ;;  %v19939_v12 = vld [vmem:[%s25566_s0 + $0x208] sm:$0xff] }
 0x301   :  { %2649 = vmatprep.mubr.f32.mxu0 %v25751_v27 }
 0x304   :  { %13791 = vmatmul.mubr.msk.f32.gmra.mrb[12].mxu0 %vm280_vm0, %v13671_v13  ;;  %v16163_v13 = vpack.c.bf16 %v14000_v10, %v13998_v6  ;;  %v20038_v6 = vld [vmem:[%s25566_s0 + $0x268] sm:$0xff]  ;;  %v20046_v10 = vld [vmem:[%s25566_s0 + $0x270] sm:$0xff] }
 0x305   :  { %2655 = vmatprep.mubr.f32.mxu0 %v25751_v27  ;;  %25784 = vst [vmem:[#allocation3_spill] sm:$0xff] %v20038_v6  ;;  %25785 = vst [vmem:[#allocation4_spill] sm:$0xff] %v20046_v10 }
 0x306   :  { %16164 = vmatprep.subr.bf16.mxu0 %v16163_v13  ;;  %v20062_v13 = vld [vmem:[%s25566_s0 + $0x280] sm:$0xff] }
 0x307   :  { %25787 = vst [vmem:[#allocation6_spill] sm:$0xff] %v20062_v13 }
 0x308   :  { %13792 = vmatmul.mubr.msk.f32.gmra.mrb[14].mxu0 %vm280_vm0, %v13672_v14  ;;  %v13999_v14 = vld [vmem:[%s25565_s1 + $0x2f0] sm:$0xff] }
 0x309   :  { %2661 = vmatprep.mubr.f32.mxu0 %v25751_v27  ;;  %v16165_v30 = vpack.c.bf16 %v13999_v14, %v13997_v11  ;;  %v20054_v11 = vld [vmem:[%s25566_s0 + $0x278] sm:$0xff]  ;;  %v14194_v14 = vld [vmem:[%s25565_s1 + $0x308] sm:$0xff] }
 0x30a   :  { %25786 = vst [vmem:[#allocation5_spill] sm:$0xff] %v20054_v11 }
 0x30b   :  { %16166 = vmatpush1.bf16.msra.mxu0 %v16165_v30  ;;  %v14196_v30 = vld [vmem:[%s25565_s1 + $0x318] sm:$0xff] }
 0x30c   :  { %13793 = vmatmul.mubr.msk.f32.gmra.mrb[16].mxu0 %vm280_vm0, %v19578_v15 }
 0x30d   :  { %2667 = vmatprep.mubr.f32.mxu0 %v25751_v27 }
 0x310   :  { %13794 = vmatmul.mubr.msk.f32.gmra.mrb[18].mxu0 %vm280_vm0, %v19586_v16 }
 0x311   :  { %2673 = vmatprep.mubr.f32.mxu0 %v25751_v27 }
 0x314   :  { %13795 = vmatmul.mubr.msk.f32.gmra.mrb[20].mxu0 %vm280_vm0, %v19594_v17 }
 0x315   :  { %2679 = vmatprep.mubr.f32.mxu0 %v25751_v27 }
 0x318   :  { %13796 = vmatmul.mubr.msk.f32.gmra.mrb[22].mxu0 %vm280_vm0, %v19602_v18 }
 0x319   :  { %2685 = vmatprep.mubr.f32.mxu0 %v25751_v27 }
 0x31c   :  { %13797 = vmatmul.mubr.msk.f32.gmra.mrb[24].mxu0 %vm280_vm0, %v19610_v19 }
 0x31d   :  { %2691 = vmatprep.mubr.f32.mxu0 %v25751_v27 }
 0x320   :  { %13798 = vmatmul.mubr.msk.f32.gmra.mrb[26].mxu0 %vm280_vm0, %v19618_v20 }
 0x321   :  { %2697 = vmatprep.mubr.f32.mxu0 %v25751_v27 }
 0x324   :  { %13799 = vmatmul.mubr.msk.f32.gmra.mrb[28].mxu0 %vm280_vm0, %v19626_v21 }
 0x325   :  { %2703 = vmatprep.mubr.f32.mxu0 %v25751_v27 }
 0x328   :  { %13800 = vmatmul.mubr.msk.f32.gmra.mrb[30].mxu0 %vm280_vm0, %v19634_v22 }
 0x329   :  { %2709 = vmatprep.mubr.f32.mxu0 %v25751_v27 }
 0x32c   :  { %13801 = vmatmul.mubr.msk.f32.gmra.mrb[32].mxu0 %vm280_vm0, %v19642_v26 }
 0x32d   :  { %2715 = vmatprep.mubr.f32.mxu0 %v25751_v27 }
 0x330   :  { %13802 = vmatmul.mubr.msk.f32.gmra.mrb[34].mxu0 %vm280_vm0, %v19659_v33 }
 0x331   :  { %2721 = vmatprep.mubr.f32.mxu0 %v25751_v27 }
 0x334   :  { %13803 = vmatmul.mubr.msk.f32.gmra.mrb[36].mxu0 %vm280_vm0, %v19670_v37 }
 0x335   :  { %2727 = vmatprep.mubr.f32.mxu0 %v25751_v27 }
 0x338   :  { %13804 = vmatmul.mubr.msk.f32.gmra.mrb[38].mxu0 %vm280_vm0, %v19678_v38 }
 0x339   :  { %2733 = vmatprep.mubr.f32.mxu0 %v25751_v27 }
 0x33c   :  { %13805 = vmatmul.mubr.msk.f32.gmra.mrb[40].mxu0 %vm280_vm0, %v19686_v39 }
 0x33d   :  { %2739 = vmatprep.mubr.f32.mxu0 %v25751_v27 }
 0x340   :  { %13806 = vmatmul.mubr.msk.f32.gmra.mrb[42].mxu0 %vm280_vm0, %v19694_v40 }
 0x341   :  { %2745 = vmatprep.mubr.f32.mxu0 %v25751_v27 }
 0x344   :  { %13807 = vmatmul.mubr.msk.f32.gmra.mrb[44].mxu0 %vm280_vm0, %v19702_v41 }
 0x345   :  { %2751 = vmatprep.mubr.f32.mxu0 %v25751_v27 }
 0x348   :  { %13808 = vmatmul.mubr.msk.f32.gmra.mrb[46].mxu0 %vm280_vm0, %v19710_v42 }
 0x349   :  { %2757 = vmatprep.mubr.f32.mxu0 %v25751_v27 }
 0x34c   :  { %13809 = vmatmul.mubr.msk.f32.gmra.mrb[48].mxu0 %vm280_vm0, %v19718_v47 }
 0x34d   :  { %2763 = vmatprep.mubr.f32.mxu0 %v25751_v27 }
 0x350   :  { %13810 = vmatmul.mubr.msk.f32.gmra.mrb[50].mxu0 %vm280_vm0, %v19726_v52 }
 0x351   :  { %2769 = vmatprep.mubr.f32.mxu0 %v25751_v27 }
 0x354   :  { %13811 = vmatmul.mubr.msk.f32.gmra.mrb[52].mxu0 %vm280_vm0, %v19734_v53 }
 0x355   :  { %2775 = vmatprep.mubr.f32.mxu0 %v25751_v27 }
 0x358   :  { %13812 = vmatmul.mubr.msk.f32.gmra.mrb[54].mxu0 %vm280_vm0, %v19742_v54 }
 0x359   :  { %2781 = vmatprep.mubr.f32.mxu0 %v25751_v27 }
 0x35c   :  { %13813 = vmatmul.mubr.msk.f32.gmra.mrb[56].mxu0 %vm280_vm0, %v19750_v55 }
 0x35d   :  { %2787 = vmatprep.mubr.f32.mxu0 %v25751_v27 }
 0x360   :  { %13814 = vmatmul.mubr.msk.f32.gmra.mrb[58].mxu0 %vm280_vm0, %v19758_v57 }
 0x361   :  { %2793 = vmatprep.mubr.f32.mxu0 %v25751_v27 }
 0x364   :  { %13815 = vmatmul.mubr.msk.f32.gmra.mrb[60].mxu0 %vm280_vm0, %v19766_v2 }
 0x365   :  { %2799 = vmatprep.mubr.f32.mxu0 %v25751_v27 }
 0x368   :  { %13816 = vmatmul.mubr.msk.f32.gmra.mrb[62].mxu0 %vm280_vm0, %v19774_v4 }
 0x369   :  { %2805 = vmatprep.mubr.f32.mxu0 %v25751_v27 }
 0x36c   :  { %13817 = vmatmul.mubr.msk.f32.gmra.mrb[64].mxu0 %vm280_vm0, %v19782_v5 }
 0x36d   :  { %2811 = vmatprep.mubr.f32.mxu0 %v25751_v27 }
 0x370   :  { %13818 = vmatmul.mubr.msk.f32.gmra.mrb[66].mxu0 %vm280_vm0, %v19799_v23 }
 0x371   :  { %2817 = vmatprep.mubr.f32.mxu0 %v25751_v27 }
 0x374   :  { %13819 = vmatmul.mubr.msk.f32.gmra.mrb[68].mxu0 %vm280_vm0, %v19810_v43 }
 0x375   :  { %2823 = vmatprep.mubr.f32.mxu0 %v25751_v27 }
 0x378   :  { %13820 = vmatmul.mubr.msk.f32.gmra.mrb[70].mxu0 %vm280_vm0, %v19818_v45 }
 0x379   :  { %2829 = vmatprep.mubr.f32.mxu0 %v25751_v27 }
 0x37c   :  { %13821 = vmatmul.mubr.msk.f32.gmra.mrb[72].mxu0 %vm280_vm0, %v19826_v29 }
 0x37d   :  { %2835 = vmatprep.mubr.f32.mxu0 %v25751_v27 }
 0x380   :  { %13822 = vmatmul.mubr.msk.f32.gmra.mrb[74].mxu0 %vm280_vm0, %v19834_v3 }
 0x381   :  { %2841 = vmatprep.mubr.f32.mxu0 %v25751_v27 }
 0x384   :  { %13823 = vmatmul.mubr.msk.f32.gmra.mrb[76].mxu0 %vm280_vm0, %v19842_v44 }
 0x385   :  { %2847 = vmatprep.mubr.f32.mxu0 %v25751_v27 }
 0x388   :  { %13824 = vmatmul.mubr.msk.f32.gmra.mrb[78].mxu0 %vm280_vm0, %v19850_v51 }
 0x389   :  { %2853 = vmatprep.mubr.f32.mxu0 %v25751_v27 }
 0x38c   :  { %13825 = vmatmul.mubr.msk.f32.gmra.mrb[80].mxu0 %vm280_vm0, %v19858_v56 }
 0x38d   :  { %2859 = vmatprep.mubr.f32.mxu0 %v25751_v27 }
 0x390   :  { %13826 = vmatmul.mubr.msk.f32.gmra.mrb[82].mxu0 %vm280_vm0, %v19866_v58 }
 0x391   :  { %2865 = vmatprep.mubr.f32.mxu0 %v25751_v27 }
 0x394   :  { %13827 = vmatmul.mubr.msk.f32.gmra.mrb[84].mxu0 %vm280_vm0, %v19874_v59 }
 0x395   :  { %2871 = vmatprep.mubr.f32.mxu0 %v25751_v27 }
 0x398   :  { %13828 = vmatmul.mubr.msk.f32.gmra.mrb[86].mxu0 %vm280_vm0, %v19882_v60 }
 0x399   :  { %2877 = vmatprep.mubr.f32.mxu0 %v25751_v27 }
 0x39c   :  { %13829 = vmatmul.mubr.msk.f32.gmra.mrb[88].mxu0 %vm280_vm0, %v19890_v61 }
 0x39d   :  { %2883 = vmatprep.mubr.f32.mxu0 %v25751_v27 }
 0x3a0   :  { %13830 = vmatmul.mubr.msk.f32.gmra.mrb[90].mxu0 %vm280_vm0, %v19898_v62 }
 0x3a1   :  { %2889 = vmatprep.mubr.f32.mxu0 %v25751_v27 }
 0x3a4   :  { %13831 = vmatmul.mubr.msk.f32.gmra.mrb[92].mxu0 %vm280_vm0, %v19906_v63 }
 0x3a5   :  { %2895 = vmatprep.mubr.f32.mxu0 %v25751_v27 }
 0x3a8   :  { %13832 = vmatmul.mubr.msk.f32.gmra.mrb[94].mxu0 %vm280_vm0, %v19914_v0 }
 0x3a9   :  { %2901 = vmatprep.mubr.f32.mxu0 %v25751_v27 }
 0x3ac   :  { %13833 = vmatmul.mubr.msk.f32.gmra.mrb[96].mxu0 %vm280_vm0, %v19922_v1 }
 0x3ad   :  { %2907 = vmatprep.mubr.f32.mxu0 %v25751_v27 }
 0x3b0   :  { %13834 = vmatmul.mubr.msk.f32.gmra.mrb[98].mxu0 %vm280_vm0, %v19939_v12 }
 0x3b1   :  { %2913 = vmatprep.mubr.f32.mxu0 %v25751_v27 }
 0x3b4   :  { %13835 = vmatmul.mubr.msk.f32.gmra.mrb[100].mxu0 %vm280_vm0, %v19950_v31 }
 0x3b5   :  { %2919 = vmatprep.mubr.f32.mxu0 %v25751_v27 }
 0x3b8   :  { %13836 = vmatmul.mubr.msk.f32.gmra.mrb[102].mxu0 %vm280_vm0, %v19958_v32 }
 0x3b9   :  { %2925 = vmatprep.mubr.f32.mxu0 %v25751_v27 }
 0x3bc   :  { %13837 = vmatmul.mubr.msk.f32.gmra.mrb[104].mxu0 %vm280_vm0, %v19966_v34 }
 0x3bd   :  { %2931 = vmatprep.mubr.f32.mxu0 %v25751_v27 }
 0x3c0   :  { %13838 = vmatmul.mubr.msk.f32.gmra.mrb[106].mxu0 %vm280_vm0, %v19974_v35 }
 0x3c1   :  { %2937 = vmatprep.mubr.f32.mxu0 %v25751_v27 }
 0x3c4   :  { %13839 = vmatmul.mubr.msk.f32.gmra.mrb[108].mxu0 %vm280_vm0, %v19982_v36 }
 0x3c5   :  { %2943 = vmatprep.mubr.f32.mxu0 %v25751_v27 }
 0x3c8   :  { %13840 = vmatmul.mubr.msk.f32.gmra.mrb[110].mxu0 %vm280_vm0, %v19990_v7 }
 0x3c9   :  { %2949 = vmatprep.mubr.f32.mxu0 %v25751_v27 }
 0x3cc   :  { %13841 = vmatmul.mubr.msk.f32.gmra.mrb[112].mxu0 %vm280_vm0, %v19998_v8 }
 0x3cd   :  { %2955 = vmatprep.mubr.f32.mxu0 %v25751_v27 }
 0x3d0   :  { %13842 = vmatmul.mubr.msk.f32.gmra.mrb[114].mxu0 %vm280_vm0, %v20006_v9 }
 0x3d1   :  { %2961 = vmatprep.mubr.f32.mxu0 %v25751_v27 }
 0x3d4   :  { %13843 = vmatmul.mubr.msk.f32.gmra.mrb[116].mxu0 %vm280_vm0, %v20014_v49 }
 0x3d5   :  { %2967 = vmatprep.mubr.f32.mxu0 %v25751_v27 }
 0x3d8   :  { %13844 = vmatmul.mubr.msk.f32.gmra.mrb[118].mxu0 %vm280_vm0, %v20022_v28 }
 0x3d9   :  { %2973 = vmatprep.mubr.f32.mxu0 %v25751_v27 }
 0x3dc   :  { %13845 = vmatmul.mubr.msk.f32.gmra.mrb[120].mxu0 %vm280_vm0, %v20030_v24 }
 0x3dd   :  { %2979 = vmatprep.mubr.f32.mxu0 %v25751_v27 }
 0x3e0   :  { %13846 = vmatmul.mubr.msk.f32.gmra.mrb[122].mxu0 %vm280_vm0, %v20038_v6  ;;  %v14202_v6 = vld [vmem:[%s25565_s1 + $0x348] sm:$0xff] }
 0x3e1   :  { %2985 = vmatprep.mubr.f32.mxu0 %v25751_v27 }
 0x3e4   :  { %13847 = vmatmul.mubr.msk.f32.gmra.mrb[124].mxu0 %vm280_vm0, %v20046_v10  ;;  %v16167_v10 = vpack.c.bf16 %v14196_v30, %v14194_v14  ;;  %v20092_v14 = vld [vmem:[%s25566_s0 + $0x298] sm:$0xff]  ;;  %v20108_v30 = vld [vmem:[%s25566_s0 + $0x2a8] sm:$0xff] }
 0x3e5   :  { %2991 = vmatprep.mubr.f32.mxu0 %v25751_v27  ;;  %25790 = vst [vmem:[#allocation9_spill] sm:$0xff] %v20092_v14  ;;  %25792 = vst [vmem:[#allocation11_spill] sm:$0xff] %v20108_v30 }
 0x3e6   :  { %16168 = vmatprep.subr.bf16.mxu0 %v16167_v10  ;;  %v20100_v10 = vld [vmem:[%s25566_s0 + $0x2a0] sm:$0xff] }
 0x3e7   :  { %25791 = vst [vmem:[#allocation10_spill] sm:$0xff] %v20100_v10 }
 0x3e8   :  { %13848 = vmatmul.mubr.msk.f32.gmra.mrb[126].mxu0 %vm280_vm0, %v20054_v11  ;;  %v20076_v11 = vld [vmem:[%s25566_s0 + $0x288] sm:$0xff] }
 0x3e9   :  { %2997 = vmatprep.mubr.f32.mxu0 %v25751_v27  ;;  %25788 = vst [vmem:[#allocation7_spill] sm:$0xff] %v20076_v11 }
 0x3ec   :  { %13849 = vmatmul.mubr.msk.f32.gmra.mrb[128].mxu0 %vm280_vm0, %v20062_v13  ;;  %v20084_v13 = vld [vmem:[%s25566_s0 + $0x290] sm:$0xff] }
 0x3ed   :  { %3003 = vmatprep.mubr.f32.mxu0 %v25751_v27  ;;  %25789 = vst [vmem:[#allocation8_spill] sm:$0xff] %v20084_v13 }
 0x3f0   :  { %13850 = vmatmul.mubr.msk.f32.gmra.mrb[130].mxu0 %vm280_vm0, %v20076_v11  ;;  %v14199_v11 = vld [vmem:[%s25565_s1 + $0x330] sm:$0xff] }
 0x3f1   :  { %3009 = vmatprep.mubr.f32.mxu0 %v25751_v27 }
 0x3f4   :  { %13851 = vmatmul.mubr.msk.f32.gmra.mrb[132].mxu0 %vm280_vm0, %v20084_v13  ;;  %v14197_v13 = vld [vmem:[%s25565_s1 + $0x320] sm:$0xff] }
 0x3f5   :  { %3015 = vmatprep.mubr.f32.mxu0 %v25751_v27 }
 0x3f8   :  { %13852 = vmatmul.mubr.msk.f32.gmra.mrb[134].mxu0 %vm280_vm0, %v20092_v14  ;;  %v20116_v14 = vld [vmem:[%s25566_s0 + $0x2b0] sm:$0xff] }
 0x3f9   :  { %3021 = vmatprep.mubr.f32.mxu0 %v25751_v27  ;;  %25793 = vst [vmem:[#allocation12_spill] sm:$0xff] %v20116_v14 }
 0x3fc   :  { %13853 = vmatmul.mubr.msk.f32.gmra.mrb[136].mxu0 %vm280_vm0, %v20100_v10  ;;  %v20124_v10 = vld [vmem:[%s25566_s0 + $0x2b8] sm:$0xff] }
 0x3fd   :  { %3027 = vmatprep.mubr.f32.mxu0 %v25751_v27  ;;  %25794 = vst [vmem:[#allocation13_spill] sm:$0xff] %v20124_v10 }
 0x400   :  { %13854 = vmatmul.mubr.msk.f32.gmra.mrb[138].mxu0 %vm280_vm0, %v20108_v30  ;;  %v20132_v30 = vld [vmem:[%s25566_s0 + $0x2c0] sm:$0xff] }
 0x401   :  { %3033 = vmatprep.mubr.f32.mxu0 %v25751_v27  ;;  %25795 = vst [vmem:[#allocation14_spill] sm:$0xff] %v20132_v30 }
 0x404   :  { %13855 = vmatmul.mubr.msk.f32.gmra.mrb[140].mxu0 %vm280_vm0, %v20116_v14  ;;  %v20140_v14 = vld [vmem:[%s25566_s0 + $0x2c8] sm:$0xff] }
 0x405   :  { %3039 = vmatprep.mubr.f32.mxu0 %v25751_v27  ;;  %25796 = vst [vmem:[#allocation15_spill] sm:$0xff] %v20140_v14 }
 0x408   :  { %13856 = vmatmul.mubr.msk.f32.gmra.mrb[142].mxu0 %vm280_vm0, %v20124_v10  ;;  %v20148_v10 = vld [vmem:[%s25566_s0 + $0x2d0] sm:$0xff] }
 0x409   :  { %3045 = vmatprep.mubr.f32.mxu0 %v25751_v27  ;;  %25797 = vst [vmem:[#allocation16_spill] sm:$0xff] %v20148_v10 }
 0x40c   :  { %13857 = vmatmul.mubr.msk.f32.gmra.mrb[144].mxu0 %vm280_vm0, %v20132_v30  ;;  %v20156_v30 = vld [vmem:[%s25566_s0 + $0x2d8] sm:$0xff] }
 0x40d   :  { %3051 = vmatprep.mubr.f32.mxu0 %v25751_v27  ;;  %25798 = vst [vmem:[#allocation17_spill] sm:$0xff] %v20156_v30 }
 0x410   :  { %13858 = vmatmul.mubr.msk.f32.gmra.mrb[146].mxu0 %vm280_vm0, %v20140_v14 }
 0x411   :  { %3057 = vmatprep.mubr.f32.mxu0 %v25751_v27 }
 0x414   :  { %13859 = vmatmul.mubr.msk.f32.gmra.mrb[148].mxu0 %vm280_vm0, %v20148_v10 }
 0x415   :  { %3063 = vmatprep.mubr.f32.mxu0 %v25751_v27 }
 0x418   :  { %13860 = vmatmul.mubr.msk.f32.gmra.mrb[150].mxu0 %vm280_vm0, %v20156_v30  ;;  %v14198_v30 = vld [vmem:[%s25565_s1 + $0x328] sm:$0xff] }
 0x419   :  { %3069 = vmatprep.mubr.f32.mxu0 %v25751_v27 }
 0x41c   :  { %13861 = vmatmul.mubr.msk.f32.gmra.mrb[152].mxu0 %vm280_vm0, %v19476_v50  ;;  %v20176_v50 = vld [vmem:[%s25566_s0 + $0x300] sm:$0xff] }
 0x41d   :  { %3075 = vmatprep.mubr.f32.mxu0 %v25751_v27  ;;  %25799 = vst [vmem:[#allocation18_spill] sm:$0xff] %v20176_v50 }
 0x420   :  { %13862 = vmatmul.mubr.msk.f32.gmra.mrb[154].mxu0 %vm280_vm0, %v19484_v48  ;;  %v20184_v48 = vld [vmem:[%s25566_s0 + $0x308] sm:$0xff] }
 0x421   :  { %3081 = vmatprep.mubr.f32.mxu0 %v25751_v27  ;;  %25800 = vst [vmem:[#allocation19_spill] sm:$0xff] %v20184_v48 }
 0x424   :  { %13863 = vmatmul.mubr.msk.f32.gmra.mrb[156].mxu0 %vm280_vm0, %v19492_v25  ;;  %v20192_v25 = vld [vmem:[%s25566_s0 + $0x310] sm:$0xff] }
 0x425   :  { %3087 = vmatprep.mubr.f32.mxu0 %v25751_v27  ;;  %25801 = vst [vmem:[#allocation20_spill] sm:$0xff] %v20192_v25 }
 0x428   :  { %13864 = vmatmul.mubr.msk.f32.gmra.mrb[158].mxu0 %vm280_vm0, %v19500_v46  ;;  %v20200_v46 = vld [vmem:[%s25566_s0 + $0x318] sm:$0xff] }
 0x429   :  { %3093 = vmatprep.mubr.f32.mxu0 %v25751_v27  ;;  %25802 = vst [vmem:[#allocation21_spill] sm:$0xff] %v20200_v46 }
 0x42c   :  { %13865 = vmatmul.mubr.msk.f32.gmra.mrb[160].mxu0 %vm280_vm0, %v20176_v50  ;;  %v14195_v50 = vld [vmem:[%s25565_s1 + $0x310] sm:$0xff] }
 0x42d   :  { %3099 = vmatprep.mubr.f32.mxu0 %v25751_v27 }
 0x430   :  { %13866 = vmatmul.mubr.msk.f32.gmra.mrb[162].mxu0 %vm280_vm0, %v20184_v48  ;;  %v20208_v48 = vld [vmem:[%s25566_s0 + $0x320] sm:$0xff] }
 0x431   :  { %3105 = vmatprep.mubr.f32.mxu0 %v25751_v27  ;;  %25803 = vst [vmem:[#allocation22_spill] sm:$0xff] %v20208_v48 }
 0x434   :  { %13867 = vmatmul.mubr.msk.f32.gmra.mrb[164].mxu0 %vm280_vm0, %v20192_v25  ;;  %v20216_v25 = vld [vmem:[%s25566_s0 + $0x328] sm:$0xff] }
 0x435   :  { %3111 = vmatprep.mubr.f32.mxu0 %v25751_v27  ;;  %25804 = vst [vmem:[#allocation23_spill] sm:$0xff] %v20216_v25 }
 0x438   :  { %13868 = vmatmul.mubr.msk.f32.gmra.mrb[166].mxu0 %vm280_vm0, %v20200_v46  ;;  %v20224_v46 = vld [vmem:[%s25566_s0 + $0x330] sm:$0xff] }
 0x439   :  { %3117 = vmatprep.mubr.f32.mxu0 %v25751_v27  ;;  %25805 = vst [vmem:[#allocation24_spill] sm:$0xff] %v20224_v46 }
 0x43c   :  { %13869 = vmatmul.mubr.msk.f32.gmra.mrb[168].mxu0 %vm280_vm0, %v20208_v48  ;;  %v20232_v48 = vld [vmem:[%s25566_s0 + $0x338] sm:$0xff] }
 0x43d   :  { %3123 = vmatprep.mubr.f32.mxu0 %v25751_v27  ;;  %25806 = vst [vmem:[#allocation25_spill] sm:$0xff] %v20232_v48 }
 0x440   :  { %13870 = vmatmul.mubr.msk.f32.gmra.mrb[170].mxu0 %vm280_vm0, %v20216_v25  ;;  %v20240_v25 = vld [vmem:[%s25566_s0 + $0x340] sm:$0xff] }
 0x441   :  { %3129 = vmatprep.mubr.f32.mxu0 %v25751_v27  ;;  %25807 = vst [vmem:[#allocation26_spill] sm:$0xff] %v20240_v25 }
 0x444   :  { %13871 = vmatmul.mubr.msk.f32.gmra.mrb[172].mxu0 %vm280_vm0, %v20224_v46  ;;  %v20248_v46 = vld [vmem:[%s25566_s0 + $0x348] sm:$0xff] }
 0x445   :  { %3135 = vmatprep.mubr.f32.mxu0 %v25751_v27  ;;  %25808 = vst [vmem:[#allocation27_spill] sm:$0xff] %v20248_v46 }
 0x448   :  { %13872 = vmatmul.mubr.msk.f32.gmra.mrb[174].mxu0 %vm280_vm0, %v20232_v48  ;;  %v20256_v48 = vld [vmem:[%s25566_s0 + $0x350] sm:$0xff] }
 0x449   :  { %3141 = vmatprep.mubr.f32.mxu0 %v25751_v27  ;;  %25809 = vst [vmem:[#allocation28_spill] sm:$0xff] %v20256_v48 }
 0x44c   :  { %13873 = vmatmul.mubr.msk.f32.gmra.mrb[176].mxu0 %vm280_vm0, %v20240_v25  ;;  %v20264_v25 = vld [vmem:[%s25566_s0 + $0x358] sm:$0xff] }
 0x44d   :  { %3147 = vmatprep.mubr.f32.mxu0 %v25751_v27  ;;  %25810 = vst [vmem:[#allocation29_spill] sm:$0xff] %v20264_v25 }
 0x450   :  { %13874 = vmatmul.mubr.msk.f32.gmra.mrb[178].mxu0 %vm280_vm0, %v20248_v46  ;;  %v20272_v46 = vld [vmem:[%s25566_s0 + $0x360] sm:$0xff] }
 0x451   :  { %3153 = vmatprep.mubr.f32.mxu0 %v25751_v27  ;;  %25811 = vst [vmem:[#allocation30_spill] sm:$0xff] %v20272_v46 }
 0x454   :  { %13875 = vmatmul.mubr.msk.f32.gmra.mrb[180].mxu0 %vm280_vm0, %v20256_v48  ;;  %v20280_v48 = vld [vmem:[%s25566_s0 + $0x368] sm:$0xff] }
 0x455   :  { %3159 = vmatprep.mubr.f32.mxu0 %v25751_v27  ;;  %25812 = vst [vmem:[#allocation31_spill] sm:$0xff] %v20280_v48 }
 0x458   :  { %13876 = vmatmul.mubr.msk.f32.gmra.mrb[182].mxu0 %vm280_vm0, %v20264_v25  ;;  %v20288_v25 = vld [vmem:[%s25566_s0 + $0x370] sm:$0xff] }
 0x459   :  { %3165 = vmatprep.mubr.f32.mxu0 %v25751_v27  ;;  %25813 = vst [vmem:[#allocation32_spill] sm:$0xff] %v20288_v25 }
 0x45c   :  { %13877 = vmatmul.mubr.msk.f32.gmra.mrb[184].mxu0 %vm280_vm0, %v20272_v46  ;;  %v20296_v46 = vld [vmem:[%s25566_s0 + $0x378] sm:$0xff] }
 0x45d   :  { %3171 = vmatprep.mubr.f32.mxu0 %v25751_v27 }
 0x460   :  { %13878 = vmatmul.mubr.msk.f32.gmra.mrb[186].mxu0 %vm280_vm0, %v20280_v48  ;;  %v14193_v48 = vld [vmem:[%s25565_s1 + $0x300] sm:$0xff] }
 0x461   :  { %3177 = vmatprep.mubr.f32.mxu0 %v25751_v27  ;;  %v16169_v10 = vpack.c.bf16 %v14195_v50, %v14193_v48  ;;  %v14204_v50 = vld [vmem:[%s25565_s1 + $0x358] sm:$0xff] }
 0x462   :  { %v16175_v48 = vpack.c.bf16 %v14204_v50, %v14202_v6  ;;  %v13969_v6 = vld [vmem:[%s25566_s0 + $0x380] sm:$0xff]  ;;  %v13974_v50 = vld [vmem:[%s25566_s0 + $0x3a8] sm:$0xff] }
 0x464   :  { %13879 = vmatmul.mubr.msk.f32.gmra.mrb[188].mxu0 %vm280_vm0, %v20288_v25  ;;  %v14200_v25 = vld [vmem:[%s25565_s1 + $0x338] sm:$0xff] }
 0x465   :  { %3183 = vmatprep.mubr.f32.mxu0 %v25751_v27  ;;  %v16171_v14 = vpack.c.bf16 %v14200_v25, %v14198_v30  ;;  %v16173_v30 = vpack.c.bf16 %v14199_v11, %v14197_v13  ;;  %v14201_v25 = vld [vmem:[%s25565_s1 + $0x340] sm:$0xff]  ;;  %v13970_v11 = vld [vmem:[%s25566_s0 + $0x388] sm:$0xff]  ;;  %v13971_v13 = vld [vmem:[%s25566_s0 + $0x390] sm:$0xff] }
 0x468   :  { %13880 = vmatmul.mubr.msk.f32.gmra.mrb[190].mxu0 %vm280_vm0, %v20296_v46 }
 0x469   :  { %3856 = vmatprep.mubr.f32.mxu0 %v25751_v27 }
 0x46c   :  { %14001 = vmatmul.mubr.msk.f32.vlgmr.msra.gmra.mrb[0].mxu0 %vm280_vm0, %v19578_v15  ;;  %v14203_v15 = vld [vmem:[%s25565_s1 + $0x350] sm:$0xff] }
 0x46d   :  { %16170 = vmatpush1.bf16.msra.mxu0 %v16169_v10  ;;  %3862 = vmatprep.mubr.f32.mxu0 %v25751_v27  ;;  %v16177_v10 = vpack.c.bf16 %v14203_v15, %v14201_v25  ;;  %v14097_v25 = vld [vmem:[%s25566_s0 + $0x100] sm:$0xff]  ;;  %v14098_v15 = vld [vmem:[%s25566_s0 + $0x108] sm:$0xff] }
 0x46e   :  { %16172 = vmatprep.subr.bf16.mxu0 %v16171_v14  ;;  %v13972_v14 = vld [vmem:[%s25566_s0 + $0x398] sm:$0xff] }
 0x470   :  { %14002 = vmatmul.mubr.msk.f32.gmra.mrb[2].mxu0 %vm280_vm0, %v19586_v16  ;;  %v14206_v16 = vld [vmem:[%s25565_s1 + $0x368] sm:$0xff] }
 0x471   :  { %3868 = vmatprep.mubr.f32.mxu0 %v25751_v27  ;;  %16174 = vmatpush1.bf16.msra.mxu0 %v16173_v30  ;;  %v13975_v30 = vld [vmem:[%s25566_s0 + $0x3b0] sm:$0xff] }
 0x472   :  { %16176 = vmatprep.subr.bf16.mxu0 %v16175_v48  ;;  %v13976_v48 = vld [vmem:[%s25566_s0 + $0x3b8] sm:$0xff] }
 0x474   :  { %14003 = vmatmul.mubr.msk.f32.gmra.mrb[4].mxu0 %vm280_vm0, %v19594_v17  ;;  %v14208_v17 = vld [vmem:[%s25565_s1 + $0x378] sm:$0xff] }
 0x475   :  { %3874 = vmatprep.mubr.f32.mxu0 %v25751_v27  ;;  %16178 = vmatpush1.bf16.msra.mxu0 %v16177_v10  ;;  %v14099_v10 = vld [vmem:[%s25566_s0 + $0x110] sm:$0xff] }
 0x478   :  { %14004 = vmatmul.mubr.msk.f32.gmra.mrb[6].mxu0 %vm280_vm0, %v19602_v18  ;;  %v14205_v18 = vld [vmem:[%s25565_s1 + $0x360] sm:$0xff] }
 0x479   :  { %3880 = vmatprep.mubr.f32.mxu0 %v25751_v27 }
 0x47c   :  { %14005 = vmatmul.mubr.msk.f32.gmra.mrb[8].mxu0 %vm280_vm0, %v19610_v19  ;;  %v16179_v19 = vpack.c.bf16 %v14208_v17, %v14206_v16  ;;  %v14100_v16 = vld [vmem:[%s25566_s0 + $0x118] sm:$0xff]  ;;  %v14101_v17 = vld [vmem:[%s25566_s0 + $0x120] sm:$0xff] }
 0x47d   :  { %3886 = vmatprep.mubr.f32.mxu0 %v25751_v27 }
 0x47e   :  { %16180 = vmatprep.subr.bf16.mxu0 %v16179_v19  ;;  %v14103_v19 = vld [vmem:[%s25566_s0 + $0x130] sm:$0xff] }
 0x480   :  { %14006 = vmatmul.mubr.msk.f32.gmra.mrb[10].mxu0 %vm280_vm0, %v19618_v20  ;;  %v14207_v20 = vld [vmem:[%s25565_s1 + $0x370] sm:$0xff] }
 0x481   :  { %3892 = vmatprep.mubr.f32.mxu0 %v25751_v27 }
 0x484   :  { %14007 = vmatmul.mubr.msk.f32.gmra.mrb[12].mxu0 %vm280_vm0, %v19626_v21  ;;  %v16181_v21 = vpack.c.bf16 %v14207_v20, %v14205_v18  ;;  %v14102_v18 = vld [vmem:[%s25566_s0 + $0x128] sm:$0xff]  ;;  %v14104_v20 = vld [vmem:[%s25566_s0 + $0x138] sm:$0xff] }
 0x485   :  { %3898 = vmatprep.mubr.f32.mxu0 %v25751_v27 }
 0x486   :  { %16182 = vmatpush1.bf16.msra.mxu0 %v16181_v21  ;;  %v14105_v21 = vld [vmem:[%s25566_s0 + $0x140] sm:$0xff] }
 0x488   :  { %14008 = vmatmul.mubr.msk.f32.gmra.mrb[14].mxu0 %vm280_vm0, %v19634_v22  ;;  %v14210_v22 = vld [vmem:[%s25565_s1 + $0x388] sm:$0xff] }
 0x489   :  { %3904 = vmatprep.mubr.f32.mxu0 %v25751_v27 }
 0x48c   :  { %14009 = vmatmul.mubr.msk.f32.gmra.mrb[16].mxu0 %vm280_vm0, %v19642_v26  ;;  %v14212_v26 = vld [vmem:[%s25565_s1 + $0x398] sm:$0xff] }
 0x48d   :  { %3910 = vmatprep.mubr.f32.mxu0 %v25751_v27 }
 0x490   :  { %14010 = vmatmul.mubr.msk.f32.gmra.mrb[18].mxu0 %vm280_vm0, %v19659_v33  ;;  %v14209_v33 = vld [vmem:[%s25565_s1 + $0x380] sm:$0xff] }
 0x491   :  { %3916 = vmatprep.mubr.f32.mxu0 %v25751_v27 }
 0x494   :  { %14011 = vmatmul.mubr.msk.f32.gmra.mrb[20].mxu0 %vm280_vm0, %v19670_v37  ;;  %v16183_v37 = vpack.c.bf16 %v14212_v26, %v14210_v22  ;;  %v14106_v22 = vld [vmem:[%s25566_s0 + $0x148] sm:$0xff]  ;;  %v14107_v26 = vld [vmem:[%s25566_s0 + $0x150] sm:$0xff] }
 0x495   :  { %3922 = vmatprep.mubr.f32.mxu0 %v25751_v27 }
 0x496   :  { %16184 = vmatprep.subr.bf16.mxu0 %v16183_v37  ;;  %v14109_v37 = vld [vmem:[%s25566_s0 + $0x160] sm:$0xff] }
 0x498   :  { %14012 = vmatmul.mubr.msk.f32.gmra.mrb[22].mxu0 %vm280_vm0, %v19678_v38  ;;  %v14211_v38 = vld [vmem:[%s25565_s1 + $0x390] sm:$0xff] }
 0x499   :  { %3928 = vmatprep.mubr.f32.mxu0 %v25751_v27 }
 0x49c   :  { %14013 = vmatmul.mubr.msk.f32.gmra.mrb[24].mxu0 %vm280_vm0, %v19686_v39  ;;  %v16185_v39 = vpack.c.bf16 %v14211_v38, %v14209_v33  ;;  %v14108_v33 = vld [vmem:[%s25566_s0 + $0x158] sm:$0xff]  ;;  %v14110_v38 = vld [vmem:[%s25566_s0 + $0x168] sm:$0xff] }
 0x49d   :  { %3934 = vmatprep.mubr.f32.mxu0 %v25751_v27 }
 0x49e   :  { %16186 = vmatpush1.bf16.msra.mxu0 %v16185_v39  ;;  %v14111_v39 = vld [vmem:[%s25566_s0 + $0x170] sm:$0xff] }
 0x4a0   :  { %14014 = vmatmul.mubr.msk.f32.gmra.mrb[26].mxu0 %vm280_vm0, %v19694_v40  ;;  %v20466_v40 = vld [vmem:[%s25566_s0 + $0x2e0] sm:$0xff] }
 0x4a1   :  { %3940 = vmatprep.mubr.f32.mxu0 %v25751_v27  ;;  %13557 = vmatmul.mubr.msk.f32.vlgmr.msra.gmra.mrb[0].mxu1 %vm280_vm0, %v20466_v40 }
 0x4a2   :  { %1143 = vmatprep.mubr.f32.mxu1 %v25751_v27 }
 0x4a4   :  { %14015 = vmatmul.mubr.msk.f32.gmra.mrb[28].mxu0 %vm280_vm0, %v19702_v41  ;;  %v20477_v41 = vld [vmem:[%s25566_s0 + $0x2e8] sm:$0xff] }
 0x4a5   :  { %3946 = vmatprep.mubr.f32.mxu0 %v25751_v27  ;;  %13558 = vmatmul.mubr.msk.f32.gmra.mrb[2].mxu1 %vm280_vm0, %v20477_v41 }
 0x4a6   :  { %1149 = vmatprep.mubr.f32.mxu1 %v25751_v27 }
 0x4a8   :  { %14016 = vmatmul.mubr.msk.f32.gmra.mrb[30].mxu0 %vm280_vm0, %v19710_v42  ;;  %v20488_v42 = vld [vmem:[%s25566_s0 + $0x2f0] sm:$0xff] }
 0x4a9   :  { %3952 = vmatprep.mubr.f32.mxu0 %v25751_v27  ;;  %13559 = vmatmul.mubr.msk.f32.gmra.mrb[4].mxu1 %vm280_vm0, %v20488_v42 }
 0x4aa   :  { %1155 = vmatprep.mubr.f32.mxu1 %v25751_v27 }
 0x4ac   :  { %14017 = vmatmul.mubr.msk.f32.gmra.mrb[32].mxu0 %vm280_vm0, %v19718_v47  ;;  %v20499_v47 = vld [vmem:[%s25566_s0 + $0x2f8] sm:$0xff] }
 0x4ad   :  { %3958 = vmatprep.mubr.f32.mxu0 %v25751_v27  ;;  %13560 = vmatmul.mubr.msk.f32.gmra.mrb[6].mxu1 %vm280_vm0, %v20499_v47 }
 0x4ae   :  { %1161 = vmatprep.mubr.f32.mxu1 %v25751_v27 }
 0x4b0   :  { %14018 = vmatmul.mubr.msk.f32.gmra.mrb[34].mxu0 %vm280_vm0, %v19726_v52  ;;  %v14214_v52 = vld [vmem:[%s25565_s1 + $0x3a8] sm:$0xff] }
 0x4b1   :  { %3964 = vmatprep.mubr.f32.mxu0 %v25751_v27 }
 0x4b4   :  { %14019 = vmatmul.mubr.msk.f32.gmra.mrb[36].mxu0 %vm280_vm0, %v19734_v53  ;;  %v14216_v53 = vld [vmem:[%s25565_s1 + $0x3b8] sm:$0xff] }
 0x4b5   :  { %3970 = vmatprep.mubr.f32.mxu0 %v25751_v27 }
 0x4b8   :  { %14020 = vmatmul.mubr.msk.f32.gmra.mrb[38].mxu0 %vm280_vm0, %v19742_v54  ;;  %v14213_v54 = vld [vmem:[%s25565_s1 + $0x3a0] sm:$0xff] }
 0x4b9   :  { %3976 = vmatprep.mubr.f32.mxu0 %v25751_v27 }
 0x4bc   :  { %14021 = vmatmul.mubr.msk.f32.gmra.mrb[40].mxu0 %vm280_vm0, %v19750_v55  ;;  %v16187_v55 = vpack.c.bf16 %v14216_v53, %v14214_v52  ;;  %v14112_v52 = vld [vmem:[%s25566_s0 + $0x178] sm:$0xff]  ;;  %v14113_v53 = vld [vmem:[%s25566_s0 + $0x180] sm:$0xff] }
 0x4bd   :  { %3982 = vmatprep.mubr.f32.mxu0 %v25751_v27 }
 0x4be   :  { %16188 = vmatprep.subr.bf16.mxu0 %v16187_v55  ;;  %v14115_v55 = vld [vmem:[%s25566_s0 + $0x190] sm:$0xff] }
 0x4c0   :  { %14022 = vmatmul.mubr.msk.f32.gmra.mrb[42].mxu0 %vm280_vm0, %v19758_v57  ;;  %v14215_v57 = vld [vmem:[%s25565_s1 + $0x3b0] sm:$0xff] }
 0x4c1   :  { %3988 = vmatprep.mubr.f32.mxu0 %v25751_v27 }
 0x4c4   :  { %14023 = vmatmul.mubr.msk.f32.gmra.mrb[44].mxu0 %vm280_vm0, %v19766_v2  ;;  %v16189_v2 = vpack.c.bf16 %v14215_v57, %v14213_v54  ;;  %v14114_v54 = vld [vmem:[%s25566_s0 + $0x188] sm:$0xff]  ;;  %v14116_v57 = vld [vmem:[%s25566_s0 + $0x198] sm:$0xff] }
 0x4c5   :  { %3994 = vmatprep.mubr.f32.mxu0 %v25751_v27 }
 0x4c6   :  { %16190 = vmatpush1.bf16.msra.mxu0 %v16189_v2  ;;  %v14117_v2 = vld [vmem:[%s25566_s0 + $0x1a0] sm:$0xff] }
 0x4c8   :  { %14024 = vmatmul.mubr.msk.f32.gmra.mrb[46].mxu0 %vm280_vm0, %v19774_v4  ;;  %v25814_v4 = vld [vmem:[#allocation3_spill] sm:$0xff] }
 0x4c9   :  { %4000 = vmatprep.mubr.f32.mxu0 %v25751_v27 }
 0x4cc   :  { %14025 = vmatmul.mubr.msk.f32.gmra.mrb[48].mxu0 %vm280_vm0, %v19782_v5  ;;  %v25815_v5 = vld [vmem:[#allocation4_spill] sm:$0xff] }
 0x4cd   :  { %4006 = vmatprep.mubr.f32.mxu0 %v25751_v27 }
 0x4d0   :  { %14026 = vmatmul.mubr.msk.f32.gmra.mrb[50].mxu0 %vm280_vm0, %v19799_v23  ;;  %v25816_v23 = vld [vmem:[#allocation5_spill] sm:$0xff] }
 0x4d1   :  { %4012 = vmatprep.mubr.f32.mxu0 %v25751_v27 }
 0x4d4   :  { %14027 = vmatmul.mubr.msk.f32.gmra.mrb[52].mxu0 %vm280_vm0, %v19810_v43  ;;  %v25817_v43 = vld [vmem:[#allocation6_spill] sm:$0xff] }
 0x4d5   :  { %4018 = vmatprep.mubr.f32.mxu0 %v25751_v27 }
 0x4d8   :  { %14028 = vmatmul.mubr.msk.f32.gmra.mrb[54].mxu0 %vm280_vm0, %v19818_v45  ;;  %v25818_v45 = vld [vmem:[#allocation7_spill] sm:$0xff] }
 0x4d9   :  { %4024 = vmatprep.mubr.f32.mxu0 %v25751_v27 }
 0x4dc   :  { %14029 = vmatmul.mubr.msk.f32.gmra.mrb[56].mxu0 %vm280_vm0, %v19826_v29  ;;  %v25819_v29 = vld [vmem:[#allocation8_spill] sm:$0xff] }
 0x4dd   :  { %4030 = vmatprep.mubr.f32.mxu0 %v25751_v27 }
 0x4e0   :  { %14030 = vmatmul.mubr.msk.f32.gmra.mrb[58].mxu0 %vm280_vm0, %v19834_v3  ;;  %v25820_v3 = vld [vmem:[#allocation9_spill] sm:$0xff] }
 0x4e1   :  { %4036 = vmatprep.mubr.f32.mxu0 %v25751_v27 }
 0x4e4   :  { %14031 = vmatmul.mubr.msk.f32.gmra.mrb[60].mxu0 %vm280_vm0, %v19842_v44  ;;  %v25821_v44 = vld [vmem:[#allocation10_spill] sm:$0xff] }
 0x4e5   :  { %4042 = vmatprep.mubr.f32.mxu0 %v25751_v27 }
 0x4e8   :  { %14032 = vmatmul.mubr.msk.f32.gmra.mrb[62].mxu0 %vm280_vm0, %v19850_v51  ;;  %v25822_v51 = vld [vmem:[#allocation11_spill] sm:$0xff] }
 0x4e9   :  { %4048 = vmatprep.mubr.f32.mxu0 %v25751_v27 }
 0x4ec   :  { %14033 = vmatmul.mubr.msk.f32.gmra.mrb[64].mxu0 %vm280_vm0, %v19858_v56  ;;  %v25823_v56 = vld [vmem:[#allocation12_spill] sm:$0xff] }
 0x4ed   :  { %4054 = vmatprep.mubr.f32.mxu0 %v25751_v27 }
 0x4f0   :  { %14034 = vmatmul.mubr.msk.f32.gmra.mrb[66].mxu0 %vm280_vm0, %v19866_v58  ;;  %v25824_v58 = vld [vmem:[#allocation13_spill] sm:$0xff] }
 0x4f1   :  { %4060 = vmatprep.mubr.f32.mxu0 %v25751_v27 }
 0x4f4   :  { %14035 = vmatmul.mubr.msk.f32.gmra.mrb[68].mxu0 %vm280_vm0, %v19874_v59  ;;  %v25825_v59 = vld [vmem:[#allocation14_spill] sm:$0xff] }
 0x4f5   :  { %4066 = vmatprep.mubr.f32.mxu0 %v25751_v27 }
 0x4f8   :  { %14036 = vmatmul.mubr.msk.f32.gmra.mrb[70].mxu0 %vm280_vm0, %v19882_v60  ;;  %v25826_v60 = vld [vmem:[#allocation15_spill] sm:$0xff] }
 0x4f9   :  { %4072 = vmatprep.mubr.f32.mxu0 %v25751_v27 }
 0x4fc   :  { %14037 = vmatmul.mubr.msk.f32.gmra.mrb[72].mxu0 %vm280_vm0, %v19890_v61  ;;  %v25827_v61 = vld [vmem:[#allocation16_spill] sm:$0xff] }
 0x4fd   :  { %4078 = vmatprep.mubr.f32.mxu0 %v25751_v27 }
 0x500   :  { %14038 = vmatmul.mubr.msk.f32.gmra.mrb[74].mxu0 %vm280_vm0, %v19898_v62  ;;  %v25828_v62 = vld [vmem:[#allocation17_spill] sm:$0xff] }
 0x501   :  { %4084 = vmatprep.mubr.f32.mxu0 %v25751_v27 }
 0x504   :  { %14039 = vmatmul.mubr.msk.f32.gmra.mrb[76].mxu0 %vm280_vm0, %v19906_v63  ;;  %v25829_v63 = vld [vmem:[#allocation18_spill] sm:$0xff] }
 0x505   :  { %4090 = vmatprep.mubr.f32.mxu0 %v25751_v27 }
 0x508   :  { %14040 = vmatmul.mubr.msk.f32.gmra.mrb[78].mxu0 %vm280_vm0, %v19914_v0  ;;  %v25830_v0 = vld [vmem:[#allocation19_spill] sm:$0xff] }
 0x509   :  { %4096 = vmatprep.mubr.f32.mxu0 %v25751_v27 }
 0x50c   :  { %14041 = vmatmul.mubr.msk.f32.gmra.mrb[80].mxu0 %vm280_vm0, %v19922_v1  ;;  %v25831_v1 = vld [vmem:[#allocation20_spill] sm:$0xff] }
 0x50d   :  { %4102 = vmatprep.mubr.f32.mxu0 %v25751_v27 }
 0x510   :  { %14042 = vmatmul.mubr.msk.f32.gmra.mrb[82].mxu0 %vm280_vm0, %v19939_v12  ;;  %v25832_v12 = vld [vmem:[#allocation21_spill] sm:$0xff] }
 0x511   :  { %4108 = vmatprep.mubr.f32.mxu0 %v25751_v27 }
 0x514   :  { %14043 = vmatmul.mubr.msk.f32.gmra.mrb[84].mxu0 %vm280_vm0, %v19950_v31  ;;  %v25833_v31 = vld [vmem:[#allocation22_spill] sm:$0xff] }
 0x515   :  { %4114 = vmatprep.mubr.f32.mxu0 %v25751_v27 }
 0x518   :  { %14044 = vmatmul.mubr.msk.f32.gmra.mrb[86].mxu0 %vm280_vm0, %v19958_v32  ;;  %v25834_v32 = vld [vmem:[#allocation23_spill] sm:$0xff] }
 0x519   :  { %4120 = vmatprep.mubr.f32.mxu0 %v25751_v27 }
 0x51c   :  { %14045 = vmatmul.mubr.msk.f32.gmra.mrb[88].mxu0 %vm280_vm0, %v19966_v34  ;;  %v25835_v34 = vld [vmem:[#allocation24_spill] sm:$0xff] }
 0x51d   :  { %4126 = vmatprep.mubr.f32.mxu0 %v25751_v27 }
 0x520   :  { %14046 = vmatmul.mubr.msk.f32.gmra.mrb[90].mxu0 %vm280_vm0, %v19974_v35  ;;  %v25836_v35 = vld [vmem:[#allocation25_spill] sm:$0xff] }
 0x521   :  { %4132 = vmatprep.mubr.f32.mxu0 %v25751_v27 }
 0x524   :  { %14047 = vmatmul.mubr.msk.f32.gmra.mrb[92].mxu0 %vm280_vm0, %v19982_v36  ;;  %v25837_v36 = vld [vmem:[#allocation26_spill] sm:$0xff] }
 0x525   :  { %4138 = vmatprep.mubr.f32.mxu0 %v25751_v27 }
 0x528   :  { %14048 = vmatmul.mubr.msk.f32.gmra.mrb[94].mxu0 %vm280_vm0, %v19990_v7  ;;  %v25838_v7 = vld [vmem:[#allocation27_spill] sm:$0xff] }
 0x529   :  { %4144 = vmatprep.mubr.f32.mxu0 %v25751_v27 }
 0x52c   :  { %14049 = vmatmul.mubr.msk.f32.gmra.mrb[96].mxu0 %vm280_vm0, %v19998_v8  ;;  %v25839_v8 = vld [vmem:[#allocation28_spill] sm:$0xff] }
 0x52d   :  { %4150 = vmatprep.mubr.f32.mxu0 %v25751_v27 }
 0x530   :  { %14050 = vmatmul.mubr.msk.f32.gmra.mrb[98].mxu0 %vm280_vm0, %v20006_v9  ;;  %v25840_v9 = vld [vmem:[#allocation29_spill] sm:$0xff] }
 0x531   :  { %4156 = vmatprep.mubr.f32.mxu0 %v25751_v27 }
 0x534   :  { %14051 = vmatmul.mubr.msk.f32.gmra.mrb[100].mxu0 %vm280_vm0, %v20014_v49  ;;  %v25841_v49 = vld [vmem:[#allocation30_spill] sm:$0xff] }
 0x535   :  { %4162 = vmatprep.mubr.f32.mxu0 %v25751_v27 }
 0x538   :  { %14052 = vmatmul.mubr.msk.f32.gmra.mrb[102].mxu0 %vm280_vm0, %v20022_v28  ;;  %v25842_v28 = vld [vmem:[#allocation31_spill] sm:$0xff] }
 0x539   :  { %4168 = vmatprep.mubr.f32.mxu0 %v25751_v27 }
 0x53c   :  { %14053 = vmatmul.mubr.msk.f32.gmra.mrb[104].mxu0 %vm280_vm0, %v20030_v24  ;;  %v25843_v24 = vld [vmem:[#allocation32_spill] sm:$0xff] }
 0x53d   :  { %4174 = vmatprep.mubr.f32.mxu0 %v25751_v27 }
 0x540   :  { %14054 = vmatmul.mubr.msk.f32.gmra.mrb[106].mxu0 %vm280_vm0, %v25814_v4  ;;  %v14118_v4 = vld [vmem:[%s25566_s0 + $0x1a8] sm:$0xff] }
 0x541   :  { %4180 = vmatprep.mubr.f32.mxu0 %v25751_v27 }
 0x544   :  { %14055 = vmatmul.mubr.msk.f32.gmra.mrb[108].mxu0 %vm280_vm0, %v25815_v5  ;;  %v14314_v5 = vld [vmem:[%s25567_s3 + $0x128] sm:$0xff] }
 0x545   :  { %4186 = vmatprep.mubr.f32.mxu0 %v25751_v27 }
 0x548   :  { %14056 = vmatmul.mubr.msk.f32.gmra.mrb[110].mxu0 %vm280_vm0, %v25816_v23  ;;  %v14316_v23 = vld [vmem:[%s25567_s3 + $0x138] sm:$0xff] }
 0x549   :  { %4192 = vmatprep.mubr.f32.mxu0 %v25751_v27 }
 0x54c   :  { %14057 = vmatmul.mubr.msk.f32.gmra.mrb[112].mxu0 %vm280_vm0, %v25817_v43  ;;  %v16191_v43 = vpack.c.bf16 %v14316_v23, %v14314_v5  ;;  %v14341_v23 = vld [vmem:[%s25567_s3 + $0x200] sm:$0xff] }
 0x54d   :  { %4198 = vmatprep.mubr.f32.mxu0 %v25751_v27 }
 0x54e   :  { %16192 = vmatprep.subr.bf16.mxu1 %v16191_v43  ;;  %v14343_v43 = vld [vmem:[%s25567_s3 + $0x210] sm:$0xff] }
 0x550   :  { %14058 = vmatmul.mubr.msk.f32.gmra.mrb[114].mxu0 %vm280_vm0, %v25818_v45  ;;  %v14119_v45 = vld [vmem:[%s25566_s0 + $0x1b0] sm:$0xff] }
 0x551   :  { %4204 = vmatprep.mubr.f32.mxu0 %v25751_v27 }
 0x554   :  { %14059 = vmatmul.mubr.msk.f32.gmra.mrb[116].mxu0 %vm280_vm0, %v25819_v29  ;;  %v14313_v29 = vld [vmem:[%s25567_s3 + $0x120] sm:$0xff] }
 0x555   :  { %4210 = vmatprep.mubr.f32.mxu0 %v25751_v27 }
 0x558   :  { %14060 = vmatmul.mubr.msk.f32.gmra.mrb[118].mxu0 %vm280_vm0, %v25820_v3  ;;  %v14315_v3 = vld [vmem:[%s25567_s3 + $0x130] sm:$0xff] }
 0x559   :  { %4216 = vmatprep.mubr.f32.mxu0 %v25751_v27 }
 0x55c   :  { %14061 = vmatmul.mubr.msk.f32.gmra.mrb[120].mxu0 %vm280_vm0, %v25821_v44  ;;  %v14120_v44 = vld [vmem:[%s25566_s0 + $0x1b8] sm:$0xff] }
 0x55d   :  { %4222 = vmatprep.mubr.f32.mxu0 %v25751_v27 }
 0x560   :  { %14062 = vmatmul.mubr.msk.f32.gmra.mrb[122].mxu0 %vm280_vm0, %v25822_v51  ;;  %v16193_v51 = vpack.c.bf16 %v14315_v3, %v14313_v29  ;;  %v14128_v29 = vld [vmem:[%s25566_s0 + $0x1f8] sm:$0xff]  ;;  %v16221_v3 = vpack.c.bf16 %v14343_v43, %v14341_v23 }
 0x561   :  { %4228 = vmatprep.mubr.f32.mxu0 %v25751_v27 }
 0x562   :  { %16194 = vmatpush1.bf16.msra.mxu1 %v16193_v51  ;;  %v14348_v51 = vld [vmem:[%s25567_s3 + $0x238] sm:$0xff] }
 0x564   :  { %14063 = vmatmul.mubr.msk.f32.gmra.mrb[124].mxu0 %vm280_vm0, %v25823_v56  ;;  %v14121_v56 = vld [vmem:[%s25566_s0 + $0x1c0] sm:$0xff] }
 0x565   :  { %4234 = vmatprep.mubr.f32.mxu0 %v25751_v27 }
 0x568   :  { %14064 = vmatmul.mubr.msk.f32.gmra.mrb[126].mxu0 %vm280_vm0, %v25824_v58  ;;  %v14318_v58 = vld [vmem:[%s25567_s3 + $0x148] sm:$0xff] }
 0x569   :  { %4240 = vmatprep.mubr.f32.mxu0 %v25751_v27 }
 0x56c   :  { %14065 = vmatmul.mubr.msk.f32.gmra.mrb[128].mxu0 %vm280_vm0, %v25825_v59  ;;  %v14320_v59 = vld [vmem:[%s25567_s3 + $0x158] sm:$0xff] }
 0x56d   :  { %4246 = vmatprep.mubr.f32.mxu0 %v25751_v27 }
 0x570   :  { %14066 = vmatmul.mubr.msk.f32.gmra.mrb[130].mxu0 %vm280_vm0, %v25826_v60  ;;  %v14317_v60 = vld [vmem:[%s25567_s3 + $0x140] sm:$0xff] }
 0x571   :  { %4252 = vmatprep.mubr.f32.mxu0 %v25751_v27 }
 0x574   :  { %14067 = vmatmul.mubr.msk.f32.gmra.mrb[132].mxu0 %vm280_vm0, %v25827_v61  ;;  %v16195_v61 = vpack.c.bf16 %v14320_v59, %v14318_v58  ;;  %v21023_v58 = vld [vmem:[%s25566_s0 + $0x338] sm:$0xff]  ;;  %v14345_v59 = vld [vmem:[%s25567_s3 + $0x220] sm:$0xff] }
 0x575   :  { %4258 = vmatprep.mubr.f32.mxu0 %v25751_v27 }
 0x576   :  { %16196 = vmatprep.subr.bf16.mxu1 %v16195_v61  ;;  %v14129_v61 = vld [vmem:[%s25566_s0 + $0x200] sm:$0xff] }
 0x578   :  { %14068 = vmatmul.mubr.msk.f32.gmra.mrb[134].mxu0 %vm280_vm0, %v25828_v62  ;;  %v14319_v62 = vld [vmem:[%s25567_s3 + $0x150] sm:$0xff] }
 0x579   :  { %4264 = vmatprep.mubr.f32.mxu0 %v25751_v27 }
 0x57c   :  { %14069 = vmatmul.mubr.msk.f32.gmra.mrb[136].mxu0 %vm280_vm0, %v20466_v40 }
 0x57d   :  { %4270 = vmatprep.mubr.f32.mxu0 %v25751_v27 }
 0x580   :  { %14070 = vmatmul.mubr.msk.f32.gmra.mrb[138].mxu0 %vm280_vm0, %v20477_v41 }
 0x581   :  { %4276 = vmatprep.mubr.f32.mxu0 %v25751_v27 }
 0x584   :  { %14071 = vmatmul.mubr.msk.f32.gmra.mrb[140].mxu0 %vm280_vm0, %v20488_v42 }
 0x585   :  { %4282 = vmatprep.mubr.f32.mxu0 %v25751_v27 }
 0x588   :  { %14072 = vmatmul.mubr.msk.f32.gmra.mrb[142].mxu0 %vm280_vm0, %v20499_v47 }
 0x589   :  { %4288 = vmatprep.mubr.f32.mxu0 %v25751_v27 }
 0x58c   :  { %14073 = vmatmul.mubr.msk.f32.gmra.mrb[144].mxu0 %vm280_vm0, %v25829_v63  ;;  %v16197_v63 = vpack.c.bf16 %v14319_v62, %v14317_v60  ;;  %v14347_v60 = vld [vmem:[%s25567_s3 + $0x230] sm:$0xff] }
 0x58d   :  { %4294 = vmatprep.mubr.f32.mxu0 %v25751_v27  ;;  %v16225_v62 = vpack.c.bf16 %v14347_v60, %v14345_v59 }
 0x58e   :  { %16198 = vmatpush1.bf16.msra.mxu1 %v16197_v63  ;;  %v14130_v63 = vld [vmem:[%s25566_s0 + $0x208] sm:$0xff] }
 0x590   :  { %14074 = vmatmul.mubr.msk.f32.gmra.mrb[146].mxu0 %vm280_vm0, %v25830_v0  ;;  %v14122_v0 = vld [vmem:[%s25566_s0 + $0x1c8] sm:$0xff] }
 0x591   :  { %4300 = vmatprep.mubr.f32.mxu0 %v25751_v27 }
 0x594   :  { %14075 = vmatmul.mubr.msk.f32.gmra.mrb[148].mxu0 %vm280_vm0, %v25831_v1  ;;  %v20857_v1 = vld [vmem:[%s25566_s0 + $0x300] sm:$0xff] }
 0x595   :  { %4306 = vmatprep.mubr.f32.mxu0 %v25751_v27  ;;  %13561 = vmatmul.mubr.msk.f32.gmra.mrb[8].mxu1 %vm280_vm0, %v20857_v1 }
 0x596   :  { %1167 = vmatprep.mubr.f32.mxu1 %v25751_v27 }
 0x598   :  { %14076 = vmatmul.mubr.msk.f32.gmra.mrb[150].mxu0 %vm280_vm0, %v25832_v12  ;;  %v14322_v12 = vld [vmem:[%s25567_s3 + $0x168] sm:$0xff] }
 0x599   :  { %4312 = vmatprep.mubr.f32.mxu0 %v25751_v27 }
 0x59c   :  { %14077 = vmatmul.mubr.msk.f32.gmra.mrb[152].mxu0 %vm280_vm0, %v25833_v31  ;;  %v14324_v31 = vld [vmem:[%s25567_s3 + $0x178] sm:$0xff] }
 0x59d   :  { %4318 = vmatprep.mubr.f32.mxu0 %v25751_v27 }
 0x5a0   :  { %14078 = vmatmul.mubr.msk.f32.gmra.mrb[154].mxu0 %vm280_vm0, %v25834_v32  ;;  %v14321_v32 = vld [vmem:[%s25567_s3 + $0x160] sm:$0xff] }
 0x5a1   :  { %4324 = vmatprep.mubr.f32.mxu0 %v25751_v27 }
 0x5a4   :  { %14079 = vmatmul.mubr.msk.f32.gmra.mrb[156].mxu0 %vm280_vm0, %v25835_v34  ;;  %v16199_v34 = vpack.c.bf16 %v14324_v31, %v14322_v12  ;;  %v6586_v12 = vld [vmem:[%s25567_s3 + $0x8] sm:$0xff]  ;;  %v6588_v31 = vld [vmem:[%s25567_s3 + $0x18] sm:$0xff] }
 0x5a5   :  { %4330 = vmatprep.mubr.f32.mxu0 %v25751_v27 }
 0x5a6   :  { %16200 = vmatprep.subr.bf16.mxu1 %v16199_v34  ;;  %v14132_v34 = vld [vmem:[%s25566_s0 + $0x218] sm:$0xff] }
 0x5a8   :  { %14080 = vmatmul.mubr.msk.f32.gmra.mrb[158].mxu0 %vm280_vm0, %v25836_v35  ;;  %v14323_v35 = vld [vmem:[%s25567_s3 + $0x170] sm:$0xff] }
 0x5a9   :  { %4336 = vmatprep.mubr.f32.mxu0 %v25751_v27 }
 0x5ac   :  { %14081 = vmatmul.mubr.msk.f32.gmra.mrb[160].mxu0 %vm280_vm0, %v25837_v36  ;;  %v16201_v36 = vpack.c.bf16 %v14323_v35, %v14321_v32  ;;  %v16227_v32 = vpack.c.bf16 %v6588_v31, %v6586_v12  ;;  %v14133_v35 = vld [vmem:[%s25566_s0 + $0x220] sm:$0xff] }
 0x5ad   :  { %4342 = vmatprep.mubr.f32.mxu0 %v25751_v27 }
 0x5ae   :  { %16202 = vmatpush1.bf16.msra.mxu1 %v16201_v36  ;;  %v14134_v36 = vld [vmem:[%s25566_s0 + $0x228] sm:$0xff] }
 0x5b0   :  { %14082 = vmatmul.mubr.msk.f32.gmra.mrb[162].mxu0 %vm280_vm0, %v25838_v7  ;;  %v20879_v7 = vld [vmem:[%s25566_s0 + $0x308] sm:$0xff] }
 0x5b1   :  { %4348 = vmatprep.mubr.f32.mxu0 %v25751_v27  ;;  %13562 = vmatmul.mubr.msk.f32.gmra.mrb[10].mxu1 %vm280_vm0, %v20879_v7 }
 0x5b2   :  { %1173 = vmatprep.mubr.f32.mxu1 %v25751_v27 }
 0x5b4   :  { %14083 = vmatmul.mubr.msk.f32.gmra.mrb[164].mxu0 %vm280_vm0, %v25839_v8  ;;  %v14123_v8 = vld [vmem:[%s25566_s0 + $0x1d0] sm:$0xff] }
 0x5b5   :  { %4354 = vmatprep.mubr.f32.mxu0 %v25751_v27 }
 0x5b8   :  { %14084 = vmatmul.mubr.msk.f32.gmra.mrb[166].mxu0 %vm280_vm0, %v25840_v9  ;;  %v14326_v9 = vld [vmem:[%s25567_s3 + $0x188] sm:$0xff] }
 0x5b9   :  { %4360 = vmatprep.mubr.f32.mxu0 %v25751_v27 }
 0x5bc   :  { %14085 = vmatmul.mubr.msk.f32.gmra.mrb[168].mxu0 %vm280_vm0, %v25841_v49  ;;  %v14328_v49 = vld [vmem:[%s25567_s3 + $0x198] sm:$0xff] }
 0x5bd   :  { %4366 = vmatprep.mubr.f32.mxu0 %v25751_v27 }
 0x5c0   :  { %14086 = vmatmul.mubr.msk.f32.gmra.mrb[170].mxu0 %vm280_vm0, %v25842_v28  ;;  %v16203_v28 = vpack.c.bf16 %v14328_v49, %v14326_v9  ;;  %v14136_v9 = vld [vmem:[%s25566_s0 + $0x238] sm:$0xff]  ;;  %v14137_v49 = vld [vmem:[%s25566_s0 + $0x240] sm:$0xff] }
 0x5c1   :  { %4372 = vmatprep.mubr.f32.mxu0 %v25751_v27 }
 0x5c2   :  { %16204 = vmatprep.subr.bf16.mxu1 %v16203_v28  ;;  %v14138_v28 = vld [vmem:[%s25566_s0 + $0x248] sm:$0xff] }
 0x5c4   :  { %14087 = vmatmul.mubr.msk.f32.gmra.mrb[172].mxu0 %vm280_vm0, %v25843_v24  ;;  %v14325_v24 = vld [vmem:[%s25567_s3 + $0x180] sm:$0xff] }
 0x5c5   :  { %4378 = vmatprep.mubr.f32.mxu0 %v25751_v27 }
 0x5c8   :  { %14088 = vmatmul.mubr.msk.f32.gmra.mrb[174].mxu0 %vm280_vm0, %v20296_v46  ;;  %v13973_v46 = vld [vmem:[%s25566_s0 + $0x3a0] sm:$0xff] }
 0x5c9   :  { %4384 = vmatprep.mubr.f32.mxu0 %v25751_v27 }
 0x5cc   :  { %14089 = vmatmul.mubr.msk.f32.gmra.mrb[176].mxu0 %vm280_vm0, %v13969_v6  ;;  %v14327_v6 = vld [vmem:[%s25567_s3 + $0x190] sm:$0xff] }
 0x5cd   :  { %4390 = vmatprep.mubr.f32.mxu0 %v25751_v27 }
 0x5d0   :  { %14090 = vmatmul.mubr.msk.f32.gmra.mrb[178].mxu0 %vm280_vm0, %v13970_v11  ;;  %v20904_v11 = vld [vmem:[%s25566_s0 + $0x310] sm:$0xff] }
 0x5d1   :  { %4396 = vmatprep.mubr.f32.mxu0 %v25751_v27  ;;  %13563 = vmatmul.mubr.msk.f32.gmra.mrb[12].mxu1 %vm280_vm0, %v20904_v11 }
 0x5d2   :  { %1179 = vmatprep.mubr.f32.mxu1 %v25751_v27 }
 0x5d4   :  { %14091 = vmatmul.mubr.msk.f32.gmra.mrb[180].mxu0 %vm280_vm0, %v13971_v13  ;;  %v14124_v13 = vld [vmem:[%s25566_s0 + $0x1d8] sm:$0xff] }
 0x5d5   :  { %4402 = vmatprep.mubr.f32.mxu0 %v25751_v27 }
 0x5d8   :  { %14092 = vmatmul.mubr.msk.f32.gmra.mrb[182].mxu0 %vm280_vm0, %v13972_v14  ;;  %v16205_v14 = vpack.c.bf16 %v14327_v6, %v14325_v24  ;;  %v14139_v24 = vld [vmem:[%s25566_s0 + $0x250] sm:$0xff]  ;;  %v14140_v6 = vld [vmem:[%s25566_s0 + $0x258] sm:$0xff] }
 0x5d9   :  { %4408 = vmatprep.mubr.f32.mxu0 %v25751_v27 }
 0x5da   :  { %16206 = vmatpush1.bf16.msra.mxu1 %v16205_v14  ;;  %v14142_v14 = vld [vmem:[%s25566_s0 + $0x268] sm:$0xff] }
 0x5dc   :  { %14093 = vmatmul.mubr.msk.f32.gmra.mrb[184].mxu0 %vm280_vm0, %v13973_v46  ;;  %v14330_v46 = vld [vmem:[%s25567_s3 + $0x1a8] sm:$0xff] }
 0x5dd   :  { %4414 = vmatprep.mubr.f32.mxu0 %v25751_v27 }
 0x5e0   :  { %14094 = vmatmul.mubr.msk.f32.gmra.mrb[186].mxu0 %vm280_vm0, %v13974_v50  ;;  %v14332_v50 = vld [vmem:[%s25567_s3 + $0x1b8] sm:$0xff] }
 0x5e1   :  { %4420 = vmatprep.mubr.f32.mxu0 %v25751_v27 }
 0x5e4   :  { %14095 = vmatmul.mubr.msk.f32.gmra.mrb[188].mxu0 %vm280_vm0, %v13975_v30  ;;  %v16207_v30 = vpack.c.bf16 %v14332_v50, %v14330_v46  ;;  %v14143_v46 = vld [vmem:[%s25566_s0 + $0x270] sm:$0xff]  ;;  %v14144_v50 = vld [vmem:[%s25566_s0 + $0x278] sm:$0xff] }
 0x5e5   :  { %4426 = vmatprep.mubr.f32.mxu0 %v25751_v27 }
 0x5e6   :  { %16208 = vmatprep.subr.bf16.mxu1 %v16207_v30  ;;  %v14145_v30 = vld [vmem:[%s25566_s0 + $0x280] sm:$0xff] }
 0x5e8   :  { %14096 = vmatmul.mubr.msk.f32.gmra.mrb[190].mxu0 %vm280_vm0, %v13976_v48  ;;  %v14329_v48 = vld [vmem:[%s25567_s3 + $0x1a0] sm:$0xff] }
 0x5e9   :  { %5099 = vmatprep.mubr.f32.mxu0 %v25751_v27 }
 0x5ec   :  { %14217 = vmatmul.mubr.msk.f32.vlgmr.msra.gmra.mrb[0].mxu0 %vm280_vm0, %v14097_v25  ;;  %v14331_v25 = vld [vmem:[%s25567_s3 + $0x1b0] sm:$0xff] }
 0x5ed   :  { %5105 = vmatprep.mubr.f32.mxu0 %v25751_v27 }
 0x5f0   :  { %14218 = vmatmul.mubr.msk.f32.gmra.mrb[2].mxu0 %vm280_vm0, %v14098_v15  ;;  %v20929_v15 = vld [vmem:[%s25566_s0 + $0x318] sm:$0xff] }
 0x5f1   :  { %5111 = vmatprep.mubr.f32.mxu0 %v25751_v27  ;;  %13564 = vmatmul.mubr.msk.f32.gmra.mrb[14].mxu1 %vm280_vm0, %v20929_v15 }
 0x5f2   :  { %1185 = vmatprep.mubr.f32.mxu1 %v25751_v27 }
 0x5f4   :  { %14219 = vmatmul.mubr.msk.f32.gmra.mrb[4].mxu0 %vm280_vm0, %v14099_v10  ;;  %v14125_v10 = vld [vmem:[%s25566_s0 + $0x1e0] sm:$0xff] }
 0x5f5   :  { %5117 = vmatprep.mubr.f32.mxu0 %v25751_v27 }
 0x5f8   :  { %14220 = vmatmul.mubr.msk.f32.gmra.mrb[6].mxu0 %vm280_vm0, %v14100_v16  ;;  %v16209_v16 = vpack.c.bf16 %v14331_v25, %v14329_v48  ;;  %v14146_v48 = vld [vmem:[%s25566_s0 + $0x288] sm:$0xff]  ;;  %v5870_v25 = vlaneseq }
 0x5f9   :  { %5123 = vmatprep.mubr.f32.mxu0 %v25751_v27 }
 0x5fa   :  { %16210 = vmatpush1.bf16.msra.mxu1 %v16209_v16  ;;  %v21134_v16 = vshrl.u32 %v5870_v25, 7 }
 0x5fc   :  { %14221 = vmatmul.mubr.msk.f32.gmra.mrb[8].mxu0 %vm280_vm0, %v14101_v17  ;;  %v14334_v17 = vld [vmem:[%s25567_s3 + $0x1c8] sm:$0xff]  ;;  %25844 = vst [vmem:[#allocation33_spill] sm:$0xff] %v21134_v16 }
 0x5fd   :  { %5129 = vmatprep.mubr.f32.mxu0 %v25751_v27 }
 0x600   :  { %14222 = vmatmul.mubr.msk.f32.gmra.mrb[10].mxu0 %vm280_vm0, %v14102_v18  ;;  %v14336_v18 = vld [vmem:[%s25567_s3 + $0x1d8] sm:$0xff] }
 0x601   :  { %5135 = vmatprep.mubr.f32.mxu0 %v25751_v27 }
 0x604   :  { %14223 = vmatmul.mubr.msk.f32.gmra.mrb[12].mxu0 %vm280_vm0, %v14103_v19  ;;  %v16211_v19 = vpack.c.bf16 %v14336_v18, %v14334_v17  ;;  %v14148_v17 = vld [vmem:[%s25566_s0 + $0x298] sm:$0xff]  ;;  %v25641_v18 = vsub.s32 0, %v21134_v16 }
 0x605   :  { %5141 = vmatprep.mubr.f32.mxu0 %v25751_v27 }
 0x606   :  { %16212 = vmatprep.subr.bf16.mxu1 %v16211_v19  ;;  %v14149_v19 = vld [vmem:[%s25566_s0 + $0x2a0] sm:$0xff] }
 0x608   :  { %14224 = vmatmul.mubr.msk.f32.gmra.mrb[14].mxu0 %vm280_vm0, %v14104_v20  ;;  %v14333_v20 = vld [vmem:[%s25567_s3 + $0x1c0] sm:$0xff] }
 0x609   :  { %5147 = vmatprep.mubr.f32.mxu0 %v25751_v27 }
 0x60c   :  { %14225 = vmatmul.mubr.msk.f32.gmra.mrb[16].mxu0 %vm280_vm0, %v14105_v21  ;;  %v14335_v21 = vld [vmem:[%s25567_s3 + $0x1d0] sm:$0xff] }
 0x60d   :  { %5153 = vmatprep.mubr.f32.mxu0 %v25751_v27 }
 0x610   :  { %14226 = vmatmul.mubr.msk.f32.gmra.mrb[18].mxu0 %vm280_vm0, %v14106_v22  ;;  %v20954_v22 = vld [vmem:[%s25566_s0 + $0x320] sm:$0xff] }
 0x611   :  { %5159 = vmatprep.mubr.f32.mxu0 %v25751_v27  ;;  %13565 = vmatmul.mubr.msk.f32.gmra.mrb[16].mxu1 %vm280_vm0, %v20954_v22 }
 0x612   :  { %1191 = vmatprep.mubr.f32.mxu1 %v25751_v27 }
 0x614   :  { %14227 = vmatmul.mubr.msk.f32.gmra.mrb[20].mxu0 %vm280_vm0, %v14107_v26  ;;  %v14126_v26 = vld [vmem:[%s25566_s0 + $0x1e8] sm:$0xff] }
 0x615   :  { %5165 = vmatprep.mubr.f32.mxu0 %v25751_v27 }
 0x618   :  { %14228 = vmatmul.mubr.msk.f32.gmra.mrb[22].mxu0 %vm280_vm0, %v14108_v33  ;;  %v16213_v33 = vpack.c.bf16 %v14335_v21, %v14333_v20  ;;  %v5868_v20 = vld [vmem:[%s25568_s2] sm:$0x3]  ;;  %v25642_v21 = vsub.s32 1, %v21134_v16 }
 0x619   :  { %5171 = vmatprep.mubr.f32.mxu0 %v25751_v27 }
 0x61a   :  { %16214 = vmatpush1.bf16.msra.mxu1 %v16213_v33  ;;  %v21158_v33 = vrot.slane %v5868_v20, %v25642_v21 }
 0x61c   :  { %14229 = vmatmul.mubr.msk.f32.gmra.mrb[24].mxu0 %vm280_vm0, %v14109_v37  ;;  %v14338_v37 = vld [vmem:[%s25567_s3 + $0x1e8] sm:$0xff] }
 0x61d   :  { %5177 = vmatprep.mubr.f32.mxu0 %v25751_v27 }
 0x620   :  { %14230 = vmatmul.mubr.msk.f32.gmra.mrb[26].mxu0 %vm280_vm0, %v14110_v38  ;;  %v14340_v38 = vld [vmem:[%s25567_s3 + $0x1f8] sm:$0xff] }
 0x621   :  { %5183 = vmatprep.mubr.f32.mxu0 %v25751_v27 }
 0x624   :  { %14231 = vmatmul.mubr.msk.f32.gmra.mrb[28].mxu0 %vm280_vm0, %v14111_v39  ;;  %v16215_v39 = vpack.c.bf16 %v14340_v38, %v14338_v37  ;;  %v14150_v37 = vld [vmem:[%s25566_s0 + $0x2a8] sm:$0xff] }
 0x625   :  { %5189 = vmatprep.mubr.f32.mxu0 %v25751_v27 }
 0x626   :  { %16216 = vmatprep.subr.bf16.mxu1 %v16215_v39 }
 0x628   :  { %14232 = vmatmul.mubr.msk.f32.gmra.mrb[30].mxu0 %vm280_vm0, %v14112_v52  ;;  %v14337_v52 = vld [vmem:[%s25567_s3 + $0x1e0] sm:$0xff] }
 0x629   :  { %5195 = vmatprep.mubr.f32.mxu0 %v25751_v27 }
 0x62c   :  { %14233 = vmatmul.mubr.msk.f32.gmra.mrb[32].mxu0 %vm280_vm0, %v14113_v53  ;;  %v14339_v53 = vld [vmem:[%s25567_s3 + $0x1f0] sm:$0xff] }
 0x62d   :  { %5201 = vmatprep.mubr.f32.mxu0 %v25751_v27 }
 0x630   :  { %14234 = vmatmul.mubr.msk.f32.gmra.mrb[34].mxu0 %vm280_vm0, %v14114_v54  ;;  %v20979_v54 = vld [vmem:[%s25566_s0 + $0x328] sm:$0xff] }
 0x631   :  { %5207 = vmatprep.mubr.f32.mxu0 %v25751_v27  ;;  %13566 = vmatmul.mubr.msk.f32.gmra.mrb[18].mxu1 %vm280_vm0, %v20979_v54 }
 0x632   :  { %1197 = vmatprep.mubr.f32.mxu1 %v25751_v27 }
 0x634   :  { %14235 = vmatmul.mubr.msk.f32.gmra.mrb[36].mxu0 %vm280_vm0, %v14115_v55  ;;  %v14127_v55 = vld [vmem:[%s25566_s0 + $0x1f0] sm:$0xff] }
 0x635   :  { %5213 = vmatprep.mubr.f32.mxu0 %v25751_v27 }
 0x638   :  { %14236 = vmatmul.mubr.msk.f32.gmra.mrb[38].mxu0 %vm280_vm0, %v14116_v57  ;;  %v16217_v57 = vpack.c.bf16 %v14339_v53, %v14337_v52 }
 0x639   :  { %5219 = vmatprep.mubr.f32.mxu0 %v25751_v27 }
 0x63a   :  { %16218 = vmatpush1.bf16.msra.mxu1 %v16217_v57 }
 0x63c   :  { %14237 = vmatmul.mubr.msk.f32.gmra.mrb[40].mxu0 %vm280_vm0, %v14117_v2  ;;  %v14342_v2 = vld [vmem:[%s25567_s3 + $0x208] sm:$0xff] }
 0x63d   :  { %5225 = vmatprep.mubr.f32.mxu0 %v25751_v27 }
 0x640   :  { %14238 = vmatmul.mubr.msk.f32.gmra.mrb[42].mxu0 %vm280_vm0, %v14118_v4  ;;  %v14344_v4 = vld [vmem:[%s25567_s3 + $0x218] sm:$0xff] }
 0x641   :  { %5231 = vmatprep.mubr.f32.mxu0 %v25751_v27  ;;  %v16219_v5 = vpack.c.bf16 %v14344_v4, %v14342_v2 }
 0x643   :  { %16220 = vmatprep.subr.bf16.mxu1 %v16219_v5 }
 0x644   :  { %14239 = vmatmul.mubr.msk.f32.gmra.mrb[44].mxu0 %vm280_vm0, %v14119_v45  ;;  %v21004_v45 = vld [vmem:[%s25566_s0 + $0x330] sm:$0xff]  ;;  %16222 = vmatpush1.bf16.msra.mxu1 %v16221_v3 }
 0x645   :  { %5237 = vmatprep.mubr.f32.mxu0 %v25751_v27  ;;  %13567 = vmatmul.mubr.msk.f32.gmra.mrb[20].mxu1 %vm280_vm0, %v21004_v45 }
 0x646   :  { %1203 = vmatprep.mubr.f32.mxu1 %v25751_v27 }
 0x648   :  { %14240 = vmatmul.mubr.msk.f32.gmra.mrb[46].mxu0 %vm280_vm0, %v14120_v44  ;;  %v14346_v44 = vld [vmem:[%s25567_s3 + $0x228] sm:$0xff] }
 0x649   :  { %5243 = vmatprep.mubr.f32.mxu0 %v25751_v27  ;;  %13568 = vmatmul.mubr.msk.f32.gmra.mrb[22].mxu1 %vm280_vm0, %v21023_v58 }
 0x64c   :  { %14241 = vmatmul.mubr.msk.f32.gmra.mrb[48].mxu0 %vm280_vm0, %v14121_v56  ;;  %v16223_v56 = vpack.c.bf16 %v14348_v51, %v14346_v44 }
 0x64d   :  { %5249 = vmatprep.mubr.f32.mxu0 %v25751_v27 }
 0x64e   :  { %16224 = vmatprep.subr.bf16.mxu1 %v16223_v56 }
 0x64f   :  { %16226 = vmatpush1.bf16.msra.mxu1 %v16225_v62 }
 0x650   :  { %14242 = vmatmul.mubr.msk.f32.gmra.mrb[50].mxu0 %vm280_vm0, %v14122_v0  ;;  %v14131_v0 = vld [vmem:[%s25566_s0 + $0x210] sm:$0xff]  ;;  %16228 = vmatprep.subr.bf16.mxu1 %v16227_v32 }
 0x651   :  { %5255 = vmatprep.mubr.f32.mxu0 %v25751_v27 }
 0x654   :  { %14243 = vmatmul.mubr.msk.f32.gmra.mrb[52].mxu0 %vm280_vm0, %v14123_v8  ;;  %v14135_v8 = vld [vmem:[%s25566_s0 + $0x230] sm:$0xff] }
 0x655   :  { %5261 = vmatprep.mubr.f32.mxu0 %v25751_v27 }
 0x658   :  { %14244 = vmatmul.mubr.msk.f32.gmra.mrb[54].mxu0 %vm280_vm0, %v14124_v13  ;;  %v14141_v13 = vld [vmem:[%s25566_s0 + $0x260] sm:$0xff] }
 0x659   :  { %5267 = vmatprep.mubr.f32.mxu0 %v25751_v27 }
 0x65c   :  { %14245 = vmatmul.mubr.msk.f32.gmra.mrb[56].mxu0 %vm280_vm0, %v14125_v10  ;;  %v14147_v10 = vld [vmem:[%s25566_s0 + $0x290] sm:$0xff] }
 0x65d   :  { %5273 = vmatprep.mubr.f32.mxu0 %v25751_v27 }
 0x660   :  { %14246 = vmatmul.mubr.msk.f32.gmra.mrb[58].mxu0 %vm280_vm0, %v14126_v26  ;;  %v21153_v26 = vrot.slane %v5868_v20, %v25641_v18 }
 0x661   :  { %5279 = vmatprep.mubr.f32.mxu0 %v25751_v27 }
 0x664   :  { %14247 = vmatmul.mubr.msk.f32.gmra.mrb[60].mxu0 %vm280_vm0, %v14127_v55  ;;  %v14151_v55 = vld [vmem:[%s25566_s0 + $0x2b0] sm:$0xff] }
 0x665   :  { %5285 = vmatprep.mubr.f32.mxu0 %v25751_v27 }
 0x668   :  { %14248 = vmatmul.mubr.msk.f32.gmra.mrb[62].mxu0 %vm280_vm0, %v14128_v29  ;;  %v14152_v29 = vld [vmem:[%s25566_s0 + $0x2b8] sm:$0xff] }
 0x669   :  { %5291 = vmatprep.mubr.f32.mxu0 %v25751_v27 }
 0x66c   :  { %14249 = vmatmul.mubr.msk.f32.gmra.mrb[64].mxu0 %vm280_vm0, %v14129_v61  ;;  %v14153_v61 = vld [vmem:[%s25566_s0 + $0x2c0] sm:$0xff] }
 0x66d   :  { %5297 = vmatprep.mubr.f32.mxu0 %v25751_v27 }
 0x670   :  { %14250 = vmatmul.mubr.msk.f32.gmra.mrb[66].mxu0 %vm280_vm0, %v14130_v63 }
 0x671   :  { %5303 = vmatprep.mubr.f32.mxu0 %v25751_v27 }
 0x674   :  { %14251 = vmatmul.mubr.msk.f32.gmra.mrb[68].mxu0 %vm280_vm0, %v14131_v0 }
 0x675   :  { %5309 = vmatprep.mubr.f32.mxu0 %v25751_v27 }
 0x678   :  { %14252 = vmatmul.mubr.msk.f32.gmra.mrb[70].mxu0 %vm280_vm0, %v14132_v34  ;;  %v14154_v34 = vld [vmem:[%s25566_s0 + $0x2c8] sm:$0xff] }
 0x679   :  { %5315 = vmatprep.mubr.f32.mxu0 %v25751_v27 }
 0x67c   :  { %14253 = vmatmul.mubr.msk.f32.gmra.mrb[72].mxu0 %vm280_vm0, %v14133_v35 }
 0x67d   :  { %5321 = vmatprep.mubr.f32.mxu0 %v25751_v27 }
 0x680   :  { %14254 = vmatmul.mubr.msk.f32.gmra.mrb[74].mxu0 %vm280_vm0, %v14134_v36 }
 0x681   :  { %5327 = vmatprep.mubr.f32.mxu0 %v25751_v27 }
 0x684   :  { %14255 = vmatmul.mubr.msk.f32.gmra.mrb[76].mxu0 %vm280_vm0, %v14135_v8 }
 0x685   :  { %5333 = vmatprep.mubr.f32.mxu0 %v25751_v27 }
 0x688   :  { %14256 = vmatmul.mubr.msk.f32.gmra.mrb[78].mxu0 %vm280_vm0, %v14136_v9 }
 0x689   :  { %5339 = vmatprep.mubr.f32.mxu0 %v25751_v27 }
 0x68c   :  { %14257 = vmatmul.mubr.msk.f32.gmra.mrb[80].mxu0 %vm280_vm0, %v14137_v49 }
 0x68d   :  { %5345 = vmatprep.mubr.f32.mxu0 %v25751_v27 }
 0x690   :  { %14258 = vmatmul.mubr.msk.f32.gmra.mrb[82].mxu0 %vm280_vm0, %v14138_v28 }
 0x691   :  { %5351 = vmatprep.mubr.f32.mxu0 %v25751_v27 }
 0x694   :  { %14259 = vmatmul.mubr.msk.f32.gmra.mrb[84].mxu0 %vm280_vm0, %v14139_v24  ;;  %v14155_v24 = vld [vmem:[%s25566_s0 + $0x2d0] sm:$0xff] }
 0x695   :  { %5357 = vmatprep.mubr.f32.mxu0 %v25751_v27 }
 0x698   :  { %14260 = vmatmul.mubr.msk.f32.gmra.mrb[86].mxu0 %vm280_vm0, %v14140_v6 }
 0x699   :  { %5363 = vmatprep.mubr.f32.mxu0 %v25751_v27 }
 0x69c   :  { %14261 = vmatmul.mubr.msk.f32.gmra.mrb[88].mxu0 %vm280_vm0, %v14141_v13 }
 0x69d   :  { %5369 = vmatprep.mubr.f32.mxu0 %v25751_v27 }
 0x6a0   :  { %14262 = vmatmul.mubr.msk.f32.gmra.mrb[90].mxu0 %vm280_vm0, %v14142_v14 }
 0x6a1   :  { %5375 = vmatprep.mubr.f32.mxu0 %v25751_v27 }
 0x6a4   :  { %14263 = vmatmul.mubr.msk.f32.gmra.mrb[92].mxu0 %vm280_vm0, %v14143_v46 }
 0x6a5   :  { %5381 = vmatprep.mubr.f32.mxu0 %v25751_v27 }
 0x6a8   :  { %14264 = vmatmul.mubr.msk.f32.gmra.mrb[94].mxu0 %vm280_vm0, %v14144_v50 }
 0x6a9   :  { %5387 = vmatprep.mubr.f32.mxu0 %v25751_v27 }
 0x6ac   :  { %14265 = vmatmul.mubr.msk.f32.gmra.mrb[96].mxu0 %vm280_vm0, %v14145_v30 }
 0x6ad   :  { %5393 = vmatprep.mubr.f32.mxu0 %v25751_v27 }
 0x6b0   :  { %14266 = vmatmul.mubr.msk.f32.gmra.mrb[98].mxu0 %vm280_vm0, %v14146_v48  ;;  %v14156_v48 = vld [vmem:[%s25566_s0 + $0x2d8] sm:$0xff] }
 0x6b1   :  { %5399 = vmatprep.mubr.f32.mxu0 %v25751_v27 }
 0x6b4   :  { %14267 = vmatmul.mubr.msk.f32.gmra.mrb[100].mxu0 %vm280_vm0, %v14147_v10 }
 0x6b5   :  { %5405 = vmatprep.mubr.f32.mxu0 %v25751_v27 }
 0x6b8   :  { %14268 = vmatmul.mubr.msk.f32.gmra.mrb[102].mxu0 %vm280_vm0, %v14148_v17 }
 0x6b9   :  { %5411 = vmatprep.mubr.f32.mxu0 %v25751_v27 }
 0x6bc   :  { %14269 = vmatmul.mubr.msk.f32.gmra.mrb[104].mxu0 %vm280_vm0, %v14149_v19 }
 0x6bd   :  { %5417 = vmatprep.mubr.f32.mxu0 %v25751_v27 }
 0x6bf   :  { %v5101_v38 = vpop.f32.mrb[0].mxu0 }
 0x6c0   :  { %v5880_v39 = vadd.f32 %v21153_v26, %v5101_v38  ;;  %v5103_v52 = vpop.f32.mrb[1].mxu0  ;;  %14270 = vmatmul.mubr.msk.f32.gmra.mrb[106].mxu0 %vm280_vm0, %v14150_v37 }
 0x6c1   :  { %v5881_v53 = vadd.f32 %v21158_v33, %v5103_v52  ;;  %5423 = vmatprep.mubr.f32.mxu0 %v25751_v27 }
 0x6c2   :  { %v6072_v57 = vmax.f32 %v5880_v39, 0.0 }
 0x6c3   :  { %v6073_v2 = vmax.f32 %v5881_v53, 0.0  ;;  %v5107_v4 = vpop.f32.mrb[2].mxu0 }
 0x6c4   :  { %6264 = vst [vmem:[#allocation2] sm:$0xff] %v6072_v57  ;;  %v5882_v5 = vadd.f32 %v21153_v26, %v5107_v4  ;;  %v5109_v23 = vpop.f32.mrb[3].mxu0  ;;  %14271 = vmatmul.mubr.msk.f32.gmra.mrb[108].mxu0 %vm280_vm0, %v14151_v55 }
 0x6c5   :  { %6266 = vst.msk [vmem:[#allocation2 + $0x8] sm:$0xff] %vm6265_vm1, %v6073_v2  ;;  %v5883_v43 = vadd.f32 %v21158_v33, %v5109_v23  ;;  %5429 = vmatprep.mubr.f32.mxu0 %v25751_v27 }
 0x6c6   :  { %v6074_v3 = vmax.f32 %v5882_v5, 0.0 }
 0x6c7   :  { %v6075_v44 = vmax.f32 %v5883_v43, 0.0  ;;  %v5113_v51 = vpop.f32.mrb[4].mxu0 }
 0x6c8   :  { %6267 = vst [vmem:[#allocation2 + $0x10] sm:$0xff] %v6074_v3  ;;  %v5884_v56 = vadd.f32 %v21153_v26, %v5113_v51  ;;  %v5115_v59 = vpop.f32.mrb[5].mxu0  ;;  %14272 = vmatmul.mubr.msk.f32.gmra.mrb[110].mxu0 %vm280_vm0, %v14152_v29 }
 0x6c9   :  { %6268 = vst.msk [vmem:[#allocation2 + $0x18] sm:$0xff] %vm6265_vm1, %v6075_v44  ;;  %v5885_v60 = vadd.f32 %v21158_v33, %v5115_v59  ;;  %5435 = vmatprep.mubr.f32.mxu0 %v25751_v27 }
 0x6ca   :  { %v6076_v62 = vmax.f32 %v5884_v56, 0.0 }
 0x6cb   :  { %v6077_v63 = vmax.f32 %v5885_v60, 0.0  ;;  %v5119_v0 = vpop.f32.mrb[6].mxu0 }
 0x6cc   :  { %6269 = vst [vmem:[#allocation2 + $0x20] sm:$0xff] %v6076_v62  ;;  %v5886_v12 = vadd.f32 %v21153_v26, %v5119_v0  ;;  %v5121_v31 = vpop.f32.mrb[7].mxu0  ;;  %14273 = vmatmul.mubr.msk.f32.gmra.mrb[112].mxu0 %vm280_vm0, %v14153_v61  ;;  %v6587_v0 = vld [vmem:[%s25567_s3 + $0x10] sm:$0xff] }
 0x6cd   :  { %6270 = vst.msk [vmem:[#allocation2 + $0x28] sm:$0xff] %vm6265_vm1, %v6077_v63  ;;  %v5887_v32 = vadd.f32 %v21158_v33, %v5121_v31  ;;  %5441 = vmatprep.mubr.f32.mxu0 %v25751_v27  ;;  %v6590_v31 = vld [vmem:[%s25567_s3 + $0x28] sm:$0xff] }
 0x6ce   :  { %v6078_v35 = vmax.f32 %v5886_v12, 0.0 }
 0x6cf   :  { %v6079_v36 = vmax.f32 %v5887_v32, 0.0  ;;  %v5125_v8 = vpop.f32.mrb[8].mxu0 }
 0x6d0   :  { %6271 = vst [vmem:[#allocation2 + $0x30] sm:$0xff] %v6078_v35  ;;  %v5888_v9 = vadd.f32 %v21153_v26, %v5125_v8  ;;  %v5127_v49 = vpop.f32.mrb[9].mxu0  ;;  %14274 = vmatmul.mubr.msk.f32.gmra.mrb[114].mxu0 %vm280_vm0, %v14154_v34 }
 0x6d1   :  { %6272 = vst.msk [vmem:[#allocation2 + $0x38] sm:$0xff] %vm6265_vm1, %v6079_v36  ;;  %v5889_v28 = vadd.f32 %v21158_v33, %v5127_v49  ;;  %5447 = vmatprep.mubr.f32.mxu0 %v25751_v27 }
 0x6d2   :  { %v6080_v6 = vmax.f32 %v5888_v9, 0.0 }
 0x6d3   :  { %v6081_v13 = vmax.f32 %v5889_v28, 0.0  ;;  %v5131_v14 = vpop.f32.mrb[10].mxu0 }
 0x6d4   :  { %6273 = vst [vmem:[#allocation2 + $0x40] sm:$0xff] %v6080_v6  ;;  %v5890_v46 = vadd.f32 %v21153_v26, %v5131_v14  ;;  %v5133_v50 = vpop.f32.mrb[11].mxu0  ;;  %14275 = vmatmul.mubr.msk.f32.gmra.mrb[116].mxu0 %vm280_vm0, %v14155_v24  ;;  %v6589_v24 = vld [vmem:[%s25567_s3 + $0x20] sm:$0xff]  ;;  %v6591_v6 = vld [vmem:[%s25567_s3 + $0x30] sm:$0xff]  ;;  %v6596_v14 = vld [vmem:[%s25567_s3 + $0x58] sm:$0xff] }
 0x6d5   :  { %6274 = vst.msk [vmem:[#allocation2 + $0x48] sm:$0xff] %vm6265_vm1, %v6081_v13  ;;  %v5891_v30 = vadd.f32 %v21158_v33, %v5133_v50  ;;  %5453 = vmatprep.mubr.f32.mxu0 %v25751_v27 }
 0x6d6   :  { %v6082_v25 = vmax.f32 %v5890_v46, 0.0 }
 0x6d7   :  { %v6083_v10 = vmax.f32 %v5891_v30, 0.0  ;;  %v5137_v17 = vpop.f32.mrb[12].mxu0 }
 0x6d8   :  { %6275 = vst [vmem:[#allocation2 + $0x50] sm:$0xff] %v6082_v25  ;;  %v5892_v19 = vadd.f32 %v21153_v26, %v5137_v17  ;;  %v5139_v20 = vpop.f32.mrb[13].mxu0  ;;  %14276 = vmatmul.mubr.msk.f32.gmra.mrb[118].mxu0 %vm280_vm0, %v14156_v48  ;;  %v16233_v48 = vpack.c.bf16 %v6591_v6, %v6589_v24 }
 0x6d9   :  { %6276 = vst.msk [vmem:[#allocation2 + $0x58] sm:$0xff] %vm6265_vm1, %v6083_v10  ;;  %v5893_v37 = vadd.f32 %v21158_v33, %v5139_v20  ;;  %5459 = vmatprep.mubr.f32.mxu0 %v25751_v27  ;;  %v6593_v20 = vld [vmem:[%s25567_s3 + $0x40] sm:$0xff] }
 0x6da   :  { %v6084_v38 = vmax.f32 %v5892_v19, 0.0 }
 0x6db   :  { %v6085_v39 = vmax.f32 %v5893_v37, 0.0  ;;  %v5143_v52 = vpop.f32.mrb[14].mxu0  ;;  %v6595_v37 = vld [vmem:[%s25567_s3 + $0x50] sm:$0xff] }
 0x6dc   :  { %6277 = vst [vmem:[#allocation2 + $0x60] sm:$0xff] %v6084_v38  ;;  %v5894_v53 = vadd.f32 %v21153_v26, %v5143_v52  ;;  %v5145_v55 = vpop.f32.mrb[15].mxu0  ;;  %14277 = vmatmul.mubr.msk.f32.gmra.mrb[120].mxu0 %vm280_vm0, %v20466_v40 }
 0x6dd   :  { %6278 = vst.msk [vmem:[#allocation2 + $0x68] sm:$0xff] %vm6265_vm1, %v6085_v39  ;;  %v5895_v57 = vadd.f32 %v21158_v33, %v5145_v55  ;;  %5465 = vmatprep.mubr.f32.mxu0 %v25751_v27  ;;  %v6600_v39 = vld [vmem:[%s25567_s3 + $0x78] sm:$0xff] }
 0x6de   :  { %v6086_v2 = vmax.f32 %v5894_v53, 0.0 }
 0x6df   :  { %v6087_v4 = vmax.f32 %v5895_v57, 0.0  ;;  %v5149_v5 = vpop.f32.mrb[16].mxu0  ;;  %v16237_v57 = vpack.c.bf16 %v6595_v37, %v6593_v20 }
 0x6e0   :  { %6279 = vst [vmem:[#allocation2 + $0x70] sm:$0xff] %v6086_v2  ;;  %v5896_v23 = vadd.f32 %v21153_v26, %v5149_v5  ;;  %v5151_v43 = vpop.f32.mrb[17].mxu0  ;;  %14278 = vmatmul.mubr.msk.f32.gmra.mrb[122].mxu0 %vm280_vm0, %v20477_v41 }
 0x6e1   :  { %6280 = vst.msk [vmem:[#allocation2 + $0x78] sm:$0xff] %vm6265_vm1, %v6087_v4  ;;  %v5897_v40 = vadd.f32 %v21158_v33, %v5151_v43  ;;  %5471 = vmatprep.mubr.f32.mxu0 %v25751_v27  ;;  %v6597_v43 = vld [vmem:[%s25567_s3 + $0x60] sm:$0xff] }
 0x6e2   :  { %v6088_v29 = vmax.f32 %v5896_v23, 0.0 }
 0x6e3   :  { %v6089_v3 = vmax.f32 %v5897_v40, 0.0  ;;  %v5155_v44 = vpop.f32.mrb[18].mxu0  ;;  %v6599_v40 = vld [vmem:[%s25567_s3 + $0x70] sm:$0xff] }
 0x6e4   :  { %6281 = vst [vmem:[#allocation2 + $0x80] sm:$0xff] %v6088_v29  ;;  %v5898_v51 = vadd.f32 %v21153_v26, %v5155_v44  ;;  %v5157_v56 = vpop.f32.mrb[19].mxu0  ;;  %14279 = vmatmul.mubr.msk.f32.gmra.mrb[124].mxu0 %vm280_vm0, %v20488_v42  ;;  %v6585_v42 = vld [vmem:[%s25567_s3] sm:$0xff] }
 0x6e5   :  { %6282 = vst.msk [vmem:[#allocation2 + $0x88] sm:$0xff] %vm6265_vm1, %v6089_v3  ;;  %v5899_v41 = vadd.f32 %v21158_v33, %v5157_v56  ;;  %5477 = vmatprep.mubr.f32.mxu0 %v25751_v27  ;;  %v16229_v36 = vpack.c.bf16 %v6587_v0, %v6585_v42  ;;  %v6604_v3 = vld [vmem:[%s25567_s3 + $0x98] sm:$0xff]  ;;  %v6603_v42 = vld [vmem:[%s25567_s3 + $0x90] sm:$0xff] }
 0x6e6   :  { %v6090_v59 = vmax.f32 %v5898_v51, 0.0 }
 0x6e7   :  { %v6091_v60 = vmax.f32 %v5899_v41, 0.0  ;;  %v5161_v61 = vpop.f32.mrb[20].mxu0  ;;  %v16241_v41 = vpack.c.bf16 %v6599_v40, %v6597_v43  ;;  %v14170_v40 = vld [vmem:[%s25566_s0 + $0x348] sm:$0xff] }
 0x6e8   :  { %6283 = vst [vmem:[#allocation2 + $0x90] sm:$0xff] %v6090_v59  ;;  %v21234_v62 = vadd.f32 %v21153_v26, %v5161_v61  ;;  %v5163_v63 = vpop.f32.mrb[21].mxu0  ;;  %14280 = vmatmul.mubr.msk.f32.gmra.mrb[126].mxu0 %vm280_vm0, %v20499_v47  ;;  %v6592_v47 = vld [vmem:[%s25567_s3 + $0x38] sm:$0xff] }
 0x6e9   :  { %6284 = vst.msk [vmem:[#allocation2 + $0x98] sm:$0xff] %vm6265_vm1, %v6091_v60  ;;  %v5901_v12 = vadd.f32 %v21158_v33, %v5163_v63  ;;  %5483 = vmatprep.mubr.f32.mxu0 %v25751_v27  ;;  %v16231_v28 = vpack.c.bf16 %v6592_v47, %v6590_v31  ;;  %v6601_v63 = vld [vmem:[%s25567_s3 + $0x80] sm:$0xff] }
 0x6ea   :  { %v6092_v32 = vmax.f32 %v21234_v62, 0.0  ;;  %v16245_v47 = vpack.c.bf16 %v6603_v42, %v6601_v63 }
 0x6eb   :  { %v6093_v34 = vmax.f32 %v5901_v12, 0.0  ;;  %v5167_v35 = vpop.f32.mrb[22].mxu0 }
 0x6ec   :  { %6285 = vst [vmem:[#allocation2 + $0xa0] sm:$0xff] %v6092_v32  ;;  %v21255_v8 = vadd.f32 %v21153_v26, %v5167_v35  ;;  %v5169_v9 = vpop.f32.mrb[23].mxu0  ;;  %14281 = vmatmul.mubr.msk.f32.gmra.mrb[128].mxu0 %vm280_vm0, %v20857_v1  ;;  %v6623_v49 = vld [vmem:[#allocation2 + $0x88] sm:$0xff] }
 0x6ed   :  { %6286 = vst.msk [vmem:[#allocation2 + $0xa8] sm:$0xff] %vm6265_vm1, %v6093_v34  ;;  %v5903_v13 = vadd.f32 %v21158_v33, %v5169_v9  ;;  %14349 = vmatprep.mubr.msk.f32.mxu1 %vm6265_vm1, %v6623_v49  ;;  %5489 = vmatprep.mubr.f32.mxu0 %v25751_v27  ;;  %v6594_v1 = vld [vmem:[%s25567_s3 + $0x48] sm:$0xff] }
 0x6ee   :  { %v6094_v46 = vmax.f32 %v21255_v8, 0.0  ;;  %7044 = vmatmul.mubr.f32.vlgmr.msra.gmra.mrb[24].mxu1 %v6088_v29  ;;  %v16235_v19 = vpack.c.bf16 %v6596_v14, %v6594_v1  ;;  %v6608_v1 = vld [vmem:[%s25567_s3 + $0xb8] sm:$0xff] }
 0x6ef   :  { %v6095_v50 = vmax.f32 %v5903_v13, 0.0  ;;  %v5173_v30 = vpop.f32.mrb[24].mxu0  ;;  %16230 = vmatpush1.bf16.msra.mxu1 %v16229_v36  ;;  %v6606_v13 = vld [vmem:[%s25567_s3 + $0xa8] sm:$0xff] }
 0x6f0   :  { %6287 = vst [vmem:[#allocation2 + $0xb0] sm:$0xff] %v6094_v46  ;;  %v21277_v25 = vadd.f32 %v21153_v26, %v5173_v30  ;;  %v5175_v10 = vpop.f32.mrb[25].mxu0  ;;  %14282 = vmatmul.mubr.msk.f32.gmra.mrb[130].mxu0 %vm280_vm0, %v20879_v7  ;;  %v6625_v17 = vld [vmem:[#allocation2 + $0x98] sm:$0xff]  ;;  %16232 = vmatprep.subr.bf16.mxu1 %v16231_v28  ;;  %v6598_v7 = vld [vmem:[%s25567_s3 + $0x68] sm:$0xff] }
 0x6f1   :  { %6288 = vst.msk [vmem:[#allocation2 + $0xb8] sm:$0xff] %vm6265_vm1, %v6095_v50  ;;  %v5905_v38 = vadd.f32 %v21158_v33, %v5175_v10  ;;  %14350 = vmatprep.mubr.msk.f32.mxu1 %vm6265_vm1, %v6625_v17  ;;  %5495 = vmatprep.mubr.f32.mxu0 %v25751_v27  ;;  %v16239_v23 = vpack.c.bf16 %v6600_v39, %v6598_v7  ;;  %v6607_v50 = vld [vmem:[%s25567_s3 + $0xb0] sm:$0xff] }
 0x6f2   :  { %v6096_v52 = vmax.f32 %v21277_v25, 0.0  ;;  %7050 = vmatmul.mubr.f32.gmra.mrb[26].mxu1 %v6090_v59 }
 0x6f3   :  { %v6097_v53 = vmax.f32 %v5905_v38, 0.0  ;;  %v5179_v55 = vpop.f32.mrb[26].mxu0  ;;  %16234 = vmatpush1.bf16.msra.mxu1 %v16233_v48 }
 0x6f4   :  { %6289 = vst [vmem:[#allocation2 + $0xc0] sm:$0xff] %v6096_v52  ;;  %v21299_v2 = vadd.f32 %v21153_v26, %v5179_v55  ;;  %v5181_v4 = vpop.f32.mrb[27].mxu0  ;;  %14283 = vmatmul.mubr.msk.f32.gmra.mrb[132].mxu0 %vm280_vm0, %v20904_v11  ;;  %v6627_v5 = vld [vmem:[#allocation2 + $0xa8] sm:$0xff]  ;;  %16236 = vmatprep.subr.bf16.mxu1 %v16235_v19  ;;  %v14169_v55 = vld [vmem:[%s25566_s0 + $0x340] sm:$0xff] }
 0x6f5   :  { %6290 = vst.msk [vmem:[#allocation2 + $0xc8] sm:$0xff] %vm6265_vm1, %v6097_v53  ;;  %v5907_v29 = vadd.f32 %v21158_v33, %v5181_v4  ;;  %14351 = vmatprep.mubr.msk.f32.mxu1 %vm6265_vm1, %v6627_v5  ;;  %5501 = vmatprep.mubr.f32.mxu0 %v25751_v27  ;;  %v6602_v11 = vld [vmem:[%s25567_s3 + $0x88] sm:$0xff] }
 0x6f6   :  { %v6098_v44 = vmax.f32 %v21299_v2, 0.0  ;;  %7056 = vmatmul.mubr.f32.gmra.mrb[28].mxu1 %v6092_v32  ;;  %v16243_v62 = vpack.c.bf16 %v6604_v3, %v6602_v11 }
 0x6f7   :  { %v6099_v51 = vmax.f32 %v5907_v29, 0.0  ;;  %v5185_v56 = vpop.f32.mrb[28].mxu0  ;;  %16238 = vmatpush1.bf16.msra.mxu1 %v16237_v57 }
 0x6f8   :  { %6291 = vst [vmem:[#allocation2 + $0xd0] sm:$0xff] %v6098_v44  ;;  %v21321_v59 = vadd.f32 %v21153_v26, %v5185_v56  ;;  %v5187_v60 = vpop.f32.mrb[29].mxu0  ;;  %14284 = vmatmul.mubr.msk.f32.gmra.mrb[134].mxu0 %vm280_vm0, %v20929_v15  ;;  %v6629_v61 = vld [vmem:[#allocation2 + $0xb8] sm:$0xff]  ;;  %16240 = vmatprep.subr.bf16.mxu1 %v16239_v23 }
 0x6f9   :  { %6292 = vst.msk [vmem:[#allocation2 + $0xd8] sm:$0xff] %vm6265_vm1, %v6099_v51  ;;  %v5909_v0 = vadd.f32 %v21158_v33, %v5187_v60  ;;  %14352 = vmatprep.mubr.msk.f32.mxu1 %vm6265_vm1, %v6629_v61  ;;  %5507 = vmatprep.mubr.f32.mxu0 %v25751_v27  ;;  %v14171_v60 = vld [vmem:[%s25566_s0 + $0x350] sm:$0xff] }
 0x6fa   :  { %v6100_v15 = vmax.f32 %v21321_v59, 0.0  ;;  %7062 = vmatmul.mubr.f32.gmra.mrb[30].mxu1 %v6094_v46  ;;  %v16247_v46 = vpack.c.bf16 %v6608_v1, %v6606_v13 }
 0x6fb   :  { %v6101_v12 = vmax.f32 %v5909_v0, 0.0  ;;  %v5191_v31 = vpop.f32.mrb[30].mxu0  ;;  %16242 = vmatpush1.bf16.msra.mxu1 %v16241_v41  ;;  %v21392_v41 = vpop.f32.mrb[0].mxu1 }
 0x6fc   :  { %6293 = vst [vmem:[#allocation2 + $0xe0] sm:$0xff] %v6100_v15  ;;  %v5910_v32 = vadd.f32 %v21153_v26, %v5191_v31  ;;  %v5193_v34 = vpop.f32.mrb[31].mxu0  ;;  %14285 = vmatmul.mubr.msk.f32.gmra.mrb[136].mxu0 %vm280_vm0, %v20954_v22  ;;  %v6631_v35 = vld [vmem:[#allocation2 + $0xc8] sm:$0xff]  ;;  %16244 = vmatprep.subr.bf16.mxu1 %v16243_v62  ;;  %v21401_v61 = vpop.f32.mrb[1].mxu1 }
 0x6fd   :  { %6294 = vst.msk [vmem:[#allocation2 + $0xe8] sm:$0xff] %vm6265_vm1, %v6101_v12  ;;  %v5911_v36 = vadd.f32 %v21158_v33, %v5193_v34  ;;  %14353 = vmatprep.mubr.msk.f32.mxu1 %vm6265_vm1, %v6631_v35  ;;  %5513 = vmatprep.mubr.f32.mxu0 %v25751_v27  ;;  %v21408_v31 = vpop.f32.mrb[2].mxu1 }
 0x6fe   :  { %v6102_v8 = vmax.f32 %v5910_v32, 0.0  ;;  %7068 = vmatmul.mubr.f32.gmra.mrb[32].mxu1 %v6096_v52  ;;  %v14172_v32 = vld [vmem:[%s25566_s0 + $0x358] sm:$0xff]  ;;  %v21417_v34 = vpop.f32.mrb[3].mxu1 }
 0x6ff   :  { %v6103_v9 = vmax.f32 %v5911_v36, 0.0  ;;  %v5197_v49 = vpop.f32.mrb[32].mxu0  ;;  %16246 = vmatpush1.bf16.msra.mxu1 %v16245_v47 }
 0x700   :  { %6295 = vst [vmem:[#allocation2 + $0xf0] sm:$0xff] %v6102_v8  ;;  %v5912_v28 = vadd.f32 %v21153_v26, %v5197_v49  ;;  %v5199_v24 = vpop.f32.mrb[33].mxu0  ;;  %14286 = vmatmul.mubr.msk.f32.gmra.mrb[138].mxu0 %vm280_vm0, %v20979_v54  ;;  %v6633_v22 = vld [vmem:[#allocation2 + $0xd8] sm:$0xff]  ;;  %v6605_v54 = vld [vmem:[%s25567_s3 + $0xa0] sm:$0xff]  ;;  %16248 = vmatprep.subr.bf16.mxu1 %v16247_v46 }
 0x701   :  { %6296 = vst.msk [vmem:[#allocation2 + $0xf8] sm:$0xff] %vm6265_vm1, %v6103_v9  ;;  %v5913_v6 = vadd.f32 %v21158_v33, %v5199_v24  ;;  %14354 = vmatprep.mubr.msk.f32.mxu1 %vm6265_vm1, %v6633_v22  ;;  %5519 = vmatprep.mubr.f32.mxu0 %v25751_v27  ;;  %v16249_v25 = vpack.c.bf16 %v6607_v50, %v6605_v54  ;;  %v21424_v24 = vpop.f32.mrb[4].mxu1 }
 0x702   :  { %v6104_v14 = vmax.f32 %v5912_v28, 0.0  ;;  %7074 = vmatmul.mubr.f32.gmra.mrb[34].mxu1 %v6098_v44  ;;  %v21433_v13 = vpop.f32.mrb[5].mxu1 }
 0x703   :  { %v6105_v30 = vmax.f32 %v5913_v6, 0.0  ;;  %v5203_v48 = vpop.f32.mrb[34].mxu0  ;;  %16250 = vmatpush1.bf16.msra.mxu1 %v16249_v25  ;;  %v14173_v6 = vld [vmem:[%s25566_s0 + $0x360] sm:$0xff]  ;;  %v21443_v25 = vpop.f32.mrb[6].mxu1 }
 0x704   :  { %6297 = vst [vmem:[#allocation2 + $0x100] sm:$0xff] %v6104_v14  ;;  %v5914_v10 = vadd.f32 %v21153_v26, %v5203_v48  ;;  %v5205_v17 = vpop.f32.mrb[35].mxu0  ;;  %14287 = vmatmul.mubr.msk.f32.gmra.mrb[140].mxu0 %vm280_vm0, %v21004_v45  ;;  %v6635_v19 = vld [vmem:[#allocation2 + $0xe8] sm:$0xff] }
 0x705   :  { %6298 = vst.msk [vmem:[#allocation2 + $0x108] sm:$0xff] %vm6265_vm1, %v6105_v30  ;;  %v5915_v20 = vadd.f32 %v21158_v33, %v5205_v17  ;;  %14355 = vmatprep.mubr.msk.f32.mxu1 %vm6265_vm1, %v6635_v19  ;;  %5525 = vmatprep.mubr.f32.mxu0 %v25751_v27  ;;  %v14174_v48 = vld [vmem:[%s25566_s0 + $0x368] sm:$0xff]  ;;  %v6612_v19 = vld [vmem:[%s25567_s3 + $0xd8] sm:$0xff] }
 0x706   :  { %v6106_v37 = vmax.f32 %v5914_v10, 0.0  ;;  %7080 = vmatmul.mubr.f32.gmra.mrb[36].mxu1 %v6100_v15  ;;  %v6610_v17 = vld [vmem:[%s25567_s3 + $0xc8] sm:$0xff] }
 0x707   :  { %v6107_v38 = vmax.f32 %v5915_v20, 0.0  ;;  %v5209_v7 = vpop.f32.mrb[36].mxu0  ;;  %v6609_v20 = vld [vmem:[%s25567_s3 + $0xc0] sm:$0xff] }
 0x708   :  { %6299 = vst [vmem:[#allocation2 + $0x110] sm:$0xff] %v6106_v37  ;;  %v5916_v39 = vadd.f32 %v21153_v26, %v5209_v7  ;;  %v5211_v52 = vpop.f32.mrb[37].mxu0  ;;  %14288 = vmatmul.mubr.msk.f32.gmra.mrb[142].mxu0 %vm280_vm0, %v21023_v58  ;;  %v6637_v45 = vld [vmem:[#allocation2 + $0xf8] sm:$0xff]  ;;  %v16251_v7 = vpack.c.bf16 %v6612_v19, %v6610_v17 }
 0x709   :  { %6300 = vst.msk [vmem:[#allocation2 + $0x118] sm:$0xff] %vm6265_vm1, %v6107_v38  ;;  %v5917_v53 = vadd.f32 %v21158_v33, %v5211_v52  ;;  %14356 = vmatprep.mubr.msk.f32.mxu1 %vm6265_vm1, %v6637_v45  ;;  %5531 = vmatprep.mubr.f32.mxu0 %v25751_v27 }
 0x70a   :  { %v6108_v57 = vmax.f32 %v5916_v39, 0.0  ;;  %7086 = vmatmul.mubr.f32.gmra.mrb[38].mxu1 %v6102_v8  ;;  %v6611_v39 = vld [vmem:[%s25567_s3 + $0xd0] sm:$0xff]  ;;  %16252 = vmatprep.subr.bf16.mxu1 %v16251_v7 }
 0x70b   :  { %v6109_v2 = vmax.f32 %v5917_v53, 0.0  ;;  %v5215_v4 = vpop.f32.mrb[38].mxu0  ;;  %v16253_v53 = vpack.c.bf16 %v6611_v39, %v6609_v20 }
 0x70c   :  { %6301 = vst [vmem:[#allocation2 + $0x120] sm:$0xff] %v6108_v57  ;;  %v5918_v58 = vadd.f32 %v21153_v26, %v5215_v4  ;;  %v5217_v5 = vpop.f32.mrb[39].mxu0  ;;  %14289 = vmatmul.mubr.msk.f32.gmra.mrb[144].mxu0 %vm280_vm0, %v14169_v55  ;;  %v6639_v23 = vld [vmem:[#allocation2 + $0x108] sm:$0xff] }
 0x70d   :  { %6302 = vst.msk [vmem:[#allocation2 + $0x128] sm:$0xff] %vm6265_vm1, %v6109_v2  ;;  %v5919_v43 = vadd.f32 %v21158_v33, %v5217_v5  ;;  %14357 = vmatprep.mubr.msk.f32.mxu1 %vm6265_vm1, %v6639_v23  ;;  %5537 = vmatprep.mubr.f32.mxu0 %v25751_v27 }
 0x70e   :  { %v6110_v29 = vmax.f32 %v5918_v58, 0.0  ;;  %7092 = vmatmul.mubr.f32.gmra.mrb[40].mxu1 %v6104_v14  ;;  %v14175_v58 = vld [vmem:[%s25566_s0 + $0x370] sm:$0xff] }
 0x70f   :  { %v6111_v11 = vmax.f32 %v5919_v43, 0.0  ;;  %v5221_v3 = vpop.f32.mrb[40].mxu0  ;;  %16254 = vmatpush1.bf16.msra.mxu1 %v16253_v53 }
 0x710   :  { %6303 = vst [vmem:[#allocation2 + $0x130] sm:$0xff] %v6110_v29  ;;  %v21389_v44 = vadd.f32 %v21153_v26, %v5221_v3  ;;  %v5223_v51 = vpop.f32.mrb[41].mxu0  ;;  %14290 = vmatmul.mubr.msk.f32.gmra.mrb[146].mxu0 %vm280_vm0, %v14170_v40  ;;  %v6641_v56 = vld [vmem:[#allocation2 + $0x118] sm:$0xff] }
 0x711   :  { %6304 = vst.msk [vmem:[#allocation2 + $0x138] sm:$0xff] %vm6265_vm1, %v6111_v11  ;;  %v5921_v59 = vadd.f32 %v21158_v33, %v5223_v51  ;;  %14358 = vmatprep.mubr.msk.f32.mxu1 %vm6265_vm1, %v6641_v56  ;;  %5543 = vmatprep.mubr.f32.mxu0 %v25751_v27  ;;  %v14176_v56 = vld [vmem:[%s25566_s0 + $0x378] sm:$0xff] }
 0x712   :  { %v6112_v62 = vmax.f32 %v21389_v44, 0.0  ;;  %7098 = vmatmul.mubr.f32.gmra.mrb[42].mxu1 %v6106_v37  ;;  %v21458_v37 = vpop.f32.mrb[7].mxu1 }
 0x713   :  { %v6113_v63 = vmax.f32 %v5921_v59, 0.0  ;;  %v5227_v42 = vpop.f32.mrb[42].mxu0  ;;  %v21473_v5 = vpop.f32.mrb[8].mxu1 }
 0x714   :  { %6305 = vst [vmem:[#allocation2 + $0x140] sm:$0xff] %v6112_v62  ;;  %v21405_v0 = vadd.f32 %v21153_v26, %v5227_v42  ;;  %v5229_v15 = vpop.f32.mrb[43].mxu0  ;;  %14291 = vmatmul.mubr.msk.f32.gmra.mrb[148].mxu0 %vm280_vm0, %v14171_v60  ;;  %v6643_v12 = vld [vmem:[#allocation2 + $0x128] sm:$0xff]  ;;  %v21475_v43 = vpop.f32.mrb[9].mxu1 }
 0x715   :  { %6306 = vst.msk [vmem:[#allocation2 + $0x148] sm:$0xff] %vm6265_vm1, %v6113_v63  ;;  %v5923_v47 = vadd.f32 %v21158_v33, %v5229_v15  ;;  %14359 = vmatprep.mubr.msk.f32.mxu1 %vm6265_vm1, %v6643_v12  ;;  %5549 = vmatprep.mubr.f32.mxu0 %v25751_v27  ;;  %v21486_v59 = vpop.f32.mrb[10].mxu1 }
 0x716   :  { %v6114_v35 = vmax.f32 %v21405_v0, 0.0  ;;  %7104 = vmatmul.mubr.f32.gmra.mrb[44].mxu1 %v6108_v57 }
 0x717   :  { %v6115_v36 = vmax.f32 %v5923_v47, 0.0  ;;  %v5233_v8 = vpop.f32.mrb[44].mxu0 }
 0x718   :  { %6307 = vst [vmem:[#allocation2 + $0x150] sm:$0xff] %v6114_v35  ;;  %v21421_v9 = vadd.f32 %v21153_v26, %v5233_v8  ;;  %v5235_v49 = vpop.f32.mrb[45].mxu0  ;;  %14292 = vmatmul.mubr.msk.f32.gmra.mrb[150].mxu0 %vm280_vm0, %v14172_v32  ;;  %v6645_v28 = vld [vmem:[#allocation2 + $0x138] sm:$0xff]  ;;  %v14177_v32 = vld [vmem:[%s25566_s0 + $0x380] sm:$0xff] }
 0x719   :  { %6308 = vst.msk [vmem:[#allocation2 + $0x158] sm:$0xff] %vm6265_vm1, %v6115_v36  ;;  %v5925_v22 = vadd.f32 %v21158_v33, %v5235_v49  ;;  %14360 = vmatprep.mubr.msk.f32.mxu1 %vm6265_vm1, %v6645_v28  ;;  %5555 = vmatprep.mubr.f32.mxu0 %v25751_v27 }
 0x71a   :  { %v6116_v1 = vmax.f32 %v21421_v9, 0.0  ;;  %7110 = vmatmul.mubr.f32.gmra.mrb[46].mxu1 %v6110_v29 }
 0x71b   :  { %v6117_v54 = vmax.f32 %v5925_v22, 0.0  ;;  %v5239_v14 = vpop.f32.mrb[46].mxu0 }
 0x71c   :  { %6309 = vst [vmem:[#allocation2 + $0x160] sm:$0xff] %v6116_v1  ;;  %v21437_v46 = vadd.f32 %v21153_v26, %v5239_v14  ;;  %v5241_v50 = vpop.f32.mrb[47].mxu0  ;;  %14293 = vmatmul.mubr.msk.f32.gmra.mrb[152].mxu0 %vm280_vm0, %v14173_v6  ;;  %v6647_v30 = vld [vmem:[#allocation2 + $0x148] sm:$0xff] }
 0x71d   :  { %6310 = vst.msk [vmem:[#allocation2 + $0x168] sm:$0xff] %vm6265_vm1, %v6117_v54  ;;  %v5927_v10 = vadd.f32 %v21158_v33, %v5241_v50  ;;  %14361 = vmatprep.mubr.msk.f32.mxu1 %vm6265_vm1, %v6647_v30  ;;  %5561 = vmatprep.mubr.f32.mxu0 %v25751_v27  ;;  %v14178_v54 = vld [vmem:[%s25566_s0 + $0x388] sm:$0xff] }
 0x71e   :  { %v6118_v38 = vmax.f32 %v21437_v46, 0.0  ;;  %7116 = vmatmul.mubr.f32.gmra.mrb[48].mxu1 %v6112_v62  ;;  %v21488_v62 = vpop.f32.mrb[11].mxu1 }
 0x71f   :  { %v6119_v52 = vmax.f32 %v5927_v10, 0.0  ;;  %v5245_v45 = vpop.f32.mrb[48].mxu0 }
 0x720   :  { %6311 = vst [vmem:[#allocation2 + $0x170] sm:$0xff] %v6118_v38  ;;  %v5928_v55 = vadd.f32 %v21153_v26, %v5245_v45  ;;  %v5247_v57 = vpop.f32.mrb[49].mxu0  ;;  %14294 = vmatmul.mubr.msk.f32.gmra.mrb[154].mxu0 %vm280_vm0, %v14174_v48  ;;  %v6649_v2 = vld [vmem:[#allocation2 + $0x158] sm:$0xff] }
 0x721   :  { %6312 = vst.msk [vmem:[#allocation2 + $0x178] sm:$0xff] %vm6265_vm1, %v6119_v52  ;;  %v5929_v4 = vadd.f32 %v21158_v33, %v5247_v57  ;;  %14362 = vmatprep.mubr.msk.f32.mxu1 %vm6265_vm1, %v6649_v2  ;;  %5567 = vmatprep.mubr.f32.mxu0 %v25751_v27 }
 0x722   :  { %v6120_v23 = vmax.f32 %v5928_v55, 0.0  ;;  %7122 = vmatmul.mubr.f32.gmra.mrb[50].mxu1 %v6114_v35  ;;  %v21499_v35 = vpop.f32.mrb[12].mxu1 }
 0x723   :  { %v6121_v40 = vmax.f32 %v5929_v4, 0.0  ;;  %v5251_v29 = vpop.f32.mrb[50].mxu0  ;;  %v21501_v8 = vpop.f32.mrb[13].mxu1 }
 0x724   :  { %6313 = vst [vmem:[#allocation2 + $0x180] sm:$0xff] %v6120_v23  ;;  %v5930_v11 = vadd.f32 %v21153_v26, %v5251_v29  ;;  %v5253_v3 = vpop.f32.mrb[51].mxu0  ;;  %14295 = vmatmul.mubr.msk.f32.gmra.mrb[156].mxu0 %vm280_vm0, %v14175_v58  ;;  %v6651_v44 = vld [vmem:[#allocation2 + $0x168] sm:$0xff]  ;;  %v21512_v14 = vpop.f32.mrb[14].mxu1  ;;  %v14180_v58 = vld [vmem:[%s25566_s0 + $0x398] sm:$0xff] }
 0x725   :  { %6314 = vst.msk [vmem:[#allocation2 + $0x188] sm:$0xff] %vm6265_vm1, %v6121_v40  ;;  %v5931_v51 = vadd.f32 %v21158_v33, %v5253_v3  ;;  %14363 = vmatprep.mubr.msk.f32.mxu1 %vm6265_vm1, %v6651_v44  ;;  %5573 = vmatprep.mubr.f32.mxu0 %v25751_v27  ;;  %v21514_v50 = vpop.f32.mrb[15].mxu1 }
 0x726   :  { %v6122_v60 = vmax.f32 %v5930_v11, 0.0  ;;  %7128 = vmatmul.mubr.f32.gmra.mrb[52].mxu1 %v6116_v1  ;;  %v21527_v7 = vpop.f32.mrb[16].mxu1 }
 0x727   :  { %v6123_v63 = vmax.f32 %v5931_v51, 0.0  ;;  %v5257_v42 = vpop.f32.mrb[52].mxu0  ;;  %v21530_v52 = vpop.f32.mrb[17].mxu1 }
 0x728   :  { %6315 = vst [vmem:[#allocation2 + $0x190] sm:$0xff] %v6122_v60  ;;  %v5932_v0 = vadd.f32 %v21153_v26, %v5257_v42  ;;  %v5259_v15 = vpop.f32.mrb[53].mxu0  ;;  %14296 = vmatmul.mubr.msk.f32.gmra.mrb[158].mxu0 %vm280_vm0, %v14176_v56  ;;  %v6653_v12 = vld [vmem:[#allocation2 + $0x178] sm:$0xff]  ;;  %v6614_v42 = vld [vmem:[%s25567_s3 + $0xe8] sm:$0xff] }
 0x729   :  { %6316 = vst.msk [vmem:[#allocation2 + $0x198] sm:$0xff] %vm6265_vm1, %v6123_v63  ;;  %v5933_v47 = vadd.f32 %v21158_v33, %v5259_v15  ;;  %14364 = vmatprep.mubr.msk.f32.mxu1 %vm6265_vm1, %v6653_v12  ;;  %5579 = vmatprep.mubr.f32.mxu0 %v25751_v27  ;;  %v14181_v63 = vld [vmem:[%s25566_s0 + $0x3a0] sm:$0xff] }
 0x72a   :  { %v6124_v36 = vmax.f32 %v5932_v0, 0.0  ;;  %7134 = vmatmul.mubr.f32.gmra.mrb[54].mxu1 %v6118_v38  ;;  %v14179_v38 = vld [vmem:[%s25566_s0 + $0x390] sm:$0xff]  ;;  %v6616_v0 = vld [vmem:[%s25567_s3 + $0xf8] sm:$0xff] }
 0x72b   :  { %v6125_v9 = vmax.f32 %v5933_v47, 0.0  ;;  %v5263_v49 = vpop.f32.mrb[54].mxu0  ;;  %v16255_v47 = vpack.c.bf16 %v6616_v0, %v6614_v42 }
 0x72c   :  { %6317 = vst [vmem:[#allocation2 + $0x1a0] sm:$0xff] %v6124_v36  ;;  %v5934_v28 = vadd.f32 %v21153_v26, %v5263_v49  ;;  %v5265_v22 = vpop.f32.mrb[55].mxu0  ;;  %14297 = vmatmul.mubr.msk.f32.gmra.mrb[160].mxu0 %vm280_vm0, %v14177_v32  ;;  %v6655_v6 = vld [vmem:[#allocation2 + $0x188] sm:$0xff] }
 0x72d   :  { %6318 = vst.msk [vmem:[#allocation2 + $0x1a8] sm:$0xff] %vm6265_vm1, %v6125_v9  ;;  %v5935_v1 = vadd.f32 %v21158_v33, %v5265_v22  ;;  %14365 = vmatprep.mubr.msk.f32.mxu1 %vm6265_vm1, %v6655_v6  ;;  %5585 = vmatprep.mubr.f32.mxu0 %v25751_v27  ;;  %v6613_v6 = vld [vmem:[%s25567_s3 + $0xe0] sm:$0xff] }
 0x72e   :  { %v6126_v46 = vmax.f32 %v5934_v28, 0.0  ;;  %7140 = vmatmul.mubr.f32.gmra.mrb[56].mxu1 %v6120_v23  ;;  %v21543_v23 = vpop.f32.mrb[18].mxu1  ;;  %16256 = vmatprep.subr.bf16.mxu1 %v16255_v47 }
 0x72f   :  { %v6127_v30 = vmax.f32 %v5935_v1, 0.0  ;;  %v5269_v48 = vpop.f32.mrb[56].mxu0  ;;  %v21546_v29 = vpop.f32.mrb[19].mxu1  ;;  %v6615_v1 = vld [vmem:[%s25567_s3 + $0xf0] sm:$0xff] }
 0x730   :  { %6319 = vst [vmem:[#allocation2 + $0x1b0] sm:$0xff] %v6126_v46  ;;  %v21517_v10 = vadd.f32 %v21153_v26, %v5269_v48  ;;  %v5271_v17 = vpop.f32.mrb[57].mxu0  ;;  %14298 = vmatmul.mubr.msk.f32.gmra.mrb[162].mxu0 %vm280_vm0, %v14178_v54  ;;  %v6657_v19 = vld [vmem:[#allocation2 + $0x198] sm:$0xff]  ;;  %v21565_v15 = vpop.f32.mrb[20].mxu1 }
 0x731   :  { %6320 = vst.msk [vmem:[#allocation2 + $0x1b8] sm:$0xff] %vm6265_vm1, %v6127_v30  ;;  %v5937_v20 = vadd.f32 %v21158_v33, %v5271_v17  ;;  %14366 = vmatprep.mubr.msk.f32.mxu1 %vm6265_vm1, %v6657_v19  ;;  %5591 = vmatprep.mubr.f32.mxu0 %v25751_v27  ;;  %v21568_v32 = vpop.f32.mrb[21].mxu1  ;;  %v16257_v30 = vpack.c.bf16 %v6615_v1, %v6613_v6 }
 0x732   :  { %v6128_v39 = vmax.f32 %v21517_v10, 0.0  ;;  %7146 = vmatmul.mubr.f32.gmra.mrb[58].mxu1 %v6122_v60  ;;  %v21585_v48 = vpop.f32.mrb[22].mxu1 }
 0x733   :  { %v6129_v45 = vmax.f32 %v5937_v20, 0.0  ;;  %v5275_v53 = vpop.f32.mrb[58].mxu0  ;;  %v21587_v17 = vpop.f32.mrb[23].mxu1  ;;  %16258 = vmatpush1.bf16.msra.mxu1 %v16257_v30 }
 0x734   :  { %6321 = vst [vmem:[#allocation2 + $0x1c0] sm:$0xff] %v6128_v39  ;;  %v21533_v55 = vadd.f32 %v21153_v26, %v5275_v53  ;;  %v5277_v57 = vpop.f32.mrb[59].mxu0  ;;  %14299 = vmatmul.mubr.msk.f32.gmra.mrb[164].mxu0 %vm280_vm0, %v14179_v38  ;;  %v6659_v2 = vld [vmem:[#allocation2 + $0x1a8] sm:$0xff] }
 0x735   :  { %6322 = vst.msk [vmem:[#allocation2 + $0x1c8] sm:$0xff] %vm6265_vm1, %v6129_v45  ;;  %v5939_v4 = vadd.f32 %v21158_v33, %v5277_v57  ;;  %14367 = vmatprep.mubr.msk.f32.mxu1 %vm6265_vm1, %v6659_v2  ;;  %5597 = vmatprep.mubr.f32.mxu0 %v25751_v27 }
 0x736   :  { %v6130_v40 = vmax.f32 %v21533_v55, 0.0  ;;  %7152 = vmatmul.mubr.f32.gmra.mrb[60].mxu1 %v6124_v36 }
 0x737   :  { %v6131_v11 = vmax.f32 %v5939_v4, 0.0  ;;  %v5281_v3 = vpop.f32.mrb[60].mxu0 }
 0x738   :  { %6323 = vst [vmem:[#allocation2 + $0x1d0] sm:$0xff] %v6130_v40  ;;  %v21549_v44 = vadd.f32 %v21153_v26, %v5281_v3  ;;  %v5283_v51 = vpop.f32.mrb[61].mxu0  ;;  %14300 = vmatmul.mubr.msk.f32.gmra.mrb[166].mxu0 %vm280_vm0, %v14180_v58  ;;  %v6661_v56 = vld [vmem:[#allocation2 + $0x1b8] sm:$0xff] }
 0x739   :  { %6324 = vst.msk [vmem:[#allocation2 + $0x1d8] sm:$0xff] %vm6265_vm1, %v6131_v11  ;;  %v5941_v60 = vadd.f32 %v21158_v33, %v5283_v51  ;;  %14368 = vmatprep.mubr.msk.f32.mxu1 %vm6265_vm1, %v6661_v56  ;;  %5603 = vmatprep.mubr.f32.mxu0 %v25751_v27 }
 0x73a   :  { %v6132_v12 = vmax.f32 %v21549_v44, 0.0  ;;  %7158 = vmatmul.mubr.f32.gmra.mrb[62].mxu1 %v6126_v46  ;;  %v14182_v46 = vld [vmem:[%s25566_s0 + $0x3a8] sm:$0xff] }
 0x73b   :  { %v6133_v36 = vmax.f32 %v5941_v60, 0.0  ;;  %v5287_v9 = vpop.f32.mrb[62].mxu0 }
 0x73c   :  { %6325 = vst [vmem:[#allocation2 + $0x1e0] sm:$0xff] %v6132_v12  ;;  %v5942_v49 = vadd.f32 %v21153_v26, %v5287_v9  ;;  %v5289_v28 = vpop.f32.mrb[63].mxu0  ;;  %14301 = vmatmul.mubr.msk.f32.gmra.mrb[168].mxu0 %vm280_vm0, %v14181_v63  ;;  %v6663_v22 = vld [vmem:[#allocation2 + $0x1c8] sm:$0xff] }
 0x73d   :  { %6326 = vst.msk [vmem:[#allocation2 + $0x1e8] sm:$0xff] %vm6265_vm1, %v6133_v36  ;;  %v5943_v54 = vadd.f32 %v21158_v33, %v5289_v28  ;;  %14369 = vmatprep.mubr.msk.f32.mxu1 %vm6265_vm1, %v6663_v22  ;;  %5609 = vmatprep.mubr.f32.mxu0 %v25751_v27 }
 0x73e   :  { %v6134_v10 = vmax.f32 %v5942_v49, 0.0  ;;  %7164 = vmatmul.mubr.f32.gmra.mrb[64].mxu1 %v6128_v39  ;;  %v14183_v39 = vld [vmem:[%s25566_s0 + $0x3b0] sm:$0xff] }
 0x73f   :  { %v6135_v19 = vmax.f32 %v5943_v54, 0.0  ;;  %v5293_v20 = vpop.f32.mrb[64].mxu0  ;;  %v14186_v54 = vld [vmem:[%s25566_s0 + $0x3c8] sm:$0xff] }
 0x740   :  { %6327 = vst [vmem:[#allocation2 + $0x1f0] sm:$0xff] %v6134_v10  ;;  %v5944_v38 = vadd.f32 %v21153_v26, %v5293_v20  ;;  %v5295_v45 = vpop.f32.mrb[65].mxu0  ;;  %14302 = vmatmul.mubr.msk.f32.gmra.mrb[170].mxu0 %vm280_vm0, %v14182_v46  ;;  %v6665_v53 = vld [vmem:[#allocation2 + $0x1d8] sm:$0xff] }
 0x741   :  { %6328 = vst.msk [vmem:[#allocation2 + $0x1f8] sm:$0xff] %vm6265_vm1, %v6135_v19  ;;  %v5945_v55 = vadd.f32 %v21158_v33, %v5295_v45  ;;  %14370 = vmatprep.mubr.msk.f32.mxu1 %vm6265_vm1, %v6665_v53  ;;  %5615 = vmatprep.mubr.f32.mxu0 %v25751_v27  ;;  %v14187_v53 = vld [vmem:[%s25566_s0 + $0x3d0] sm:$0xff] }
 0x742   :  { %v6136_v57 = vmax.f32 %v5944_v38, 0.0  ;;  %7170 = vmatmul.mubr.f32.gmra.mrb[66].mxu1 %v6130_v40  ;;  %v14184_v40 = vld [vmem:[%s25566_s0 + $0x3b8] sm:$0xff] }
 0x743   :  { %v6137_v2 = vmax.f32 %v5945_v55, 0.0  ;;  %v5299_v4 = vpop.f32.mrb[66].mxu0 }
 0x744   :  { %6329 = vst [vmem:[#allocation2 + $0x200] sm:$0xff] %v6136_v57  ;;  %v5946_v58 = vadd.f32 %v21153_v26, %v5299_v4  ;;  %v5301_v11 = vpop.f32.mrb[67].mxu0  ;;  %14303 = vmatmul.mubr.msk.f32.gmra.mrb[172].mxu0 %vm280_vm0, %v14183_v39  ;;  %v6667_v3 = vld [vmem:[#allocation2 + $0x1e8] sm:$0xff] }
 0x745   :  { %6330 = vst.msk [vmem:[#allocation2 + $0x208] sm:$0xff] %vm6265_vm1, %v6137_v2  ;;  %v5947_v44 = vadd.f32 %v21158_v33, %v5301_v11  ;;  %14371 = vmatprep.mubr.msk.f32.mxu1 %vm6265_vm1, %v6667_v3  ;;  %5621 = vmatprep.mubr.f32.mxu0 %v25751_v27  ;;  %v14188_v3 = vld [vmem:[%s25566_s0 + $0x3d8] sm:$0xff] }
 0x746   :  { %v6138_v51 = vmax.f32 %v5946_v58, 0.0  ;;  %7176 = vmatmul.mubr.f32.gmra.mrb[68].mxu1 %v6132_v12  ;;  %v14185_v12 = vld [vmem:[%s25566_s0 + $0x3c0] sm:$0xff] }
 0x747   :  { %v6139_v56 = vmax.f32 %v5947_v44, 0.0  ;;  %v5305_v60 = vpop.f32.mrb[68].mxu0  ;;  %v6618_v44 = vld [vmem:[%s25567_s3 + $0x108] sm:$0xff] }
 0x748   :  { %6331 = vst [vmem:[#allocation2 + $0x210] sm:$0xff] %v6138_v51  ;;  %v5948_v63 = vadd.f32 %v21153_v26, %v5305_v60  ;;  %v5307_v42 = vpop.f32.mrb[69].mxu0  ;;  %14304 = vmatmul.mubr.msk.f32.gmra.mrb[174].mxu0 %vm280_vm0, %v14184_v40  ;;  %v6669_v0 = vld [vmem:[#allocation2 + $0x1f8] sm:$0xff] }
 0x749   :  { %6332 = vst.msk [vmem:[#allocation2 + $0x218] sm:$0xff] %vm6265_vm1, %v6139_v56  ;;  %v5949_v47 = vadd.f32 %v21158_v33, %v5307_v42  ;;  %14372 = vmatprep.mubr.msk.f32.mxu1 %vm6265_vm1, %v6669_v0  ;;  %5627 = vmatprep.mubr.f32.mxu0 %v25751_v27  ;;  %v6620_v40 = vld [vmem:[%s25567_s3 + $0x118] sm:$0xff] }
 0x74a   :  { %v6140_v36 = vmax.f32 %v5948_v63, 0.0  ;;  %7182 = vmatmul.mubr.f32.gmra.mrb[70].mxu1 %v6134_v10  ;;  %v16259_v56 = vpack.c.bf16 %v6620_v40, %v6618_v44 }
 0x74b   :  { %v6141_v9 = vmax.f32 %v5949_v47, 0.0  ;;  %v5311_v49 = vpop.f32.mrb[70].mxu0 }
 0x74c   :  { %6333 = vst [vmem:[#allocation2 + $0x220] sm:$0xff] %v6140_v36  ;;  %v5950_v28 = vadd.f32 %v21153_v26, %v5311_v49  ;;  %v5313_v22 = vpop.f32.mrb[71].mxu0  ;;  %14305 = vmatmul.mubr.msk.f32.gmra.mrb[176].mxu0 %vm280_vm0, %v14185_v12  ;;  %v6671_v6 = vld [vmem:[#allocation2 + $0x208] sm:$0xff]  ;;  %16260 = vmatprep.subr.bf16.mxu1 %v16259_v56  ;;  %v6617_v12 = vld [vmem:[%s25567_s3 + $0x100] sm:$0xff] }
 0x74d   :  { %6334 = vst.msk [vmem:[#allocation2 + $0x228] sm:$0xff] %vm6265_vm1, %v6141_v9  ;;  %v5951_v1 = vadd.f32 %v21158_v33, %v5313_v22  ;;  %14373 = vmatprep.mubr.msk.f32.mxu1 %vm6265_vm1, %v6671_v6  ;;  %5633 = vmatprep.mubr.f32.mxu0 %v25751_v27  ;;  %v6619_v9 = vld [vmem:[%s25567_s3 + $0x110] sm:$0xff]  ;;  %v14189_v49 = vld [vmem:[%s25566_s0 + $0x3e0] sm:$0xff] }
 0x74e   :  { %v6142_v46 = vmax.f32 %v5950_v28, 0.0  ;;  %7188 = vmatmul.mubr.f32.gmra.mrb[72].mxu1 %v6136_v57  ;;  %v16261_v28 = vpack.c.bf16 %v6619_v9, %v6617_v12 }
 0x74f   :  { %v6143_v30 = vmax.f32 %v5951_v1, 0.0  ;;  %v5317_v10 = vpop.f32.mrb[72].mxu0 }
 0x750   :  { %6335 = vst [vmem:[#allocation2 + $0x230] sm:$0xff] %v6142_v46  ;;  %v5952_v19 = vadd.f32 %v21153_v26, %v5317_v10  ;;  %v5319_v20 = vpop.f32.mrb[73].mxu0  ;;  %14306 = vmatmul.mubr.msk.f32.gmra.mrb[178].mxu0 %vm280_vm0, %v14186_v54  ;;  %v6673_v38 = vld [vmem:[#allocation2 + $0x218] sm:$0xff]  ;;  %16262 = vmatpush1.bf16.msra.mxu1 %v16261_v28 }
 0x751   :  { %6336 = vst.msk [vmem:[#allocation2 + $0x238] sm:$0xff] %vm6265_vm1, %v6143_v30  ;;  %v5953_v45 = vadd.f32 %v21158_v33, %v5319_v20  ;;  %14374 = vmatprep.mubr.msk.f32.mxu1 %vm6265_vm1, %v6673_v38  ;;  %5639 = vmatprep.mubr.f32.mxu0 %v25751_v27 }
 0x752   :  { %v6144_v55 = vmax.f32 %v5952_v19, 0.0  ;;  %7194 = vmatmul.mubr.f32.gmra.mrb[74].mxu1 %v6138_v51 }
 0x753   :  { %v6145_v39 = vmax.f32 %v5953_v45, 0.0  ;;  %v5323_v57 = vpop.f32.mrb[74].mxu0 }
 0x754   :  { %6337 = vst [vmem:[#allocation2 + $0x240] sm:$0xff] %v6144_v55  ;;  %v5954_v2 = vadd.f32 %v21153_v26, %v5323_v57  ;;  %v5325_v4 = vpop.f32.mrb[75].mxu0  ;;  %14307 = vmatmul.mubr.msk.f32.gmra.mrb[180].mxu0 %vm280_vm0, %v14187_v53  ;;  %v6675_v58 = vld [vmem:[#allocation2 + $0x228] sm:$0xff] }
 0x755   :  { %6338 = vst.msk [vmem:[#allocation2 + $0x248] sm:$0xff] %vm6265_vm1, %v6145_v39  ;;  %v5955_v11 = vadd.f32 %v21158_v33, %v5325_v4  ;;  %14375 = vmatprep.mubr.msk.f32.mxu1 %vm6265_vm1, %v6675_v58  ;;  %5645 = vmatprep.mubr.f32.mxu0 %v25751_v27 }
 0x756   :  { %v6146_v51 = vmax.f32 %v5954_v2, 0.0  ;;  %7200 = vmatmul.mubr.f32.gmra.mrb[76].mxu1 %v6140_v36 }
 0x757   :  { %v6147_v60 = vmax.f32 %v5955_v11, 0.0  ;;  %v5329_v63 = vpop.f32.mrb[76].mxu0 }
 0x758   :  { %6339 = vst [vmem:[#allocation2 + $0x250] sm:$0xff] %v6146_v51  ;;  %v5956_v42 = vadd.f32 %v21153_v26, %v5329_v63  ;;  %v5331_v0 = vpop.f32.mrb[77].mxu0  ;;  %14308 = vmatmul.mubr.msk.f32.gmra.mrb[182].mxu0 %vm280_vm0, %v14188_v3  ;;  %v6677_v47 = vld [vmem:[#allocation2 + $0x238] sm:$0xff] }
 0x759   :  { %6340 = vst.msk [vmem:[#allocation2 + $0x258] sm:$0xff] %vm6265_vm1, %v6147_v60  ;;  %v5957_v36 = vadd.f32 %v21158_v33, %v5331_v0  ;;  %14376 = vmatprep.mubr.msk.f32.mxu1 %vm6265_vm1, %v6677_v47  ;;  %5651 = vmatprep.mubr.f32.mxu0 %v25751_v27 }
 0x75a   :  { %v6148_v22 = vmax.f32 %v5956_v42, 0.0  ;;  %7206 = vmatmul.mubr.f32.gmra.mrb[78].mxu1 %v6142_v46  ;;  %v14190_v46 = vld [vmem:[%s25566_s0 + $0x3e8] sm:$0xff] }
 0x75b   :  { %v6149_v6 = vmax.f32 %v5957_v36, 0.0  ;;  %v5335_v1 = vpop.f32.mrb[78].mxu0 }
 0x75c   :  { %6341 = vst [vmem:[#allocation2 + $0x260] sm:$0xff] %v6148_v22  ;;  %v5958_v54 = vadd.f32 %v21153_v26, %v5335_v1  ;;  %v5337_v30 = vpop.f32.mrb[79].mxu0  ;;  %14309 = vmatmul.mubr.msk.f32.gmra.mrb[184].mxu0 %vm280_vm0, %v14189_v49  ;;  %v6679_v10 = vld [vmem:[#allocation2 + $0x248] sm:$0xff] }
 0x75d   :  { %6342 = vst.msk [vmem:[#allocation2 + $0x268] sm:$0xff] %vm6265_vm1, %v6149_v6  ;;  %v5959_v19 = vadd.f32 %v21158_v33, %v5337_v30  ;;  %14377 = vmatprep.mubr.msk.f32.mxu1 %vm6265_vm1, %v6679_v10  ;;  %5657 = vmatprep.mubr.f32.mxu0 %v25751_v27 }
 0x75e   :  { %v6150_v20 = vmax.f32 %v5958_v54, 0.0  ;;  %7212 = vmatmul.mubr.f32.gmra.mrb[80].mxu1 %v6144_v55  ;;  %v14191_v55 = vld [vmem:[%s25566_s0 + $0x3f0] sm:$0xff] }
 0x75f   :  { %v6151_v38 = vmax.f32 %v5959_v19, 0.0  ;;  %v5341_v45 = vpop.f32.mrb[80].mxu0 }
 0x760   :  { %6343 = vst [vmem:[#allocation2 + $0x270] sm:$0xff] %v6150_v20  ;;  %v5960_v53 = vadd.f32 %v21153_v26, %v5341_v45  ;;  %v5343_v39 = vpop.f32.mrb[81].mxu0  ;;  %14310 = vmatmul.mubr.msk.f32.gmra.mrb[186].mxu0 %vm280_vm0, %v14190_v46  ;;  %v6681_v57 = vld [vmem:[#allocation2 + $0x258] sm:$0xff]  ;;  %v14478_v45 = vld [vmem:[%s25567_s3 + $0x248] sm:$0xff] }
 0x761   :  { %6344 = vst.msk [vmem:[#allocation2 + $0x278] sm:$0xff] %vm6265_vm1, %v6151_v38  ;;  %v5961_v2 = vadd.f32 %v21158_v33, %v5343_v39  ;;  %14378 = vmatprep.mubr.msk.f32.mxu1 %vm6265_vm1, %v6681_v57  ;;  %5663 = vmatprep.mubr.f32.mxu0 %v25751_v27 }
 0x762   :  { %v6152_v4 = vmax.f32 %v5960_v53, 0.0  ;;  %7218 = vmatmul.mubr.f32.gmra.mrb[82].mxu1 %v6146_v51  ;;  %v14192_v51 = vld [vmem:[%s25566_s0 + $0x3f8] sm:$0xff] }
 0x763   :  { %v6153_v58 = vmax.f32 %v5961_v2, 0.0  ;;  %v5347_v11 = vpop.f32.mrb[82].mxu0  ;;  %v14480_v53 = vld [vmem:[%s25567_s3 + $0x258] sm:$0xff] }
 0x764   :  { %6345 = vst [vmem:[#allocation2 + $0x280] sm:$0xff] %v6152_v4  ;;  %v5962_v3 = vadd.f32 %v21153_v26, %v5347_v11  ;;  %v5349_v44 = vpop.f32.mrb[83].mxu0  ;;  %14311 = vmatmul.mubr.msk.f32.gmra.mrb[188].mxu0 %vm280_vm0, %v14191_v55  ;;  %v6683_v40 = vld [vmem:[#allocation2 + $0x268] sm:$0xff]  ;;  %v16263_v57 = vpack.c.bf16 %v14480_v53, %v14478_v45 }
 0x765   :  { %6346 = vst.msk [vmem:[#allocation2 + $0x288] sm:$0xff] %vm6265_vm1, %v6153_v58  ;;  %v5963_v56 = vadd.f32 %v21158_v33, %v5349_v44  ;;  %14379 = vmatprep.mubr.msk.f32.mxu1 %vm6265_vm1, %v6683_v40  ;;  %5669 = vmatprep.mubr.f32.mxu0 %v25751_v27 }
 0x766   :  { %v6154_v60 = vmax.f32 %v5962_v3, 0.0  ;;  %7224 = vmatmul.mubr.f32.gmra.mrb[84].mxu1 %v6148_v22  ;;  %16264 = vmatprep.subr.bf16.mxu1 %v16263_v57 }
 0x767   :  { %v6155_v63 = vmax.f32 %v5963_v56, 0.0  ;;  %v5353_v42 = vpop.f32.mrb[84].mxu0 }
 0x768   :  { %6347 = vst [vmem:[#allocation2 + $0x290] sm:$0xff] %v6154_v60  ;;  %v5964_v0 = vadd.f32 %v21153_v26, %v5353_v42  ;;  %v5355_v47 = vpop.f32.mrb[85].mxu0  ;;  %14312 = vmatmul.mubr.msk.f32.gmra.mrb[190].mxu0 %vm280_vm0, %v14192_v51  ;;  %v6685_v12 = vld [vmem:[#allocation2 + $0x278] sm:$0xff] }
 0x769   :  { %6348 = vst.msk [vmem:[#allocation2 + $0x298] sm:$0xff] %vm6265_vm1, %v6155_v63  ;;  %v5965_v9 = vadd.f32 %v21158_v33, %v5355_v47  ;;  %14380 = vmatprep.mubr.msk.f32.mxu1 %vm6265_vm1, %v6685_v12 }
 0x76a   :  { %v6156_v27 = vmax.f32 %v5964_v0, 0.0  ;;  %7230 = vmatmul.mubr.f32.gmra.mrb[86].mxu1 %v6150_v20 }
 0x76b   :  { %v6157_v36 = vmax.f32 %v5965_v9, 0.0  ;;  %v5359_v49 = vpop.f32.mrb[86].mxu0 }
 0x76c   :  { %6349 = vst [vmem:[#allocation2 + $0x2a0] sm:$0xff] %v6156_v27  ;;  %v5966_v28 = vadd.f32 %v21153_v26, %v5359_v49  ;;  %v5361_v22 = vpop.f32.mrb[87].mxu0  ;;  %v6687_v6 = vld [vmem:[#allocation2 + $0x288] sm:$0xff] }
 0x76d   :  { %6350 = vst.msk [vmem:[#allocation2 + $0x2a8] sm:$0xff] %vm6265_vm1, %v6157_v36  ;;  %v5967_v1 = vadd.f32 %v21158_v33, %v5361_v22  ;;  %14381 = vmatprep.mubr.msk.f32.mxu1 %vm6265_vm1, %v6687_v6 }
 0x76e   :  { %v6158_v54 = vmax.f32 %v5966_v28, 0.0  ;;  %7236 = vmatmul.mubr.f32.gmra.mrb[88].mxu1 %v6152_v4 }
 0x76f   :  { %v6159_v30 = vmax.f32 %v5967_v1, 0.0  ;;  %v5365_v10 = vpop.f32.mrb[88].mxu0 }
 0x770   :  { %6351 = vst [vmem:[#allocation2 + $0x2b0] sm:$0xff] %v6158_v54  ;;  %v5968_v19 = vadd.f32 %v21153_v26, %v5365_v10  ;;  %v5367_v46 = vpop.f32.mrb[89].mxu0  ;;  %v6689_v20 = vld [vmem:[#allocation2 + $0x298] sm:$0xff] }
 0x771   :  { %6352 = vst.msk [vmem:[#allocation2 + $0x2b8] sm:$0xff] %vm6265_vm1, %v6159_v30  ;;  %v5969_v38 = vadd.f32 %v21158_v33, %v5367_v46  ;;  %14382 = vmatprep.mubr.msk.f32.mxu1 %vm6265_vm1, %v6689_v20 }
 0x772   :  { %v6160_v39 = vmax.f32 %v5968_v19, 0.0  ;;  %7242 = vmatmul.mubr.f32.gmra.mrb[90].mxu1 %v6154_v60 }
 0x773   :  { %v6161_v2 = vmax.f32 %v5969_v38, 0.0  ;;  %v5371_v55 = vpop.f32.mrb[90].mxu0 }
 0x774   :  { %6353 = vst [vmem:[#allocation2 + $0x2c0] sm:$0xff] %v6160_v39  ;;  %v5970_v4 = vadd.f32 %v21153_v26, %v5371_v55  ;;  %v5373_v58 = vpop.f32.mrb[91].mxu0  ;;  %v6691_v11 = vld [vmem:[#allocation2 + $0x2a8] sm:$0xff] }
 0x775   :  { %6354 = vst.msk [vmem:[#allocation2 + $0x2c8] sm:$0xff] %vm6265_vm1, %v6161_v2  ;;  %v5971_v3 = vadd.f32 %v21158_v33, %v5373_v58  ;;  %14383 = vmatprep.mubr.msk.f32.mxu1 %vm6265_vm1, %v6691_v11 }
 0x776   :  { %v6162_v44 = vmax.f32 %v5970_v4, 0.0  ;;  %7248 = vmatmul.mubr.f32.gmra.mrb[92].mxu1 %v6156_v27 }
 0x777   :  { %v6163_v40 = vmax.f32 %v5971_v3, 0.0  ;;  %v5377_v56 = vpop.f32.mrb[92].mxu0 }
 0x778   :  { %6355 = vst [vmem:[#allocation2 + $0x2d0] sm:$0xff] %v6162_v44  ;;  %v5972_v51 = vadd.f32 %v21153_v26, %v5377_v56  ;;  %v5379_v60 = vpop.f32.mrb[93].mxu0  ;;  %v6693_v63 = vld [vmem:[#allocation2 + $0x2b8] sm:$0xff] }
 0x779   :  { %6356 = vst.msk [vmem:[#allocation2 + $0x2d8] sm:$0xff] %vm6265_vm1, %v6163_v40  ;;  %v5973_v42 = vadd.f32 %v21158_v33, %v5379_v60  ;;  %14384 = vmatprep.mubr.msk.f32.mxu1 %vm6265_vm1, %v6693_v63 }
 0x77a   :  { %v6164_v0 = vmax.f32 %v5972_v51, 0.0  ;;  %7254 = vmatmul.mubr.f32.gmra.mrb[94].mxu1 %v6158_v54 }
 0x77b   :  { %v6165_v47 = vmax.f32 %v5973_v42, 0.0  ;;  %v5383_v12 = vpop.f32.mrb[94].mxu0 }
 0x77c   :  { %6357 = vst [vmem:[#allocation2 + $0x2e0] sm:$0xff] %v6164_v0  ;;  %v5974_v9 = vadd.f32 %v21153_v26, %v5383_v12  ;;  %v5385_v27 = vpop.f32.mrb[95].mxu0  ;;  %v6695_v36 = vld [vmem:[#allocation2 + $0x2c8] sm:$0xff] }
 0x77d   :  { %6358 = vst.msk [vmem:[#allocation2 + $0x2e8] sm:$0xff] %vm6265_vm1, %v6165_v47  ;;  %v5975_v49 = vadd.f32 %v21158_v33, %v5385_v27  ;;  %14385 = vmatprep.mubr.msk.f32.mxu1 %vm6265_vm1, %v6695_v36 }
 0x77e   :  { %v6166_v28 = vmax.f32 %v5974_v9, 0.0  ;;  %7260 = vmatmul.mubr.f32.gmra.mrb[96].mxu1 %v6160_v39 }
 0x77f   :  { %v6167_v22 = vmax.f32 %v5975_v49, 0.0  ;;  %v5389_v6 = vpop.f32.mrb[96].mxu0 }
 0x780   :  { %6359 = vst [vmem:[#allocation2 + $0x2f0] sm:$0xff] %v6166_v28  ;;  %v5976_v1 = vadd.f32 %v21153_v26, %v5389_v6  ;;  %v5391_v54 = vpop.f32.mrb[97].mxu0  ;;  %v6697_v30 = vld [vmem:[#allocation2 + $0x2d8] sm:$0xff] }
 0x781   :  { %6360 = vst.msk [vmem:[#allocation2 + $0x2f8] sm:$0xff] %vm6265_vm1, %v6167_v22  ;;  %v5977_v10 = vadd.f32 %v21158_v33, %v5391_v54  ;;  %14386 = vmatprep.mubr.msk.f32.mxu1 %vm6265_vm1, %v6697_v30 }
 0x782   :  { %v6168_v19 = vmax.f32 %v5976_v1, 0.0  ;;  %7266 = vmatmul.mubr.f32.gmra.mrb[98].mxu1 %v6162_v44 }
 0x783   :  { %v6169_v46 = vmax.f32 %v5977_v10, 0.0  ;;  %v5395_v20 = vpop.f32.mrb[98].mxu0  ;;  %v22256_v18 = vld [vmem:[#allocation2 + $0x2e0] sm:$0xff] }
 0x784   :  { %6361 = vst [vmem:[#allocation2 + $0x300] sm:$0xff] %v6168_v19  ;;  %v5978_v38 = vadd.f32 %v21153_v26, %v5395_v20  ;;  %v5397_v45 = vpop.f32.mrb[99].mxu0  ;;  %v6699_v53 = vld [vmem:[#allocation2 + $0x2e8] sm:$0xff]  ;;  %25852 = vst [vmem:[#allocation9_spill] sm:$0xff] %v22256_v18 }
 0x785   :  { %6362 = vst.msk [vmem:[#allocation2 + $0x308] sm:$0xff] %vm6265_vm1, %v6169_v46  ;;  %v5979_v39 = vadd.f32 %v21158_v33, %v5397_v45  ;;  %14387 = vmatprep.mubr.msk.f32.mxu1 %vm6265_vm1, %v6699_v53 }
 0x786   :  { %v6170_v57 = vmax.f32 %v5978_v38, 0.0  ;;  %7272 = vmatmul.mubr.f32.gmra.mrb[100].mxu1 %v6164_v0 }
 0x787   :  { %v6171_v2 = vmax.f32 %v5979_v39, 0.0  ;;  %v5401_v55 = vpop.f32.mrb[100].mxu0  ;;  %v22263_v16 = vld [vmem:[#allocation2 + $0x2f0] sm:$0xff] }
 0x788   :  { %6363 = vst [vmem:[#allocation2 + $0x310] sm:$0xff] %v6170_v57  ;;  %v5980_v4 = vadd.f32 %v21153_v26, %v5401_v55  ;;  %v5403_v58 = vpop.f32.mrb[101].mxu0  ;;  %v6701_v11 = vld [vmem:[#allocation2 + $0x2f8] sm:$0xff]  ;;  %25854 = vst [vmem:[#allocation11_spill] sm:$0xff] %v22263_v16 }
 0x789   :  { %6364 = vst.msk [vmem:[#allocation2 + $0x318] sm:$0xff] %vm6265_vm1, %v6171_v2  ;;  %v5981_v3 = vadd.f32 %v21158_v33, %v5403_v58  ;;  %14388 = vmatprep.mubr.msk.f32.mxu1 %vm6265_vm1, %v6701_v11  ;;  %v22259_v21 = vld [vmem:[#allocation2 + $0x2f8] sm:$0xff] }
 0x78a   :  { %v6172_v44 = vmax.f32 %v5980_v4, 0.0  ;;  %7278 = vmatmul.mubr.f32.gmra.mrb[102].mxu1 %v6166_v28  ;;  %25853 = vst [vmem:[#allocation10_spill] sm:$0xff] %v22259_v21 }
 0x78b   :  { %v6173_v40 = vmax.f32 %v5981_v3, 0.0  ;;  %v5407_v56 = vpop.f32.mrb[102].mxu0 }
 0x78c   :  { %6365 = vst [vmem:[#allocation2 + $0x320] sm:$0xff] %v6172_v44  ;;  %v5982_v51 = vadd.f32 %v21153_v26, %v5407_v56  ;;  %v5409_v60 = vpop.f32.mrb[103].mxu0  ;;  %v6703_v63 = vld [vmem:[#allocation2 + $0x308] sm:$0xff] }
 0x78d   :  { %6366 = vst.msk [vmem:[#allocation2 + $0x328] sm:$0xff] %vm6265_vm1, %v6173_v40  ;;  %v5983_v42 = vadd.f32 %v21158_v33, %v5409_v60  ;;  %14389 = vmatprep.mubr.msk.f32.mxu1 %vm6265_vm1, %v6703_v63 }
 0x78e   :  { %v6174_v0 = vmax.f32 %v5982_v51, 0.0  ;;  %7284 = vmatmul.mubr.f32.gmra.mrb[104].mxu1 %v6168_v19 }
 0x78f   :  { %v6175_v47 = vmax.f32 %v5983_v42, 0.0  ;;  %v5413_v12 = vpop.f32.mrb[104].mxu0 }
 0x790   :  { %6367 = vst [vmem:[#allocation2 + $0x330] sm:$0xff] %v6174_v0  ;;  %v5984_v9 = vadd.f32 %v21153_v26, %v5413_v12  ;;  %v5415_v27 = vpop.f32.mrb[105].mxu0  ;;  %v6705_v36 = vld [vmem:[#allocation2 + $0x318] sm:$0xff] }
 0x791   :  { %6368 = vst.msk [vmem:[#allocation2 + $0x338] sm:$0xff] %vm6265_vm1, %v6175_v47  ;;  %v5985_v49 = vadd.f32 %v21158_v33, %v5415_v27  ;;  %14390 = vmatprep.mubr.msk.f32.mxu1 %vm6265_vm1, %v6705_v36 }
 0x792   :  { %v6176_v28 = vmax.f32 %v5984_v9, 0.0  ;;  %7290 = vmatmul.mubr.f32.gmra.mrb[106].mxu1 %v6170_v57 }
 0x793   :  { %v6177_v22 = vmax.f32 %v5985_v49, 0.0  ;;  %v5419_v6 = vpop.f32.mrb[106].mxu0 }
 0x794   :  { %6369 = vst [vmem:[#allocation2 + $0x340] sm:$0xff] %v6176_v28  ;;  %v5986_v1 = vadd.f32 %v21153_v26, %v5419_v6  ;;  %v5421_v54 = vpop.f32.mrb[107].mxu0  ;;  %v6707_v30 = vld [vmem:[#allocation2 + $0x328] sm:$0xff] }
 0x795   :  { %6370 = vst.msk [vmem:[#allocation2 + $0x348] sm:$0xff] %vm6265_vm1, %v6177_v22  ;;  %v5987_v10 = vadd.f32 %v21158_v33, %v5421_v54  ;;  %14391 = vmatprep.mubr.msk.f32.mxu1 %vm6265_vm1, %v6707_v30 }
 0x796   :  { %v6178_v19 = vmax.f32 %v5986_v1, 0.0  ;;  %7296 = vmatmul.mubr.f32.gmra.mrb[108].mxu1 %v6172_v44 }
 0x797   :  { %v6179_v46 = vmax.f32 %v5987_v10, 0.0  ;;  %v5425_v20 = vpop.f32.mrb[108].mxu0 }
 0x798   :  { %6371 = vst [vmem:[#allocation2 + $0x350] sm:$0xff] %v6178_v19  ;;  %v5988_v38 = vadd.f32 %v21153_v26, %v5425_v20  ;;  %v5427_v45 = vpop.f32.mrb[109].mxu0  ;;  %v6709_v53 = vld [vmem:[#allocation2 + $0x338] sm:$0xff] }
 0x799   :  { %6372 = vst.msk [vmem:[#allocation2 + $0x358] sm:$0xff] %vm6265_vm1, %v6179_v46  ;;  %v5989_v39 = vadd.f32 %v21158_v33, %v5427_v45  ;;  %14392 = vmatprep.mubr.msk.f32.mxu1 %vm6265_vm1, %v6709_v53 }
 0x79a   :  { %v6180_v57 = vmax.f32 %v5988_v38, 0.0  ;;  %7302 = vmatmul.mubr.f32.gmra.mrb[110].mxu1 %v6174_v0 }
 0x79b   :  { %v6181_v2 = vmax.f32 %v5989_v39, 0.0  ;;  %v5431_v55 = vpop.f32.mrb[110].mxu0 }
 0x79c   :  { %6373 = vst [vmem:[#allocation2 + $0x360] sm:$0xff] %v6180_v57  ;;  %v5990_v4 = vadd.f32 %v21153_v26, %v5431_v55  ;;  %v5433_v58 = vpop.f32.mrb[111].mxu0  ;;  %v6711_v11 = vld [vmem:[#allocation2 + $0x348] sm:$0xff] }
 0x79d   :  { %6374 = vst.msk [vmem:[#allocation2 + $0x368] sm:$0xff] %vm6265_vm1, %v6181_v2  ;;  %v5991_v3 = vadd.f32 %v21158_v33, %v5433_v58  ;;  %14393 = vmatprep.mubr.msk.f32.mxu1 %vm6265_vm1, %v6711_v11 }
 0x79e   :  { %v6182_v44 = vmax.f32 %v5990_v4, 0.0  ;;  %7308 = vmatmul.mubr.f32.gmra.mrb[112].mxu1 %v6176_v28 }
 0x79f   :  { %v6183_v40 = vmax.f32 %v5991_v3, 0.0  ;;  %v5437_v56 = vpop.f32.mrb[112].mxu0 }
 0x7a0   :  { %6375 = vst [vmem:[#allocation2 + $0x370] sm:$0xff] %v6182_v44  ;;  %v5992_v51 = vadd.f32 %v21153_v26, %v5437_v56  ;;  %v5439_v60 = vpop.f32.mrb[113].mxu0  ;;  %v6713_v63 = vld [vmem:[#allocation2 + $0x358] sm:$0xff] }
 0x7a1   :  { %6376 = vst.msk [vmem:[#allocation2 + $0x378] sm:$0xff] %vm6265_vm1, %v6183_v40  ;;  %v5993_v42 = vadd.f32 %v21158_v33, %v5439_v60  ;;  %14394 = vmatprep.mubr.msk.f32.mxu1 %vm6265_vm1, %v6713_v63 }
 0x7a2   :  { %v6184_v0 = vmax.f32 %v5992_v51, 0.0  ;;  %7314 = vmatmul.mubr.f32.gmra.mrb[114].mxu1 %v6178_v19 }
 0x7a3   :  { %v6185_v47 = vmax.f32 %v5993_v42, 0.0  ;;  %v5443_v12 = vpop.f32.mrb[114].mxu0 }
 0x7a4   :  { %6377 = vst [vmem:[#allocation2 + $0x380] sm:$0xff] %v6184_v0  ;;  %v5994_v9 = vadd.f32 %v21153_v26, %v5443_v12  ;;  %v5445_v27 = vpop.f32.mrb[115].mxu0  ;;  %v6715_v36 = vld [vmem:[#allocation2 + $0x368] sm:$0xff] }
 0x7a5   :  { %6378 = vst.msk [vmem:[#allocation2 + $0x388] sm:$0xff] %vm6265_vm1, %v6185_v47  ;;  %v5995_v49 = vadd.f32 %v21158_v33, %v5445_v27  ;;  %14395 = vmatprep.mubr.msk.f32.mxu1 %vm6265_vm1, %v6715_v36 }
 0x7a6   :  { %v6186_v28 = vmax.f32 %v5994_v9, 0.0  ;;  %7320 = vmatmul.mubr.f32.gmra.mrb[116].mxu1 %v6180_v57 }
 0x7a7   :  { %v6187_v22 = vmax.f32 %v5995_v49, 0.0  ;;  %v5449_v6 = vpop.f32.mrb[116].mxu0 }
 0x7a8   :  { %6379 = vst [vmem:[#allocation2 + $0x390] sm:$0xff] %v6186_v28  ;;  %v5996_v1 = vadd.f32 %v21153_v26, %v5449_v6  ;;  %v5451_v54 = vpop.f32.mrb[117].mxu0  ;;  %v6717_v30 = vld [vmem:[#allocation2 + $0x378] sm:$0xff] }
 0x7a9   :  { %6380 = vst.msk [vmem:[#allocation2 + $0x398] sm:$0xff] %vm6265_vm1, %v6187_v22  ;;  %v5997_v10 = vadd.f32 %v21158_v33, %v5451_v54  ;;  %14396 = vmatprep.mubr.msk.f32.mxu1 %vm6265_vm1, %v6717_v30 }
 0x7aa   :  { %v6188_v19 = vmax.f32 %v5996_v1, 0.0  ;;  %7326 = vmatmul.mubr.f32.gmra.mrb[118].mxu1 %v6182_v44 }
 0x7ab   :  { %v6189_v46 = vmax.f32 %v5997_v10, 0.0  ;;  %v5455_v20 = vpop.f32.mrb[118].mxu0 }
 0x7ac   :  { %6381 = vst [vmem:[#allocation2 + $0x3a0] sm:$0xff] %v6188_v19  ;;  %v5998_v38 = vadd.f32 %v21153_v26, %v5455_v20  ;;  %v5457_v45 = vpop.f32.mrb[119].mxu0  ;;  %v6719_v53 = vld [vmem:[#allocation2 + $0x388] sm:$0xff] }
 0x7ad   :  { %6382 = vst.msk [vmem:[#allocation2 + $0x3a8] sm:$0xff] %vm6265_vm1, %v6189_v46  ;;  %v5999_v39 = vadd.f32 %v21158_v33, %v5457_v45  ;;  %14397 = vmatprep.mubr.msk.f32.mxu1 %vm6265_vm1, %v6719_v53 }
 0x7ae   :  { %v6190_v57 = vmax.f32 %v5998_v38, 0.0  ;;  %7332 = vmatmul.mubr.f32.gmra.mrb[120].mxu1 %v6184_v0 }
 0x7af   :  { %v6191_v2 = vmax.f32 %v5999_v39, 0.0  ;;  %v5461_v55 = vpop.f32.mrb[120].mxu0 }
 0x7b0   :  { %6383 = vst [vmem:[#allocation2 + $0x3b0] sm:$0xff] %v6190_v57  ;;  %v6000_v4 = vadd.f32 %v21153_v26, %v5461_v55  ;;  %v5463_v58 = vpop.f32.mrb[121].mxu0  ;;  %v6721_v11 = vld [vmem:[#allocation2 + $0x398] sm:$0xff] }
 0x7b1   :  { %6384 = vst.msk [vmem:[#allocation2 + $0x3b8] sm:$0xff] %vm6265_vm1, %v6191_v2  ;;  %v6001_v3 = vadd.f32 %v21158_v33, %v5463_v58  ;;  %14398 = vmatprep.mubr.msk.f32.mxu1 %vm6265_vm1, %v6721_v11 }
 0x7b2   :  { %v6192_v44 = vmax.f32 %v6000_v4, 0.0  ;;  %7338 = vmatmul.mubr.f32.gmra.mrb[122].mxu1 %v6186_v28 }
 0x7b3   :  { %v6193_v40 = vmax.f32 %v6001_v3, 0.0  ;;  %v5467_v56 = vpop.f32.mrb[122].mxu0 }
 0x7b4   :  { %6385 = vst [vmem:[#allocation2 + $0x3c0] sm:$0xff] %v6192_v44  ;;  %v6002_v51 = vadd.f32 %v21153_v26, %v5467_v56  ;;  %v5469_v60 = vpop.f32.mrb[123].mxu0  ;;  %v6723_v63 = vld [vmem:[#allocation2 + $0x3a8] sm:$0xff] }
 0x7b5   :  { %6386 = vst.msk [vmem:[#allocation2 + $0x3c8] sm:$0xff] %vm6265_vm1, %v6193_v40  ;;  %v6003_v42 = vadd.f32 %v21158_v33, %v5469_v60  ;;  %14399 = vmatprep.mubr.msk.f32.mxu1 %vm6265_vm1, %v6723_v63 }
 0x7b6   :  { %v6194_v0 = vmax.f32 %v6002_v51, 0.0  ;;  %7344 = vmatmul.mubr.f32.gmra.mrb[124].mxu1 %v6188_v19 }
 0x7b7   :  { %v6195_v47 = vmax.f32 %v6003_v42, 0.0  ;;  %v5473_v12 = vpop.f32.mrb[124].mxu0 }
 0x7b8   :  { %6387 = vst [vmem:[#allocation2 + $0x3d0] sm:$0xff] %v6194_v0  ;;  %v6004_v9 = vadd.f32 %v21153_v26, %v5473_v12  ;;  %v5475_v27 = vpop.f32.mrb[125].mxu0  ;;  %v6725_v36 = vld [vmem:[#allocation2 + $0x3b8] sm:$0xff] }
 0x7b9   :  { %6388 = vst.msk [vmem:[#allocation2 + $0x3d8] sm:$0xff] %vm6265_vm1, %v6195_v47  ;;  %v6005_v49 = vadd.f32 %v21158_v33, %v5475_v27  ;;  %14400 = vmatprep.mubr.msk.f32.mxu1 %vm6265_vm1, %v6725_v36 }
 0x7ba   :  { %v6196_v28 = vmax.f32 %v6004_v9, 0.0  ;;  %7350 = vmatmul.mubr.f32.gmra.mrb[126].mxu1 %v6190_v57 }
 0x7bb   :  { %v6197_v22 = vmax.f32 %v6005_v49, 0.0  ;;  %v5479_v6 = vpop.f32.mrb[126].mxu0 }
 0x7bc   :  { %6389 = vst [vmem:[#allocation2 + $0x3e0] sm:$0xff] %v6196_v28  ;;  %v6006_v1 = vadd.f32 %v21153_v26, %v5479_v6  ;;  %v5481_v54 = vpop.f32.mrb[127].mxu0  ;;  %v6727_v30 = vld [vmem:[#allocation2 + $0x3c8] sm:$0xff] }
 0x7bd   :  { %6390 = vst.msk [vmem:[#allocation2 + $0x3e8] sm:$0xff] %vm6265_vm1, %v6197_v22  ;;  %v6007_v10 = vadd.f32 %v21158_v33, %v5481_v54  ;;  %14401 = vmatprep.mubr.msk.f32.mxu1 %vm6265_vm1, %v6727_v30 }
 0x7be   :  { %v6198_v19 = vmax.f32 %v6006_v1, 0.0  ;;  %7356 = vmatmul.mubr.f32.gmra.mrb[128].mxu1 %v6192_v44 }
 0x7bf   :  { %v6199_v46 = vmax.f32 %v6007_v10, 0.0  ;;  %v5485_v20 = vpop.f32.mrb[128].mxu0 }
 0x7c0   :  { %6391 = vst [vmem:[#allocation2 + $0x3f0] sm:$0xff] %v6198_v19  ;;  %v6008_v38 = vadd.f32 %v21153_v26, %v5485_v20  ;;  %v5487_v45 = vpop.f32.mrb[129].mxu0  ;;  %v6729_v53 = vld [vmem:[#allocation2 + $0x3d8] sm:$0xff] }
 0x7c1   :  { %6392 = vst.msk [vmem:[#allocation2 + $0x3f8] sm:$0xff] %vm6265_vm1, %v6199_v46  ;;  %v6009_v39 = vadd.f32 %v21158_v33, %v5487_v45  ;;  %14402 = vmatprep.mubr.msk.f32.mxu1 %vm6265_vm1, %v6729_v53 }
 0x7c2   :  { %v6200_v57 = vmax.f32 %v6008_v38, 0.0  ;;  %7362 = vmatmul.mubr.f32.gmra.mrb[130].mxu1 %v6194_v0 }
 0x7c3   :  { %v6201_v2 = vmax.f32 %v6009_v39, 0.0  ;;  %v5491_v55 = vpop.f32.mrb[130].mxu0 }
 0x7c4   :  { %6393 = vst [vmem:[#allocation2 + $0x400] sm:$0xff] %v6200_v57  ;;  %v6010_v4 = vadd.f32 %v21153_v26, %v5491_v55  ;;  %v5493_v58 = vpop.f32.mrb[131].mxu0  ;;  %v6731_v11 = vld [vmem:[#allocation2 + $0x3e8] sm:$0xff] }
 0x7c5   :  { %6394 = vst.msk [vmem:[#allocation2 + $0x408] sm:$0xff] %vm6265_vm1, %v6201_v2  ;;  %v6011_v3 = vadd.f32 %v21158_v33, %v5493_v58  ;;  %14403 = vmatprep.mubr.msk.f32.mxu1 %vm6265_vm1, %v6731_v11 }
 0x7c6   :  { %v6202_v44 = vmax.f32 %v6010_v4, 0.0  ;;  %7368 = vmatmul.mubr.f32.gmra.mrb[132].mxu1 %v6196_v28 }
 0x7c7   :  { %v6203_v40 = vmax.f32 %v6011_v3, 0.0  ;;  %v5497_v56 = vpop.f32.mrb[132].mxu0 }
 0x7c8   :  { %6395 = vst [vmem:[#allocation2 + $0x410] sm:$0xff] %v6202_v44  ;;  %v6012_v51 = vadd.f32 %v21153_v26, %v5497_v56  ;;  %v5499_v60 = vpop.f32.mrb[133].mxu0  ;;  %v6733_v63 = vld [vmem:[#allocation2 + $0x3f8] sm:$0xff] }
 0x7c9   :  { %6396 = vst.msk [vmem:[#allocation2 + $0x418] sm:$0xff] %vm6265_vm1, %v6203_v40  ;;  %v6013_v42 = vadd.f32 %v21158_v33, %v5499_v60  ;;  %14404 = vmatprep.mubr.msk.f32.mxu1 %vm6265_vm1, %v6733_v63 }
 0x7ca   :  { %v6204_v0 = vmax.f32 %v6012_v51, 0.0  ;;  %7374 = vmatmul.mubr.f32.gmra.mrb[134].mxu1 %v6198_v19 }
 0x7cb   :  { %v6205_v47 = vmax.f32 %v6013_v42, 0.0  ;;  %v5503_v12 = vpop.f32.mrb[134].mxu0 }
 0x7cc   :  { %6397 = vst [vmem:[#allocation2 + $0x420] sm:$0xff] %v6204_v0  ;;  %v6014_v9 = vadd.f32 %v21153_v26, %v5503_v12  ;;  %v5505_v27 = vpop.f32.mrb[135].mxu0  ;;  %v6735_v36 = vld [vmem:[#allocation2 + $0x408] sm:$0xff] }
 0x7cd   :  { %6398 = vst.msk [vmem:[#allocation2 + $0x428] sm:$0xff] %vm6265_vm1, %v6205_v47  ;;  %v6015_v49 = vadd.f32 %v21158_v33, %v5505_v27  ;;  %14405 = vmatprep.mubr.msk.f32.mxu1 %vm6265_vm1, %v6735_v36 }
 0x7ce   :  { %v6206_v28 = vmax.f32 %v6014_v9, 0.0  ;;  %7380 = vmatmul.mubr.f32.gmra.mrb[136].mxu1 %v6200_v57 }
 0x7cf   :  { %v6207_v22 = vmax.f32 %v6015_v49, 0.0  ;;  %v5509_v6 = vpop.f32.mrb[136].mxu0 }
 0x7d0   :  { %6399 = vst [vmem:[#allocation2 + $0x430] sm:$0xff] %v6206_v28  ;;  %v6016_v1 = vadd.f32 %v21153_v26, %v5509_v6  ;;  %v5511_v54 = vpop.f32.mrb[137].mxu0  ;;  %v6737_v30 = vld [vmem:[#allocation2 + $0x418] sm:$0xff] }
 0x7d1   :  { %6400 = vst.msk [vmem:[#allocation2 + $0x438] sm:$0xff] %vm6265_vm1, %v6207_v22  ;;  %v6017_v10 = vadd.f32 %v21158_v33, %v5511_v54  ;;  %14406 = vmatprep.mubr.msk.f32.mxu1 %vm6265_vm1, %v6737_v30 }
 0x7d2   :  { %v6208_v19 = vmax.f32 %v6016_v1, 0.0  ;;  %7386 = vmatmul.mubr.f32.gmra.mrb[138].mxu1 %v6202_v44 }
 0x7d3   :  { %v6209_v46 = vmax.f32 %v6017_v10, 0.0  ;;  %v5515_v20 = vpop.f32.mrb[138].mxu0 }
 0x7d4   :  { %6401 = vst [vmem:[#allocation2 + $0x440] sm:$0xff] %v6208_v19  ;;  %v6018_v38 = vadd.f32 %v21153_v26, %v5515_v20  ;;  %v5517_v45 = vpop.f32.mrb[139].mxu0  ;;  %v6739_v53 = vld [vmem:[#allocation2 + $0x428] sm:$0xff] }
 0x7d5   :  { %6402 = vst.msk [vmem:[#allocation2 + $0x448] sm:$0xff] %vm6265_vm1, %v6209_v46  ;;  %v6019_v39 = vadd.f32 %v21158_v33, %v5517_v45  ;;  %14407 = vmatprep.mubr.msk.f32.mxu1 %vm6265_vm1, %v6739_v53 }
 0x7d6   :  { %v6210_v57 = vmax.f32 %v6018_v38, 0.0  ;;  %7392 = vmatmul.mubr.f32.gmra.mrb[140].mxu1 %v6204_v0 }
 0x7d7   :  { %v6211_v2 = vmax.f32 %v6019_v39, 0.0  ;;  %v5521_v55 = vpop.f32.mrb[140].mxu0  ;;  %v14477_v39 = vld [vmem:[%s25567_s3 + $0x240] sm:$0xff] }
 0x7d8   :  { %6403 = vst [vmem:[#allocation2 + $0x450] sm:$0xff] %v6210_v57  ;;  %v6020_v4 = vadd.f32 %v21153_v26, %v5521_v55  ;;  %v5523_v58 = vpop.f32.mrb[141].mxu0  ;;  %v6741_v11 = vld [vmem:[#allocation2 + $0x438] sm:$0xff]  ;;  %v14482_v55 = vld [vmem:[%s25567_s3 + $0x268] sm:$0xff] }
 0x7d9   :  { %6404 = vst.msk [vmem:[#allocation2 + $0x458] sm:$0xff] %vm6265_vm1, %v6211_v2  ;;  %v6021_v3 = vadd.f32 %v21158_v33, %v5523_v58  ;;  %14408 = vmatprep.mubr.msk.f32.mxu1 %vm6265_vm1, %v6741_v11  ;;  %v6458_v11 = vld [vmem:[#allocation2 + $0x8] sm:$0xff] }
 0x7da   :  { %v6212_v44 = vmax.f32 %v6020_v4, 0.0  ;;  %7398 = vmatmul.mubr.f32.gmra.mrb[142].mxu1 %v6206_v28  ;;  %v14484_v4 = vld [vmem:[%s25567_s3 + $0x278] sm:$0xff] }
 0x7db   :  { %v6213_v40 = vmax.f32 %v6021_v3, 0.0  ;;  %v5527_v56 = vpop.f32.mrb[142].mxu0 }
 0x7dc   :  { %6405 = vst [vmem:[#allocation2 + $0x460] sm:$0xff] %v6212_v44  ;;  %v6022_v51 = vadd.f32 %v21153_v26, %v5527_v56  ;;  %v5529_v60 = vpop.f32.mrb[143].mxu0  ;;  %v6743_v63 = vld [vmem:[#allocation2 + $0x448] sm:$0xff] }
 0x7dd   :  { %6406 = vst.msk [vmem:[#allocation2 + $0x468] sm:$0xff] %vm6265_vm1, %v6213_v40  ;;  %v6023_v42 = vadd.f32 %v21158_v33, %v5529_v60  ;;  %14409 = vmatprep.mubr.msk.f32.mxu1 %vm6265_vm1, %v6743_v63  ;;  %v16267_v60 = vpack.c.bf16 %v14484_v4, %v14482_v55  ;;  %v14481_v63 = vld [vmem:[%s25567_s3 + $0x260] sm:$0xff] }
 0x7de   :  { %v6214_v0 = vmax.f32 %v6022_v51, 0.0  ;;  %7404 = vmatmul.mubr.f32.gmra.mrb[144].mxu1 %v6208_v19 }
 0x7df   :  { %v6215_v47 = vmax.f32 %v6023_v42, 0.0  ;;  %v5533_v12 = vpop.f32.mrb[144].mxu0  ;;  %v14483_v42 = vld [vmem:[%s25567_s3 + $0x270] sm:$0xff] }
 0x7e0   :  { %6407 = vst [vmem:[#allocation2 + $0x470] sm:$0xff] %v6214_v0  ;;  %v6024_v9 = vadd.f32 %v21153_v26, %v5533_v12  ;;  %v5535_v27 = vpop.f32.mrb[145].mxu0  ;;  %v6745_v36 = vld [vmem:[#allocation2 + $0x458] sm:$0xff]  ;;  %v14486_v12 = vld [vmem:[%s25567_s3 + $0x288] sm:$0xff] }
 0x7e1   :  { %6408 = vst.msk [vmem:[#allocation2 + $0x478] sm:$0xff] %vm6265_vm1, %v6215_v47  ;;  %v6025_v49 = vadd.f32 %v21158_v33, %v5535_v27  ;;  %14410 = vmatprep.mubr.msk.f32.mxu1 %vm6265_vm1, %v6745_v36  ;;  %v6457_v47 = vld [vmem:[#allocation2] sm:$0xff]  ;;  %v6460_v36 = vld [vmem:[#allocation2 + $0x18] sm:$0xff] }
 0x7e2   :  { %v6216_v28 = vmax.f32 %v6024_v9, 0.0  ;;  %7410 = vmatmul.mubr.f32.gmra.mrb[146].mxu1 %v6210_v57  ;;  %v14479_v57 = vld [vmem:[%s25567_s3 + $0x250] sm:$0xff]  ;;  %v14488_v9 = vld [vmem:[%s25567_s3 + $0x298] sm:$0xff] }
 0x7e3   :  { %v6217_v22 = vmax.f32 %v6025_v49, 0.0  ;;  %v5539_v6 = vpop.f32.mrb[146].mxu0  ;;  %v16265_v40 = vpack.c.bf16 %v14479_v57, %v14477_v39 }
 0x7e4   :  { %6409 = vst [vmem:[#allocation2 + $0x480] sm:$0xff] %v6216_v28  ;;  %v6026_v1 = vadd.f32 %v21153_v26, %v5539_v6  ;;  %v5541_v54 = vpop.f32.mrb[147].mxu0  ;;  %v6747_v30 = vld [vmem:[#allocation2 + $0x468] sm:$0xff] }
 0x7e5   :  { %6410 = vst.msk [vmem:[#allocation2 + $0x488] sm:$0xff] %vm6265_vm1, %v6217_v22  ;;  %v6027_v10 = vadd.f32 %v21158_v33, %v5541_v54  ;;  %14411 = vmatprep.mubr.msk.f32.mxu1 %vm6265_vm1, %v6747_v30  ;;  %v16269_v22 = vpack.c.bf16 %v14483_v42, %v14481_v63  ;;  %v16271_v54 = vpack.c.bf16 %v14488_v9, %v14486_v12  ;;  %v14485_v30 = vld [vmem:[%s25567_s3 + $0x280] sm:$0xff]  ;;  %v6464_v63 = vld [vmem:[#allocation2 + $0x38] sm:$0xff] }
 0x7e6   :  { %v6218_v19 = vmax.f32 %v6026_v1, 0.0  ;;  %7416 = vmatmul.mubr.f32.gmra.mrb[148].mxu1 %v6212_v44 }
 0x7e7   :  { %v6219_v46 = vmax.f32 %v6027_v10, 0.0  ;;  %v5545_v20 = vpop.f32.mrb[148].mxu0  ;;  %v14487_v10 = vld [vmem:[%s25567_s3 + $0x290] sm:$0xff] }
 0x7e8   :  { %6411 = vst [vmem:[#allocation2 + $0x490] sm:$0xff] %v6218_v19  ;;  %v6028_v38 = vadd.f32 %v21153_v26, %v5545_v20  ;;  %v5547_v45 = vpop.f32.mrb[149].mxu0  ;;  %v6749_v53 = vld [vmem:[#allocation2 + $0x478] sm:$0xff]  ;;  %v14490_v20 = vld [vmem:[%s25567_s3 + $0x2a8] sm:$0xff] }
 0x7e9   :  { %6412 = vst.msk [vmem:[#allocation2 + $0x498] sm:$0xff] %vm6265_vm1, %v6219_v46  ;;  %v6029_v2 = vadd.f32 %v21158_v33, %v5547_v45  ;;  %14412 = vmatprep.mubr.msk.f32.mxu1 %vm6265_vm1, %v6749_v53  ;;  %v6459_v46 = vld [vmem:[#allocation2 + $0x10] sm:$0xff]  ;;  %v6462_v53 = vld [vmem:[#allocation2 + $0x28] sm:$0xff] }
 0x7ea   :  { %v6220_v58 = vmax.f32 %v6028_v38, 0.0  ;;  %7422 = vmatmul.mubr.f32.gmra.mrb[150].mxu1 %v6214_v0  ;;  %v14492_v38 = vld [vmem:[%s25567_s3 + $0x2b8] sm:$0xff] }
 0x7eb   :  { %v6221_v3 = vmax.f32 %v6029_v2, 0.0  ;;  %v5551_v44 = vpop.f32.mrb[150].mxu0  ;;  %14413 = vmatprep.mubr.msk.f32.mxu1 %vm6265_vm1, %v6458_v11  ;;  %v16273_v2 = vpack.c.bf16 %v14487_v10, %v14485_v30  ;;  %v14489_v11 = vld [vmem:[%s25567_s3 + $0x2a0] sm:$0xff] }
 0x7ec   :  { %6413 = vst [vmem:[#allocation2 + $0x4a0] sm:$0xff] %v6220_v58  ;;  %v6030_v56 = vadd.f32 %v21153_v26, %v5551_v44  ;;  %v5553_v51 = vpop.f32.mrb[151].mxu0  ;;  %v16275_v58 = vpack.c.bf16 %v14492_v38, %v14490_v20 }
 0x7ed   :  { %6414 = vst.msk [vmem:[#allocation2 + $0x4a8] sm:$0xff] %vm6265_vm1, %v6221_v3  ;;  %v6031_v0 = vadd.f32 %v21158_v33, %v5553_v51  ;;  %v14491_v3 = vld [vmem:[%s25567_s3 + $0x2b0] sm:$0xff]  ;;  %v14496_v51 = vld [vmem:[%s25567_s3 + $0x2d8] sm:$0xff] }
 0x7ee   :  { %v6222_v27 = vmax.f32 %v6030_v56, 0.0  ;;  %7685 = vmatmul.mubr.f32.vlgmr.msra.gmra.mrb[24].mxu1 %v6457_v47  ;;  %v14494_v56 = vld [vmem:[%s25567_s3 + $0x2c8] sm:$0xff]  ;;  %v16277_v47 = vpack.c.bf16 %v14491_v3, %v14489_v11 }
 0x7ef   :  { %v6223_v49 = vmax.f32 %v6031_v0, 0.0  ;;  %v5557_v28 = vpop.f32.mrb[152].mxu0  ;;  %14414 = vmatprep.mubr.msk.f32.mxu1 %vm6265_vm1, %v6460_v36  ;;  %16266 = vmatpush1.bf16.msra.mxu1 %v16265_v40  ;;  %v6461_v40 = vld [vmem:[#allocation2 + $0x20] sm:$0xff] }
 0x7f0   :  { %6415 = vst [vmem:[#allocation2 + $0x4b0] sm:$0xff] %v6222_v27  ;;  %v6032_v6 = vadd.f32 %v21153_v26, %v5557_v28  ;;  %v5559_v1 = vpop.f32.mrb[153].mxu0  ;;  %16268 = vmatprep.subr.bf16.mxu1 %v16267_v60  ;;  %v16279_v27 = vpack.c.bf16 %v14496_v51, %v14494_v56  ;;  %v14493_v36 = vld [vmem:[%s25567_s3 + $0x2c0] sm:$0xff]  ;;  %v6467_v51 = vld [vmem:[#allocation2 + $0x50] sm:$0xff] }
 0x7f1   :  { %6416 = vst.msk [vmem:[#allocation2 + $0x4b8] sm:$0xff] %vm6265_vm1, %v6223_v49  ;;  %v6033_v19 = vadd.f32 %v21158_v33, %v5559_v1  ;;  %v14495_v49 = vld [vmem:[%s25567_s3 + $0x2d0] sm:$0xff]  ;;  %v6466_v1 = vld [vmem:[#allocation2 + $0x48] sm:$0xff] }
 0x7f2   :  { %v6224_v45 = vmax.f32 %v6032_v6, 0.0  ;;  %7691 = vmatmul.mubr.f32.gmra.mrb[26].mxu1 %v6459_v46  ;;  %v16281_v10 = vpack.c.bf16 %v14495_v49, %v14493_v36  ;;  %v14500_v46 = vld [vmem:[%s25567_s3 + $0x2f8] sm:$0xff] }
 0x7f3   :  { %v6225_v39 = vmax.f32 %v6033_v19, 0.0  ;;  %v5563_v57 = vpop.f32.mrb[154].mxu0  ;;  %14415 = vmatprep.mubr.msk.f32.mxu1 %vm6265_vm1, %v6462_v53  ;;  %16270 = vmatpush1.bf16.msra.mxu1 %v16269_v22  ;;  %v6463_v22 = vld [vmem:[#allocation2 + $0x30] sm:$0xff]  ;;  %v14498_v19 = vld [vmem:[%s25567_s3 + $0x2e8] sm:$0xff]  ;;  %v6472_v49 = vld [vmem:[#allocation2 + $0x78] sm:$0xff] }
 0x7f4   :  { %6417 = vst [vmem:[#allocation2 + $0x4c0] sm:$0xff] %v6224_v45  ;;  %v6034_v55 = vadd.f32 %v21153_v26, %v5563_v57  ;;  %v5565_v4 = vpop.f32.mrb[155].mxu0  ;;  %16272 = vmatprep.subr.bf16.mxu1 %v16271_v54  ;;  %v16283_v45 = vpack.c.bf16 %v14500_v46, %v14498_v19  ;;  %v6474_v19 = vld [vmem:[#allocation2 + $0x88] sm:$0xff] }
 0x7f5   :  { %6418 = vst.msk [vmem:[#allocation2 + $0x4c8] sm:$0xff] %vm6265_vm1, %v6225_v39  ;;  %v6035_v44 = vadd.f32 %v21158_v33, %v5565_v4  ;;  %v6465_v39 = vld [vmem:[#allocation2 + $0x40] sm:$0xff]  ;;  %v14499_v4 = vld [vmem:[%s25567_s3 + $0x2f0] sm:$0xff] }
 0x7f6   :  { %v6226_v60 = vmax.f32 %v6034_v55, 0.0  ;;  %7697 = vmatmul.mubr.f32.gmra.mrb[28].mxu1 %v6461_v40  ;;  %v14497_v55 = vld [vmem:[%s25567_s3 + $0x2e0] sm:$0xff] }
 0x7f7   :  { %v6227_v42 = vmax.f32 %v6035_v44, 0.0  ;;  %v5569_v0 = vpop.f32.mrb[156].mxu0  ;;  %14416 = vmatprep.mubr.msk.f32.mxu1 %vm6265_vm1, %v6464_v63  ;;  %16274 = vmatpush1.bf16.msra.mxu1 %v16273_v2  ;;  %v6468_v2 = vld [vmem:[#allocation2 + $0x58] sm:$0xff]  ;;  %v16285_v3 = vpack.c.bf16 %v14499_v4, %v14497_v55  ;;  %v6470_v63 = vld [vmem:[#allocation2 + $0x68] sm:$0xff] }
 0x7f8   :  { %6419 = vst [vmem:[#allocation2 + $0x4d0] sm:$0xff] %v6226_v60  ;;  %v6036_v12 = vadd.f32 %v21153_v26, %v5569_v0  ;;  %v5571_v9 = vpop.f32.mrb[157].mxu0  ;;  %16276 = vmatprep.subr.bf16.mxu1 %v16275_v58 }
 0x7f9   :  { %6420 = vst.msk [vmem:[#allocation2 + $0x4d8] sm:$0xff] %vm6265_vm1, %v6227_v42  ;;  %v6037_v28 = vadd.f32 %v21158_v33, %v5571_v9 }
 0x7fa   :  { %v6228_v6 = vmax.f32 %v6036_v12, 0.0  ;;  %7703 = vmatmul.mubr.f32.gmra.mrb[30].mxu1 %v6463_v22 }
 0x7fb   :  { %v6229_v54 = vmax.f32 %v6037_v28, 0.0  ;;  %v5575_v30 = vpop.f32.mrb[158].mxu0  ;;  %14417 = vmatprep.mubr.msk.f32.mxu1 %vm6265_vm1, %v6466_v1  ;;  %16278 = vmatpush1.bf16.msra.mxu1 %v16277_v47 }
 0x7fc   :  { %6421 = vst [vmem:[#allocation2 + $0x4e0] sm:$0xff] %v6228_v6  ;;  %v6038_v20 = vadd.f32 %v21153_v26, %v5575_v30  ;;  %v5577_v38 = vpop.f32.mrb[159].mxu0  ;;  %16280 = vmatprep.subr.bf16.mxu1 %v16279_v27  ;;  %v6469_v27 = vld [vmem:[#allocation2 + $0x60] sm:$0xff]  ;;  %v6471_v30 = vld [vmem:[#allocation2 + $0x70] sm:$0xff] }
 0x7fd   :  { %6422 = vst.msk [vmem:[#allocation2 + $0x4e8] sm:$0xff] %vm6265_vm1, %v6229_v54  ;;  %v6039_v53 = vadd.f32 %v21158_v33, %v5577_v38 }
 0x7fe   :  { %v6230_v57 = vmax.f32 %v6038_v20, 0.0  ;;  %7709 = vmatmul.mubr.f32.gmra.mrb[32].mxu1 %v6465_v39  ;;  %v6473_v39 = vld [vmem:[#allocation2 + $0x80] sm:$0xff] }
 0x7ff   :  { %v6231_v58 = vmax.f32 %v6039_v53, 0.0  ;;  %v5581_v11 = vpop.f32.mrb[160].mxu0  ;;  %14418 = vmatprep.mubr.msk.f32.mxu1 %vm6265_vm1, %v6468_v2  ;;  %16282 = vmatpush1.bf16.msra.mxu1 %v16281_v10  ;;  %v6476_v2 = vld [vmem:[#allocation2 + $0x98] sm:$0xff] }
 0x800   :  { %6423 = vst [vmem:[#allocation2 + $0x4f0] sm:$0xff] %v6230_v57  ;;  %v6040_v44 = vadd.f32 %v21153_v26, %v5581_v11  ;;  %v5583_v40 = vpop.f32.mrb[161].mxu0  ;;  %16284 = vmatprep.subr.bf16.mxu1 %v16283_v45 }
 0x801   :  { %6424 = vst.msk [vmem:[#allocation2 + $0x4f8] sm:$0xff] %vm6265_vm1, %v6231_v58  ;;  %v6041_v56 = vadd.f32 %v21158_v33, %v5583_v40 }
 0x802   :  { %v6232_v60 = vmax.f32 %v6040_v44, 0.0  ;;  %7715 = vmatmul.mubr.f32.gmra.mrb[34].mxu1 %v6467_v51  ;;  %v6475_v44 = vld [vmem:[#allocation2 + $0x90] sm:$0xff] }
 0x803   :  { %v6233_v42 = vmax.f32 %v6041_v56, 0.0  ;;  %v5587_v0 = vpop.f32.mrb[162].mxu0  ;;  %14419 = vmatprep.mubr.msk.f32.mxu1 %vm6265_vm1, %v6470_v63  ;;  %16286 = vmatpush1.bf16.msra.mxu1 %v16285_v3  ;;  %v6478_v56 = vld [vmem:[#allocation2 + $0xa8] sm:$0xff] }
 0x804   :  { %6425 = vst [vmem:[#allocation2 + $0x500] sm:$0xff] %v6232_v60  ;;  %v6042_v47 = vadd.f32 %v21153_v26, %v5587_v0  ;;  %v5589_v12 = vpop.f32.mrb[163].mxu0 }
 0x805   :  { %6426 = vst.msk [vmem:[#allocation2 + $0x508] sm:$0xff] %vm6265_vm1, %v6233_v42  ;;  %v6043_v9 = vadd.f32 %v21158_v33, %v5589_v12  ;;  %v6477_v12 = vld [vmem:[#allocation2 + $0xa0] sm:$0xff] }
 0x806   :  { %v6234_v36 = vmax.f32 %v6042_v47, 0.0  ;;  %7721 = vmatmul.mubr.f32.gmra.mrb[36].mxu1 %v6469_v27 }
 0x807   :  { %v6235_v28 = vmax.f32 %v6043_v9, 0.0  ;;  %v5593_v22 = vpop.f32.mrb[164].mxu0  ;;  %14420 = vmatprep.mubr.msk.f32.mxu1 %vm6265_vm1, %v6472_v49  ;;  %v6480_v9 = vld [vmem:[#allocation2 + $0xb8] sm:$0xff] }
 0x808   :  { %6427 = vst [vmem:[#allocation2 + $0x510] sm:$0xff] %v6234_v36  ;;  %v6044_v6 = vadd.f32 %v21153_v26, %v5593_v22  ;;  %v5595_v1 = vpop.f32.mrb[165].mxu0 }
 0x809   :  { %6428 = vst.msk [vmem:[#allocation2 + $0x518] sm:$0xff] %vm6265_vm1, %v6235_v28  ;;  %v6045_v54 = vadd.f32 %v21158_v33, %v5595_v1 }
 0x80a   :  { %v6236_v10 = vmax.f32 %v6044_v6, 0.0  ;;  %7727 = vmatmul.mubr.f32.gmra.mrb[38].mxu1 %v6471_v30  ;;  %v6479_v30 = vld [vmem:[#allocation2 + $0xb0] sm:$0xff] }
 0x80b   :  { %v6237_v46 = vmax.f32 %v6045_v54, 0.0  ;;  %v5599_v20 = vpop.f32.mrb[166].mxu0  ;;  %14421 = vmatprep.mubr.msk.f32.mxu1 %vm6265_vm1, %v6474_v19  ;;  %v6482_v19 = vld [vmem:[#allocation2 + $0xc8] sm:$0xff] }
 0x80c   :  { %6429 = vst [vmem:[#allocation2 + $0x520] sm:$0xff] %v6236_v10  ;;  %v6046_v38 = vadd.f32 %v21153_v26, %v5599_v20  ;;  %v5601_v45 = vpop.f32.mrb[167].mxu0 }
 0x80d   :  { %6430 = vst.msk [vmem:[#allocation2 + $0x528] sm:$0xff] %vm6265_vm1, %v6237_v46  ;;  %v6047_v53 = vadd.f32 %v21158_v33, %v5601_v45  ;;  %v14501_v46 = vld [vmem:[%s25567_s3 + $0x300] sm:$0xff] }
 0x80e   :  { %v6238_v57 = vmax.f32 %v6046_v38, 0.0  ;;  %7733 = vmatmul.mubr.f32.gmra.mrb[40].mxu1 %v6473_v39 }
 0x80f   :  { %v6239_v55 = vmax.f32 %v6047_v53, 0.0  ;;  %v5605_v4 = vpop.f32.mrb[168].mxu0  ;;  %14422 = vmatprep.mubr.msk.f32.mxu1 %vm6265_vm1, %v6476_v2 }
 0x810   :  { %6431 = vst [vmem:[#allocation2 + $0x530] sm:$0xff] %v6238_v57  ;;  %v16943_v58 = vadd.f32 %v5605_v4, %v21392_v41  ;;  %v5607_v11 = vpop.f32.mrb[169].mxu0 }
 0x811   :  { %6432 = vst.msk [vmem:[#allocation2 + $0x538] sm:$0xff] %vm6265_vm1, %v6239_v55  ;;  %v16944_v3 = vadd.f32 %v5607_v11, %v21401_v61  ;;  %v6481_v55 = vld [vmem:[#allocation2 + $0xc0] sm:$0xff] }
 0x812   :  { %v6048_v40 = vadd.f32 %v16943_v58, %v21153_v26  ;;  %7739 = vmatmul.mubr.f32.gmra.mrb[42].mxu1 %v6475_v44  ;;  %v6484_v58 = vld [vmem:[#allocation2 + $0xd8] sm:$0xff] }
 0x813   :  { %v6049_v51 = vadd.f32 %v16944_v3, %v21158_v33  ;;  %v5611_v60 = vpop.f32.mrb[170].mxu0  ;;  %14423 = vmatprep.mubr.msk.f32.mxu1 %vm6265_vm1, %v6478_v56 }
 0x814   :  { %v6240_v63 = vmax.f32 %v6048_v40, 0.0  ;;  %v16945_v42 = vadd.f32 %v5611_v60, %v21408_v31  ;;  %v5613_v0 = vpop.f32.mrb[171].mxu0  ;;  %v14502_v31 = vld [vmem:[%s25567_s3 + $0x308] sm:$0xff] }
 0x815   :  { %v6241_v41 = vmax.f32 %v6049_v51, 0.0  ;;  %v16946_v47 = vadd.f32 %v5613_v0, %v21417_v34  ;;  %v14504_v34 = vld [vmem:[%s25567_s3 + $0x318] sm:$0xff]  ;;  %v6483_v51 = vld [vmem:[#allocation2 + $0xd0] sm:$0xff] }
 0x816   :  { %6433 = vst [vmem:[#allocation2 + $0x540] sm:$0xff] %v6240_v63  ;;  %v6050_v61 = vadd.f32 %v16945_v42, %v21153_v26  ;;  %7745 = vmatmul.mubr.f32.gmra.mrb[44].mxu1 %v6477_v12  ;;  %v16287_v6 = vpack.c.bf16 %v14504_v34, %v14502_v31  ;;  %v6486_v63 = vld [vmem:[#allocation2 + $0xe8] sm:$0xff] }
 0x817   :  { %6434 = vst.msk [vmem:[#allocation2 + $0x548] sm:$0xff] %vm6265_vm1, %v6241_v41  ;;  %v6051_v27 = vadd.f32 %v16946_v47, %v21158_v33  ;;  %v5617_v36 = vpop.f32.mrb[172].mxu0  ;;  %14424 = vmatprep.mubr.msk.f32.mxu1 %vm6265_vm1, %v6480_v9 }
 0x818   :  { %v6242_v49 = vmax.f32 %v6050_v61, 0.0  ;;  %v16947_v28 = vadd.f32 %v5617_v36, %v21424_v24  ;;  %v5619_v22 = vpop.f32.mrb[173].mxu0  ;;  %16288 = vmatprep.subr.bf16.mxu1 %v16287_v6  ;;  %v14503_v24 = vld [vmem:[%s25567_s3 + $0x310] sm:$0xff]  ;;  %v6485_v61 = vld [vmem:[#allocation2 + $0xe0] sm:$0xff] }
 0x819   :  { %v6243_v1 = vmax.f32 %v6051_v27, 0.0  ;;  %v16948_v54 = vadd.f32 %v5619_v22, %v21433_v13  ;;  %v16289_v38 = vpack.c.bf16 %v14503_v24, %v14501_v46  ;;  %v6488_v27 = vld [vmem:[#allocation2 + $0xf8] sm:$0xff]  ;;  %v6487_v22 = vld [vmem:[#allocation2 + $0xf0] sm:$0xff]  ;;  %v21992_v24 = vld [vmem:[#allocation2 + $0x100] sm:$0xff] }
 0x81a   :  { %6435 = vst [vmem:[#allocation2 + $0x550] sm:$0xff] %v6242_v49  ;;  %v6052_v10 = vadd.f32 %v16947_v28, %v21153_v26  ;;  %7751 = vmatmul.mubr.f32.gmra.mrb[46].mxu1 %v6479_v30 }
 0x81b   :  { %6436 = vst.msk [vmem:[#allocation2 + $0x558] sm:$0xff] %vm6265_vm1, %v6243_v1  ;;  %v6053_v20 = vadd.f32 %v16948_v54, %v21158_v33  ;;  %v5623_v13 = vpop.f32.mrb[174].mxu0  ;;  %14425 = vmatprep.mubr.msk.f32.mxu1 %vm6265_vm1, %v6482_v19  ;;  %16290 = vmatpush1.bf16.msra.mxu1 %v16289_v38  ;;  %v21984_v1 = vld [vmem:[#allocation2 + $0x108] sm:$0xff] }
 0x81c   :  { %v6244_v45 = vmax.f32 %v6052_v10, 0.0  ;;  %v16949_v53 = vadd.f32 %v5623_v13, %v21443_v25  ;;  %v5625_v39 = vpop.f32.mrb[175].mxu0  ;;  %v21996_v13 = vld [vmem:[#allocation2 + $0x118] sm:$0xff] }
 0x81d   :  { %v6245_v57 = vmax.f32 %v6053_v20, 0.0  ;;  %v16950_v2 = vadd.f32 %v5625_v39, %v21458_v37 }
 0x81e   :  { %6437 = vst [vmem:[#allocation2 + $0x560] sm:$0xff] %v6244_v45  ;;  %v6054_v4 = vadd.f32 %v16949_v53, %v21153_v26  ;;  %7757 = vmatmul.mubr.f32.gmra.mrb[48].mxu1 %v6481_v55 }
 0x81f   :  { %6438 = vst.msk [vmem:[#allocation2 + $0x568] sm:$0xff] %vm6265_vm1, %v6245_v57  ;;  %v6055_v11 = vadd.f32 %v16950_v2, %v21158_v33  ;;  %v5629_v3 = vpop.f32.mrb[176].mxu0  ;;  %14426 = vmatprep.mubr.msk.f32.mxu1 %vm6265_vm1, %v6484_v58  ;;  %v22004_v2 = vld [vmem:[#allocation2 + $0x110] sm:$0xff] }
 0x820   :  { %v6246_v44 = vmax.f32 %v6054_v4, 0.0  ;;  %v16951_v25 = vadd.f32 %v5629_v3, %v21473_v5  ;;  %v5631_v40 = vpop.f32.mrb[177].mxu0  ;;  %v22008_v4 = vld [vmem:[#allocation2 + $0x128] sm:$0xff] }
 0x821   :  { %v6247_v56 = vmax.f32 %v6055_v11, 0.0  ;;  %v16952_v37 = vadd.f32 %v5631_v40, %v21475_v43  ;;  %v22016_v40 = vld [vmem:[#allocation2 + $0x120] sm:$0xff] }
 0x822   :  { %6439 = vst [vmem:[#allocation2 + $0x570] sm:$0xff] %v6246_v44  ;;  %v6056_v60 = vadd.f32 %v16951_v25, %v21153_v26  ;;  %7763 = vmatmul.mubr.f32.gmra.mrb[50].mxu1 %v6483_v51  ;;  %v14506_v51 = vld [vmem:[%s25567_s3 + $0x328] sm:$0xff] }
 0x823   :  { %6440 = vst.msk [vmem:[#allocation2 + $0x578] sm:$0xff] %vm6265_vm1, %v6247_v56  ;;  %v6057_v42 = vadd.f32 %v16952_v37, %v21158_v33  ;;  %v5635_v0 = vpop.f32.mrb[178].mxu0  ;;  %14427 = vmatprep.mubr.msk.f32.mxu1 %vm6265_vm1, %v6486_v63  ;;  %v22020_v37 = vld [vmem:[#allocation2 + $0x138] sm:$0xff] }
 0x824   :  { %v6248_v41 = vmax.f32 %v6056_v60, 0.0  ;;  %v16953_v5 = vadd.f32 %v5635_v0, %v21486_v59  ;;  %v5637_v47 = vpop.f32.mrb[179].mxu0  ;;  %v14507_v0 = vld [vmem:[%s25567_s3 + $0x330] sm:$0xff] }
 0x825   :  { %v6249_v12 = vmax.f32 %v6057_v42, 0.0  ;;  %v16954_v43 = vadd.f32 %v5637_v47, %v21488_v62  ;;  %v14505_v42 = vld [vmem:[%s25567_s3 + $0x320] sm:$0xff] }
 0x826   :  { %6441 = vst [vmem:[#allocation2 + $0x580] sm:$0xff] %v6248_v41  ;;  %v6058_v9 = vadd.f32 %v16953_v5, %v21153_v26  ;;  %7769 = vmatmul.mubr.f32.gmra.mrb[52].mxu1 %v6485_v61 }
 0x827   :  { %6442 = vst.msk [vmem:[#allocation2 + $0x588] sm:$0xff] %vm6265_vm1, %v6249_v12  ;;  %v6059_v36 = vadd.f32 %v16954_v43, %v21158_v33  ;;  %v5641_v31 = vpop.f32.mrb[180].mxu0  ;;  %14428 = vmatprep.mubr.msk.f32.mxu1 %vm6265_vm1, %v6488_v27  ;;  %v16293_v12 = vpack.c.bf16 %v14507_v0, %v14505_v42  ;;  %v14578_v42 = vld [vmem:[%s25567_s3 + $0x368] sm:$0xff]  ;;  %v14580_v0 = vld [vmem:[%s25567_s3 + $0x378] sm:$0xff] }
 0x828   :  { %v6250_v34 = vmax.f32 %v6058_v9, 0.0  ;;  %v16955_v59 = vadd.f32 %v5641_v31, %v21499_v35  ;;  %v5643_v49 = vpop.f32.mrb[181].mxu0  ;;  %v22040_v9 = vld [vmem:[#allocation2 + $0x130] sm:$0xff] }
 0x829   :  { %v6251_v28 = vmax.f32 %v6059_v36, 0.0  ;;  %v16956_v62 = vadd.f32 %v5643_v49, %v21501_v8  ;;  %v22044_v36 = vld [vmem:[#allocation2 + $0x148] sm:$0xff] }
 0x82a   :  { %6443 = vst [vmem:[#allocation2 + $0x590] sm:$0xff] %v6250_v34  ;;  %v6060_v6 = vadd.f32 %v16955_v59, %v21153_v26  ;;  %7775 = vmatmul.mubr.f32.gmra.mrb[54].mxu1 %v6487_v22 }
 0x82b   :  { %6444 = vst.msk [vmem:[#allocation2 + $0x598] sm:$0xff] %vm6265_vm1, %v6251_v28  ;;  %v6061_v54 = vadd.f32 %v16956_v62, %v21158_v33  ;;  %v5647_v30 = vpop.f32.mrb[182].mxu0  ;;  %14429 = vmatprep.mubr.msk.f32.mxu1 %vm6265_vm1, %v21984_v1  ;;  %v22052_v62 = vld [vmem:[#allocation2 + $0x140] sm:$0xff] }
 0x82c   :  { %v6252_v35 = vmax.f32 %v6060_v6, 0.0  ;;  %v16957_v10 = vadd.f32 %v5647_v30, %v21512_v14  ;;  %v5649_v19 = vpop.f32.mrb[183].mxu0  ;;  %v22056_v6 = vld [vmem:[#allocation2 + $0x158] sm:$0xff] }
 0x82d   :  { %v6253_v8 = vmax.f32 %v6061_v54, 0.0  ;;  %v16958_v46 = vadd.f32 %v5649_v19, %v21514_v50  ;;  %v22080_v19 = vld [vmem:[#allocation2 + $0x188] sm:$0xff] }
 0x82e   :  { %6445 = vst [vmem:[#allocation2 + $0x5a0] sm:$0xff] %v6252_v35  ;;  %v6062_v20 = vadd.f32 %v16957_v10, %v21153_v26  ;;  %7781 = vmatmul.mubr.f32.gmra.mrb[56].mxu1 %v21992_v24  ;;  %v22062_v35 = vld [vmem:[#allocation2 + $0x150] sm:$0xff] }
 0x82f   :  { %6446 = vst.msk [vmem:[#allocation2 + $0x5a8] sm:$0xff] %vm6265_vm1, %v6253_v8  ;;  %v6063_v38 = vadd.f32 %v16958_v46, %v21158_v33  ;;  %v5653_v45 = vpop.f32.mrb[184].mxu0  ;;  %14430 = vmatprep.mubr.msk.f32.mxu1 %vm6265_vm1, %v21996_v13  ;;  %v22077_v10 = vld [vmem:[#allocation2 + $0x170] sm:$0xff]  ;;  %v22084_v8 = vld [vmem:[#allocation2 + $0x180] sm:$0xff]  ;;  %v22087_v46 = vld [vmem:[#allocation2 + $0x198] sm:$0xff] }
 0x830   :  { %v6254_v14 = vmax.f32 %v6062_v20, 0.0  ;;  %v16959_v50 = vadd.f32 %v5653_v45, %v21527_v7  ;;  %v5655_v53 = vpop.f32.mrb[185].mxu0  ;;  %v22091_v20 = vld [vmem:[#allocation2 + $0x190] sm:$0xff]  ;;  %v14510_v45 = vld [vmem:[%s25567_s3 + $0x348] sm:$0xff] }
 0x831   :  { %v6255_v39 = vmax.f32 %v6063_v38, 0.0  ;;  %v16960_v57 = vadd.f32 %v5655_v53, %v21530_v52  ;;  %v22094_v38 = vld [vmem:[#allocation2 + $0x1a8] sm:$0xff]  ;;  %v14509_v53 = vld [vmem:[%s25567_s3 + $0x340] sm:$0xff] }
 0x832   :  { %6447 = vst [vmem:[#allocation2 + $0x5b0] sm:$0xff] %v6254_v14  ;;  %v6064_v55 = vadd.f32 %v16959_v50, %v21153_v26  ;;  %7787 = vmatmul.mubr.f32.gmra.mrb[58].mxu1 %v22004_v2  ;;  %v14512_v14 = vld [vmem:[%s25567_s3 + $0x358] sm:$0xff] }
 0x833   :  { %6448 = vst.msk [vmem:[#allocation2 + $0x5b8] sm:$0xff] %vm6265_vm1, %v6255_v39  ;;  %v6065_v58 = vadd.f32 %v16960_v57, %v21158_v33  ;;  %v5659_v11 = vpop.f32.mrb[186].mxu0  ;;  %14431 = vmatprep.mubr.msk.f32.mxu1 %vm6265_vm1, %v22008_v4  ;;  %v16295_v50 = vpack.c.bf16 %v14512_v14, %v14510_v45  ;;  %v14511_v39 = vld [vmem:[%s25567_s3 + $0x350] sm:$0xff]  ;;  %v22224_v45 = vld [vmem:[#allocation2 + $0x2a8] sm:$0xff]  ;;  %v22228_v14 = vld [vmem:[#allocation2 + $0x2a0] sm:$0xff] }
 0x834   :  { %v6256_v7 = vmax.f32 %v6064_v55, 0.0  ;;  %v16961_v52 = vadd.f32 %v5659_v11, %v21543_v23  ;;  %v5661_v3 = vpop.f32.mrb[187].mxu0  ;;  %v14508_v23 = vld [vmem:[%s25567_s3 + $0x338] sm:$0xff]  ;;  %v16297_v57 = vpack.c.bf16 %v14511_v39, %v14509_v53  ;;  %v22110_v55 = vld [vmem:[#allocation2 + $0x1a0] sm:$0xff]  ;;  %v22117_v11 = vld [vmem:[#allocation2 + $0x1b0] sm:$0xff] }
 0x835   :  { %v6257_v44 = vmax.f32 %v6065_v58, 0.0  ;;  %v16962_v25 = vadd.f32 %v5661_v3, %v21546_v29  ;;  %v16291_v63 = vpack.c.bf16 %v14508_v23, %v14506_v51  ;;  %v22113_v58 = vld [vmem:[#allocation2 + $0x1b8] sm:$0xff]  ;;  %v22145_v23 = vld [vmem:[#allocation2 + $0x1f0] sm:$0xff]  ;;  %v22238_v39 = vld [vmem:[#allocation2 + $0x2c8] sm:$0xff] }
 0x836   :  { %6449 = vst [vmem:[#allocation2 + $0x5c0] sm:$0xff] %v6256_v7  ;;  %v6066_v56 = vadd.f32 %v16961_v52, %v21153_v26  ;;  %7793 = vmatmul.mubr.f32.gmra.mrb[60].mxu1 %v22016_v40  ;;  %v22120_v7 = vld [vmem:[#allocation2 + $0x1c8] sm:$0xff]  ;;  %v22124_v52 = vld [vmem:[#allocation2 + $0x1c0] sm:$0xff]  ;;  %v22127_v3 = vld [vmem:[#allocation2 + $0x1d8] sm:$0xff] }
 0x837   :  { %6450 = vst.msk [vmem:[#allocation2 + $0x5c8] sm:$0xff] %vm6265_vm1, %v6257_v44  ;;  %v6067_v29 = vadd.f32 %v16962_v25, %v21158_v33  ;;  %v5665_v60 = vpop.f32.mrb[188].mxu0  ;;  %14432 = vmatprep.mubr.msk.f32.mxu1 %vm6265_vm1, %v22020_v37  ;;  %16292 = vmatprep.subr.bf16.mxu1 %v16291_v63  ;;  %v22131_v44 = vld [vmem:[#allocation2 + $0x1d0] sm:$0xff]  ;;  %v22134_v25 = vld [vmem:[#allocation2 + $0x1e8] sm:$0xff]  ;;  %v22141_v51 = vld [vmem:[#allocation2 + $0x1f8] sm:$0xff] }
 0x838   :  { %v6258_v41 = vmax.f32 %v6066_v56, 0.0  ;;  %v16963_v5 = vadd.f32 %v5665_v60, %v21565_v15  ;;  %v5667_v47 = vpop.f32.mrb[189].mxu0  ;;  %16294 = vmatpush1.bf16.msra.mxu1 %v16293_v12  ;;  %v22138_v56 = vld [vmem:[#allocation2 + $0x1e0] sm:$0xff]  ;;  %v22155_v63 = vld [vmem:[#allocation2 + $0x218] sm:$0xff]  ;;  %v22235_v53 = vld [vmem:[#allocation2 + $0x2b0] sm:$0xff]  ;;  %25847 = vst [vmem:[#allocation4_spill] sm:$0xff] %v22238_v39 }
 0x839   :  { %v6259_v43 = vmax.f32 %v6067_v29, 0.0  ;;  %v16964_v61 = vadd.f32 %v5667_v47, %v21568_v32  ;;  %16296 = vmatprep.subr.bf16.mxu1 %v16295_v50  ;;  %v22148_v29 = vld [vmem:[#allocation2 + $0x208] sm:$0xff]  ;;  %v22152_v60 = vld [vmem:[#allocation2 + $0x200] sm:$0xff]  ;;  %v22231_v50 = vld [vmem:[#allocation2 + $0x2b8] sm:$0xff]  ;;  %25846 = vst [vmem:[#allocation3_spill] sm:$0xff] %v22235_v53 }
 0x83a   :  { %6451 = vst [vmem:[#allocation2 + $0x5d0] sm:$0xff] %v6258_v41  ;;  %v6068_v27 = vadd.f32 %v16963_v5, %v21153_v26  ;;  %7799 = vmatmul.mubr.f32.gmra.mrb[62].mxu1 %v22040_v9  ;;  %v16299_v41 = vpack.c.bf16 %v14580_v0, %v14578_v42  ;;  %v22165_v5 = vld [vmem:[#allocation2 + $0x210] sm:$0xff]  ;;  %v22168_v47 = vld [vmem:[#allocation2 + $0x228] sm:$0xff]  ;;  %v22172_v12 = vld [vmem:[#allocation2 + $0x220] sm:$0xff] }
 0x83b   :  { %6452 = vst.msk [vmem:[#allocation2 + $0x5d8] sm:$0xff] %vm6265_vm1, %v6259_v43  ;;  %v6069_v31 = vadd.f32 %v16964_v61, %v21158_v33  ;;  %v5671_v15 = vpop.f32.mrb[190].mxu0  ;;  %14433 = vmatprep.mubr.msk.f32.mxu1 %vm6265_vm1, %v22044_v36  ;;  %v22175_v43 = vld [vmem:[#allocation2 + $0x238] sm:$0xff]  ;;  %v22179_v61 = vld [vmem:[#allocation2 + $0x230] sm:$0xff]  ;;  %25845 = vst [vmem:[#allocation34_spill] sm:$0xff] %v22231_v50 }
 0x83c   :  { %v6260_v32 = vmax.f32 %v6068_v27, 0.0  ;;  %v16965_v34 = vadd.f32 %v5671_v15, %v21585_v48  ;;  %v5673_v59 = vpop.f32.mrb[191].mxu0  ;;  %16298 = vmatpush1.bf16.msra.mxu1 %v16297_v57  ;;  %v22182_v27 = vld [vmem:[#allocation2 + $0x248] sm:$0xff]  ;;  %v22189_v15 = vld [vmem:[#allocation2 + $0x258] sm:$0xff]  ;;  %v22242_v57 = vld [vmem:[#allocation2 + $0x2c0] sm:$0xff] }
 0x83d   :  { %v6261_v49 = vmax.f32 %v6069_v31, 0.0  ;;  %v16966_v28 = vadd.f32 %v5673_v59, %v21587_v17  ;;  %v22065_v17 = vld [vmem:[#allocation2 + $0x168] sm:$0xff]  ;;  %16300 = vmatprep.subr.bf16.mxu1 %v16299_v41  ;;  %v22186_v31 = vld [vmem:[#allocation2 + $0x240] sm:$0xff]  ;;  %25848 = vst [vmem:[#allocation5_spill] sm:$0xff] %v22242_v57  ;;  %v22245_v42 = vld [vmem:[#allocation2 + $0x2d8] sm:$0xff] }
 0x83e   :  { %6453 = vst [vmem:[#allocation2 + $0x5e0] sm:$0xff] %v6260_v32  ;;  %v6070_v22 = vadd.f32 %v16965_v34, %v21153_v26  ;;  %7805 = vmatmul.mubr.f32.gmra.mrb[64].mxu1 %v22052_v62  ;;  %v22070_v26 = vld [vmem:[#allocation2 + $0x160] sm:$0xff]  ;;  %v22193_v32 = vld [vmem:[#allocation2 + $0x250] sm:$0xff]  ;;  %v22196_v34 = vld [vmem:[#allocation2 + $0x268] sm:$0xff] }
 0x83f   :  { %6454 = vst.msk [vmem:[#allocation2 + $0x5e8] sm:$0xff] %vm6265_vm1, %v6261_v49  ;;  %v6071_v54 = vadd.f32 %v16966_v28, %v21158_v33  ;;  %14434 = vmatprep.mubr.msk.f32.mxu1 %vm6265_vm1, %v22056_v6  ;;  %v22073_v33 = vld [vmem:[#allocation2 + $0x178] sm:$0xff]  ;;  %v22200_v59 = vld [vmem:[#allocation2 + $0x260] sm:$0xff]  ;;  %v22207_v28 = vld [vmem:[#allocation2 + $0x270] sm:$0xff] }
 0x840   :  { %v6262_v48 = vmax.f32 %v6070_v22, 0.0  ;;  %v22203_v49 = vld [vmem:[#allocation2 + $0x278] sm:$0xff]  ;;  %v22210_v22 = vld [vmem:[#allocation2 + $0x288] sm:$0xff]  ;;  %25849 = vst [vmem:[#allocation6_spill] sm:$0xff] %v22245_v42  ;;  %v22249_v0 = vld [vmem:[#allocation2 + $0x2d0] sm:$0xff] }
 0x841   :  { %v6263_v30 = vmax.f32 %v6071_v54, 0.0  ;;  %v22214_v54 = vld [vmem:[#allocation2 + $0x280] sm:$0xff]  ;;  %25850 = vst [vmem:[#allocation7_spill] sm:$0xff] %v22249_v0  ;;  %v22252_v41 = vld [vmem:[#allocation2 + $0x2e8] sm:$0xff] }
 0x842   :  { %6455 = vst [vmem:[#allocation2 + $0x5f0] sm:$0xff] %v6262_v48  ;;  %7811 = vmatmul.mubr.f32.gmra.mrb[66].mxu1 %v22062_v35  ;;  %v22217_v48 = vld [vmem:[#allocation2 + $0x298] sm:$0xff]  ;;  %25851 = vst [vmem:[#allocation8_spill] sm:$0xff] %v22252_v41 }
 0x843   :  { %6456 = vst.msk [vmem:[#allocation2 + $0x5f8] sm:$0xff] %vm6265_vm1, %v6263_v30  ;;  %14435 = vmatprep.mubr.msk.f32.mxu1 %vm6265_vm1, %v22065_v17  ;;  %v22221_v30 = vld [vmem:[#allocation2 + $0x290] sm:$0xff] }
 0x846   :  { %7817 = vmatmul.mubr.f32.gmra.mrb[68].mxu1 %v22070_v26 }
 0x847   :  { %14436 = vmatprep.mubr.msk.f32.mxu1 %vm6265_vm1, %v22073_v33 }
 0x84a   :  { %7823 = vmatmul.mubr.f32.gmra.mrb[70].mxu1 %v22077_v10 }
 0x84b   :  { %14437 = vmatprep.mubr.msk.f32.mxu1 %vm6265_vm1, %v22080_v19 }
 0x84e   :  { %7829 = vmatmul.mubr.f32.gmra.mrb[72].mxu1 %v22084_v8 }
 0x84f   :  { %14438 = vmatprep.mubr.msk.f32.mxu1 %vm6265_vm1, %v22087_v46 }
 0x852   :  { %7835 = vmatmul.mubr.f32.gmra.mrb[74].mxu1 %v22091_v20 }
 0x853   :  { %14439 = vmatprep.mubr.msk.f32.mxu1 %vm6265_vm1, %v22094_v38 }
 0x856   :  { %7841 = vmatmul.mubr.f32.gmra.mrb[76].mxu1 %v22110_v55 }
 0x857   :  { %14440 = vmatprep.mubr.msk.f32.mxu1 %vm6265_vm1, %v22113_v58 }
 0x85a   :  { %7847 = vmatmul.mubr.f32.gmra.mrb[78].mxu1 %v22117_v11 }
 0x85b   :  { %14441 = vmatprep.mubr.msk.f32.mxu1 %vm6265_vm1, %v22120_v7 }
 0x85e   :  { %7853 = vmatmul.mubr.f32.gmra.mrb[80].mxu1 %v22124_v52 }
 0x85f   :  { %14442 = vmatprep.mubr.msk.f32.mxu1 %vm6265_vm1, %v22127_v3 }
 0x862   :  { %7859 = vmatmul.mubr.f32.gmra.mrb[82].mxu1 %v22131_v44 }
 0x863   :  { %14443 = vmatprep.mubr.msk.f32.mxu1 %vm6265_vm1, %v22134_v25 }
 0x866   :  { %7865 = vmatmul.mubr.f32.gmra.mrb[84].mxu1 %v22138_v56 }
 0x867   :  { %14444 = vmatprep.mubr.msk.f32.mxu1 %vm6265_vm1, %v22141_v51 }
 0x86a   :  { %7871 = vmatmul.mubr.f32.gmra.mrb[86].mxu1 %v22145_v23 }
 0x86b   :  { %14445 = vmatprep.mubr.msk.f32.mxu1 %vm6265_vm1, %v22148_v29 }
 0x86e   :  { %7877 = vmatmul.mubr.f32.gmra.mrb[88].mxu1 %v22152_v60 }
 0x86f   :  { %14446 = vmatprep.mubr.msk.f32.mxu1 %vm6265_vm1, %v22155_v63 }
 0x872   :  { %7883 = vmatmul.mubr.f32.gmra.mrb[90].mxu1 %v22165_v5 }
 0x873   :  { %14447 = vmatprep.mubr.msk.f32.mxu1 %vm6265_vm1, %v22168_v47 }
 0x876   :  { %7889 = vmatmul.mubr.f32.gmra.mrb[92].mxu1 %v22172_v12 }
 0x877   :  { %14448 = vmatprep.mubr.msk.f32.mxu1 %vm6265_vm1, %v22175_v43 }
 0x87a   :  { %7895 = vmatmul.mubr.f32.gmra.mrb[94].mxu1 %v22179_v61 }
 0x87b   :  { %14449 = vmatprep.mubr.msk.f32.mxu1 %vm6265_vm1, %v22182_v27 }
 0x87e   :  { %7901 = vmatmul.mubr.f32.gmra.mrb[96].mxu1 %v22186_v31 }
 0x87f   :  { %14450 = vmatprep.mubr.msk.f32.mxu1 %vm6265_vm1, %v22189_v15 }
 0x882   :  { %7907 = vmatmul.mubr.f32.gmra.mrb[98].mxu1 %v22193_v32 }
 0x883   :  { %14451 = vmatprep.mubr.msk.f32.mxu1 %vm6265_vm1, %v22196_v34 }
 0x886   :  { %7913 = vmatmul.mubr.f32.gmra.mrb[100].mxu1 %v22200_v59 }
 0x887   :  { %14452 = vmatprep.mubr.msk.f32.mxu1 %vm6265_vm1, %v22203_v49 }
 0x88a   :  { %7919 = vmatmul.mubr.f32.gmra.mrb[102].mxu1 %v22207_v28 }
 0x88b   :  { %14453 = vmatprep.mubr.msk.f32.mxu1 %vm6265_vm1, %v22210_v22 }
 0x88e   :  { %7925 = vmatmul.mubr.f32.gmra.mrb[104].mxu1 %v22214_v54 }
 0x88f   :  { %14454 = vmatprep.mubr.msk.f32.mxu1 %vm6265_vm1, %v22217_v48 }
 0x892   :  { %7931 = vmatmul.mubr.f32.gmra.mrb[106].mxu1 %v22221_v30 }
 0x893   :  { %14455 = vmatprep.mubr.msk.f32.mxu1 %vm6265_vm1, %v22224_v45 }
 0x896   :  { %7937 = vmatmul.mubr.f32.gmra.mrb[108].mxu1 %v22228_v14 }
 0x897   :  { %14456 = vmatprep.mubr.msk.f32.mxu1 %vm6265_vm1, %v22231_v50  ;;  %v14586_v50 = vld [vmem:[%s25567_s3 + $0x3a8] sm:$0xff] }
 0x89a   :  { %7943 = vmatmul.mubr.f32.gmra.mrb[110].mxu1 %v22235_v53  ;;  %v14583_v53 = vld [vmem:[%s25567_s3 + $0x390] sm:$0xff] }
 0x89b   :  { %14457 = vmatprep.mubr.msk.f32.mxu1 %vm6265_vm1, %v22238_v39  ;;  %v14581_v39 = vld [vmem:[%s25567_s3 + $0x380] sm:$0xff] }
 0x89e   :  { %7949 = vmatmul.mubr.f32.gmra.mrb[112].mxu1 %v22242_v57 }
 0x89f   :  { %14458 = vmatprep.mubr.msk.f32.mxu1 %vm6265_vm1, %v22245_v42  ;;  %v22266_v42 = vld [vmem:[#allocation2 + $0x308] sm:$0xff] }
 0x8a0   :  { %25855 = vst [vmem:[#allocation12_spill] sm:$0xff] %v22266_v42 }
 0x8a2   :  { %7955 = vmatmul.mubr.f32.gmra.mrb[114].mxu1 %v22249_v0  ;;  %v22270_v0 = vld [vmem:[#allocation2 + $0x300] sm:$0xff] }
 0x8a3   :  { %14459 = vmatprep.mubr.msk.f32.mxu1 %vm6265_vm1, %v22252_v41  ;;  %25856 = vst [vmem:[#allocation13_spill] sm:$0xff] %v22270_v0  ;;  %v22273_v41 = vld [vmem:[#allocation2 + $0x318] sm:$0xff] }
 0x8a4   :  { %25857 = vst [vmem:[#allocation14_spill] sm:$0xff] %v22273_v41 }
 0x8a6   :  { %7961 = vmatmul.mubr.f32.gmra.mrb[116].mxu1 %v22256_v18  ;;  %v22277_v18 = vld [vmem:[#allocation2 + $0x310] sm:$0xff] }
 0x8a7   :  { %14460 = vmatprep.mubr.msk.f32.mxu1 %vm6265_vm1, %v22259_v21  ;;  %25858 = vst [vmem:[#allocation15_spill] sm:$0xff] %v22277_v18  ;;  %v22280_v21 = vld [vmem:[#allocation2 + $0x328] sm:$0xff] }
 0x8a8   :  { %25859 = vst [vmem:[#allocation16_spill] sm:$0xff] %v22280_v21 }
 0x8aa   :  { %7967 = vmatmul.mubr.f32.gmra.mrb[118].mxu1 %v22263_v16  ;;  %v22284_v16 = vld [vmem:[#allocation2 + $0x320] sm:$0xff] }
 0x8ab   :  { %14461 = vmatprep.mubr.msk.f32.mxu1 %vm6265_vm1, %v22266_v42  ;;  %25860 = vst [vmem:[#allocation17_spill] sm:$0xff] %v22284_v16  ;;  %v22287_v42 = vld [vmem:[#allocation2 + $0x338] sm:$0xff] }
 0x8ac   :  { %25861 = vst [vmem:[#allocation18_spill] sm:$0xff] %v22287_v42 }
 0x8ae   :  { %7973 = vmatmul.mubr.f32.gmra.mrb[120].mxu1 %v22270_v0  ;;  %v22291_v0 = vld [vmem:[#allocation2 + $0x330] sm:$0xff] }
 0x8af   :  { %14462 = vmatprep.mubr.msk.f32.mxu1 %vm6265_vm1, %v22273_v41  ;;  %25862 = vst [vmem:[#allocation19_spill] sm:$0xff] %v22291_v0  ;;  %v22294_v41 = vld [vmem:[#allocation2 + $0x348] sm:$0xff] }
 0x8b0   :  { %25863 = vst [vmem:[#allocation20_spill] sm:$0xff] %v22294_v41 }
 0x8b2   :  { %7979 = vmatmul.mubr.f32.gmra.mrb[122].mxu1 %v22277_v18  ;;  %v22298_v18 = vld [vmem:[#allocation2 + $0x340] sm:$0xff] }
 0x8b3   :  { %14463 = vmatprep.mubr.msk.f32.mxu1 %vm6265_vm1, %v22280_v21  ;;  %25864 = vst [vmem:[#allocation21_spill] sm:$0xff] %v22298_v18  ;;  %v22301_v21 = vld [vmem:[#allocation2 + $0x358] sm:$0xff] }
 0x8b4   :  { %25865 = vst [vmem:[#allocation22_spill] sm:$0xff] %v22301_v21 }
 0x8b6   :  { %7985 = vmatmul.mubr.f32.gmra.mrb[124].mxu1 %v22284_v16  ;;  %v22305_v16 = vld [vmem:[#allocation2 + $0x350] sm:$0xff] }
 0x8b7   :  { %14464 = vmatprep.mubr.msk.f32.mxu1 %vm6265_vm1, %v22287_v42  ;;  %25866 = vst [vmem:[#allocation23_spill] sm:$0xff] %v22305_v16  ;;  %v22308_v42 = vld [vmem:[#allocation2 + $0x368] sm:$0xff] }
 0x8b8   :  { %25867 = vst [vmem:[#allocation24_spill] sm:$0xff] %v22308_v42 }
 0x8ba   :  { %7991 = vmatmul.mubr.f32.gmra.mrb[126].mxu1 %v22291_v0  ;;  %v22312_v0 = vld [vmem:[#allocation2 + $0x360] sm:$0xff] }
 0x8bb   :  { %14465 = vmatprep.mubr.msk.f32.mxu1 %vm6265_vm1, %v22294_v41  ;;  %25868 = vst [vmem:[#allocation25_spill] sm:$0xff] %v22312_v0  ;;  %v22315_v41 = vld [vmem:[#allocation2 + $0x378] sm:$0xff] }
 0x8bc   :  { %25869 = vst [vmem:[#allocation26_spill] sm:$0xff] %v22315_v41 }
 0x8be   :  { %7997 = vmatmul.mubr.f32.gmra.mrb[128].mxu1 %v22298_v18  ;;  %v22319_v18 = vld [vmem:[#allocation2 + $0x370] sm:$0xff] }
 0x8bf   :  { %14466 = vmatprep.mubr.msk.f32.mxu1 %vm6265_vm1, %v22301_v21  ;;  %25870 = vst [vmem:[#allocation27_spill] sm:$0xff] %v22319_v18  ;;  %v22322_v21 = vld [vmem:[#allocation2 + $0x388] sm:$0xff] }
 0x8c0   :  { %25871 = vst [vmem:[#allocation28_spill] sm:$0xff] %v22322_v21 }
 0x8c2   :  { %8003 = vmatmul.mubr.f32.gmra.mrb[130].mxu1 %v22305_v16  ;;  %v22326_v16 = vld [vmem:[#allocation2 + $0x380] sm:$0xff] }
 0x8c3   :  { %14467 = vmatprep.mubr.msk.f32.mxu1 %vm6265_vm1, %v22308_v42  ;;  %25872 = vst [vmem:[#allocation29_spill] sm:$0xff] %v22326_v16  ;;  %v22329_v42 = vld [vmem:[#allocation2 + $0x398] sm:$0xff] }
 0x8c4   :  { %25873 = vst [vmem:[#allocation30_spill] sm:$0xff] %v22329_v42 }
 0x8c6   :  { %8009 = vmatmul.mubr.f32.gmra.mrb[132].mxu1 %v22312_v0  ;;  %v22333_v0 = vld [vmem:[#allocation2 + $0x390] sm:$0xff] }
 0x8c7   :  { %14468 = vmatprep.mubr.msk.f32.mxu1 %vm6265_vm1, %v22315_v41  ;;  %25874 = vst [vmem:[#allocation31_spill] sm:$0xff] %v22333_v0  ;;  %v22336_v41 = vld [vmem:[#allocation2 + $0x3a8] sm:$0xff] }
 0x8c8   :  { %25875 = vst [vmem:[#allocation32_spill] sm:$0xff] %v22336_v41 }
 0x8ca   :  { %8015 = vmatmul.mubr.f32.gmra.mrb[134].mxu1 %v22319_v18  ;;  %v22340_v18 = vld [vmem:[#allocation2 + $0x3a0] sm:$0xff] }
 0x8cb   :  { %14469 = vmatprep.mubr.msk.f32.mxu1 %vm6265_vm1, %v22322_v21  ;;  %25876 = vst [vmem:[#allocation35_spill] sm:$0xff] %v22340_v18  ;;  %v22343_v21 = vld [vmem:[#allocation2 + $0x3b8] sm:$0xff] }
 0x8cc   :  { %25877 = vst [vmem:[#allocation36_spill] sm:$0xff] %v22343_v21 }
 0x8ce   :  { %8021 = vmatmul.mubr.f32.gmra.mrb[136].mxu1 %v22326_v16  ;;  %v22347_v16 = vld [vmem:[#allocation2 + $0x3b0] sm:$0xff] }
 0x8cf   :  { %14470 = vmatprep.mubr.msk.f32.mxu1 %vm6265_vm1, %v22329_v42  ;;  %25878 = vst [vmem:[#allocation37_spill] sm:$0xff] %v22347_v16  ;;  %v22350_v42 = vld [vmem:[#allocation2 + $0x3c8] sm:$0xff] }
 0x8d0   :  { %25879 = vst [vmem:[#allocation38_spill] sm:$0xff] %v22350_v42 }
 0x8d2   :  { %8027 = vmatmul.mubr.f32.gmra.mrb[138].mxu1 %v22333_v0  ;;  %v22354_v0 = vld [vmem:[#allocation2 + $0x3c0] sm:$0xff] }
 0x8d3   :  { %14471 = vmatprep.mubr.msk.f32.mxu1 %vm6265_vm1, %v22336_v41  ;;  %25880 = vst [vmem:[#allocation39_spill] sm:$0xff] %v22354_v0  ;;  %v22357_v41 = vld [vmem:[#allocation2 + $0x3d8] sm:$0xff] }
 0x8d4   :  { %25881 = vst [vmem:[#allocation40_spill] sm:$0xff] %v22357_v41 }
 0x8d6   :  { %8033 = vmatmul.mubr.f32.gmra.mrb[140].mxu1 %v22340_v18  ;;  %v22361_v18 = vld [vmem:[#allocation2 + $0x3d0] sm:$0xff] }
 0x8d7   :  { %14472 = vmatprep.mubr.msk.f32.mxu1 %vm6265_vm1, %v22343_v21  ;;  %25882 = vst [vmem:[#allocation41_spill] sm:$0xff] %v22361_v18  ;;  %v22364_v21 = vld [vmem:[#allocation2 + $0x3e8] sm:$0xff] }
 0x8d8   :  { %25883 = vst [vmem:[#allocation42_spill] sm:$0xff] %v22364_v21 }
 0x8da   :  { %8039 = vmatmul.mubr.f32.gmra.mrb[142].mxu1 %v22347_v16  ;;  %v22368_v16 = vld [vmem:[#allocation2 + $0x3e0] sm:$0xff] }
 0x8db   :  { %14473 = vmatprep.mubr.msk.f32.mxu1 %vm6265_vm1, %v22350_v42  ;;  %25884 = vst [vmem:[#allocation43_spill] sm:$0xff] %v22368_v16  ;;  %v22371_v42 = vld [vmem:[#allocation2 + $0x3f8] sm:$0xff] }
 0x8dc   :  { %25885 = vst [vmem:[#allocation44_spill] sm:$0xff] %v22371_v42 }
 0x8de   :  { %8045 = vmatmul.mubr.f32.gmra.mrb[144].mxu1 %v22354_v0  ;;  %v22381_v0 = vld [vmem:[#allocation2 + $0x3f0] sm:$0xff] }
 0x8df   :  { %14474 = vmatprep.mubr.msk.f32.mxu1 %vm6265_vm1, %v22357_v41  ;;  %v14577_v41 = vld [vmem:[%s25567_s3 + $0x360] sm:$0xff]  ;;  %25886 = vst [vmem:[#allocation45_spill] sm:$0xff] %v22381_v0 }
 0x8e2   :  { %8051 = vmatmul.mubr.f32.gmra.mrb[146].mxu1 %v22361_v18  ;;  %v14579_v18 = vld [vmem:[%s25567_s3 + $0x370] sm:$0xff] }
 0x8e3   :  { %14475 = vmatprep.mubr.msk.f32.mxu1 %vm6265_vm1, %v22364_v21  ;;  %v14582_v21 = vld [vmem:[%s25567_s3 + $0x388] sm:$0xff] }
 0x8e6   :  { %8057 = vmatmul.mubr.f32.gmra.mrb[148].mxu1 %v22368_v16  ;;  %v14584_v16 = vld [vmem:[%s25567_s3 + $0x398] sm:$0xff] }
 0x8e7   :  { %14476 = vmatprep.mubr.msk.f32.mxu1 %vm6265_vm1, %v22371_v42  ;;  %v16301_v42 = vpack.c.bf16 %v14579_v18, %v14577_v41  ;;  %v16303_v57 = vpack.c.bf16 %v14584_v16, %v14582_v21  ;;  %v16305_v16 = vpack.c.bf16 %v14583_v53, %v14581_v39  ;;  %v14585_v21 = vld [vmem:[%s25567_s3 + $0x3a0] sm:$0xff]  ;;  %v14590_v41 = vld [vmem:[%s25567_s3 + $0x3c8] sm:$0xff]  ;;  %v14591_v39 = vld [vmem:[%s25567_s3 + $0x3d0] sm:$0xff] }
 0x8e8   :  { %v14589_v53 = vld [vmem:[%s25567_s3 + $0x3c0] sm:$0xff] }
 0x8ea   :  { %8063 = vmatmul.mubr.f32.gmra.mrb[150].mxu1 %v22381_v0  ;;  %v14588_v0 = vld [vmem:[%s25567_s3 + $0x3b8] sm:$0xff] }
 0x8eb   :  { %14513 = vmatprep.mubr.msk.f32.mxu1 %vm6265_vm1, %v21984_v1  ;;  %v16307_v18 = vpack.c.bf16 %v14588_v0, %v14586_v50  ;;  %v14587_v1 = vld [vmem:[%s25567_s3 + $0x3b0] sm:$0xff]  ;;  %v14593_v0 = vld [vmem:[%s25567_s3 + $0x3e0] sm:$0xff] }
 0x8ee   :  { %8492 = vmatmul.mubr.f32.vlgmr.msra.gmra.mrb[24].mxu1 %v21992_v24  ;;  %v14592_v24 = vld [vmem:[%s25567_s3 + $0x3d8] sm:$0xff] }
 0x8ef   :  { %14514 = vmatprep.mubr.msk.f32.mxu1 %vm6265_vm1, %v21996_v13  ;;  %16302 = vmatpush1.bf16.msra.mxu1 %v16301_v42  ;;  %v16309_v13 = vpack.c.bf16 %v14587_v1, %v14585_v21  ;;  %v16311_v50 = vpack.c.bf16 %v14592_v24, %v14590_v41  ;;  %v25911_v41 = vld [vmem:[#allocation26_spill] sm:$0xff]  ;;  %v25912_v24 = vld [vmem:[#allocation27_spill] sm:$0xff] }
 0x8f0   :  { %16304 = vmatprep.subr.bf16.mxu1 %v16303_v57  ;;  %v14594_v57 = vld [vmem:[%s25567_s3 + $0x3e8] sm:$0xff] }
 0x8f2   :  { %8498 = vmatmul.mubr.f32.gmra.mrb[26].mxu1 %v22004_v2  ;;  %v14596_v2 = vld [vmem:[%s25567_s3 + $0x3f8] sm:$0xff] }
 0x8f3   :  { %14515 = vmatprep.mubr.msk.f32.mxu1 %vm6265_vm1, %v22008_v4  ;;  %16306 = vmatpush1.bf16.msra.mxu1 %v16305_v16  ;;  %v16313_v4 = vpack.c.bf16 %v14591_v39, %v14589_v53  ;;  %v16315_v42 = vpack.c.bf16 %v14596_v2, %v14594_v57  ;;  %v14595_v16 = vld [vmem:[%s25567_s3 + $0x3f0] sm:$0xff]  ;;  %v25915_v53 = vld [vmem:[#allocation30_spill] sm:$0xff]  ;;  %v25916_v39 = vld [vmem:[#allocation31_spill] sm:$0xff] }
 0x8f4   :  { %16308 = vmatprep.subr.bf16.mxu1 %v16307_v18  ;;  %v14600_v18 = vld [vmem:[%s25567_s3 + $0x418] sm:$0xff]  ;;  %v25917_v57 = vld [vmem:[#allocation32_spill] sm:$0xff]  ;;  %v25918_v2 = vld [vmem:[#allocation35_spill] sm:$0xff] }
 0x8f6   :  { %8504 = vmatmul.mubr.f32.gmra.mrb[28].mxu1 %v22016_v40  ;;  %v16317_v40 = vpack.c.bf16 %v14595_v16, %v14593_v0  ;;  %v25921_v0 = vld [vmem:[#allocation38_spill] sm:$0xff]  ;;  %v25922_v16 = vld [vmem:[#allocation39_spill] sm:$0xff] }
 0x8f7   :  { %14516 = vmatprep.mubr.msk.f32.mxu1 %vm6265_vm1, %v22020_v37  ;;  %16310 = vmatpush1.bf16.msra.mxu1 %v16309_v13  ;;  %v14598_v37 = vld [vmem:[%s25567_s3 + $0x408] sm:$0xff] }
 0x8f8   :  { %16312 = vmatprep.subr.bf16.mxu1 %v16311_v50  ;;  %v16319_v21 = vpack.c.bf16 %v14600_v18, %v14598_v37  ;;  %v25913_v13 = vld [vmem:[#allocation28_spill] sm:$0xff]  ;;  %v25914_v50 = vld [vmem:[#allocation29_spill] sm:$0xff]  ;;  %v25925_v18 = vld [vmem:[#allocation42_spill] sm:$0xff] }
 0x8f9   :  { %v25924_v37 = vld [vmem:[#allocation41_spill] sm:$0xff] }
 0x8fa   :  { %8510 = vmatmul.mubr.f32.gmra.mrb[30].mxu1 %v22040_v9  ;;  %v14597_v9 = vld [vmem:[%s25567_s3 + $0x400] sm:$0xff] }
 0x8fb   :  { %14517 = vmatprep.mubr.msk.f32.mxu1 %vm6265_vm1, %v22044_v36  ;;  %16314 = vmatpush1.bf16.msra.mxu1 %v16313_v4  ;;  %v14599_v36 = vld [vmem:[%s25567_s3 + $0x410] sm:$0xff]  ;;  %v25919_v4 = vld [vmem:[#allocation36_spill] sm:$0xff] }
 0x8fc   :  { %16316 = vmatprep.subr.bf16.mxu1 %v16315_v42  ;;  %v16321_v1 = vpack.c.bf16 %v14599_v36, %v14597_v9  ;;  %v25920_v42 = vld [vmem:[#allocation37_spill] sm:$0xff]  ;;  %v25927_v9 = vld [vmem:[#allocation44_spill] sm:$0xff] }
 0x8fd   :  { %v25928_v36 = vld [vmem:[#allocation45_spill] sm:$0xff] }
 0x8fe   :  { %8516 = vmatmul.mubr.f32.gmra.mrb[32].mxu1 %v22052_v62  ;;  %v14602_v62 = vld [vmem:[%s25567_s3 + $0x428] sm:$0xff] }
 0x8ff   :  { %14518 = vmatprep.mubr.msk.f32.mxu1 %vm6265_vm1, %v22056_v6  ;;  %16318 = vmatpush1.bf16.msra.mxu1 %v16317_v40  ;;  %v14604_v6 = vld [vmem:[%s25567_s3 + $0x438] sm:$0xff]  ;;  %v25923_v40 = vld [vmem:[#allocation40_spill] sm:$0xff] }
 0x900   :  { %16320 = vmatprep.subr.bf16.mxu1 %v16319_v21  ;;  %v25926_v21 = vld [vmem:[#allocation43_spill] sm:$0xff] }
 0x902   :  { %8522 = vmatmul.mubr.f32.gmra.mrb[34].mxu1 %v22062_v35  ;;  %v16323_v35 = vpack.c.bf16 %v14604_v6, %v14602_v62  ;;  %v22634_v62 = vld [vmem:[#allocation2 + $0x400] sm:$0xff]  ;;  %v22637_v6 = vld [vmem:[#allocation2 + $0x418] sm:$0xff] }
 0x903   :  { %14519 = vmatprep.mubr.msk.f32.mxu1 %vm6265_vm1, %v22065_v17  ;;  %16322 = vmatpush1.bf16.msra.mxu1 %v16321_v1  ;;  %v14601_v17 = vld [vmem:[%s25567_s3 + $0x420] sm:$0xff]  ;;  %v22630_v1 = vld [vmem:[#allocation2 + $0x408] sm:$0xff] }
 0x904   :  { %16324 = vmatprep.subr.bf16.mxu1 %v16323_v35  ;;  %v22641_v35 = vld [vmem:[#allocation2 + $0x410] sm:$0xff] }
 0x906   :  { %8528 = vmatmul.mubr.f32.gmra.mrb[36].mxu1 %v22070_v26  ;;  %v14603_v26 = vld [vmem:[%s25567_s3 + $0x430] sm:$0xff] }
 0x907   :  { %14520 = vmatprep.mubr.msk.f32.mxu1 %vm6265_vm1, %v22073_v33  ;;  %v16325_v33 = vpack.c.bf16 %v14603_v26, %v14601_v17  ;;  %v22644_v17 = vld [vmem:[#allocation2 + $0x428] sm:$0xff]  ;;  %v22648_v26 = vld [vmem:[#allocation2 + $0x420] sm:$0xff] }
 0x909   :  { %16326 = vmatpush1.bf16.msra.mxu1 %v16325_v33  ;;  %v22651_v33 = vld [vmem:[#allocation2 + $0x438] sm:$0xff] }
 0x90a   :  { %8534 = vmatmul.mubr.f32.gmra.mrb[38].mxu1 %v22077_v10  ;;  %v14606_v10 = vld [vmem:[%s25567_s3 + $0x448] sm:$0xff] }
 0x90b   :  { %14521 = vmatprep.mubr.msk.f32.mxu1 %vm6265_vm1, %v22080_v19  ;;  %v14608_v19 = vld [vmem:[%s25567_s3 + $0x458] sm:$0xff] }
 0x90e   :  { %8540 = vmatmul.mubr.f32.gmra.mrb[40].mxu1 %v22084_v8  ;;  %v16327_v8 = vpack.c.bf16 %v14608_v19, %v14606_v10  ;;  %v22655_v10 = vld [vmem:[#allocation2 + $0x430] sm:$0xff]  ;;  %v22658_v19 = vld [vmem:[#allocation2 + $0x448] sm:$0xff] }
 0x90f   :  { %14522 = vmatprep.mubr.msk.f32.mxu1 %vm6265_vm1, %v22087_v46  ;;  %v14605_v46 = vld [vmem:[%s25567_s3 + $0x440] sm:$0xff] }
 0x910   :  { %16328 = vmatprep.subr.bf16.mxu1 %v16327_v8  ;;  %v22662_v8 = vld [vmem:[#allocation2 + $0x440] sm:$0xff] }
 0x912   :  { %8546 = vmatmul.mubr.f32.gmra.mrb[42].mxu1 %v22091_v20  ;;  %v14607_v20 = vld [vmem:[%s25567_s3 + $0x450] sm:$0xff] }
 0x913   :  { %14523 = vmatprep.mubr.msk.f32.mxu1 %vm6265_vm1, %v22094_v38  ;;  %v16329_v38 = vpack.c.bf16 %v14607_v20, %v14605_v46  ;;  %v22665_v46 = vld [vmem:[#allocation2 + $0x458] sm:$0xff]  ;;  %v22669_v20 = vld [vmem:[#allocation2 + $0x450] sm:$0xff] }
 0x915   :  { %16330 = vmatpush1.bf16.msra.mxu1 %v16329_v38  ;;  %v22672_v38 = vld [vmem:[#allocation2 + $0x468] sm:$0xff] }
 0x916   :  { %8552 = vmatmul.mubr.f32.gmra.mrb[44].mxu1 %v22110_v55  ;;  %v14610_v55 = vld [vmem:[%s25567_s3 + $0x468] sm:$0xff] }
 0x917   :  { %14524 = vmatprep.mubr.msk.f32.mxu1 %vm6265_vm1, %v22113_v58  ;;  %v14612_v58 = vld [vmem:[%s25567_s3 + $0x478] sm:$0xff] }
 0x91a   :  { %8558 = vmatmul.mubr.f32.gmra.mrb[46].mxu1 %v22117_v11  ;;  %v16331_v11 = vpack.c.bf16 %v14612_v58, %v14610_v55  ;;  %v22676_v55 = vld [vmem:[#allocation2 + $0x460] sm:$0xff]  ;;  %v22679_v58 = vld [vmem:[#allocation2 + $0x478] sm:$0xff] }
 0x91b   :  { %14525 = vmatprep.mubr.msk.f32.mxu1 %vm6265_vm1, %v22120_v7  ;;  %v14609_v7 = vld [vmem:[%s25567_s3 + $0x460] sm:$0xff] }
 0x91c   :  { %16332 = vmatprep.subr.bf16.mxu1 %v16331_v11  ;;  %v22683_v11 = vld [vmem:[#allocation2 + $0x470] sm:$0xff] }
 0x91e   :  { %8564 = vmatmul.mubr.f32.gmra.mrb[48].mxu1 %v22124_v52  ;;  %v14611_v52 = vld [vmem:[%s25567_s3 + $0x470] sm:$0xff] }
 0x91f   :  { %14526 = vmatprep.mubr.msk.f32.mxu1 %vm6265_vm1, %v22127_v3  ;;  %v16333_v3 = vpack.c.bf16 %v14611_v52, %v14609_v7  ;;  %v22686_v7 = vld [vmem:[#allocation2 + $0x488] sm:$0xff]  ;;  %v22690_v52 = vld [vmem:[#allocation2 + $0x480] sm:$0xff] }
 0x921   :  { %16334 = vmatpush1.bf16.msra.mxu1 %v16333_v3  ;;  %v22693_v3 = vld [vmem:[#allocation2 + $0x498] sm:$0xff] }
 0x922   :  { %8570 = vmatmul.mubr.f32.gmra.mrb[50].mxu1 %v22131_v44  ;;  %v25887_v44 = vld [vmem:[#allocation34_spill] sm:$0xff] }
 0x923   :  { %14527 = vmatprep.mubr.msk.f32.mxu1 %vm6265_vm1, %v22134_v25  ;;  %v25888_v25 = vld [vmem:[#allocation3_spill] sm:$0xff] }
 0x926   :  { %8576 = vmatmul.mubr.f32.gmra.mrb[52].mxu1 %v22138_v56  ;;  %v25889_v56 = vld [vmem:[#allocation4_spill] sm:$0xff] }
 0x927   :  { %14528 = vmatprep.mubr.msk.f32.mxu1 %vm6265_vm1, %v22141_v51  ;;  %v25890_v51 = vld [vmem:[#allocation5_spill] sm:$0xff] }
 0x92a   :  { %8582 = vmatmul.mubr.f32.gmra.mrb[54].mxu1 %v22145_v23  ;;  %v25891_v23 = vld [vmem:[#allocation6_spill] sm:$0xff] }
 0x92b   :  { %14529 = vmatprep.mubr.msk.f32.mxu1 %vm6265_vm1, %v22148_v29  ;;  %v25892_v29 = vld [vmem:[#allocation7_spill] sm:$0xff] }
 0x92e   :  { %8588 = vmatmul.mubr.f32.gmra.mrb[56].mxu1 %v22152_v60  ;;  %v25893_v60 = vld [vmem:[#allocation8_spill] sm:$0xff] }
 0x92f   :  { %14530 = vmatprep.mubr.msk.f32.mxu1 %vm6265_vm1, %v22155_v63  ;;  %v25894_v63 = vld [vmem:[#allocation9_spill] sm:$0xff] }
 0x932   :  { %8594 = vmatmul.mubr.f32.gmra.mrb[58].mxu1 %v22165_v5  ;;  %v25895_v5 = vld [vmem:[#allocation10_spill] sm:$0xff] }
 0x933   :  { %14531 = vmatprep.mubr.msk.f32.mxu1 %vm6265_vm1, %v22168_v47  ;;  %v25896_v47 = vld [vmem:[#allocation11_spill] sm:$0xff] }
 0x936   :  { %8600 = vmatmul.mubr.f32.gmra.mrb[60].mxu1 %v22172_v12  ;;  %v25897_v12 = vld [vmem:[#allocation12_spill] sm:$0xff] }
 0x937   :  { %14532 = vmatprep.mubr.msk.f32.mxu1 %vm6265_vm1, %v22175_v43  ;;  %v25898_v43 = vld [vmem:[#allocation13_spill] sm:$0xff] }
 0x93a   :  { %8606 = vmatmul.mubr.f32.gmra.mrb[62].mxu1 %v22179_v61  ;;  %v14678_v61 = vld [vmem:[%s25567_s3 + $0x488] sm:$0xff] }
 0x93b   :  { %14533 = vmatprep.mubr.msk.f32.mxu1 %vm6265_vm1, %v22182_v27  ;;  %v14680_v27 = vld [vmem:[%s25567_s3 + $0x498] sm:$0xff] }
 0x93e   :  { %8612 = vmatmul.mubr.f32.gmra.mrb[64].mxu1 %v22186_v31  ;;  %v25899_v31 = vld [vmem:[#allocation14_spill] sm:$0xff] }
 0x93f   :  { %14534 = vmatprep.mubr.msk.f32.mxu1 %vm6265_vm1, %v22189_v15  ;;  %v16335_v15 = vpack.c.bf16 %v14680_v27, %v14678_v61  ;;  %v14677_v61 = vld [vmem:[%s25567_s3 + $0x480] sm:$0xff]  ;;  %v14679_v27 = vld [vmem:[%s25567_s3 + $0x490] sm:$0xff] }
 0x941   :  { %16336 = vmatprep.subr.bf16.mxu1 %v16335_v15  ;;  %v14682_v15 = vld [vmem:[%s25567_s3 + $0x4a8] sm:$0xff] }
 0x942   :  { %8618 = vmatmul.mubr.f32.gmra.mrb[66].mxu1 %v22193_v32  ;;  %v25900_v32 = vld [vmem:[#allocation15_spill] sm:$0xff] }
 0x943   :  { %14535 = vmatprep.mubr.msk.f32.mxu1 %vm6265_vm1, %v22196_v34  ;;  %v25901_v34 = vld [vmem:[#allocation16_spill] sm:$0xff] }
 0x946   :  { %8624 = vmatmul.mubr.f32.gmra.mrb[68].mxu1 %v22200_v59  ;;  %v25902_v59 = vld [vmem:[#allocation17_spill] sm:$0xff] }
 0x947   :  { %14536 = vmatprep.mubr.msk.f32.mxu1 %vm6265_vm1, %v22203_v49  ;;  %v25903_v49 = vld [vmem:[#allocation18_spill] sm:$0xff] }
 0x94a   :  { %8630 = vmatmul.mubr.f32.gmra.mrb[70].mxu1 %v22207_v28  ;;  %v25904_v28 = vld [vmem:[#allocation19_spill] sm:$0xff] }
 0x94b   :  { %14537 = vmatprep.mubr.msk.f32.mxu1 %vm6265_vm1, %v22210_v22  ;;  %v25905_v22 = vld [vmem:[#allocation20_spill] sm:$0xff] }
 0x94e   :  { %8636 = vmatmul.mubr.f32.gmra.mrb[72].mxu1 %v22214_v54  ;;  %v25906_v54 = vld [vmem:[#allocation21_spill] sm:$0xff] }
 0x94f   :  { %14538 = vmatprep.mubr.msk.f32.mxu1 %vm6265_vm1, %v22217_v48  ;;  %v25907_v48 = vld [vmem:[#allocation22_spill] sm:$0xff] }
 0x952   :  { %8642 = vmatmul.mubr.f32.gmra.mrb[74].mxu1 %v22221_v30  ;;  %v25908_v30 = vld [vmem:[#allocation23_spill] sm:$0xff] }
 0x953   :  { %14539 = vmatprep.mubr.msk.f32.mxu1 %vm6265_vm1, %v22224_v45  ;;  %v25909_v45 = vld [vmem:[#allocation24_spill] sm:$0xff] }
 0x956   :  { %8648 = vmatmul.mubr.f32.gmra.mrb[76].mxu1 %v22228_v14  ;;  %v25910_v14 = vld [vmem:[#allocation25_spill] sm:$0xff] }
 0x957   :  { %14540 = vmatprep.mubr.msk.f32.mxu1 %vm6265_vm1, %v25887_v44  ;;  %v22697_v44 = vld [vmem:[#allocation2 + $0x490] sm:$0xff] }
 0x95a   :  { %8654 = vmatmul.mubr.f32.gmra.mrb[78].mxu1 %v25888_v25  ;;  %v22700_v25 = vld [vmem:[#allocation2 + $0x4a8] sm:$0xff] }
 0x95b   :  { %14541 = vmatprep.mubr.msk.f32.mxu1 %vm6265_vm1, %v25889_v56  ;;  %v22704_v56 = vld [vmem:[#allocation2 + $0x4a0] sm:$0xff] }
 0x95e   :  { %8660 = vmatmul.mubr.f32.gmra.mrb[80].mxu1 %v25890_v51  ;;  %v22707_v51 = vld [vmem:[#allocation2 + $0x4b8] sm:$0xff] }
 0x95f   :  { %14542 = vmatprep.mubr.msk.f32.mxu1 %vm6265_vm1, %v25891_v23  ;;  %v22711_v23 = vld [vmem:[#allocation2 + $0x4b0] sm:$0xff] }
 0x962   :  { %8666 = vmatmul.mubr.f32.gmra.mrb[82].mxu1 %v25892_v29  ;;  %v22714_v29 = vld [vmem:[#allocation2 + $0x4c8] sm:$0xff] }
 0x963   :  { %14543 = vmatprep.mubr.msk.f32.mxu1 %vm6265_vm1, %v25893_v60  ;;  %v22718_v60 = vld [vmem:[#allocation2 + $0x4c0] sm:$0xff] }
 0x966   :  { %8672 = vmatmul.mubr.f32.gmra.mrb[84].mxu1 %v25894_v63  ;;  %v22721_v63 = vld [vmem:[#allocation2 + $0x4d8] sm:$0xff] }
 0x967   :  { %14544 = vmatprep.mubr.msk.f32.mxu1 %vm6265_vm1, %v25895_v5  ;;  %v22725_v5 = vld [vmem:[#allocation2 + $0x4d0] sm:$0xff] }
 0x96a   :  { %8678 = vmatmul.mubr.f32.gmra.mrb[86].mxu1 %v25896_v47  ;;  %v22728_v47 = vld [vmem:[#allocation2 + $0x4e8] sm:$0xff] }
 0x96b   :  { %14545 = vmatprep.mubr.msk.f32.mxu1 %vm6265_vm1, %v25897_v12  ;;  %v22732_v12 = vld [vmem:[#allocation2 + $0x4e0] sm:$0xff] }
 0x96e   :  { %8684 = vmatmul.mubr.f32.gmra.mrb[88].mxu1 %v25898_v43  ;;  %v22735_v43 = vld [vmem:[#allocation2 + $0x4f8] sm:$0xff] }
 0x96f   :  { %14546 = vmatprep.mubr.msk.f32.mxu1 %vm6265_vm1, %v25899_v31  ;;  %v22745_v31 = vld [vmem:[#allocation2 + $0x4f0] sm:$0xff] }
 0x972   :  { %8690 = vmatmul.mubr.f32.gmra.mrb[90].mxu1 %v25900_v32  ;;  %v14684_v32 = vld [vmem:[%s25567_s3 + $0x4b8] sm:$0xff] }
 0x973   :  { %14547 = vmatprep.mubr.msk.f32.mxu1 %vm6265_vm1, %v25901_v34  ;;  %v9006_v34 = vld [vmem:[#allocation2 + $0x188] sm:$0xff] }
 0x976   :  { %8696 = vmatmul.mubr.f32.gmra.mrb[92].mxu1 %v25902_v59  ;;  %v16337_v59 = vpack.c.bf16 %v14679_v27, %v14677_v61  ;;  %v14695_v61 = vld [vmem:[%s25567_s3 + $0x510] sm:$0xff] }
 0x977   :  { %14548 = vmatprep.mubr.msk.f32.mxu1 %vm6265_vm1, %v25903_v49  ;;  %v16339_v49 = vpack.c.bf16 %v14684_v32, %v14682_v15  ;;  %v9011_v27 = vld [vmem:[#allocation2 + $0x1b0] sm:$0xff]  ;;  %v9014_v15 = vld [vmem:[#allocation2 + $0x1c8] sm:$0xff] }
 0x97a   :  { %8702 = vmatmul.mubr.f32.gmra.mrb[94].mxu1 %v25904_v28  ;;  %v14681_v28 = vld [vmem:[%s25567_s3 + $0x4a0] sm:$0xff] }
 0x97b   :  { %14549 = vmatprep.mubr.msk.f32.mxu1 %vm6265_vm1, %v25905_v22  ;;  %v14683_v22 = vld [vmem:[%s25567_s3 + $0x4b0] sm:$0xff] }
 0x97e   :  { %8708 = vmatmul.mubr.f32.gmra.mrb[96].mxu1 %v25906_v54  ;;  %v9005_v54 = vld [vmem:[#allocation2 + $0x180] sm:$0xff] }
 0x97f   :  { %14550 = vmatprep.mubr.msk.f32.mxu1 %vm6265_vm1, %v25907_v48  ;;  %v14686_v48 = vld [vmem:[%s25567_s3 + $0x4c8] sm:$0xff] }
 0x982   :  { %8714 = vmatmul.mubr.f32.gmra.mrb[98].mxu1 %v25908_v30  ;;  %v14688_v30 = vld [vmem:[%s25567_s3 + $0x4d8] sm:$0xff] }
 0x983   :  { %14551 = vmatprep.mubr.msk.f32.mxu1 %vm6265_vm1, %v25909_v45  ;;  %v9008_v45 = vld [vmem:[#allocation2 + $0x198] sm:$0xff] }
 0x986   :  { %8720 = vmatmul.mubr.f32.gmra.mrb[100].mxu1 %v25910_v14  ;;  %v16341_v14 = vpack.c.bf16 %v14683_v22, %v14681_v28  ;;  %v9013_v28 = vld [vmem:[#allocation2 + $0x1c0] sm:$0xff]  ;;  %v9016_v22 = vld [vmem:[#allocation2 + $0x1d8] sm:$0xff] }
 0x987   :  { %14552 = vmatprep.mubr.msk.f32.mxu1 %vm6265_vm1, %v25911_v41  ;;  %v16343_v41 = vpack.c.bf16 %v14688_v30, %v14686_v48  ;;  %v14699_v48 = vld [vmem:[%s25567_s3 + $0x530] sm:$0xff] }
 0x98a   :  { %8726 = vmatmul.mubr.f32.gmra.mrb[102].mxu1 %v25912_v24  ;;  %v14685_v24 = vld [vmem:[%s25567_s3 + $0x4c0] sm:$0xff] }
 0x98b   :  { %14553 = vmatprep.mubr.msk.f32.mxu1 %vm6265_vm1, %v25913_v13  ;;  %v14687_v13 = vld [vmem:[%s25567_s3 + $0x4d0] sm:$0xff] }
 0x98e   :  { %8732 = vmatmul.mubr.f32.gmra.mrb[104].mxu1 %v25914_v50  ;;  %v9007_v50 = vld [vmem:[#allocation2 + $0x190] sm:$0xff] }
 0x98f   :  { %14554 = vmatprep.mubr.msk.f32.mxu1 %vm6265_vm1, %v25915_v53  ;;  %v14690_v53 = vld [vmem:[%s25567_s3 + $0x4e8] sm:$0xff] }
 0x992   :  { %8738 = vmatmul.mubr.f32.gmra.mrb[106].mxu1 %v25916_v39  ;;  %v14692_v39 = vld [vmem:[%s25567_s3 + $0x4f8] sm:$0xff] }
 0x993   :  { %14555 = vmatprep.mubr.msk.f32.mxu1 %vm6265_vm1, %v25917_v57  ;;  %v9010_v57 = vld [vmem:[#allocation2 + $0x1a8] sm:$0xff] }
 0x996   :  { %8744 = vmatmul.mubr.f32.gmra.mrb[108].mxu1 %v25918_v2  ;;  %v16345_v2 = vpack.c.bf16 %v14687_v13, %v14685_v24  ;;  %v9020_v24 = vld [vmem:[#allocation2 + $0x1f8] sm:$0xff]  ;;  %v9019_v13 = vld [vmem:[#allocation2 + $0x1f0] sm:$0xff] }
 0x997   :  { %14556 = vmatprep.mubr.msk.f32.mxu1 %vm6265_vm1, %v25919_v4  ;;  %v16347_v4 = vpack.c.bf16 %v14692_v39, %v14690_v53  ;;  %v22820_v53 = vld [vmem:[#allocation2 + $0x200] sm:$0xff]  ;;  %v22823_v39 = vld [vmem:[#allocation2 + $0x218] sm:$0xff] }
 0x99a   :  { %8750 = vmatmul.mubr.f32.gmra.mrb[110].mxu1 %v25920_v42  ;;  %v14689_v42 = vld [vmem:[%s25567_s3 + $0x4e0] sm:$0xff] }
 0x99b   :  { %14557 = vmatprep.mubr.msk.f32.mxu1 %vm6265_vm1, %v25921_v0  ;;  %v14691_v0 = vld [vmem:[%s25567_s3 + $0x4f0] sm:$0xff] }
 0x99e   :  { %8756 = vmatmul.mubr.f32.gmra.mrb[112].mxu1 %v25922_v16  ;;  %v9009_v16 = vld [vmem:[#allocation2 + $0x1a0] sm:$0xff] }
 0x99f   :  { %14558 = vmatprep.mubr.msk.f32.mxu1 %vm6265_vm1, %v25923_v40  ;;  %v14694_v40 = vld [vmem:[%s25567_s3 + $0x508] sm:$0xff] }
 0x9a2   :  { %8762 = vmatmul.mubr.f32.gmra.mrb[114].mxu1 %v25924_v37  ;;  %v14696_v37 = vld [vmem:[%s25567_s3 + $0x518] sm:$0xff] }
 0x9a3   :  { %14559 = vmatprep.mubr.msk.f32.mxu1 %vm6265_vm1, %v25925_v18  ;;  %v9012_v18 = vld [vmem:[#allocation2 + $0x1b8] sm:$0xff] }
 0x9a6   :  { %8768 = vmatmul.mubr.f32.gmra.mrb[116].mxu1 %v25926_v21  ;;  %v16349_v21 = vpack.c.bf16 %v14691_v0, %v14689_v42  ;;  %v22837_v42 = vld [vmem:[#allocation2 + $0x238] sm:$0xff]  ;;  %v14702_v0 = vld [vmem:[%s25567_s3 + $0x548] sm:$0xff] }
 0x9a7   :  { %14560 = vmatprep.mubr.msk.f32.mxu1 %vm6265_vm1, %v25927_v9  ;;  %v16351_v9 = vpack.c.bf16 %v14696_v37, %v14694_v40  ;;  %v22847_v37 = vld [vmem:[#allocation2 + $0x230] sm:$0xff] }
 0x9aa   :  { %8774 = vmatmul.mubr.f32.gmra.mrb[118].mxu1 %v25928_v36  ;;  %v14693_v36 = vld [vmem:[%s25567_s3 + $0x500] sm:$0xff] }
 0x9ab   :  { %14561 = vmatprep.mubr.msk.f32.mxu1 %vm6265_vm1, %v22630_v1  ;;  %v16353_v32 = vpack.c.bf16 %v14695_v61, %v14693_v36  ;;  %v22860_v61 = vld [vmem:[#allocation2 + $0x240] sm:$0xff] }
 0x9ae   :  { %8780 = vmatmul.mubr.f32.gmra.mrb[120].mxu1 %v22634_v62 }
 0x9af   :  { %14562 = vmatprep.mubr.msk.f32.mxu1 %vm6265_vm1, %v22637_v6 }
 0x9b2   :  { %8786 = vmatmul.mubr.f32.gmra.mrb[122].mxu1 %v22641_v35 }
 0x9b3   :  { %14563 = vmatprep.mubr.msk.f32.mxu1 %vm6265_vm1, %v22644_v17 }
 0x9b6   :  { %8792 = vmatmul.mubr.f32.gmra.mrb[124].mxu1 %v22648_v26 }
 0x9b7   :  { %14564 = vmatprep.mubr.msk.f32.mxu1 %vm6265_vm1, %v22651_v33 }
 0x9ba   :  { %8798 = vmatmul.mubr.f32.gmra.mrb[126].mxu1 %v22655_v10 }
 0x9bb   :  { %14565 = vmatprep.mubr.msk.f32.mxu1 %vm6265_vm1, %v22658_v19 }
 0x9be   :  { %8804 = vmatmul.mubr.f32.gmra.mrb[128].mxu1 %v22662_v8 }
 0x9bf   :  { %14566 = vmatprep.mubr.msk.f32.mxu1 %vm6265_vm1, %v22665_v46 }
 0x9c2   :  { %8810 = vmatmul.mubr.f32.gmra.mrb[130].mxu1 %v22669_v20 }
 0x9c3   :  { %14567 = vmatprep.mubr.msk.f32.mxu1 %vm6265_vm1, %v22672_v38 }
 0x9c6   :  { %8816 = vmatmul.mubr.f32.gmra.mrb[132].mxu1 %v22676_v55 }
 0x9c7   :  { %14568 = vmatprep.mubr.msk.f32.mxu1 %vm6265_vm1, %v22679_v58 }
 0x9ca   :  { %8822 = vmatmul.mubr.f32.gmra.mrb[134].mxu1 %v22683_v11 }
 0x9cb   :  { %14569 = vmatprep.mubr.msk.f32.mxu1 %vm6265_vm1, %v22686_v7 }
 0x9ce   :  { %8828 = vmatmul.mubr.f32.gmra.mrb[136].mxu1 %v22690_v52 }
 0x9cf   :  { %14570 = vmatprep.mubr.msk.f32.mxu1 %vm6265_vm1, %v22693_v3 }
 0x9d2   :  { %8834 = vmatmul.mubr.f32.gmra.mrb[138].mxu1 %v22697_v44 }
 0x9d3   :  { %14571 = vmatprep.mubr.msk.f32.mxu1 %vm6265_vm1, %v22700_v25 }
 0x9d6   :  { %8840 = vmatmul.mubr.f32.gmra.mrb[140].mxu1 %v22704_v56 }
 0x9d7   :  { %14572 = vmatprep.mubr.msk.f32.mxu1 %vm6265_vm1, %v22707_v51 }
 0x9da   :  { %8846 = vmatmul.mubr.f32.gmra.mrb[142].mxu1 %v22711_v23 }
 0x9db   :  { %14573 = vmatprep.mubr.msk.f32.mxu1 %vm6265_vm1, %v22714_v29 }
 0x9de   :  { %8852 = vmatmul.mubr.f32.gmra.mrb[144].mxu1 %v22718_v60 }
 0x9df   :  { %14574 = vmatprep.mubr.msk.f32.mxu1 %vm6265_vm1, %v22721_v63 }
 0x9e2   :  { %8858 = vmatmul.mubr.f32.gmra.mrb[146].mxu1 %v22725_v5 }
 0x9e3   :  { %14575 = vmatprep.mubr.msk.f32.mxu1 %vm6265_vm1, %v22728_v47 }
 0x9e6   :  { %8864 = vmatmul.mubr.f32.gmra.mrb[148].mxu1 %v22732_v12 }
 0x9e7   :  { %14576 = vmatprep.mubr.msk.f32.mxu1 %vm6265_vm1, %v22735_v43 }
 0x9ea   :  { %8870 = vmatmul.mubr.f32.gmra.mrb[150].mxu1 %v22745_v31 }
 0x9eb   :  { %14613 = vmatprep.mubr.msk.f32.mxu1 %vm6265_vm1, %v9006_v34  ;;  %v14698_v34 = vld [vmem:[%s25567_s3 + $0x528] sm:$0xff] }
 0x9ee   :  { %9427 = vmatmul.mubr.f32.vlgmr.msra.gmra.mrb[24].mxu1 %v9005_v54  ;;  %v14697_v54 = vld [vmem:[%s25567_s3 + $0x520] sm:$0xff] }
 0x9ef   :  { %14614 = vmatprep.mubr.msk.f32.mxu1 %vm6265_vm1, %v9008_v45  ;;  %16338 = vmatpush1.bf16.msra.mxu1 %v16337_v59  ;;  %v14700_v59 = vld [vmem:[%s25567_s3 + $0x538] sm:$0xff]  ;;  %v16357_v30 = vpack.c.bf16 %v14699_v48, %v14697_v54  ;;  %v9015_v45 = vld [vmem:[#allocation2 + $0x1d0] sm:$0xff] }
 0x9f0   :  { %16340 = vmatprep.subr.bf16.mxu1 %v16339_v49  ;;  %v16355_v49 = vpack.c.bf16 %v14700_v59, %v14698_v34  ;;  %v22874_v34 = vld [vmem:[#allocation2 + $0x260] sm:$0xff]  ;;  %v22877_v59 = vld [vmem:[#allocation2 + $0x278] sm:$0xff]  ;;  %v22895_v48 = vld [vmem:[#allocation2 + $0x290] sm:$0xff] }
 0x9f1   :  { %v22891_v54 = vld [vmem:[#allocation2 + $0x298] sm:$0xff] }
 0x9f2   :  { %9433 = vmatmul.mubr.f32.gmra.mrb[26].mxu1 %v9007_v50  ;;  %v22816_v50 = vld [vmem:[#allocation2 + $0x208] sm:$0xff] }
 0x9f3   :  { %14615 = vmatprep.mubr.msk.f32.mxu1 %vm6265_vm1, %v9010_v57  ;;  %16342 = vmatpush1.bf16.msra.mxu1 %v16341_v14  ;;  %v9018_v14 = vld [vmem:[#allocation2 + $0x1e8] sm:$0xff]  ;;  %v22827_v57 = vld [vmem:[#allocation2 + $0x210] sm:$0xff] }
 0x9f4   :  { %16344 = vmatprep.subr.bf16.mxu1 %v16343_v41  ;;  %v9017_v41 = vld [vmem:[#allocation2 + $0x1e0] sm:$0xff] }
 0x9f6   :  { %9439 = vmatmul.mubr.f32.gmra.mrb[28].mxu1 %v9009_v16  ;;  %v14704_v16 = vld [vmem:[%s25567_s3 + $0x558] sm:$0xff] }
 0x9f7   :  { %14616 = vmatprep.mubr.msk.f32.mxu1 %vm6265_vm1, %v9012_v18  ;;  %16346 = vmatpush1.bf16.msra.mxu1 %v16345_v2  ;;  %v22830_v2 = vld [vmem:[#allocation2 + $0x228] sm:$0xff]  ;;  %v16359_v40 = vpack.c.bf16 %v14704_v16, %v14702_v0  ;;  %v14705_v0 = vld [vmem:[%s25567_s3 + $0x560] sm:$0xff]  ;;  %v14707_v16 = vld [vmem:[%s25567_s3 + $0x570] sm:$0xff] }
 0x9f8   :  { %16348 = vmatprep.subr.bf16.mxu1 %v16347_v4  ;;  %v22834_v4 = vld [vmem:[#allocation2 + $0x220] sm:$0xff]  ;;  %v22850_v18 = vld [vmem:[#allocation2 + $0x248] sm:$0xff] }
 0x9fa   :  { %9445 = vmatmul.mubr.f32.gmra.mrb[30].mxu1 %v9011_v27  ;;  %v22863_v27 = vld [vmem:[#allocation2 + $0x258] sm:$0xff] }
 0x9fb   :  { %14617 = vmatprep.mubr.msk.f32.mxu1 %vm6265_vm1, %v9014_v15  ;;  %16350 = vmatpush1.bf16.msra.mxu1 %v16349_v21  ;;  %v14701_v21 = vld [vmem:[%s25567_s3 + $0x540] sm:$0xff]  ;;  %v22867_v15 = vld [vmem:[#allocation2 + $0x250] sm:$0xff] }
 0x9fc   :  { %16352 = vmatprep.subr.bf16.mxu1 %v16351_v9  ;;  %v14703_v9 = vld [vmem:[%s25567_s3 + $0x550] sm:$0xff] }
 0x9fd   :  { %v16361_v36 = vpack.c.bf16 %v14703_v9, %v14701_v21  ;;  %v22921_v21 = vld [vmem:[#allocation2 + $0x2b0] sm:$0xff]  ;;  %v22924_v9 = vld [vmem:[#allocation2 + $0x2c8] sm:$0xff] }
 0x9fe   :  { %9451 = vmatmul.mubr.f32.gmra.mrb[32].mxu1 %v9013_v28  ;;  %v22884_v28 = vld [vmem:[#allocation2 + $0x288] sm:$0xff]  ;;  %25929 = vst [vmem:[#allocation34_spill] sm:$0xff] %v22921_v21  ;;  %25930 = vst [vmem:[#allocation3_spill] sm:$0xff] %v22924_v9 }
 0x9ff   :  { %14618 = vmatprep.mubr.msk.f32.mxu1 %vm6265_vm1, %v9016_v22  ;;  %16354 = vmatpush1.bf16.msra.mxu1 %v16353_v32  ;;  %v22870_v32 = vld [vmem:[#allocation2 + $0x268] sm:$0xff]  ;;  %v22888_v22 = vld [vmem:[#allocation2 + $0x280] sm:$0xff] }
 0xa00   :  { %16356 = vmatprep.subr.bf16.mxu1 %v16355_v49  ;;  %v22881_v49 = vld [vmem:[#allocation2 + $0x270] sm:$0xff] }
 0xa02   :  { %9457 = vmatmul.mubr.f32.gmra.mrb[34].mxu1 %v9015_v45  ;;  %v22902_v45 = vld [vmem:[#allocation2 + $0x2a0] sm:$0xff] }
 0xa03   :  { %14619 = vmatprep.mubr.msk.f32.mxu1 %vm6265_vm1, %v9018_v14  ;;  %16358 = vmatpush1.bf16.msra.mxu1 %v16357_v30  ;;  %v22898_v30 = vld [vmem:[#allocation2 + $0x2a8] sm:$0xff]  ;;  %v22905_v14 = vld [vmem:[#allocation2 + $0x2b8] sm:$0xff] }
 0xa04   :  { %16360 = vmatprep.subr.bf16.mxu1 %v16359_v40  ;;  %v16365_v40 = vpack.c.bf16 %v14707_v16, %v14705_v0  ;;  %v22942_v0 = vld [vmem:[#allocation2 + $0x2e0] sm:$0xff]  ;;  %v22945_v16 = vld [vmem:[#allocation2 + $0x2f8] sm:$0xff] }
 0xa05   :  { %25935 = vst [vmem:[#allocation8_spill] sm:$0xff] %v22942_v0  ;;  %25936 = vst [vmem:[#allocation9_spill] sm:$0xff] %v22945_v16 }
 0xa06   :  { %9463 = vmatmul.mubr.f32.gmra.mrb[36].mxu1 %v9017_v41  ;;  %v14706_v41 = vld [vmem:[%s25567_s3 + $0x568] sm:$0xff] }
 0xa07   :  { %14620 = vmatprep.mubr.msk.f32.mxu1 %vm6265_vm1, %v9020_v24  ;;  %16362 = vmatpush1.bf16.msra.mxu1 %v16361_v36  ;;  %v14708_v24 = vld [vmem:[%s25567_s3 + $0x578] sm:$0xff]  ;;  %v22928_v36 = vld [vmem:[#allocation2 + $0x2c0] sm:$0xff] }
 0xa08   :  { %25931 = vst [vmem:[#allocation4_spill] sm:$0xff] %v22928_v36 }
 0xa0a   :  { %9469 = vmatmul.mubr.f32.gmra.mrb[38].mxu1 %v9019_v13  ;;  %v16363_v13 = vpack.c.bf16 %v14708_v24, %v14706_v41  ;;  %v22931_v41 = vld [vmem:[#allocation2 + $0x2d8] sm:$0xff]  ;;  %v22935_v24 = vld [vmem:[#allocation2 + $0x2d0] sm:$0xff] }
 0xa0b   :  { %14621 = vmatprep.mubr.msk.f32.mxu1 %vm6265_vm1, %v22816_v50  ;;  %25932 = vst [vmem:[#allocation5_spill] sm:$0xff] %v22931_v41  ;;  %25933 = vst [vmem:[#allocation6_spill] sm:$0xff] %v22935_v24 }
 0xa0c   :  { %16364 = vmatprep.subr.bf16.mxu1 %v16363_v13  ;;  %v22938_v13 = vld [vmem:[#allocation2 + $0x2e8] sm:$0xff] }
 0xa0d   :  { %16366 = vmatpush1.bf16.msra.mxu1 %v16365_v40  ;;  %25934 = vst [vmem:[#allocation7_spill] sm:$0xff] %v22938_v13  ;;  %v22949_v40 = vld [vmem:[#allocation2 + $0x2f0] sm:$0xff] }
 0xa0e   :  { %9475 = vmatmul.mubr.f32.gmra.mrb[40].mxu1 %v22820_v53  ;;  %25937 = vst [vmem:[#allocation10_spill] sm:$0xff] %v22949_v40 }
 0xa0f   :  { %14622 = vmatprep.mubr.msk.f32.mxu1 %vm6265_vm1, %v22823_v39 }
 0xa12   :  { %9481 = vmatmul.mubr.f32.gmra.mrb[42].mxu1 %v22827_v57 }
 0xa13   :  { %14623 = vmatprep.mubr.msk.f32.mxu1 %vm6265_vm1, %v22830_v2 }
 0xa16   :  { %9487 = vmatmul.mubr.f32.gmra.mrb[44].mxu1 %v22834_v4 }
 0xa17   :  { %14624 = vmatprep.mubr.msk.f32.mxu1 %vm6265_vm1, %v22837_v42 }
 0xa1a   :  { %9493 = vmatmul.mubr.f32.gmra.mrb[46].mxu1 %v22847_v37 }
 0xa1b   :  { %14625 = vmatprep.mubr.msk.f32.mxu1 %vm6265_vm1, %v22850_v18 }
 0xa1e   :  { %9499 = vmatmul.mubr.f32.gmra.mrb[48].mxu1 %v22860_v61 }
 0xa1f   :  { %14626 = vmatprep.mubr.msk.f32.mxu1 %vm6265_vm1, %v22863_v27 }
 0xa22   :  { %9505 = vmatmul.mubr.f32.gmra.mrb[50].mxu1 %v22867_v15 }
 0xa23   :  { %14627 = vmatprep.mubr.msk.f32.mxu1 %vm6265_vm1, %v22870_v32 }
 0xa26   :  { %9511 = vmatmul.mubr.f32.gmra.mrb[52].mxu1 %v22874_v34 }
 0xa27   :  { %14628 = vmatprep.mubr.msk.f32.mxu1 %vm6265_vm1, %v22877_v59 }
 0xa2a   :  { %9517 = vmatmul.mubr.f32.gmra.mrb[54].mxu1 %v22881_v49 }
 0xa2b   :  { %14629 = vmatprep.mubr.msk.f32.mxu1 %vm6265_vm1, %v22884_v28 }
 0xa2e   :  { %9523 = vmatmul.mubr.f32.gmra.mrb[56].mxu1 %v22888_v22 }
 0xa2f   :  { %14630 = vmatprep.mubr.msk.f32.mxu1 %vm6265_vm1, %v22891_v54 }
 0xa32   :  { %9529 = vmatmul.mubr.f32.gmra.mrb[58].mxu1 %v22895_v48 }
 0xa33   :  { %14631 = vmatprep.mubr.msk.f32.mxu1 %vm6265_vm1, %v22898_v30 }
 0xa36   :  { %9535 = vmatmul.mubr.f32.gmra.mrb[60].mxu1 %v22902_v45 }
 0xa37   :  { %14632 = vmatprep.mubr.msk.f32.mxu1 %vm6265_vm1, %v22905_v14 }
 0xa3a   :  { %9541 = vmatmul.mubr.f32.gmra.mrb[62].mxu1 %v22921_v21  ;;  %v22985_v21 = vld [vmem:[#allocation2 + $0x338] sm:$0xff] }
 0xa3b   :  { %14633 = vmatprep.mubr.msk.f32.mxu1 %vm6265_vm1, %v22924_v9  ;;  %v22982_v9 = vld [vmem:[#allocation2 + $0x320] sm:$0xff]  ;;  %25942 = vst [vmem:[#allocation15_spill] sm:$0xff] %v22985_v21 }
 0xa3e   :  { %9547 = vmatmul.mubr.f32.gmra.mrb[64].mxu1 %v22928_v36 }
 0xa3f   :  { %14634 = vmatprep.mubr.msk.f32.mxu1 %vm6265_vm1, %v22931_v41  ;;  %v22952_v41 = vld [vmem:[#allocation2 + $0x308] sm:$0xff] }
 0xa40   :  { %25938 = vst [vmem:[#allocation11_spill] sm:$0xff] %v22952_v41 }
 0xa42   :  { %9553 = vmatmul.mubr.f32.gmra.mrb[66].mxu1 %v22935_v24  ;;  %v22956_v24 = vld [vmem:[#allocation2 + $0x300] sm:$0xff] }
 0xa43   :  { %14635 = vmatprep.mubr.msk.f32.mxu1 %vm6265_vm1, %v22938_v13  ;;  %25939 = vst [vmem:[#allocation12_spill] sm:$0xff] %v22956_v24  ;;  %v22959_v13 = vld [vmem:[#allocation2 + $0x318] sm:$0xff] }
 0xa44   :  { %25940 = vst [vmem:[#allocation13_spill] sm:$0xff] %v22959_v13 }
 0xa46   :  { %9559 = vmatmul.mubr.f32.gmra.mrb[68].mxu1 %v22942_v0  ;;  %v22963_v0 = vld [vmem:[#allocation2 + $0x310] sm:$0xff] }
 0xa47   :  { %14636 = vmatprep.mubr.msk.f32.mxu1 %vm6265_vm1, %v22945_v16  ;;  %25941 = vst [vmem:[#allocation14_spill] sm:$0xff] %v22963_v0  ;;  %v22966_v16 = vld [vmem:[#allocation2 + $0x328] sm:$0xff] }
 0xa4a   :  { %9565 = vmatmul.mubr.f32.gmra.mrb[70].mxu1 %v22949_v40  ;;  %v14710_v40 = vld [vmem:[%s25567_s3 + $0x588] sm:$0xff] }
 0xa4b   :  { %14637 = vmatprep.mubr.msk.f32.mxu1 %vm6265_vm1, %v22952_v41  ;;  %v14712_v41 = vld [vmem:[%s25567_s3 + $0x598] sm:$0xff] }
 0xa4e   :  { %9571 = vmatmul.mubr.f32.gmra.mrb[72].mxu1 %v22956_v24  ;;  %v16367_v24 = vpack.c.bf16 %v14712_v41, %v14710_v40  ;;  %v22989_v41 = vld [vmem:[#allocation2 + $0x330] sm:$0xff]  ;;  %v22992_v40 = vld [vmem:[#allocation2 + $0x348] sm:$0xff] }
 0xa4f   :  { %14638 = vmatprep.mubr.msk.f32.mxu1 %vm6265_vm1, %v22959_v13  ;;  %v14709_v13 = vld [vmem:[%s25567_s3 + $0x580] sm:$0xff]  ;;  %25943 = vst [vmem:[#allocation16_spill] sm:$0xff] %v22989_v41  ;;  %25944 = vst [vmem:[#allocation17_spill] sm:$0xff] %v22992_v40 }
 0xa50   :  { %16368 = vmatprep.subr.bf16.mxu1 %v16367_v24  ;;  %v22999_v24 = vld [vmem:[#allocation2 + $0x358] sm:$0xff] }
 0xa51   :  { %25946 = vst [vmem:[#allocation19_spill] sm:$0xff] %v22999_v24 }
 0xa52   :  { %9577 = vmatmul.mubr.f32.gmra.mrb[74].mxu1 %v22963_v0  ;;  %v14711_v0 = vld [vmem:[%s25567_s3 + $0x590] sm:$0xff] }
 0xa53   :  { %14639 = vmatprep.mubr.msk.f32.mxu1 %vm6265_vm1, %v22966_v16  ;;  %v16369_v36 = vpack.c.bf16 %v14711_v0, %v14709_v13  ;;  %v22996_v13 = vld [vmem:[#allocation2 + $0x340] sm:$0xff]  ;;  %v23003_v0 = vld [vmem:[#allocation2 + $0x350] sm:$0xff] }
 0xa54   :  { %25945 = vst [vmem:[#allocation18_spill] sm:$0xff] %v22996_v13  ;;  %25947 = vst [vmem:[#allocation20_spill] sm:$0xff] %v23003_v0 }
 0xa55   :  { %16370 = vmatpush1.bf16.msra.mxu1 %v16369_v36  ;;  %v23006_v36 = vld [vmem:[#allocation2 + $0x368] sm:$0xff] }
 0xa56   :  { %9583 = vmatmul.mubr.f32.gmra.mrb[76].mxu1 %v22982_v9  ;;  %25948 = vst [vmem:[#allocation21_spill] sm:$0xff] %v23006_v36 }
 0xa57   :  { %14640 = vmatprep.mubr.msk.f32.mxu1 %vm6265_vm1, %v22985_v21  ;;  %v23037_v21 = vld [vmem:[#allocation2 + $0x390] sm:$0xff] }
 0xa5a   :  { %9589 = vmatmul.mubr.f32.gmra.mrb[78].mxu1 %v22989_v41  ;;  %v23010_v41 = vld [vmem:[#allocation2 + $0x360] sm:$0xff] }
 0xa5b   :  { %14641 = vmatprep.mubr.msk.f32.mxu1 %vm6265_vm1, %v22992_v40  ;;  %25949 = vst [vmem:[#allocation22_spill] sm:$0xff] %v23010_v41  ;;  %v23013_v40 = vld [vmem:[#allocation2 + $0x378] sm:$0xff] }
 0xa5c   :  { %25950 = vst [vmem:[#allocation23_spill] sm:$0xff] %v23013_v40 }
 0xa5e   :  { %9595 = vmatmul.mubr.f32.gmra.mrb[80].mxu1 %v22996_v13  ;;  %v23017_v13 = vld [vmem:[#allocation2 + $0x370] sm:$0xff] }
 0xa5f   :  { %14642 = vmatprep.mubr.msk.f32.mxu1 %vm6265_vm1, %v22999_v24  ;;  %25951 = vst [vmem:[#allocation24_spill] sm:$0xff] %v23017_v13  ;;  %v23020_v24 = vld [vmem:[#allocation2 + $0x388] sm:$0xff] }
 0xa60   :  { %25952 = vst [vmem:[#allocation25_spill] sm:$0xff] %v23020_v24 }
 0xa62   :  { %9601 = vmatmul.mubr.f32.gmra.mrb[82].mxu1 %v23003_v0  ;;  %v23024_v0 = vld [vmem:[#allocation2 + $0x380] sm:$0xff] }
 0xa63   :  { %14643 = vmatprep.mubr.msk.f32.mxu1 %vm6265_vm1, %v23006_v36  ;;  %25953 = vst [vmem:[#allocation26_spill] sm:$0xff] %v23024_v0  ;;  %v23027_v36 = vld [vmem:[#allocation2 + $0x398] sm:$0xff] }
 0xa64   :  { %25954 = vst [vmem:[#allocation27_spill] sm:$0xff] %v23027_v36 }
 0xa66   :  { %9607 = vmatmul.mubr.f32.gmra.mrb[84].mxu1 %v23010_v41 }
 0xa67   :  { %14644 = vmatprep.mubr.msk.f32.mxu1 %vm6265_vm1, %v23013_v40  ;;  %v14793_v40 = vld [vmem:[%s25569_s5 + $0x180] sm:$0xff] }
 0xa6a   :  { %9613 = vmatmul.mubr.f32.gmra.mrb[86].mxu1 %v23017_v13  ;;  %v14794_v13 = vld [vmem:[%s25569_s5 + $0x188] sm:$0xff] }
 0xa6b   :  { %14645 = vmatprep.mubr.msk.f32.mxu1 %vm6265_vm1, %v23020_v24  ;;  %v16371_v41 = vpack.c.bf16 %v14794_v13, %v14793_v40  ;;  %v23040_v24 = vld [vmem:[#allocation2 + $0x3a8] sm:$0xff]  ;;  %v23051_v40 = vld [vmem:[#allocation2 + $0x3b0] sm:$0xff] }
 0xa6c   :  { %25955 = vst [vmem:[#allocation28_spill] sm:$0xff] %v23040_v24  ;;  %25958 = vst [vmem:[#allocation31_spill] sm:$0xff] %v23051_v40  ;;  %v23054_v13 = vld [vmem:[#allocation2 + $0x3c8] sm:$0xff] }
 0xa6d   :  { %16372 = vmatprep.subr.bf16.mxu1 %v16371_v41  ;;  %25959 = vst [vmem:[#allocation32_spill] sm:$0xff] %v23054_v13  ;;  %v23058_v41 = vld [vmem:[#allocation2 + $0x3c0] sm:$0xff] }
 0xa6e   :  { %9619 = vmatmul.mubr.f32.gmra.mrb[88].mxu1 %v23024_v0  ;;  %v23047_v0 = vld [vmem:[#allocation2 + $0x3b8] sm:$0xff]  ;;  %25960 = vst [vmem:[#allocation35_spill] sm:$0xff] %v23058_v41 }
 0xa6f   :  { %14646 = vmatprep.mubr.msk.f32.mxu1 %vm6265_vm1, %v23027_v36  ;;  %v23044_v36 = vld [vmem:[#allocation2 + $0x3a0] sm:$0xff]  ;;  %25957 = vst [vmem:[#allocation30_spill] sm:$0xff] %v23047_v0 }
 0xa70   :  { %25956 = vst [vmem:[#allocation29_spill] sm:$0xff] %v23044_v36 }
 0xa72   :  { %9625 = vmatmul.mubr.f32.gmra.mrb[90].mxu1 %v23037_v21 }
 0xa73   :  { %14647 = vmatprep.mubr.msk.f32.mxu1 %vm6265_vm1, %v23040_v24  ;;  %v23061_v24 = vld [vmem:[#allocation2 + $0x3d8] sm:$0xff] }
 0xa76   :  { %9631 = vmatmul.mubr.f32.gmra.mrb[92].mxu1 %v23044_v36  ;;  %v23065_v36 = vld [vmem:[#allocation2 + $0x3d0] sm:$0xff] }
 0xa77   :  { %14648 = vmatprep.mubr.msk.f32.mxu1 %vm6265_vm1, %v23047_v0  ;;  %v23068_v0 = vld [vmem:[#allocation2 + $0x3e8] sm:$0xff] }
 0xa7a   :  { %9637 = vmatmul.mubr.f32.gmra.mrb[94].mxu1 %v23051_v40  ;;  %v23072_v40 = vld [vmem:[#allocation2 + $0x3e0] sm:$0xff] }
 0xa7b   :  { %14649 = vmatprep.mubr.msk.f32.mxu1 %vm6265_vm1, %v23054_v13  ;;  %v23075_v13 = vld [vmem:[#allocation2 + $0x3f8] sm:$0xff] }
 0xa7e   :  { %9643 = vmatmul.mubr.f32.gmra.mrb[96].mxu1 %v23058_v41  ;;  %v23079_v41 = vld [vmem:[#allocation2 + $0x3f0] sm:$0xff] }
 0xa7f   :  { %14650 = vmatprep.mubr.msk.f32.mxu1 %vm6265_vm1, %v23061_v24 }
 0xa82   :  { %9649 = vmatmul.mubr.f32.gmra.mrb[98].mxu1 %v23065_v36 }
 0xa83   :  { %14651 = vmatprep.mubr.msk.f32.mxu1 %vm6265_vm1, %v23068_v0 }
 0xa86   :  { %9655 = vmatmul.mubr.f32.gmra.mrb[100].mxu1 %v23072_v40 }
 0xa87   :  { %14652 = vmatprep.mubr.msk.f32.mxu1 %vm6265_vm1, %v23075_v13 }
 0xa8a   :  { %9661 = vmatmul.mubr.f32.gmra.mrb[102].mxu1 %v23079_v41 }
 0xa8b   :  { %14653 = vmatprep.mubr.msk.f32.mxu1 %vm6265_vm1, %v22630_v1  ;;  %v23130_v1 = vld [vmem:[#allocation2 + $0x508] sm:$0xff] }
 0xa8e   :  { %9667 = vmatmul.mubr.f32.gmra.mrb[104].mxu1 %v22634_v62  ;;  %v23134_v62 = vld [vmem:[#allocation2 + $0x500] sm:$0xff] }
 0xa8f   :  { %14654 = vmatprep.mubr.msk.f32.mxu1 %vm6265_vm1, %v22637_v6  ;;  %v23137_v6 = vld [vmem:[#allocation2 + $0x518] sm:$0xff] }
 0xa92   :  { %9673 = vmatmul.mubr.f32.gmra.mrb[106].mxu1 %v22641_v35  ;;  %v23141_v35 = vld [vmem:[#allocation2 + $0x510] sm:$0xff] }
 0xa93   :  { %14655 = vmatprep.mubr.msk.f32.mxu1 %vm6265_vm1, %v22644_v17  ;;  %v23144_v17 = vld [vmem:[#allocation2 + $0x528] sm:$0xff] }
 0xa96   :  { %9679 = vmatmul.mubr.f32.gmra.mrb[108].mxu1 %v22648_v26  ;;  %v23148_v26 = vld [vmem:[#allocation2 + $0x520] sm:$0xff] }
 0xa97   :  { %14656 = vmatprep.mubr.msk.f32.mxu1 %vm6265_vm1, %v22651_v33  ;;  %v23151_v33 = vld [vmem:[#allocation2 + $0x538] sm:$0xff] }
 0xa9a   :  { %9685 = vmatmul.mubr.f32.gmra.mrb[110].mxu1 %v22655_v10  ;;  %v23155_v10 = vld [vmem:[#allocation2 + $0x530] sm:$0xff] }
 0xa9b   :  { %14657 = vmatprep.mubr.msk.f32.mxu1 %vm6265_vm1, %v22658_v19  ;;  %v23158_v19 = vld [vmem:[#allocation2 + $0x548] sm:$0xff] }
 0xa9e   :  { %9691 = vmatmul.mubr.f32.gmra.mrb[112].mxu1 %v22662_v8  ;;  %v23162_v8 = vld [vmem:[#allocation2 + $0x540] sm:$0xff] }
 0xa9f   :  { %14658 = vmatprep.mubr.msk.f32.mxu1 %vm6265_vm1, %v22665_v46  ;;  %v23165_v46 = vld [vmem:[#allocation2 + $0x558] sm:$0xff] }
 0xaa2   :  { %9697 = vmatmul.mubr.f32.gmra.mrb[114].mxu1 %v22669_v20  ;;  %v23169_v20 = vld [vmem:[#allocation2 + $0x550] sm:$0xff] }
 0xaa3   :  { %14659 = vmatprep.mubr.msk.f32.mxu1 %vm6265_vm1, %v22672_v38  ;;  %v23172_v38 = vld [vmem:[#allocation2 + $0x568] sm:$0xff] }
 0xaa6   :  { %9703 = vmatmul.mubr.f32.gmra.mrb[116].mxu1 %v22676_v55  ;;  %v23176_v55 = vld [vmem:[#allocation2 + $0x560] sm:$0xff] }
 0xaa7   :  { %14660 = vmatprep.mubr.msk.f32.mxu1 %vm6265_vm1, %v22679_v58  ;;  %v23179_v58 = vld [vmem:[#allocation2 + $0x578] sm:$0xff] }
 0xaaa   :  { %9709 = vmatmul.mubr.f32.gmra.mrb[118].mxu1 %v22683_v11  ;;  %v14777_v11 = vld [vmem:[%s25569_s5 + $0x100] sm:$0xff] }
 0xaab   :  { %14661 = vmatprep.mubr.msk.f32.mxu1 %vm6265_vm1, %v22686_v7  ;;  %v14778_v7 = vld [vmem:[%s25569_s5 + $0x108] sm:$0xff] }
 0xaae   :  { %9715 = vmatmul.mubr.f32.gmra.mrb[120].mxu1 %v22690_v52  ;;  %v23189_v52 = vld [vmem:[#allocation2 + $0x570] sm:$0xff] }
 0xaaf   :  { %14662 = vmatprep.mubr.msk.f32.mxu1 %vm6265_vm1, %v22693_v3  ;;  %v14795_v3 = vld [vmem:[%s25569_s5 + $0x190] sm:$0xff] }
 0xab2   :  { %9721 = vmatmul.mubr.f32.gmra.mrb[122].mxu1 %v22697_v44  ;;  %v14796_v44 = vld [vmem:[%s25569_s5 + $0x198] sm:$0xff] }
 0xab3   :  { %14663 = vmatprep.mubr.msk.f32.mxu1 %vm6265_vm1, %v22700_v25  ;;  %v16373_v25 = vpack.c.bf16 %v14778_v7, %v14777_v11  ;;  %v14784_v11 = vld [vmem:[%s25569_s5 + $0x138] sm:$0xff]  ;;  %v14801_v7 = vld [vmem:[%s25569_s5 + $0x1c0] sm:$0xff] }
 0xab6   :  { %9727 = vmatmul.mubr.f32.gmra.mrb[124].mxu1 %v22704_v56  ;;  %v16375_v56 = vpack.c.bf16 %v14796_v44, %v14795_v3  ;;  %v14785_v44 = vld [vmem:[%s25569_s5 + $0x140] sm:$0xff] }
 0xab7   :  { %14664 = vmatprep.mubr.msk.f32.mxu1 %vm6265_vm1, %v22707_v51  ;;  %v14779_v51 = vld [vmem:[%s25569_s5 + $0x110] sm:$0xff] }
 0xaba   :  { %9733 = vmatmul.mubr.f32.gmra.mrb[126].mxu1 %v22711_v23  ;;  %v14780_v23 = vld [vmem:[%s25569_s5 + $0x118] sm:$0xff] }
 0xabb   :  { %14665 = vmatprep.mubr.msk.f32.mxu1 %vm6265_vm1, %v22714_v29  ;;  %v14797_v29 = vld [vmem:[%s25569_s5 + $0x1a0] sm:$0xff] }
 0xabe   :  { %9739 = vmatmul.mubr.f32.gmra.mrb[128].mxu1 %v22718_v60  ;;  %v14798_v60 = vld [vmem:[%s25569_s5 + $0x1a8] sm:$0xff] }
 0xabf   :  { %14666 = vmatprep.mubr.msk.f32.mxu1 %vm6265_vm1, %v22721_v63  ;;  %v16377_v63 = vpack.c.bf16 %v14780_v23, %v14779_v51  ;;  %v14806_v51 = vld [vmem:[%s25569_s5 + $0x1e8] sm:$0xff]  ;;  %v25972_v23 = vld [vmem:[#allocation13_spill] sm:$0xff] }
 0xac2   :  { %9745 = vmatmul.mubr.f32.gmra.mrb[130].mxu1 %v22725_v5  ;;  %v16379_v5 = vpack.c.bf16 %v14798_v60, %v14797_v29  ;;  %v14789_v60 = vld [vmem:[%s25569_s5 + $0x160] sm:$0xff] }
 0xac3   :  { %14667 = vmatprep.mubr.msk.f32.mxu1 %vm6265_vm1, %v22728_v47  ;;  %v14781_v47 = vld [vmem:[%s25569_s5 + $0x120] sm:$0xff] }
 0xac6   :  { %9751 = vmatmul.mubr.f32.gmra.mrb[132].mxu1 %v22732_v12  ;;  %v14782_v12 = vld [vmem:[%s25569_s5 + $0x128] sm:$0xff] }
 0xac7   :  { %14668 = vmatprep.mubr.msk.f32.mxu1 %vm6265_vm1, %v22735_v43  ;;  %v14799_v43 = vld [vmem:[%s25569_s5 + $0x1b0] sm:$0xff] }
 0xaca   :  { %9757 = vmatmul.mubr.f32.gmra.mrb[134].mxu1 %v22745_v31  ;;  %v14800_v31 = vld [vmem:[%s25569_s5 + $0x1b8] sm:$0xff] }
 0xacb   :  { %14669 = vmatprep.mubr.msk.f32.mxu1 %vm6265_vm1, %v23130_v1 }
 0xace   :  { %9763 = vmatmul.mubr.f32.gmra.mrb[136].mxu1 %v23134_v62 }
 0xacf   :  { %14670 = vmatprep.mubr.msk.f32.mxu1 %vm6265_vm1, %v23137_v6 }
 0xad2   :  { %9769 = vmatmul.mubr.f32.gmra.mrb[138].mxu1 %v23141_v35 }
 0xad3   :  { %14671 = vmatprep.mubr.msk.f32.mxu1 %vm6265_vm1, %v23144_v17 }
 0xad6   :  { %9775 = vmatmul.mubr.f32.gmra.mrb[140].mxu1 %v23148_v26 }
 0xad7   :  { %14672 = vmatprep.mubr.msk.f32.mxu1 %vm6265_vm1, %v23151_v33 }
 0xada   :  { %9781 = vmatmul.mubr.f32.gmra.mrb[142].mxu1 %v23155_v10 }
 0xadb   :  { %14673 = vmatprep.mubr.msk.f32.mxu1 %vm6265_vm1, %v23158_v19 }
 0xade   :  { %9787 = vmatmul.mubr.f32.gmra.mrb[144].mxu1 %v23162_v8 }
 0xadf   :  { %14674 = vmatprep.mubr.msk.f32.mxu1 %vm6265_vm1, %v23165_v46 }
 0xae2   :  { %9793 = vmatmul.mubr.f32.gmra.mrb[146].mxu1 %v23169_v20 }
 0xae3   :  { %14675 = vmatprep.mubr.msk.f32.mxu1 %vm6265_vm1, %v23172_v38 }
 0xae6   :  { %9799 = vmatmul.mubr.f32.gmra.mrb[148].mxu1 %v23176_v55 }
 0xae7   :  { %14676 = vmatprep.mubr.msk.f32.mxu1 %vm6265_vm1, %v23179_v58 }
 0xaea   :  { %9805 = vmatmul.mubr.f32.gmra.mrb[150].mxu1 %v23189_v52 }
 0xaeb   :  { %14713 = vmatprep.mubr.msk.f32.mxu1 %vm6265_vm1, %v22816_v50  ;;  %v16381_v50 = vpack.c.bf16 %v14782_v12, %v14781_v47  ;;  %v25973_v47 = vld [vmem:[#allocation14_spill] sm:$0xff]  ;;  %v25974_v12 = vld [vmem:[#allocation15_spill] sm:$0xff] }
 0xaee   :  { %10362 = vmatmul.mubr.f32.vlgmr.msra.gmra.mrb[24].mxu1 %v22820_v53  ;;  %v16383_v53 = vpack.c.bf16 %v14800_v31, %v14799_v43  ;;  %v25975_v43 = vld [vmem:[#allocation16_spill] sm:$0xff]  ;;  %v25976_v31 = vld [vmem:[#allocation17_spill] sm:$0xff] }
 0xaef   :  { %14714 = vmatprep.mubr.msk.f32.mxu1 %vm6265_vm1, %v22823_v39  ;;  %16374 = vmatpush3.bf16.msra.mxu1 %v16373_v25  ;;  %v14783_v39 = vld [vmem:[%s25569_s5 + $0x130] sm:$0xff]  ;;  %v14786_v25 = vld [vmem:[%s25569_s5 + $0x148] sm:$0xff] }
 0xaf0   :  { %16376 = vmatprep.subr.bf16.mxu1 %v16375_v56  ;;  %v14805_v56 = vld [vmem:[%s25569_s5 + $0x1e0] sm:$0xff] }
 0xaf1   :  { %v16395_v29 = vpack.c.bf16 %v14806_v51, %v14805_v56  ;;  %v10017_v56 = vld [vmem:[#allocation2 + $0x468] sm:$0xff]  ;;  %v10016_v51 = vld [vmem:[#allocation2 + $0x460] sm:$0xff] }
 0xaf2   :  { %10368 = vmatmul.mubr.f32.gmra.mrb[26].mxu1 %v22827_v57  ;;  %v14802_v57 = vld [vmem:[%s25569_s5 + $0x1c8] sm:$0xff] }
 0xaf3   :  { %14715 = vmatprep.mubr.msk.f32.mxu1 %vm6265_vm1, %v22830_v2  ;;  %16378 = vmatpush3.bf16.msra.mxu1 %v16377_v63  ;;  %v16385_v2 = vpack.c.bf16 %v14784_v11, %v14783_v39  ;;  %v16387_v3 = vpack.c.bf16 %v14802_v57, %v14801_v7  ;;  %v14790_v63 = vld [vmem:[%s25569_s5 + $0x168] sm:$0xff]  ;;  %v25980_v11 = vld [vmem:[#allocation21_spill] sm:$0xff] }
 0xaf4   :  { %16380 = vmatprep.subr.bf16.mxu1 %v16379_v5  ;;  %v16397_v5 = vpack.c.bf16 %v14790_v63, %v14789_v60  ;;  %v25979_v39 = vld [vmem:[#allocation20_spill] sm:$0xff]  ;;  %v25984_v57 = vld [vmem:[#allocation25_spill] sm:$0xff]  ;;  %v10020_v63 = vld [vmem:[#allocation2 + $0x480] sm:$0xff] }
 0xaf5   :  { %v25983_v7 = vld [vmem:[#allocation24_spill] sm:$0xff] }
 0xaf6   :  { %10374 = vmatmul.mubr.f32.gmra.mrb[28].mxu1 %v22834_v4  ;;  %v16389_v4 = vpack.c.bf16 %v14786_v25, %v14785_v44  ;;  %v14807_v44 = vld [vmem:[%s25569_s5 + $0x1f0] sm:$0xff]  ;;  %v14808_v25 = vld [vmem:[%s25569_s5 + $0x1f8] sm:$0xff]  ;;  %v10021_v60 = vld [vmem:[#allocation2 + $0x488] sm:$0xff] }
 0xaf7   :  { %14716 = vmatprep.mubr.msk.f32.mxu1 %vm6265_vm1, %v22837_v42  ;;  %16382 = vmatpush3.bf16.msra.mxu1 %v16381_v50  ;;  %v14803_v42 = vld [vmem:[%s25569_s5 + $0x1d0] sm:$0xff]  ;;  %v25977_v50 = vld [vmem:[#allocation18_spill] sm:$0xff] }
 0xaf8   :  { %16384 = vmatprep.subr.bf16.mxu1 %v16383_v53  ;;  %v25978_v53 = vld [vmem:[#allocation19_spill] sm:$0xff] }
 0xafa   :  { %10380 = vmatmul.mubr.f32.gmra.mrb[30].mxu1 %v22847_v37  ;;  %v14804_v37 = vld [vmem:[%s25569_s5 + $0x1d8] sm:$0xff] }
 0xafb   :  { %14717 = vmatprep.mubr.msk.f32.mxu1 %vm6265_vm1, %v22850_v18  ;;  %16386 = vmatpush3.bf16.msra.mxu1 %v16385_v2  ;;  %v16391_v18 = vpack.c.bf16 %v14804_v37, %v14803_v42  ;;  %v25985_v2 = vld [vmem:[#allocation26_spill] sm:$0xff]  ;;  %v16399_v42 = vpack.c.bf16 %v14808_v25, %v14807_v44 }
 0xafc   :  { %16388 = vmatprep.subr.bf16.mxu1 %v16387_v3  ;;  %v25986_v3 = vld [vmem:[#allocation27_spill] sm:$0xff]  ;;  %v14792_v37 = vld [vmem:[%s25569_s5 + $0x178] sm:$0xff] }
 0xafd   :  { %v10059_v25 = vld [vmem:[#allocation2 + $0x5b8] sm:$0xff] }
 0xafe   :  { %10386 = vmatmul.mubr.f32.gmra.mrb[32].mxu1 %v22860_v61  ;;  %v14787_v61 = vld [vmem:[%s25569_s5 + $0x150] sm:$0xff] }
 0xaff   :  { %14718 = vmatprep.mubr.msk.f32.mxu1 %vm6265_vm1, %v22863_v27  ;;  %16390 = vmatpush3.bf16.msra.mxu1 %v16389_v4  ;;  %v14788_v27 = vld [vmem:[%s25569_s5 + $0x158] sm:$0xff]  ;;  %v14791_v4 = vld [vmem:[%s25569_s5 + $0x170] sm:$0xff] }
 0xb00   :  { %16392 = vmatprep.subr.bf16.mxu1 %v16391_v18  ;;  %v16401_v18 = vpack.c.bf16 %v14792_v37, %v14791_v4 }
 0xb02   :  { %10392 = vmatmul.mubr.f32.gmra.mrb[34].mxu1 %v22867_v15  ;;  %v16393_v15 = vpack.c.bf16 %v14788_v27, %v14787_v61  ;;  %v25987_v61 = vld [vmem:[#allocation28_spill] sm:$0xff]  ;;  %v25988_v27 = vld [vmem:[#allocation29_spill] sm:$0xff] }
 0xb03   :  { %14719 = vmatprep.mubr.msk.f32.mxu1 %vm6265_vm1, %v22870_v32  ;;  %v25961_v32 = vld [vmem:[#allocation34_spill] sm:$0xff] }
 0xb04   :  { %16394 = vmatpush3.bf16.msra.mxu1 %v16393_v15  ;;  %v25989_v15 = vld [vmem:[#allocation30_spill] sm:$0xff] }
 0xb05   :  { %16396 = vmatprep.subr.bf16.mxu1 %v16395_v29  ;;  %v10018_v29 = vld [vmem:[#allocation2 + $0x470] sm:$0xff] }
 0xb06   :  { %10398 = vmatmul.mubr.f32.gmra.mrb[36].mxu1 %v22874_v34  ;;  %v25962_v34 = vld [vmem:[#allocation3_spill] sm:$0xff] }
 0xb07   :  { %14720 = vmatprep.mubr.msk.f32.mxu1 %vm6265_vm1, %v22877_v59  ;;  %v25963_v59 = vld [vmem:[#allocation4_spill] sm:$0xff] }
 0xb08   :  { %16398 = vmatpush3.bf16.msra.mxu1 %v16397_v5  ;;  %v10023_v5 = vld [vmem:[#allocation2 + $0x498] sm:$0xff] }
 0xb09   :  { %16400 = vmatprep.subr.bf16.mxu1 %v16399_v42  ;;  %v10058_v42 = vld [vmem:[#allocation2 + $0x5b0] sm:$0xff] }
 0xb0a   :  { %10404 = vmatmul.mubr.f32.gmra.mrb[38].mxu1 %v22881_v49  ;;  %v25964_v49 = vld [vmem:[#allocation5_spill] sm:$0xff] }
 0xb0b   :  { %14721 = vmatprep.mubr.msk.f32.mxu1 %vm6265_vm1, %v22884_v28  ;;  %v25965_v28 = vld [vmem:[#allocation6_spill] sm:$0xff] }
 0xb0c   :  { %16402 = vmatpush3.bf16.msra.mxu1 %v16401_v18  ;;  %v10061_v18 = vld [vmem:[#allocation2 + $0x5c8] sm:$0xff] }
 0xb0e   :  { %10410 = vmatmul.mubr.f32.gmra.mrb[40].mxu1 %v22888_v22  ;;  %v25966_v22 = vld [vmem:[#allocation7_spill] sm:$0xff] }
 0xb0f   :  { %14722 = vmatprep.mubr.msk.f32.mxu1 %vm6265_vm1, %v22891_v54  ;;  %v25967_v54 = vld [vmem:[#allocation8_spill] sm:$0xff] }
 0xb12   :  { %10416 = vmatmul.mubr.f32.gmra.mrb[42].mxu1 %v22895_v48  ;;  %v25968_v48 = vld [vmem:[#allocation9_spill] sm:$0xff] }
 0xb13   :  { %14723 = vmatprep.mubr.msk.f32.mxu1 %vm6265_vm1, %v22898_v30  ;;  %v25969_v30 = vld [vmem:[#allocation10_spill] sm:$0xff] }
 0xb16   :  { %10422 = vmatmul.mubr.f32.gmra.mrb[44].mxu1 %v22902_v45  ;;  %v25970_v45 = vld [vmem:[#allocation11_spill] sm:$0xff] }
 0xb17   :  { %14724 = vmatprep.mubr.msk.f32.mxu1 %vm6265_vm1, %v22905_v14  ;;  %v25971_v14 = vld [vmem:[#allocation12_spill] sm:$0xff] }
 0xb1a   :  { %10428 = vmatmul.mubr.f32.gmra.mrb[46].mxu1 %v25961_v32  ;;  %v25990_v32 = vld [vmem:[#allocation31_spill] sm:$0xff] }
 0xb1b   :  { %14725 = vmatprep.mubr.msk.f32.mxu1 %vm6265_vm1, %v25962_v34  ;;  %v25991_v34 = vld [vmem:[#allocation32_spill] sm:$0xff] }
 0xb1e   :  { %10434 = vmatmul.mubr.f32.gmra.mrb[48].mxu1 %v25963_v59  ;;  %v25992_v59 = vld [vmem:[#allocation35_spill] sm:$0xff] }
 0xb1f   :  { %14726 = vmatprep.mubr.msk.f32.mxu1 %vm6265_vm1, %v25964_v49  ;;  %v11158_v49 = vld [vmem:[%s25569_s5 + $0x80] sm:$0xff] }
 0xb22   :  { %10440 = vmatmul.mubr.f32.gmra.mrb[50].mxu1 %v25965_v28  ;;  %v10008_v28 = vld [vmem:[#allocation2 + $0x420] sm:$0xff] }
 0xb23   :  { %14727 = vmatprep.mubr.msk.f32.mxu1 %vm6265_vm1, %v25966_v22  ;;  %v10011_v22 = vld [vmem:[#allocation2 + $0x438] sm:$0xff] }
 0xb26   :  { %10446 = vmatmul.mubr.f32.gmra.mrb[52].mxu1 %v25967_v54  ;;  %v10010_v54 = vld [vmem:[#allocation2 + $0x430] sm:$0xff] }
 0xb27   :  { %14728 = vmatprep.mubr.msk.f32.mxu1 %vm6265_vm1, %v25968_v48  ;;  %v10013_v48 = vld [vmem:[#allocation2 + $0x448] sm:$0xff] }
 0xb2a   :  { %10452 = vmatmul.mubr.f32.gmra.mrb[54].mxu1 %v25969_v30  ;;  %v10012_v30 = vld [vmem:[#allocation2 + $0x440] sm:$0xff] }
 0xb2b   :  { %14729 = vmatprep.mubr.msk.f32.mxu1 %vm6265_vm1, %v25970_v45  ;;  %v10015_v45 = vld [vmem:[#allocation2 + $0x458] sm:$0xff] }
 0xb2e   :  { %10458 = vmatmul.mubr.f32.gmra.mrb[56].mxu1 %v25971_v14  ;;  %v10014_v14 = vld [vmem:[#allocation2 + $0x450] sm:$0xff] }
 0xb2f   :  { %14730 = vmatprep.mubr.msk.f32.mxu1 %vm6265_vm1, %v25972_v23  ;;  %v10019_v23 = vld [vmem:[#allocation2 + $0x478] sm:$0xff] }
 0xb32   :  { %10464 = vmatmul.mubr.f32.gmra.mrb[58].mxu1 %v25973_v47  ;;  %v10022_v47 = vld [vmem:[#allocation2 + $0x490] sm:$0xff] }
 0xb33   :  { %14731 = vmatprep.mubr.msk.f32.mxu1 %vm6265_vm1, %v22966_v16  ;;  %v25981_v16 = vld [vmem:[#allocation22_spill] sm:$0xff] }
 0xb36   :  { %10470 = vmatmul.mubr.f32.gmra.mrb[60].mxu1 %v22982_v9  ;;  %v25982_v9 = vld [vmem:[#allocation23_spill] sm:$0xff] }
 0xb37   :  { %14732 = vmatprep.mubr.msk.f32.mxu1 %vm6265_vm1, %v25974_v12  ;;  %v10025_v12 = vld [vmem:[#allocation2 + $0x4a8] sm:$0xff] }
 0xb3a   :  { %10476 = vmatmul.mubr.f32.gmra.mrb[62].mxu1 %v25975_v43  ;;  %v10024_v43 = vld [vmem:[#allocation2 + $0x4a0] sm:$0xff] }
 0xb3b   :  { %14733 = vmatprep.mubr.msk.f32.mxu1 %vm6265_vm1, %v25976_v31  ;;  %v10027_v31 = vld [vmem:[#allocation2 + $0x4b8] sm:$0xff] }
 0xb3e   :  { %10482 = vmatmul.mubr.f32.gmra.mrb[64].mxu1 %v25977_v50  ;;  %v10026_v50 = vld [vmem:[#allocation2 + $0x4b0] sm:$0xff] }
 0xb3f   :  { %14734 = vmatprep.mubr.msk.f32.mxu1 %vm6265_vm1, %v25978_v53  ;;  %v10029_v53 = vld [vmem:[#allocation2 + $0x4c8] sm:$0xff] }
 0xb42   :  { %10488 = vmatmul.mubr.f32.gmra.mrb[66].mxu1 %v25979_v39  ;;  %v10028_v39 = vld [vmem:[#allocation2 + $0x4c0] sm:$0xff] }
 0xb43   :  { %14735 = vmatprep.mubr.msk.f32.mxu1 %vm6265_vm1, %v25980_v11  ;;  %v10031_v11 = vld [vmem:[#allocation2 + $0x4d8] sm:$0xff] }
 0xb46   :  { %10494 = vmatmul.mubr.f32.gmra.mrb[68].mxu1 %v25981_v16  ;;  %v10030_v16 = vld [vmem:[#allocation2 + $0x4d0] sm:$0xff] }
 0xb47   :  { %14736 = vmatprep.mubr.msk.f32.mxu1 %vm6265_vm1, %v25982_v9  ;;  %v10033_v9 = vld [vmem:[#allocation2 + $0x4e8] sm:$0xff] }
 0xb4a   :  { %10500 = vmatmul.mubr.f32.gmra.mrb[70].mxu1 %v25983_v7  ;;  %v10032_v7 = vld [vmem:[#allocation2 + $0x4e0] sm:$0xff] }
 0xb4b   :  { %14737 = vmatprep.mubr.msk.f32.mxu1 %vm6265_vm1, %v25984_v57  ;;  %v10035_v57 = vld [vmem:[#allocation2 + $0x4f8] sm:$0xff] }
 0xb4e   :  { %10506 = vmatmul.mubr.f32.gmra.mrb[72].mxu1 %v25985_v2  ;;  %v10034_v2 = vld [vmem:[#allocation2 + $0x4f0] sm:$0xff] }
 0xb4f   :  { %14738 = vmatprep.mubr.msk.f32.mxu1 %vm6265_vm1, %v25986_v3  ;;  %v10056_v3 = vld [vmem:[#allocation2 + $0x5a0] sm:$0xff] }
 0xb52   :  { %10512 = vmatmul.mubr.f32.gmra.mrb[74].mxu1 %v23037_v21  ;;  %v10005_v21 = vld [vmem:[#allocation2 + $0x408] sm:$0xff] }
 0xb53   :  { %14739 = vmatprep.mubr.msk.f32.mxu1 %vm6265_vm1, %v25987_v61 }
 0xb56   :  { %10518 = vmatmul.mubr.f32.gmra.mrb[76].mxu1 %v25988_v27  ;;  %v10060_v27 = vld [vmem:[#allocation2 + $0x5c0] sm:$0xff] }
 0xb57   :  { %14740 = vmatprep.mubr.msk.f32.mxu1 %vm6265_vm1, %v25989_v15 }
 0xb5a   :  { %10524 = vmatmul.mubr.f32.gmra.mrb[78].mxu1 %v25990_v32  ;;  %v10063_v32 = vld [vmem:[#allocation2 + $0x5d8] sm:$0xff] }
 0xb5b   :  { %14741 = vmatprep.mubr.msk.f32.mxu1 %vm6265_vm1, %v25991_v34  ;;  %v10874_v34 = vld [vmem:[%s25570_s4] sm:$0x3] }
 0xb5e   :  { %10530 = vmatmul.mubr.f32.gmra.mrb[80].mxu1 %v25992_v59 }
 0xb5f   :  { %14742 = vmatprep.mubr.msk.f32.mxu1 %vm6265_vm1, %v23061_v24  ;;  %v11159_v24 = vld [vmem:[%s25569_s5 + $0x88] sm:$0xff] }
 0xb62   :  { %10536 = vmatmul.mubr.f32.gmra.mrb[82].mxu1 %v23065_v36  ;;  %v10004_v36 = vld [vmem:[#allocation2 + $0x400] sm:$0xff] }
 0xb63   :  { %14743 = vmatprep.mubr.msk.f32.mxu1 %vm6265_vm1, %v23068_v0  ;;  %v16403_v0 = vpack.c.bf16 %v11159_v24, %v11158_v49  ;;  %v10065_v24 = vld [vmem:[#allocation2 + $0x5e8] sm:$0xff] }
 0xb65   :  { %16404 = vmatprep.subr.bf16.mxu1 %v16403_v0 }
 0xb66   :  { %10542 = vmatmul.mubr.f32.gmra.mrb[84].mxu1 %v23072_v40  ;;  %v10007_v40 = vld [vmem:[#allocation2 + $0x418] sm:$0xff] }
 0xb67   :  { %14744 = vmatprep.mubr.msk.f32.mxu1 %vm6265_vm1, %v23075_v13  ;;  %v10006_v13 = vld [vmem:[#allocation2 + $0x410] sm:$0xff] }
 0xb6a   :  { %10548 = vmatmul.mubr.f32.gmra.mrb[86].mxu1 %v23079_v41  ;;  %v10009_v41 = vld [vmem:[#allocation2 + $0x428] sm:$0xff] }
 0xb6b   :  { %14745 = vmatprep.mubr.msk.f32.mxu1 %vm6265_vm1, %v10005_v21  ;;  %v10062_v21 = vld [vmem:[#allocation2 + $0x5d0] sm:$0xff] }
 0xb6e   :  { %10554 = vmatmul.mubr.f32.gmra.mrb[88].mxu1 %v10004_v36  ;;  %v25993_v36 = vld [vmem:[#allocation33_spill] sm:$0xff] }
 0xb6f   :  { %14746 = vmatprep.mubr.msk.f32.mxu1 %vm6265_vm1, %v10007_v40  ;;  %v25994_v0 = vsub.s32 1, %v25993_v36 }
 0xb71   :  { %v23451_v40 = vrot.slane %v10874_v34, %v25994_v0 }
 0xb72   :  { %10560 = vmatmul.mubr.f32.gmra.mrb[90].mxu1 %v10006_v13 }
 0xb73   :  { %14747 = vmatprep.mubr.msk.f32.mxu1 %vm6265_vm1, %v10009_v41 }
 0xb76   :  { %10566 = vmatmul.mubr.f32.gmra.mrb[92].mxu1 %v10008_v28  ;;  %v10064_v28 = vld [vmem:[#allocation2 + $0x5e0] sm:$0xff] }
 0xb77   :  { %14748 = vmatprep.mubr.msk.f32.mxu1 %vm6265_vm1, %v10011_v22  ;;  %v25995_v22 = vsub.s32 0, %v25993_v36  ;;  %v11167_v36 = vld [vmem:[%s25569_s5 + $0xc8] sm:$0xff] }
 0xb7a   :  { %10572 = vmatmul.mubr.f32.gmra.mrb[94].mxu1 %v10010_v54  ;;  %v23459_v54 = vrot.slane %v10874_v34, %v25995_v22  ;;  %v11150_v22 = vld [vmem:[%s25569_s5 + $0x40] sm:$0xff] }
 0xb7b   :  { %14749 = vmatprep.mubr.msk.f32.mxu1 %vm6265_vm1, %v10013_v48 }
 0xb7e   :  { %10578 = vmatmul.mubr.f32.gmra.mrb[96].mxu1 %v10012_v30  ;;  %v10067_v30 = vld [vmem:[#allocation2 + $0x5f8] sm:$0xff] }
 0xb7f   :  { %14750 = vmatprep.mubr.msk.f32.mxu1 %vm6265_vm1, %v10015_v45 }
 0xb82   :  { %10584 = vmatmul.mubr.f32.gmra.mrb[98].mxu1 %v10014_v14  ;;  %v11142_v14 = vld [vmem:[%s25569_s5] sm:$0xff] }
 0xb83   :  { %14751 = vmatprep.mubr.msk.f32.mxu1 %vm6265_vm1, %v10017_v56  ;;  %v11143_v56 = vld [vmem:[%s25569_s5 + $0x8] sm:$0xff] }
 0xb86   :  { %10590 = vmatmul.mubr.f32.gmra.mrb[100].mxu1 %v10016_v51 }
 0xb87   :  { %14752 = vmatprep.mubr.msk.f32.mxu1 %vm6265_vm1, %v10019_v23 }
 0xb8a   :  { %10596 = vmatmul.mubr.f32.gmra.mrb[102].mxu1 %v10018_v29 }
 0xb8b   :  { %14753 = vmatprep.mubr.msk.f32.mxu1 %vm6265_vm1, %v10021_v60  ;;  %v10066_v60 = vld [vmem:[#allocation2 + $0x5f0] sm:$0xff] }
 0xb8e   :  { %10602 = vmatmul.mubr.f32.gmra.mrb[104].mxu1 %v10020_v63  ;;  %v11160_v63 = vld [vmem:[%s25569_s5 + $0x90] sm:$0xff] }
 0xb8f   :  { %14754 = vmatprep.mubr.msk.f32.mxu1 %vm6265_vm1, %v10023_v5  ;;  %v11161_v5 = vld [vmem:[%s25569_s5 + $0x98] sm:$0xff] }
 0xb92   :  { %10608 = vmatmul.mubr.f32.gmra.mrb[106].mxu1 %v10022_v47 }
 0xb93   :  { %14755 = vmatprep.mubr.msk.f32.mxu1 %vm6265_vm1, %v10025_v12  ;;  %v16405_v12 = vpack.c.bf16 %v11143_v56, %v11142_v14  ;;  %v11168_v56 = vld [vmem:[%s25569_s5 + $0xd0] sm:$0xff] }
 0xb96   :  { %10614 = vmatmul.mubr.f32.gmra.mrb[108].mxu1 %v10024_v43 }
 0xb97   :  { %14756 = vmatprep.mubr.msk.f32.mxu1 %vm6265_vm1, %v10027_v31 }
 0xb9a   :  { %10620 = vmatmul.mubr.f32.gmra.mrb[110].mxu1 %v10026_v50  ;;  %v16407_v50 = vpack.c.bf16 %v11161_v5, %v11160_v63  ;;  %v11152_v5 = vld [vmem:[%s25569_s5 + $0x50] sm:$0xff] }
 0xb9b   :  { %14757 = vmatprep.mubr.msk.f32.mxu1 %vm6265_vm1, %v10029_v53  ;;  %v11144_v53 = vld [vmem:[%s25569_s5 + $0x10] sm:$0xff] }
 0xb9e   :  { %10626 = vmatmul.mubr.f32.gmra.mrb[112].mxu1 %v10028_v39  ;;  %v11145_v39 = vld [vmem:[%s25569_s5 + $0x18] sm:$0xff] }
 0xb9f   :  { %14758 = vmatprep.mubr.msk.f32.mxu1 %vm6265_vm1, %v10031_v11 }
 0xba2   :  { %10632 = vmatmul.mubr.f32.gmra.mrb[114].mxu1 %v10030_v16 }
 0xba3   :  { %14759 = vmatprep.mubr.msk.f32.mxu1 %vm6265_vm1, %v10033_v9 }
 0xba6   :  { %10638 = vmatmul.mubr.f32.gmra.mrb[116].mxu1 %v10032_v7  ;;  %v11162_v7 = vld [vmem:[%s25569_s5 + $0xa0] sm:$0xff] }
 0xba7   :  { %14760 = vmatprep.mubr.msk.f32.mxu1 %vm6265_vm1, %v10035_v57  ;;  %v11163_v57 = vld [vmem:[%s25569_s5 + $0xa8] sm:$0xff] }
 0xbaa   :  { %10644 = vmatmul.mubr.f32.gmra.mrb[118].mxu1 %v10034_v2 }
 0xbab   :  { %14761 = vmatprep.mubr.msk.f32.mxu1 %vm6265_vm1, %v23130_v1 }
 0xbae   :  { %10650 = vmatmul.mubr.f32.gmra.mrb[120].mxu1 %v23134_v62 }
 0xbaf   :  { %14762 = vmatprep.mubr.msk.f32.mxu1 %vm6265_vm1, %v23137_v6 }
 0xbb2   :  { %10656 = vmatmul.mubr.f32.gmra.mrb[122].mxu1 %v23141_v35 }
 0xbb3   :  { %14763 = vmatprep.mubr.msk.f32.mxu1 %vm6265_vm1, %v23144_v17 }
 0xbb6   :  { %10662 = vmatmul.mubr.f32.gmra.mrb[124].mxu1 %v23148_v26 }
 0xbb7   :  { %14764 = vmatprep.mubr.msk.f32.mxu1 %vm6265_vm1, %v23151_v33  ;;  %v10053_v33 = vld [vmem:[#allocation2 + $0x588] sm:$0xff] }
 0xbba   :  { %10668 = vmatmul.mubr.f32.gmra.mrb[126].mxu1 %v23155_v10 }
 0xbbb   :  { %14765 = vmatprep.mubr.msk.f32.mxu1 %vm6265_vm1, %v23158_v19  ;;  %v10052_v19 = vld [vmem:[#allocation2 + $0x580] sm:$0xff] }
 0xbbe   :  { %10674 = vmatmul.mubr.f32.gmra.mrb[128].mxu1 %v23162_v8 }
 0xbbf   :  { %14766 = vmatprep.mubr.msk.f32.mxu1 %vm6265_vm1, %v23165_v46  ;;  %v10055_v46 = vld [vmem:[#allocation2 + $0x598] sm:$0xff] }
 0xbc1   :  { %v23411_v1 = vpop.f32.mrb[24].mxu1 }
 0xbc2   :  { %v23413_v62 = vpop.f32.mrb[25].mxu1  ;;  %10680 = vmatmul.mubr.f32.gmra.mrb[130].mxu1 %v23169_v20 }
 0xbc3   :  { %14767 = vmatprep.mubr.msk.f32.mxu1 %vm6265_vm1, %v23172_v38  ;;  %v10054_v38 = vld [vmem:[#allocation2 + $0x590] sm:$0xff]  ;;  %v10887_v34 = vadd.f32 %v23451_v40, %v23413_v62 }
 0xbc5   :  { %v23418_v6 = vpop.f32.mrb[26].mxu1  ;;  %v11015_v14 = vmax.f32 %v10887_v34, 0.0 }
 0xbc6   :  { %v23420_v35 = vpop.f32.mrb[27].mxu1  ;;  %10686 = vmatmul.mubr.f32.gmra.mrb[132].mxu1 %v23176_v55 }
 0xbc7   :  { %14768 = vmatprep.mubr.msk.f32.mxu1 %vm6265_vm1, %v23179_v58  ;;  %v10057_v58 = vld [vmem:[#allocation2 + $0x5a8] sm:$0xff]  ;;  %v10889_v34 = vadd.f32 %v23451_v40, %v23420_v35 }
 0xbc9   :  { %v23425_v17 = vpop.f32.mrb[28].mxu1 }
 0xbca   :  { %v23427_v26 = vpop.f32.mrb[29].mxu1  ;;  %10692 = vmatmul.mubr.f32.gmra.mrb[134].mxu1 %v23189_v52 }
 0xbcb   :  { %14769 = vmatprep.mubr.msk.f32.mxu1 %vm6265_vm1, %v10053_v33  ;;  %v16409_v33 = vpack.c.bf16 %v11145_v39, %v11144_v53 }
 0xbcd   :  { %v23431_v10 = vpop.f32.mrb[30].mxu1 }
 0xbce   :  { %v23433_v8 = vpop.f32.mrb[31].mxu1  ;;  %10698 = vmatmul.mubr.f32.gmra.mrb[136].mxu1 %v10052_v19 }
 0xbcf   :  { %14770 = vmatprep.mubr.msk.f32.mxu1 %vm6265_vm1, %v10055_v46 }
 0xbd1   :  { %v10387_v20 = vpop.f32.mrb[32].mxu1 }
 0xbd2   :  { %v10389_v55 = vpop.f32.mrb[33].mxu1  ;;  %10704 = vmatmul.mubr.f32.gmra.mrb[138].mxu1 %v10054_v38  ;;  %v10894_v45 = vadd.f32 %v23459_v54, %v10387_v20  ;;  %v16411_v20 = vpack.c.bf16 %v11163_v57, %v11162_v7  ;;  %v11146_v38 = vld [vmem:[%s25569_s5 + $0x20] sm:$0xff]  ;;  %v11155_v7 = vld [vmem:[%s25569_s5 + $0x68] sm:$0xff] }
 0xbd3   :  { %14771 = vmatprep.mubr.msk.f32.mxu1 %vm6265_vm1, %v10057_v58  ;;  %v10895_v13 = vadd.f32 %v23451_v40, %v10389_v55  ;;  %v11147_v55 = vld [vmem:[%s25569_s5 + $0x28] sm:$0xff] }
 0xbd4   :  { %v11022_v43 = vmax.f32 %v10894_v45, 0.0 }
 0xbd5   :  { %v10393_v52 = vpop.f32.mrb[34].mxu1  ;;  %v11023_v51 = vmax.f32 %v10895_v13, 0.0 }
 0xbd6   :  { %v10395_v44 = vpop.f32.mrb[35].mxu1  ;;  %10710 = vmatmul.mubr.f32.gmra.mrb[140].mxu1 %v10056_v3  ;;  %v10896_v31 = vadd.f32 %v23459_v54, %v10393_v52 }
 0xbd7   :  { %14772 = vmatprep.mubr.msk.f32.mxu1 %vm6265_vm1, %v10059_v25  ;;  %v10897_v23 = vadd.f32 %v23451_v40, %v10395_v44  ;;  %v11164_v44 = vld [vmem:[%s25569_s5 + $0xb0] sm:$0xff]  ;;  %v11165_v25 = vld [vmem:[%s25569_s5 + $0xb8] sm:$0xff] }
 0xbd8   :  { %v11024_v19 = vmax.f32 %v10896_v31, 0.0  ;;  %v11170_v31 = vld [vmem:[%s25569_s5 + $0xe0] sm:$0xff] }
 0xbd9   :  { %v10399_v4 = vpop.f32.mrb[36].mxu1  ;;  %v11025_v11 = vmax.f32 %v10897_v23, 0.0 }
 0xbda   :  { %v10401_v37 = vpop.f32.mrb[37].mxu1  ;;  %10716 = vmatmul.mubr.f32.gmra.mrb[142].mxu1 %v10058_v42  ;;  %v10898_v46 = vadd.f32 %v23459_v54, %v10399_v4  ;;  %v16413_v42 = vpack.c.bf16 %v11147_v55, %v11146_v38  ;;  %v11156_v55 = vld [vmem:[%s25569_s5 + $0x70] sm:$0xff] }
 0xbdb   :  { %14773 = vmatprep.mubr.msk.f32.mxu1 %vm6265_vm1, %v10061_v18  ;;  %v10899_v16 = vadd.f32 %v23451_v40, %v10401_v37 }
 0xbdc   :  { %v11026_v37 = vmax.f32 %v10898_v46, 0.0 }
 0xbdd   :  { %v23439_v61 = vpop.f32.mrb[38].mxu1  ;;  %v11027_v58 = vmax.f32 %v10899_v16, 0.0  ;;  %v11154_v16 = vld [vmem:[%s25569_s5 + $0x60] sm:$0xff] }
 0xbde   :  { %v10407_v15 = vpop.f32.mrb[39].mxu1  ;;  %10722 = vmatmul.mubr.f32.gmra.mrb[144].mxu1 %v10060_v27  ;;  %v10900_v18 = vadd.f32 %v23459_v54, %v23439_v61  ;;  %v16415_v27 = vpack.c.bf16 %v11165_v25, %v11164_v44  ;;  %v11166_v61 = vld [vmem:[%s25569_s5 + $0xc0] sm:$0xff]  ;;  %v14826_v25 = vld [vmem:[%s25569_s5 + $0x288] sm:$0xff] }
 0xbdf   :  { %14774 = vmatprep.mubr.msk.f32.mxu1 %vm6265_vm1, %v10063_v32  ;;  %v10901_v52 = vadd.f32 %v23451_v40, %v10407_v15  ;;  %v11148_v15 = vld [vmem:[%s25569_s5 + $0x30] sm:$0xff]  ;;  %v11149_v32 = vld [vmem:[%s25569_s5 + $0x38] sm:$0xff]  ;;  %v16419_v62 = vpack.c.bf16 %v11167_v36, %v11166_v61  ;;  %v14825_v44 = vld [vmem:[%s25569_s5 + $0x280] sm:$0xff] }
 0xbe0   :  { %v16417_v13 = vpack.c.bf16 %v11149_v32, %v11148_v15  ;;  %v14809_v15 = vld [vmem:[%s25569_s5 + $0x200] sm:$0xff]  ;;  %v14810_v32 = vld [vmem:[%s25569_s5 + $0x208] sm:$0xff]  ;;  %v14827_v61 = vld [vmem:[%s25569_s5 + $0x290] sm:$0xff] }
 0xbe1   :  { %v23445_v59 = vpop.f32.mrb[40].mxu1 }
 0xbe2   :  { %v23447_v49 = vpop.f32.mrb[41].mxu1  ;;  %10728 = vmatmul.mubr.f32.gmra.mrb[146].mxu1 %v10062_v21  ;;  %v11029_v21 = vmax.f32 %v10901_v52, 0.0 }
 0xbe3   :  { %14775 = vmatprep.mubr.msk.f32.mxu1 %vm6265_vm1, %v10065_v24 }
 0xbe5   :  { %v23455_v41 = vpop.f32.mrb[42].mxu1 }
 0xbe6   :  { %v23461_v48 = vpop.f32.mrb[43].mxu1  ;;  %10734 = vmatmul.mubr.f32.gmra.mrb[148].mxu1 %v10064_v28  ;;  %v11028_v28 = vmax.f32 %v10900_v18, 0.0  ;;  %v10886_v18 = vadd.f32 %v23459_v54, %v23411_v1  ;;  %v14828_v1 = vld [vmem:[%s25569_s5 + $0x298] sm:$0xff] }
 0xbe7   :  { %14776 = vmatprep.mubr.msk.f32.mxu1 %vm6265_vm1, %v10067_v30  ;;  %v11151_v30 = vld [vmem:[%s25569_s5 + $0x48] sm:$0xff]  ;;  %v16439_v35 = vpack.c.bf16 %v14828_v1, %v14827_v61  ;;  %v14817_v61 = vld [vmem:[%s25569_s5 + $0x240] sm:$0xff] }
 0xbe8   :  { %v14818_v1 = vld [vmem:[%s25569_s5 + $0x248] sm:$0xff] }
 0xbe9   :  { %v23472_v29 = vpop.f32.mrb[44].mxu1 }
 0xbea   :  { %v23480_v47 = vpop.f32.mrb[45].mxu1  ;;  %10740 = vmatmul.mubr.f32.gmra.mrb[150].mxu1 %v10066_v60  ;;  %v16421_v60 = vpack.c.bf16 %v11151_v30, %v11150_v22  ;;  %v14811_v22 = vld [vmem:[%s25569_s5 + $0x210] sm:$0xff]  ;;  %v14812_v30 = vld [vmem:[%s25569_s5 + $0x218] sm:$0xff] }
 0xbeb   :  { %11271 = vmatprep.mubr.f32.mxu1 %v11023_v51  ;;  %v11169_v51 = vld [vmem:[%s25569_s5 + $0xd8] sm:$0xff] }
 0xbec   :  { %v16423_v63 = vpack.c.bf16 %v11169_v51, %v11168_v56  ;;  %v11017_v51 = vmax.f32 %v10889_v34, 0.0 }
 0xbed   :  { %v23490_v9 = vpop.f32.mrb[46].mxu1 }
 0xbee   :  { %v23498_v2 = vpop.f32.mrb[47].mxu1  ;;  %11272 = vmatmul.mubr.f32.vlgmr.msra.gmra.mrb[152].mxu1 %v11022_v43 }
 0xbef   :  { %16406 = vmatpush3.bf16.msra.mxu1 %v16405_v12  ;;  %11276 = vmatprep.mubr.f32.mxu1 %v11025_v11  ;;  %v11153_v12 = vld [vmem:[%s25569_s5 + $0x58] sm:$0xff] }
 0xbf0   :  { %16408 = vmatprep.subr.bf16.mxu1 %v16407_v50  ;;  %v11171_v50 = vld [vmem:[%s25569_s5 + $0xe8] sm:$0xff]  ;;  %v16425_v39 = vpack.c.bf16 %v11153_v12, %v11152_v5  ;;  %v16441_v5 = vpack.c.bf16 %v14812_v30, %v14811_v22  ;;  %v16453_v30 = vpack.c.bf16 %v14818_v1, %v14817_v61  ;;  %v10905_v1 = vadd.f32 %v23451_v40, %v23461_v48 }
 0xbf1   :  { %v23508_v3 = vpop.f32.mrb[48].mxu1  ;;  %v16427_v11 = vpack.c.bf16 %v11171_v50, %v11170_v31  ;;  %v14813_v50 = vld [vmem:[%s25569_s5 + $0x220] sm:$0xff]  ;;  %v14842_v61 = vld [vmem:[%s25569_s5 + $0x308] sm:$0xff] }
 0xbf2   :  { %v23516_v4 = vpop.f32.mrb[49].mxu1  ;;  %11277 = vmatmul.mubr.f32.gmra.mrb[154].mxu1 %v11024_v19  ;;  %v11173_v19 = vld [vmem:[%s25569_s5 + $0xf8] sm:$0xff] }
 0xbf3   :  { %16410 = vmatpush3.bf16.msra.mxu1 %v16409_v33  ;;  %11281 = vmatprep.mubr.f32.mxu1 %v11027_v58  ;;  %v11172_v33 = vld [vmem:[%s25569_s5 + $0xf0] sm:$0xff]  ;;  %v11157_v58 = vld [vmem:[%s25569_s5 + $0x78] sm:$0xff] }
 0xbf4   :  { %16412 = vmatprep.subr.bf16.mxu1 %v16411_v20  ;;  %v16429_v20 = vpack.c.bf16 %v11155_v7, %v11154_v16  ;;  %v16431_v38 = vpack.c.bf16 %v11173_v19, %v11172_v33  ;;  %v14832_v33 = vld [vmem:[%s25569_s5 + $0x2b8] sm:$0xff] }
 0xbf5   :  { %v23528_v24 = vpop.f32.mrb[50].mxu1 }
 0xbf6   :  { %v23536_v0 = vpop.f32.mrb[51].mxu1  ;;  %11282 = vmatmul.mubr.f32.gmra.mrb[156].mxu1 %v11026_v37  ;;  %v16433_v37 = vpack.c.bf16 %v11157_v58, %v11156_v55  ;;  %v14815_v58 = vld [vmem:[%s25569_s5 + $0x230] sm:$0xff] }
 0xbf7   :  { %16414 = vmatpush3.bf16.msra.mxu1 %v16413_v42  ;;  %11286 = vmatprep.mubr.f32.mxu1 %v11029_v21 }
 0xbf8   :  { %16416 = vmatprep.subr.bf16.mxu1 %v16415_v27  ;;  %v16435_v27 = vpack.c.bf16 %v14826_v25, %v14825_v44  ;;  %v14816_v44 = vld [vmem:[%s25569_s5 + $0x238] sm:$0xff]  ;;  %v10903_v25 = vadd.f32 %v23451_v40, %v23447_v49 }
 0xbf9   :  { %v23544_v45 = vpop.f32.mrb[52].mxu1 }
 0xbfa   :  { %v23552_v23 = vpop.f32.mrb[53].mxu1  ;;  %11287 = vmatmul.mubr.f32.gmra.mrb[158].mxu1 %v11028_v28  ;;  %v11014_v28 = vmax.f32 %v10886_v18, 0.0 }
 0xbfb   :  { %16418 = vmatpush3.bf16.msra.mxu1 %v16417_v13  ;;  %11356 = vmatprep.mubr.f32.mxu1 %v11015_v14  ;;  %v16437_v13 = vpack.c.bf16 %v14810_v32, %v14809_v15  ;;  %v10891_v14 = vadd.f32 %v23451_v40, %v23427_v26  ;;  %v10890_v26 = vadd.f32 %v23459_v54, %v23425_v17  ;;  %v14831_v17 = vld [vmem:[%s25569_s5 + $0x2b0] sm:$0xff] }
 0xbfc   :  { %16420 = vmatprep.subr.bf16.mxu1 %v16419_v62  ;;  %v10888_v62 = vadd.f32 %v23459_v54, %v23418_v6  ;;  %v14829_v6 = vld [vmem:[%s25569_s5 + $0x2a0] sm:$0xff]  ;;  %v16447_v55 = vpack.c.bf16 %v14832_v33, %v14831_v17  ;;  %v16449_v32 = vpack.c.bf16 %v14816_v44, %v14815_v58  ;;  %v14839_v17 = vld [vmem:[%s25569_s5 + $0x2f0] sm:$0xff]  ;;  %v14840_v33 = vld [vmem:[%s25569_s5 + $0x2f8] sm:$0xff] }
 0xbfd   :  { %v23560_v43 = vpop.f32.mrb[54].mxu1  ;;  %v11019_v7 = vmax.f32 %v10891_v14, 0.0  ;;  %v14824_v58 = vld [vmem:[%s25569_s5 + $0x278] sm:$0xff] }
 0xbfe   :  { %v23568_v53 = vpop.f32.mrb[55].mxu1  ;;  %v11016_v12 = vmax.f32 %v10888_v62, 0.0  ;;  %v14835_v62 = vld [vmem:[%s25569_s5 + $0x2d0] sm:$0xff] }
 0xbff   :  { %16422 = vmatpush3.bf16.msra.mxu1 %v16421_v60  ;;  %v14830_v60 = vld [vmem:[%s25569_s5 + $0x2a8] sm:$0xff] }
 0xc00   :  { %16424 = vmatprep.subr.bf16.mxu1 %v16423_v63  ;;  %v16443_v31 = vpack.c.bf16 %v14830_v60, %v14829_v6  ;;  %v14820_v6 = vld [vmem:[%s25569_s5 + $0x258] sm:$0xff] }
 0xc01   :  { %v23576_v57 = vpop.f32.mrb[56].mxu1 }
 0xc02   :  { %v23584_v46 = vpop.f32.mrb[57].mxu1 }
 0xc03   :  { %16426 = vmatpush3.bf16.msra.mxu1 %v16425_v39  ;;  %v14814_v39 = vld [vmem:[%s25569_s5 + $0x228] sm:$0xff] }
 0xc04   :  { %16428 = vmatprep.subr.bf16.mxu1 %v16427_v11  ;;  %v10893_v11 = vadd.f32 %v23451_v40, %v23433_v8  ;;  %v10892_v8 = vadd.f32 %v23459_v54, %v23431_v10  ;;  %v14833_v10 = vld [vmem:[%s25569_s5 + $0x2c0] sm:$0xff] }
 0xc05   :  { %v23592_v52 = vpop.f32.mrb[58].mxu1 }
 0xc06   :  { %v23600_v42 = vpop.f32.mrb[59].mxu1  ;;  %v11021_v18 = vmax.f32 %v10893_v11, 0.0  ;;  %v11020_v34 = vmax.f32 %v10892_v8, 0.0  ;;  %v14822_v11 = vld [vmem:[%s25569_s5 + $0x268] sm:$0xff] }
 0xc07   :  { %16430 = vmatpush3.bf16.msra.mxu1 %v16429_v20  ;;  %v16445_v20 = vpack.c.bf16 %v14814_v39, %v14813_v50  ;;  %v14821_v39 = vld [vmem:[%s25569_s5 + $0x260] sm:$0xff] }
 0xc08   :  { %16432 = vmatprep.subr.bf16.mxu1 %v16431_v38  ;;  %v11018_v38 = vmax.f32 %v10890_v26, 0.0  ;;  %v14838_v26 = vld [vmem:[%s25569_s5 + $0x2e8] sm:$0xff]  ;;  %v16461_v8 = vpack.c.bf16 %v14822_v11, %v14821_v39 }
 0xc09   :  { %v23612_v21 = vpop.f32.mrb[60].mxu1  ;;  %v14862_v39 = vld [vmem:[%s25569_s5 + $0x3a8] sm:$0xff] }
 0xc0a   :  { %v23620_v36 = vpop.f32.mrb[61].mxu1 }
 0xc0b   :  { %16434 = vmatpush3.bf16.msra.mxu1 %v16433_v37 }
 0xc0c   :  { %16436 = vmatprep.subr.bf16.mxu1 %v16435_v27  ;;  %v14834_v27 = vld [vmem:[%s25569_s5 + $0x2c8] sm:$0xff] }
 0xc0d   :  { %v23632_v56 = vpop.f32.mrb[62].mxu1  ;;  %v16451_v49 = vpack.c.bf16 %v14834_v27, %v14833_v10 }
 0xc0e   :  { %11357 = vmatmul.mubr.f32.vlgmr.msra.gmra.mrb[160].mxu1 %v11014_v28  ;;  %v23640_v63 = vpop.f32.mrb[63].mxu1 }
 0xc0f   :  { %11361 = vmatprep.mubr.f32.mxu1 %v11017_v51  ;;  %16438 = vmatpush3.bf16.msra.mxu1 %v16437_v13  ;;  %v11031_v13 = vmax.f32 %v10903_v25, 0.0  ;;  %v14819_v51 = vld [vmem:[%s25569_s5 + $0x250] sm:$0xff]  ;;  %v14857_v25 = vld [vmem:[%s25569_s5 + $0x380] sm:$0xff] }
 0xc10   :  { %16440 = vmatprep.subr.bf16.mxu1 %v16439_v35  ;;  %v14836_v35 = vld [vmem:[%s25569_s5 + $0x2d8] sm:$0xff] }
 0xc11   :  { %v23652_v16 = vpop.f32.mrb[64].mxu1  ;;  %v16455_v14 = vpack.c.bf16 %v14836_v35, %v14835_v62  ;;  %v14859_v62 = vld [vmem:[%s25569_s5 + $0x390] sm:$0xff] }
 0xc12   :  { %11362 = vmatmul.mubr.f32.gmra.mrb[162].mxu1 %v11016_v12  ;;  %v23660_v19 = vpop.f32.mrb[65].mxu1 }
 0xc13   :  { %11366 = vmatprep.mubr.f32.mxu1 %v11019_v7  ;;  %16442 = vmatpush3.bf16.msra.mxu1 %v16441_v5  ;;  %v14837_v5 = vld [vmem:[%s25569_s5 + $0x2e0] sm:$0xff] }
 0xc14   :  { %16444 = vmatprep.subr.bf16.mxu1 %v16443_v31  ;;  %v16457_v31 = vpack.c.bf16 %v14820_v6, %v14819_v51  ;;  %v16459_v50 = vpack.c.bf16 %v14838_v26, %v14837_v5  ;;  %v10904_v51 = vadd.f32 %v23459_v54, %v23455_v41  ;;  %v14843_v6 = vld [vmem:[%s25569_s5 + $0x310] sm:$0xff]  ;;  %v14844_v5 = vld [vmem:[%s25569_s5 + $0x318] sm:$0xff]  ;;  %v11033_v26 = vmax.f32 %v10905_v1, 0.0  ;;  %v14861_v41 = vld [vmem:[%s25569_s5 + $0x3a0] sm:$0xff] }
 0xc15   :  { %v23672_v37 = vpop.f32.mrb[66].mxu1  ;;  %v14847_v1 = vld [vmem:[%s25569_s5 + $0x330] sm:$0xff] }
 0xc16   :  { %11367 = vmatmul.mubr.f32.gmra.mrb[164].mxu1 %v11018_v38  ;;  %v23680_v15 = vpop.f32.mrb[67].mxu1  ;;  %v16463_v38 = vpack.c.bf16 %v14840_v33, %v14839_v17  ;;  %v16473_v17 = vpack.c.bf16 %v14844_v5, %v14843_v6  ;;  %v11032_v33 = vmax.f32 %v10904_v51, 0.0  ;;  %v14866_v51 = vld [vmem:[%s25569_s5 + $0x3c8] sm:$0xff] }
 0xc17   :  { %11371 = vmatprep.mubr.f32.mxu1 %v11021_v18  ;;  %16446 = vmatpush3.bf16.msra.mxu1 %v16445_v20  ;;  %v14858_v18 = vld [vmem:[%s25569_s5 + $0x388] sm:$0xff] }
 0xc18   :  { %16448 = vmatprep.subr.bf16.mxu1 %v16447_v55  ;;  %v14823_v55 = vld [vmem:[%s25569_s5 + $0x270] sm:$0xff] }
 0xc19   :  { %v23688_v28 = vpop.f32.mrb[68].mxu1  ;;  %v16465_v27 = vpack.c.bf16 %v14824_v58, %v14823_v55  ;;  %v14846_v55 = vld [vmem:[%s25569_s5 + $0x328] sm:$0xff] }
 0xc1a   :  { %11372 = vmatmul.mubr.f32.gmra.mrb[166].mxu1 %v11020_v34  ;;  %v23696_v22 = vpop.f32.mrb[69].mxu1  ;;  %v16467_v34 = vpack.c.bf16 %v14858_v18, %v14857_v25  ;;  %v10909_v25 = vadd.f32 %v23451_v40, %v23498_v2  ;;  %v10908_v2 = vadd.f32 %v23459_v54, %v23490_v9  ;;  %v14865_v9 = vld [vmem:[%s25569_s5 + $0x3c0] sm:$0xff] }
 0xc1b   :  { %16450 = vmatpush3.bf16.msra.mxu1 %v16449_v32  ;;  %11474 = vmatprep.mubr.f32.mxu1 %v11031_v13  ;;  %v10902_v32 = vadd.f32 %v23459_v54, %v23445_v59  ;;  %v14860_v59 = vld [vmem:[%s25569_s5 + $0x398] sm:$0xff] }
 0xc1c   :  { %16452 = vmatprep.subr.bf16.mxu1 %v16451_v49  ;;  %v14841_v49 = vld [vmem:[%s25569_s5 + $0x300] sm:$0xff]  ;;  %v16471_v48 = vpack.c.bf16 %v14860_v59, %v14859_v62  ;;  %v14848_v62 = vld [vmem:[%s25569_s5 + $0x338] sm:$0xff]  ;;  %v11037_v59 = vmax.f32 %v10909_v25, 0.0  ;;  %v11036_v5 = vmax.f32 %v10908_v2, 0.0 }
 0xc1d   :  { %v23704_v60 = vpop.f32.mrb[70].mxu1  ;;  %v16481_v6 = vpack.c.bf16 %v14848_v62, %v14847_v1  ;;  %v14854_v1 = vld [vmem:[%s25569_s5 + $0x368] sm:$0xff] }
 0xc1e   :  { %v23712_v12 = vpop.f32.mrb[71].mxu1 }
 0xc1f   :  { %16454 = vmatpush3.bf16.msra.mxu1 %v16453_v30  ;;  %v16469_v30 = vpack.c.bf16 %v14842_v61, %v14841_v49 }
 0xc20   :  { %16456 = vmatprep.subr.bf16.mxu1 %v16455_v14  ;;  %v11030_v14 = vmax.f32 %v10902_v32, 0.0 }
 0xc21   :  { %v23720_v7 = vpop.f32.mrb[72].mxu1 }
 0xc22   :  { %v23728_v20 = vpop.f32.mrb[73].mxu1 }
 0xc23   :  { %16458 = vmatpush3.bf16.msra.mxu1 %v16457_v31  ;;  %v10907_v31 = vadd.f32 %v23451_v40, %v23480_v47  ;;  %v10906_v47 = vadd.f32 %v23459_v54, %v23472_v29  ;;  %v14863_v29 = vld [vmem:[%s25569_s5 + $0x3b0] sm:$0xff] }
 0xc24   :  { %16460 = vmatprep.subr.bf16.mxu1 %v16459_v50 }
 0xc25   :  { %v23736_v44 = vpop.f32.mrb[74].mxu1  ;;  %v11035_v58 = vmax.f32 %v10907_v31, 0.0  ;;  %v11034_v49 = vmax.f32 %v10906_v47, 0.0  ;;  %v14850_v31 = vld [vmem:[%s25569_s5 + $0x348] sm:$0xff] }
 0xc26   :  { %v23744_v10 = vpop.f32.mrb[75].mxu1 }
 0xc27   :  { %16462 = vmatpush3.bf16.msra.mxu1 %v16461_v8  ;;  %v16475_v8 = vpack.c.bf16 %v14862_v39, %v14861_v41 }
 0xc28   :  { %16464 = vmatprep.subr.bf16.mxu1 %v16463_v38  ;;  %v14845_v38 = vld [vmem:[%s25569_s5 + $0x320] sm:$0xff] }
 0xc29   :  { %v23756_v13 = vpop.f32.mrb[76].mxu1 }
 0xc2a   :  { %v23764_v35 = vpop.f32.mrb[77].mxu1 }
 0xc2b   :  { %16466 = vmatpush3.bf16.msra.mxu1 %v16465_v27  ;;  %v14864_v27 = vld [vmem:[%s25569_s5 + $0x3b8] sm:$0xff] }
 0xc2c   :  { %16468 = vmatprep.subr.bf16.mxu1 %v16467_v34  ;;  %v16477_v34 = vpack.c.bf16 %v14846_v55, %v14845_v38  ;;  %v16479_v61 = vpack.c.bf16 %v14864_v27, %v14863_v29  ;;  %v14851_v55 = vld [vmem:[%s25569_s5 + $0x350] sm:$0xff]  ;;  %v14869_v29 = vld [vmem:[%s25569_s5 + $0x3e0] sm:$0xff]  ;;  %v14870_v27 = vld [vmem:[%s25569_s5 + $0x3e8] sm:$0xff] }
 0xc2d   :  { %v23776_v50 = vpop.f32.mrb[78].mxu1  ;;  %v16491_v2 = vpack.c.bf16 %v14870_v27, %v14869_v29  ;;  %v10913_v29 = vadd.f32 %v23451_v40, %v23536_v0 }
 0xc2e   :  { %11475 = vmatmul.mubr.f32.vlgmr.msra.gmra.mrb[168].mxu1 %v11030_v14  ;;  %v23784_v11 = vpop.f32.mrb[79].mxu1 }
 0xc2f   :  { %11479 = vmatprep.mubr.f32.mxu1 %v11033_v26  ;;  %16470 = vmatpush3.bf16.msra.mxu1 %v16469_v30  ;;  %v10911_v30 = vadd.f32 %v23451_v40, %v23516_v4  ;;  %v16483_v26 = vpack.c.bf16 %v14866_v51, %v14865_v9  ;;  %v14849_v4 = vld [vmem:[%s25569_s5 + $0x340] sm:$0xff] }
 0xc30   :  { %16472 = vmatprep.subr.bf16.mxu1 %v16471_v48 }
 0xc31   :  { %v23796_v18 = vpop.f32.mrb[80].mxu1  ;;  %v11039_v41 = vmax.f32 %v10911_v30, 0.0  ;;  %v14872_v30 = vld [vmem:[%s25569_s5 + $0x3f8] sm:$0xff] }
 0xc32   :  { %11480 = vmatmul.mubr.f32.gmra.mrb[170].mxu1 %v11032_v33  ;;  %v23804_v32 = vpop.f32.mrb[81].mxu1  ;;  %v14868_v33 = vld [vmem:[%s25569_s5 + $0x3d8] sm:$0xff] }
 0xc33   :  { %11484 = vmatprep.mubr.f32.mxu1 %v11035_v58  ;;  %16474 = vmatpush3.bf16.msra.mxu1 %v16473_v17  ;;  %v14867_v17 = vld [vmem:[%s25569_s5 + $0x3d0] sm:$0xff]  ;;  %v14852_v58 = vld [vmem:[%s25569_s5 + $0x358] sm:$0xff] }
 0xc34   :  { %16476 = vmatprep.subr.bf16.mxu1 %v16475_v8  ;;  %v16485_v8 = vpack.c.bf16 %v14850_v31, %v14849_v4  ;;  %v16487_v38 = vpack.c.bf16 %v14868_v33, %v14867_v17  ;;  %v14889_v31 = vld [vmem:[%s25569_s5 + $0x480] sm:$0xff] }
 0xc35   :  { %v23816_v14 = vpop.f32.mrb[82].mxu1 }
 0xc36   :  { %11485 = vmatmul.mubr.f32.gmra.mrb[172].mxu1 %v11034_v49  ;;  %v23824_v48 = vpop.f32.mrb[83].mxu1  ;;  %v16489_v49 = vpack.c.bf16 %v14852_v58, %v14851_v55  ;;  %v14873_v55 = vld [vmem:[%s25569_s5 + $0x400] sm:$0xff]  ;;  %v14874_v58 = vld [vmem:[%s25569_s5 + $0x408] sm:$0xff] }
 0xc37   :  { %11489 = vmatprep.mubr.f32.mxu1 %v11037_v59  ;;  %16478 = vmatpush3.bf16.msra.mxu1 %v16477_v34  ;;  %v14871_v59 = vld [vmem:[%s25569_s5 + $0x3f0] sm:$0xff] }
 0xc38   :  { %16480 = vmatprep.subr.bf16.mxu1 %v16479_v61  ;;  %v14853_v61 = vld [vmem:[%s25569_s5 + $0x360] sm:$0xff] }
 0xc39   :  { %v23832_v39 = vpop.f32.mrb[84].mxu1  ;;  %v16493_v51 = vpack.c.bf16 %v14854_v1, %v14853_v61  ;;  %v16501_v61 = vpack.c.bf16 %v14874_v58, %v14873_v55  ;;  %v14877_v55 = vld [vmem:[%s25569_s5 + $0x420] sm:$0xff]  ;;  %v14878_v58 = vld [vmem:[%s25569_s5 + $0x428] sm:$0xff] }
 0xc3a   :  { %11490 = vmatmul.mubr.f32.gmra.mrb[174].mxu1 %v11036_v5  ;;  %v23840_v47 = vpop.f32.mrb[85].mxu1  ;;  %v14855_v5 = vld [vmem:[%s25569_s5 + $0x370] sm:$0xff] }
 0xc3b   :  { %16482 = vmatpush3.bf16.msra.mxu1 %v16481_v6  ;;  %11596 = vmatprep.mubr.f32.mxu1 %v11039_v41  ;;  %v16495_v6 = vpack.c.bf16 %v14872_v30, %v14871_v59  ;;  %v14890_v41 = vld [vmem:[%s25569_s5 + $0x488] sm:$0xff]  ;;  %v10912_v59 = vadd.f32 %v23459_v54, %v23528_v24  ;;  %v14875_v30 = vld [vmem:[%s25569_s5 + $0x410] sm:$0xff]  ;;  %v14893_v24 = vld [vmem:[%s25569_s5 + $0x4a0] sm:$0xff] }
 0xc3c   :  { %16484 = vmatprep.subr.bf16.mxu1 %v16483_v26  ;;  %v14856_v26 = vld [vmem:[%s25569_s5 + $0x378] sm:$0xff] }
 0xc3d   :  { %v23848_v25 = vpop.f32.mrb[86].mxu1  ;;  %v16497_v33 = vpack.c.bf16 %v14856_v26, %v14855_v5  ;;  %v10915_v5 = vadd.f32 %v23451_v40, %v23552_v23  ;;  %v10914_v23 = vadd.f32 %v23459_v54, %v23544_v45  ;;  %v14895_v45 = vld [vmem:[%s25569_s5 + $0x4b0] sm:$0xff] }
 0xc3e   :  { %v23856_v34 = vpop.f32.mrb[87].mxu1 }
 0xc3f   :  { %16486 = vmatpush3.bf16.msra.mxu1 %v16485_v8  ;;  %v10910_v8 = vadd.f32 %v23459_v54, %v23508_v3  ;;  %v14892_v3 = vld [vmem:[%s25569_s5 + $0x498] sm:$0xff] }
 0xc40   :  { %16488 = vmatprep.subr.bf16.mxu1 %v16487_v38  ;;  %v16499_v38 = vpack.c.bf16 %v14890_v41, %v14889_v31  ;;  %v14894_v31 = vld [vmem:[%s25569_s5 + $0x4a8] sm:$0xff] }
 0xc41   :  { %v23864_v62 = vpop.f32.mrb[88].mxu1  ;;  %v11038_v1 = vmax.f32 %v10910_v8, 0.0  ;;  %v11040_v8 = vmax.f32 %v10912_v59, 0.0  ;;  %v16509_v59 = vpack.c.bf16 %v14878_v58, %v14877_v55  ;;  %v14882_v58 = vld [vmem:[%s25569_s5 + $0x448] sm:$0xff] }
 0xc42   :  { %v23872_v9 = vpop.f32.mrb[89].mxu1 }
 0xc43   :  { %16490 = vmatpush3.bf16.msra.mxu1 %v16489_v49  ;;  %v14891_v49 = vld [vmem:[%s25569_s5 + $0x490] sm:$0xff] }
 0xc44   :  { %16492 = vmatprep.subr.bf16.mxu1 %v16491_v2  ;;  %v16503_v0 = vpack.c.bf16 %v14892_v3, %v14891_v49  ;;  %v10917_v49 = vadd.f32 %v23451_v40, %v23568_v53  ;;  %v10916_v53 = vadd.f32 %v23459_v54, %v23560_v43  ;;  %v14897_v43 = vld [vmem:[%s25569_s5 + $0x4c0] sm:$0xff] }
 0xc45   :  { %v23880_v4 = vpop.f32.mrb[90].mxu1 }
 0xc46   :  { %v23888_v17 = vpop.f32.mrb[91].mxu1 }
 0xc47   :  { %16494 = vmatpush3.bf16.msra.mxu1 %v16493_v51  ;;  %v14876_v51 = vld [vmem:[%s25569_s5 + $0x418] sm:$0xff] }
 0xc48   :  { %16496 = vmatprep.subr.bf16.mxu1 %v16495_v6  ;;  %v11041_v6 = vmax.f32 %v10913_v29, 0.0  ;;  %v11043_v29 = vmax.f32 %v10915_v5, 0.0  ;;  %v11045_v5 = vmax.f32 %v10917_v49, 0.0 }
 0xc49   :  { %v23900_v27 = vpop.f32.mrb[92].mxu1 }
 0xc4a   :  { %v23908_v2 = vpop.f32.mrb[93].mxu1 }
 0xc4b   :  { %16498 = vmatpush3.bf16.msra.mxu1 %v16497_v33  ;;  %v16505_v33 = vpack.c.bf16 %v14876_v51, %v14875_v30  ;;  %v14879_v51 = vld [vmem:[%s25569_s5 + $0x430] sm:$0xff] }
 0xc4c   :  { %16500 = vmatprep.subr.bf16.mxu1 %v16499_v38  ;;  %v16507_v38 = vpack.c.bf16 %v14894_v31, %v14893_v24  ;;  %v10919_v24 = vadd.f32 %v23451_v40, %v23584_v46  ;;  %v14881_v46 = vld [vmem:[%s25569_s5 + $0x440] sm:$0xff] }
 0xc4d   :  { %v23920_v26 = vpop.f32.mrb[94].mxu1 }
 0xc4e   :  { %11597 = vmatmul.mubr.f32.vlgmr.msra.gmra.mrb[176].mxu1 %v11038_v1  ;;  %v23928_v41 = vpop.f32.mrb[95].mxu1 }
 0xc4f   :  { %11601 = vmatprep.mubr.f32.mxu1 %v11041_v6  ;;  %16502 = vmatpush3.bf16.msra.mxu1 %v16501_v61  ;;  %v14896_v61 = vld [vmem:[%s25569_s5 + $0x4b8] sm:$0xff] }
 0xc50   :  { %16504 = vmatprep.subr.bf16.mxu1 %v16503_v0  ;;  %v11042_v0 = vmax.f32 %v10914_v23, 0.0  ;;  %v16511_v30 = vpack.c.bf16 %v14896_v61, %v14895_v45  ;;  %v14880_v6 = vld [vmem:[%s25569_s5 + $0x438] sm:$0xff]  ;;  %v14899_v45 = vld [vmem:[%s25569_s5 + $0x4d0] sm:$0xff] }
 0xc51   :  { %v23940_v3 = vpop.f32.mrb[96].mxu1  ;;  %v16513_v23 = vpack.c.bf16 %v14880_v6, %v14879_v51  ;;  %v14900_v61 = vld [vmem:[%s25569_s5 + $0x4d8] sm:$0xff] }
 0xc52   :  { %11602 = vmatmul.mubr.f32.gmra.mrb[178].mxu1 %v11040_v8  ;;  %v23948_v1 = vpop.f32.mrb[97].mxu1  ;;  %v14884_v51 = vld [vmem:[%s25569_s5 + $0x458] sm:$0xff] }
 0xc53   :  { %11606 = vmatprep.mubr.f32.mxu1 %v11043_v29  ;;  %16506 = vmatpush3.bf16.msra.mxu1 %v16505_v33  ;;  %v14898_v33 = vld [vmem:[%s25569_s5 + $0x4c8] sm:$0xff]  ;;  %v11047_v29 = vmax.f32 %v10919_v24, 0.0 }
 0xc54   :  { %16508 = vmatprep.subr.bf16.mxu1 %v16507_v38  ;;  %v11044_v38 = vmax.f32 %v10916_v53, 0.0  ;;  %v16515_v55 = vpack.c.bf16 %v14898_v33, %v14897_v43  ;;  %v16519_v53 = vpack.c.bf16 %v14900_v61, %v14899_v45  ;;  %v14902_v24 = vld [vmem:[%s25569_s5 + $0x4e8] sm:$0xff] }
 0xc55   :  { %v23960_v31 = vpop.f32.mrb[98].mxu1 }
 0xc56   :  { %11607 = vmatmul.mubr.f32.gmra.mrb[180].mxu1 %v11042_v0  ;;  %v23968_v8 = vpop.f32.mrb[99].mxu1  ;;  %v16517_v0 = vpack.c.bf16 %v14882_v58, %v14881_v46  ;;  %v14903_v58 = vld [vmem:[%s25569_s5 + $0x4f0] sm:$0xff] }
 0xc57   :  { %11611 = vmatprep.mubr.f32.mxu1 %v11045_v5  ;;  %16510 = vmatpush3.bf16.msra.mxu1 %v16509_v59  ;;  %v14901_v5 = vld [vmem:[%s25569_s5 + $0x4e0] sm:$0xff] }
 0xc58   :  { %16512 = vmatprep.subr.bf16.mxu1 %v16511_v30  ;;  %v14883_v30 = vld [vmem:[%s25569_s5 + $0x450] sm:$0xff] }
 0xc59   :  { %v23976_v49 = vpop.f32.mrb[100].mxu1  ;;  %v16521_v33 = vpack.c.bf16 %v14884_v51, %v14883_v30  ;;  %v14888_v30 = vld [vmem:[%s25569_s5 + $0x478] sm:$0xff] }
 0xc5a   :  { %11612 = vmatmul.mubr.f32.gmra.mrb[182].mxu1 %v11044_v38  ;;  %v23984_v59 = vpop.f32.mrb[101].mxu1  ;;  %v14885_v38 = vld [vmem:[%s25569_s5 + $0x460] sm:$0xff] }
 0xc5b   :  { %16514 = vmatpush3.bf16.msra.mxu1 %v16513_v23  ;;  %11718 = vmatprep.mubr.f32.mxu1 %v11047_v29  ;;  %v16523_v23 = vpack.c.bf16 %v14902_v24, %v14901_v5  ;;  %v14904_v29 = vld [vmem:[%s25569_s5 + $0x4f8] sm:$0xff]  ;;  %v14921_v5 = vld [vmem:[%s25569_s5 + $0x580] sm:$0xff]  ;;  %v14922_v24 = vld [vmem:[%s25569_s5 + $0x588] sm:$0xff] }
 0xc5c   :  { %16516 = vmatprep.subr.bf16.mxu1 %v16515_v55  ;;  %v14886_v55 = vld [vmem:[%s25569_s5 + $0x468] sm:$0xff] }
 0xc5d   :  { %v23992_v6 = vpop.f32.mrb[102].mxu1  ;;  %v16525_v61 = vpack.c.bf16 %v14886_v55, %v14885_v38  ;;  %v10918_v38 = vadd.f32 %v23459_v54, %v23576_v57  ;;  %v16531_v55 = vpack.c.bf16 %v14922_v24, %v14921_v5  ;;  %v14924_v57 = vld [vmem:[%s25569_s5 + $0x598] sm:$0xff]  ;;  %v10920_v5 = vadd.f32 %v23459_v54, %v23592_v52  ;;  %v14907_v24 = vld [vmem:[%s25569_s5 + $0x510] sm:$0xff]  ;;  %v14925_v52 = vld [vmem:[%s25569_s5 + $0x5a0] sm:$0xff] }
 0xc5e   :  { %v24000_v43 = vpop.f32.mrb[103].mxu1 }
 0xc5f   :  { %16518 = vmatpush3.bf16.msra.mxu1 %v16517_v0  ;;  %v16527_v0 = vpack.c.bf16 %v14904_v29, %v14903_v58  ;;  %v14905_v58 = vld [vmem:[%s25569_s5 + $0x500] sm:$0xff]  ;;  %v14906_v29 = vld [vmem:[%s25569_s5 + $0x508] sm:$0xff] }
 0xc60   :  { %16520 = vmatprep.subr.bf16.mxu1 %v16519_v53  ;;  %v14887_v53 = vld [vmem:[%s25569_s5 + $0x470] sm:$0xff] }
 0xc61   :  { %v24008_v46 = vpop.f32.mrb[104].mxu1 }
 0xc62   :  { %25996 = vst [vmem:[#allocation36_spill] sm:$0xff] %v24008_v46  ;;  %v24016_v45 = vpop.f32.mrb[105].mxu1 }
 0xc63   :  { %16522 = vmatpush3.bf16.msra.mxu1 %v16521_v33 }
 0xc64   :  { %16524 = vmatprep.subr.bf16.mxu1 %v16523_v23  ;;  %v16529_v23 = vpack.c.bf16 %v14888_v30, %v14887_v53  ;;  %v16533_v53 = vpack.c.bf16 %v14906_v29, %v14905_v58  ;;  %v11046_v30 = vmax.f32 %v10918_v38, 0.0  ;;  %v14926_v38 = vld [vmem:[%s25569_s5 + $0x5a8] sm:$0xff] }
 0xc65   :  { %v24024_v51 = vpop.f32.mrb[106].mxu1  ;;  %v16539_v29 = vpack.c.bf16 %v14926_v38, %v14925_v52  ;;  %v14911_v52 = vld [vmem:[%s25569_s5 + $0x530] sm:$0xff]  ;;  %v14912_v38 = vld [vmem:[%s25569_s5 + $0x538] sm:$0xff] }
 0xc66   :  { %25997 = vst [vmem:[#allocation37_spill] sm:$0xff] %v24024_v51  ;;  %v24032_v33 = vpop.f32.mrb[107].mxu1  ;;  %v10921_v51 = vadd.f32 %v23451_v40, %v23600_v42 }
 0xc67   :  { %25998 = vst [vmem:[#allocation38_spill] sm:$0xff] %v24032_v33  ;;  %16526 = vmatpush3.bf16.msra.mxu1 %v16525_v61  ;;  %v14923_v61 = vld [vmem:[%s25569_s5 + $0x590] sm:$0xff] }
 0xc68   :  { %16528 = vmatprep.subr.bf16.mxu1 %v16527_v0  ;;  %v16535_v42 = vpack.c.bf16 %v14924_v57, %v14923_v61  ;;  %v11049_v33 = vmax.f32 %v10921_v51, 0.0  ;;  %v11048_v51 = vmax.f32 %v10920_v5, 0.0  ;;  %v14909_v61 = vld [vmem:[%s25569_s5 + $0x520] sm:$0xff]  ;;  %v14910_v57 = vld [vmem:[%s25569_s5 + $0x528] sm:$0xff] }
 0xc69   :  { %v24044_v46 = vpop.f32.mrb[108].mxu1 }
 0xc6a   :  { %25999 = vst [vmem:[#allocation39_spill] sm:$0xff] %v24044_v46  ;;  %v24052_v0 = vpop.f32.mrb[109].mxu1  ;;  %v14908_v46 = vld [vmem:[%s25569_s5 + $0x518] sm:$0xff] }
 0xc6b   :  { %26000 = vst [vmem:[#allocation40_spill] sm:$0xff] %v24052_v0  ;;  %16530 = vmatpush3.bf16.msra.mxu1 %v16529_v23  ;;  %v10923_v0 = vadd.f32 %v23451_v40, %v23620_v36  ;;  %v16537_v58 = vpack.c.bf16 %v14908_v46, %v14907_v24  ;;  %v10922_v36 = vadd.f32 %v23459_v54, %v23612_v21  ;;  %v14927_v21 = vld [vmem:[%s25569_s5 + $0x5b0] sm:$0xff]  ;;  %v14928_v46 = vld [vmem:[%s25569_s5 + $0x5b8] sm:$0xff] }
 0xc6c   :  { %16532 = vmatprep.subr.bf16.mxu1 %v16531_v55  ;;  %v16543_v24 = vpack.c.bf16 %v14928_v46, %v14927_v21  ;;  %v14914_v21 = vld [vmem:[%s25569_s5 + $0x548] sm:$0xff] }
 0xc6d   :  { %v24064_v23 = vpop.f32.mrb[110].mxu1 }
 0xc6e   :  { %11719 = vmatmul.mubr.f32.vlgmr.msra.gmra.mrb[184].mxu1 %v11046_v30  ;;  %v24072_v55 = vpop.f32.mrb[111].mxu1  ;;  %v11051_v30 = vmax.f32 %v10923_v0, 0.0  ;;  %v11050_v0 = vmax.f32 %v10922_v36, 0.0  ;;  %v14930_v36 = vld [vmem:[%s25569_s5 + $0x5c8] sm:$0xff] }
 0xc6f   :  { %11723 = vmatprep.mubr.f32.mxu1 %v11049_v33  ;;  %16534 = vmatpush3.bf16.msra.mxu1 %v16533_v53  ;;  %v10925_v33 = vadd.f32 %v23451_v40, %v23640_v63  ;;  %v10924_v63 = vadd.f32 %v23459_v54, %v23632_v56  ;;  %v14929_v56 = vld [vmem:[%s25569_s5 + $0x5c0] sm:$0xff] }
 0xc70   :  { %16536 = vmatprep.subr.bf16.mxu1 %v16535_v42  ;;  %v16541_v42 = vpack.c.bf16 %v14910_v57, %v14909_v61  ;;  %v16545_v61 = vpack.c.bf16 %v14912_v38, %v14911_v52  ;;  %v14915_v38 = vld [vmem:[%s25569_s5 + $0x550] sm:$0xff] }
 0xc71   :  { %v24084_v53 = vpop.f32.mrb[112].mxu1  ;;  %v11052_v57 = vmax.f32 %v10924_v63, 0.0 }
 0xc72   :  { %11724 = vmatmul.mubr.f32.gmra.mrb[186].mxu1 %v11048_v51  ;;  %v24092_v5 = vpop.f32.mrb[113].mxu1  ;;  %v11053_v51 = vmax.f32 %v10925_v33, 0.0  ;;  %v16547_v33 = vpack.c.bf16 %v14930_v36, %v14929_v56  ;;  %v14933_v56 = vld [vmem:[%s25569_s5 + $0x5e0] sm:$0xff]  ;;  %v14934_v36 = vld [vmem:[%s25569_s5 + $0x5e8] sm:$0xff] }
 0xc73   :  { %11728 = vmatprep.mubr.f32.mxu1 %v11051_v30  ;;  %16538 = vmatpush3.bf16.msra.mxu1 %v16537_v58  ;;  %v10927_v30 = vadd.f32 %v23451_v40, %v23660_v19  ;;  %v14913_v19 = vld [vmem:[%s25569_s5 + $0x540] sm:$0xff] }
 0xc74   :  { %16540 = vmatprep.subr.bf16.mxu1 %v16539_v29 }
 0xc75   :  { %v24104_v58 = vpop.f32.mrb[114].mxu1  ;;  %v11055_v46 = vmax.f32 %v10927_v30, 0.0 }
 0xc76   :  { %26001 = vst [vmem:[#allocation41_spill] sm:$0xff] %v24104_v58  ;;  %11729 = vmatmul.mubr.f32.gmra.mrb[188].mxu1 %v11050_v0  ;;  %v24112_v29 = vpop.f32.mrb[115].mxu1  ;;  %v14931_v0 = vld [vmem:[%s25569_s5 + $0x5d0] sm:$0xff] }
 0xc77   :  { %11733 = vmatprep.mubr.f32.mxu1 %v11053_v51  ;;  %16542 = vmatpush3.bf16.msra.mxu1 %v16541_v42  ;;  %v14932_v42 = vld [vmem:[%s25569_s5 + $0x5d8] sm:$0xff] }
 0xc78   :  { %16544 = vmatprep.subr.bf16.mxu1 %v16543_v24  ;;  %v16549_v24 = vpack.c.bf16 %v14914_v21, %v14913_v19  ;;  %v16551_v52 = vpack.c.bf16 %v14932_v42, %v14931_v0  ;;  %v14916_v51 = vld [vmem:[%s25569_s5 + $0x558] sm:$0xff]  ;;  %v14917_v19 = vld [vmem:[%s25569_s5 + $0x560] sm:$0xff]  ;;  %v14918_v21 = vld [vmem:[%s25569_s5 + $0x568] sm:$0xff] }
 0xc79   :  { %v24120_v58 = vpop.f32.mrb[116].mxu1  ;;  %v14935_v0 = vld [vmem:[%s25569_s5 + $0x5f0] sm:$0xff]  ;;  %v14936_v42 = vld [vmem:[%s25569_s5 + $0x5f8] sm:$0xff] }
 0xc7a   :  { %11734 = vmatmul.mubr.f32.gmra.mrb[190].mxu1 %v11052_v57  ;;  %v24128_v63 = vpop.f32.mrb[117].mxu1  ;;  %v16553_v57 = vpack.c.bf16 %v14916_v51, %v14915_v38  ;;  %v16559_v38 = vpack.c.bf16 %v14936_v42, %v14935_v0  ;;  %v14919_v51 = vld [vmem:[%s25569_s5 + $0x570] sm:$0xff]  ;;  %v14937_v42 = vld [vmem:[%s25569_s5 + $0x600] sm:$0xff] }
 0xc7b   :  { %16546 = vmatpush3.bf16.msra.mxu1 %v16545_v61  ;;  %11840 = vmatprep.mubr.f32.mxu1 %v11055_v46 }
 0xc7c   :  { %16548 = vmatprep.subr.bf16.mxu1 %v16547_v33  ;;  %v16555_v33 = vpack.c.bf16 %v14934_v36, %v14933_v56  ;;  %v14920_v56 = vld [vmem:[%s25569_s5 + $0x578] sm:$0xff] }
 0xc7d   :  { %v24136_v30 = vpop.f32.mrb[118].mxu1 }
 0xc7e   :  { %26002 = vst [vmem:[#allocation42_spill] sm:$0xff] %v24136_v30  ;;  %v24144_v61 = vpop.f32.mrb[119].mxu1 }
 0xc7f   :  { %16550 = vmatpush3.bf16.msra.mxu1 %v16549_v24 }
 0xc80   :  { %16552 = vmatprep.subr.bf16.mxu1 %v16551_v52  ;;  %v16557_v52 = vpack.c.bf16 %v14918_v21, %v14917_v19  ;;  %v16561_v19 = vpack.c.bf16 %v14920_v56, %v14919_v51  ;;  %v10926_v21 = vadd.f32 %v23459_v54, %v23652_v16  ;;  %v14956_v16 = vld [vmem:[%s25569_s5 + $0x698] sm:$0xff]  ;;  %v10928_v56 = vadd.f32 %v23459_v54, %v23672_v37  ;;  %v14957_v37 = vld [vmem:[%s25569_s5 + $0x6a0] sm:$0xff] }
 0xc81   :  { %v24152_v46 = vpop.f32.mrb[120].mxu1 }
 0xc82   :  { %26003 = vst [vmem:[#allocation43_spill] sm:$0xff] %v24152_v46  ;;  %v24160_v24 = vpop.f32.mrb[121].mxu1  ;;  %v14953_v46 = vld [vmem:[%s25569_s5 + $0x680] sm:$0xff]  ;;  %v11054_v51 = vmax.f32 %v10926_v21, 0.0 }
 0xc83   :  { %26004 = vst [vmem:[#allocation44_spill] sm:$0xff] %v24160_v24  ;;  %16554 = vmatpush3.bf16.msra.mxu1 %v16553_v57  ;;  %v14954_v57 = vld [vmem:[%s25569_s5 + $0x688] sm:$0xff]  ;;  %v10929_v24 = vadd.f32 %v23451_v40, %v23680_v15 }
 0xc84   :  { %16556 = vmatprep.subr.bf16.mxu1 %v16555_v33  ;;  %v16563_v0 = vpack.c.bf16 %v14954_v57, %v14953_v46  ;;  %v14939_v57 = vld [vmem:[%s25569_s5 + $0x610] sm:$0xff] }
 0xc85   :  { %v24168_v36 = vpop.f32.mrb[122].mxu1 }
 0xc86   :  { %26005 = vst [vmem:[#allocation45_spill] sm:$0xff] %v24168_v36  ;;  %v24176_v33 = vpop.f32.mrb[123].mxu1  ;;  %v14938_v36 = vld [vmem:[%s25569_s5 + $0x608] sm:$0xff] }
 0xc87   :  { %26006 = vst [vmem:[#allocation34_spill] sm:$0xff] %v24176_v33  ;;  %16558 = vmatpush3.bf16.msra.mxu1 %v16557_v52  ;;  %v14955_v52 = vld [vmem:[%s25569_s5 + $0x690] sm:$0xff]  ;;  %v11057_v33 = vmax.f32 %v10929_v24, 0.0  ;;  %v11056_v24 = vmax.f32 %v10928_v56, 0.0 }
 0xc88   :  { %16560 = vmatprep.subr.bf16.mxu1 %v16559_v38  ;;  %v16565_v38 = vpack.c.bf16 %v14938_v36, %v14937_v42  ;;  %v16567_v15 = vpack.c.bf16 %v14956_v16, %v14955_v52  ;;  %v14958_v36 = vld [vmem:[%s25569_s5 + $0x6a8] sm:$0xff]  ;;  %v14941_v52 = vld [vmem:[%s25569_s5 + $0x620] sm:$0xff] }
 0xc89   :  { %v24188_v30 = vpop.f32.mrb[124].mxu1  ;;  %v16571_v42 = vpack.c.bf16 %v14958_v36, %v14957_v37  ;;  %v14942_v16 = vld [vmem:[%s25569_s5 + $0x628] sm:$0xff]  ;;  %v14943_v37 = vld [vmem:[%s25569_s5 + $0x630] sm:$0xff]  ;;  %v14944_v36 = vld [vmem:[%s25569_s5 + $0x638] sm:$0xff] }
 0xc8a   :  { %26007 = vst [vmem:[#allocation3_spill] sm:$0xff] %v24188_v30  ;;  %v24196_v46 = vpop.f32.mrb[125].mxu1  ;;  %v14940_v30 = vld [vmem:[%s25569_s5 + $0x618] sm:$0xff] }
 0xc8b   :  { %26008 = vst [vmem:[#allocation4_spill] sm:$0xff] %v24196_v46  ;;  %16562 = vmatpush3.bf16.msra.mxu1 %v16561_v19  ;;  %v10931_v46 = vadd.f32 %v23451_v40, %v23696_v22  ;;  %v10930_v22 = vadd.f32 %v23459_v54, %v23688_v28  ;;  %v14959_v28 = vld [vmem:[%s25569_s5 + $0x6b0] sm:$0xff] }
 0xc8c   :  { %16564 = vmatprep.subr.bf16.mxu1 %v16563_v0  ;;  %v16569_v0 = vpack.c.bf16 %v14940_v30, %v14939_v57  ;;  %v14960_v30 = vld [vmem:[%s25569_s5 + $0x6b8] sm:$0xff] }
 0xc8d   :  { %v24208_v19 = vpop.f32.mrb[126].mxu1  ;;  %v16575_v57 = vpack.c.bf16 %v14960_v30, %v14959_v28  ;;  %v14946_v28 = vld [vmem:[%s25569_s5 + $0x648] sm:$0xff] }
 0xc8e   :  { %11841 = vmatmul.mubr.f32.vlgmr.msra.gmra.mrb[192].mxu1 %v11054_v51  ;;  %v24216_v21 = vpop.f32.mrb[127].mxu1  ;;  %v11059_v51 = vmax.f32 %v10931_v46, 0.0  ;;  %v11058_v46 = vmax.f32 %v10930_v22, 0.0  ;;  %v14962_v22 = vld [vmem:[%s25569_s5 + $0x6c8] sm:$0xff] }
 0xc8f   :  { %11845 = vmatprep.mubr.f32.mxu1 %v11057_v33  ;;  %16566 = vmatpush3.bf16.msra.mxu1 %v16565_v38  ;;  %v10933_v33 = vadd.f32 %v23451_v40, %v23712_v12  ;;  %v10932_v12 = vadd.f32 %v23459_v54, %v23704_v60  ;;  %v14961_v60 = vld [vmem:[%s25569_s5 + $0x6c0] sm:$0xff] }
 0xc90   :  { %16568 = vmatprep.subr.bf16.mxu1 %v16567_v15  ;;  %v16573_v15 = vpack.c.bf16 %v14942_v16, %v14941_v52  ;;  %v16577_v52 = vpack.c.bf16 %v14944_v36, %v14943_v37  ;;  %v14947_v36 = vld [vmem:[%s25569_s5 + $0x650] sm:$0xff] }
 0xc91   :  { %v24228_v38 = vpop.f32.mrb[128].mxu1  ;;  %v11060_v16 = vmax.f32 %v10932_v12, 0.0 }
 0xc92   :  { %11846 = vmatmul.mubr.f32.gmra.mrb[194].mxu1 %v11056_v24  ;;  %v24236_v56 = vpop.f32.mrb[129].mxu1  ;;  %v11061_v24 = vmax.f32 %v10933_v33, 0.0  ;;  %v16579_v33 = vpack.c.bf16 %v14962_v22, %v14961_v60  ;;  %v14965_v60 = vld [vmem:[%s25569_s5 + $0x6e0] sm:$0xff]  ;;  %v14966_v22 = vld [vmem:[%s25569_s5 + $0x6e8] sm:$0xff] }
 0xc93   :  { %11850 = vmatprep.mubr.f32.mxu1 %v11059_v51  ;;  %16570 = vmatpush3.bf16.msra.mxu1 %v16569_v0  ;;  %v10935_v51 = vadd.f32 %v23451_v40, %v23728_v20  ;;  %v14945_v20 = vld [vmem:[%s25569_s5 + $0x640] sm:$0xff] }
 0xc94   :  { %16572 = vmatprep.subr.bf16.mxu1 %v16571_v42 }
 0xc95   :  { %v24248_v0 = vpop.f32.mrb[130].mxu1  ;;  %v11063_v30 = vmax.f32 %v10935_v51, 0.0 }
 0xc96   :  { %26009 = vst [vmem:[#allocation5_spill] sm:$0xff] %v24248_v0  ;;  %11851 = vmatmul.mubr.f32.gmra.mrb[196].mxu1 %v11058_v46  ;;  %v24256_v42 = vpop.f32.mrb[131].mxu1  ;;  %v14963_v46 = vld [vmem:[%s25569_s5 + $0x6d0] sm:$0xff] }
 0xc97   :  { %11855 = vmatprep.mubr.f32.mxu1 %v11061_v24  ;;  %16574 = vmatpush3.bf16.msra.mxu1 %v16573_v15  ;;  %v14964_v15 = vld [vmem:[%s25569_s5 + $0x6d8] sm:$0xff] }
 0xc98   :  { %16576 = vmatprep.subr.bf16.mxu1 %v16575_v57  ;;  %v16581_v57 = vpack.c.bf16 %v14946_v28, %v14945_v20  ;;  %v16583_v37 = vpack.c.bf16 %v14964_v15, %v14963_v46  ;;  %v14948_v24 = vld [vmem:[%s25569_s5 + $0x658] sm:$0xff]  ;;  %v14949_v20 = vld [vmem:[%s25569_s5 + $0x660] sm:$0xff]  ;;  %v14950_v28 = vld [vmem:[%s25569_s5 + $0x668] sm:$0xff] }
 0xc99   :  { %v24264_v0 = vpop.f32.mrb[132].mxu1  ;;  %v14967_v46 = vld [vmem:[%s25569_s5 + $0x6f0] sm:$0xff]  ;;  %v14968_v15 = vld [vmem:[%s25569_s5 + $0x6f8] sm:$0xff] }
 0xc9a   :  { %11856 = vmatmul.mubr.f32.gmra.mrb[198].mxu1 %v11060_v16  ;;  %v24272_v12 = vpop.f32.mrb[133].mxu1  ;;  %v16585_v16 = vpack.c.bf16 %v14948_v24, %v14947_v36  ;;  %v16591_v36 = vpack.c.bf16 %v14968_v15, %v14967_v46  ;;  %v14951_v24 = vld [vmem:[%s25569_s5 + $0x670] sm:$0xff]  ;;  %v14969_v15 = vld [vmem:[%s25569_s5 + $0x700] sm:$0xff] }
 0xc9b   :  { %16578 = vmatpush3.bf16.msra.mxu1 %v16577_v52  ;;  %11962 = vmatprep.mubr.f32.mxu1 %v11063_v30 }
 0xc9c   :  { %16580 = vmatprep.subr.bf16.mxu1 %v16579_v33  ;;  %v16587_v33 = vpack.c.bf16 %v14966_v22, %v14965_v60  ;;  %v14952_v60 = vld [vmem:[%s25569_s5 + $0x678] sm:$0xff] }
 0xc9d   :  { %v24280_v51 = vpop.f32.mrb[134].mxu1 }
 0xc9e   :  { %26010 = vst [vmem:[#allocation6_spill] sm:$0xff] %v24280_v51  ;;  %v24288_v52 = vpop.f32.mrb[135].mxu1 }
 0xc9f   :  { %16582 = vmatpush3.bf16.msra.mxu1 %v16581_v57 }
 0xca0   :  { %16584 = vmatprep.subr.bf16.mxu1 %v16583_v37  ;;  %v16589_v37 = vpack.c.bf16 %v14950_v28, %v14949_v20  ;;  %v16593_v20 = vpack.c.bf16 %v14952_v60, %v14951_v24  ;;  %v10934_v28 = vadd.f32 %v23459_v54, %v23720_v7  ;;  %v14988_v7 = vld [vmem:[%s25569_s5 + $0x798] sm:$0xff]  ;;  %v10936_v60 = vadd.f32 %v23459_v54, %v23736_v44  ;;  %v14989_v44 = vld [vmem:[%s25569_s5 + $0x7a0] sm:$0xff] }
 0xca1   :  { %v24296_v30 = vpop.f32.mrb[136].mxu1 }
 0xca2   :  { %26011 = vst [vmem:[#allocation7_spill] sm:$0xff] %v24296_v30  ;;  %v24304_v57 = vpop.f32.mrb[137].mxu1  ;;  %v14985_v30 = vld [vmem:[%s25569_s5 + $0x780] sm:$0xff]  ;;  %v11062_v24 = vmax.f32 %v10934_v28, 0.0 }
 0xca3   :  { %26012 = vst [vmem:[#allocation8_spill] sm:$0xff] %v24304_v57  ;;  %16586 = vmatpush3.bf16.msra.mxu1 %v16585_v16  ;;  %v14986_v16 = vld [vmem:[%s25569_s5 + $0x788] sm:$0xff]  ;;  %v10937_v57 = vadd.f32 %v23451_v40, %v23744_v10 }
 0xca4   :  { %16588 = vmatprep.subr.bf16.mxu1 %v16587_v33  ;;  %v16595_v46 = vpack.c.bf16 %v14986_v16, %v14985_v30  ;;  %v14971_v16 = vld [vmem:[%s25569_s5 + $0x710] sm:$0xff] }
 0xca5   :  { %v24312_v22 = vpop.f32.mrb[138].mxu1 }
 0xca6   :  { %26013 = vst [vmem:[#allocation9_spill] sm:$0xff] %v24312_v22  ;;  %v24320_v33 = vpop.f32.mrb[139].mxu1  ;;  %v14970_v22 = vld [vmem:[%s25569_s5 + $0x708] sm:$0xff] }
 0xca7   :  { %26014 = vst [vmem:[#allocation10_spill] sm:$0xff] %v24320_v33  ;;  %16590 = vmatpush3.bf16.msra.mxu1 %v16589_v37  ;;  %v14987_v37 = vld [vmem:[%s25569_s5 + $0x790] sm:$0xff]  ;;  %v11065_v33 = vmax.f32 %v10937_v57, 0.0  ;;  %v11064_v57 = vmax.f32 %v10936_v60, 0.0 }
 0xca8   :  { %16592 = vmatprep.subr.bf16.mxu1 %v16591_v36  ;;  %v16597_v36 = vpack.c.bf16 %v14970_v22, %v14969_v15  ;;  %v16599_v10 = vpack.c.bf16 %v14988_v7, %v14987_v37  ;;  %v14990_v22 = vld [vmem:[%s25569_s5 + $0x7a8] sm:$0xff]  ;;  %v14973_v37 = vld [vmem:[%s25569_s5 + $0x720] sm:$0xff] }
 0xca9   :  { %v24332_v51 = vpop.f32.mrb[140].mxu1  ;;  %v16603_v15 = vpack.c.bf16 %v14990_v22, %v14989_v44  ;;  %v14974_v7 = vld [vmem:[%s25569_s5 + $0x728] sm:$0xff]  ;;  %v14975_v44 = vld [vmem:[%s25569_s5 + $0x730] sm:$0xff]  ;;  %v14976_v22 = vld [vmem:[%s25569_s5 + $0x738] sm:$0xff] }
 0xcaa   :  { %26015 = vst [vmem:[#allocation11_spill] sm:$0xff] %v24332_v51  ;;  %v24340_v30 = vpop.f32.mrb[141].mxu1  ;;  %v14972_v51 = vld [vmem:[%s25569_s5 + $0x718] sm:$0xff] }
 0xcab   :  { %26016 = vst [vmem:[#allocation12_spill] sm:$0xff] %v24340_v30  ;;  %16594 = vmatpush3.bf16.msra.mxu1 %v16593_v20  ;;  %v10939_v30 = vadd.f32 %v23451_v40, %v23764_v35  ;;  %v10938_v35 = vadd.f32 %v23459_v54, %v23756_v13  ;;  %v14991_v13 = vld [vmem:[%s25569_s5 + $0x7b0] sm:$0xff] }
 0xcac   :  { %16596 = vmatprep.subr.bf16.mxu1 %v16595_v46  ;;  %v16601_v46 = vpack.c.bf16 %v14972_v51, %v14971_v16  ;;  %v14992_v51 = vld [vmem:[%s25569_s5 + $0x7b8] sm:$0xff] }
 0xcad   :  { %v24352_v20 = vpop.f32.mrb[142].mxu1  ;;  %v16607_v16 = vpack.c.bf16 %v14992_v51, %v14991_v13  ;;  %v14978_v13 = vld [vmem:[%s25569_s5 + $0x748] sm:$0xff] }
 0xcae   :  { %11963 = vmatmul.mubr.f32.vlgmr.msra.gmra.mrb[200].mxu1 %v11062_v24  ;;  %v24360_v28 = vpop.f32.mrb[143].mxu1  ;;  %v11067_v24 = vmax.f32 %v10939_v30, 0.0  ;;  %v11066_v30 = vmax.f32 %v10938_v35, 0.0  ;;  %v14994_v35 = vld [vmem:[%s25569_s5 + $0x7c8] sm:$0xff] }
 0xcaf   :  { %11967 = vmatprep.mubr.f32.mxu1 %v11065_v33  ;;  %16598 = vmatpush3.bf16.msra.mxu1 %v16597_v36  ;;  %v10941_v33 = vadd.f32 %v23451_v40, %v23784_v11  ;;  %v10940_v11 = vadd.f32 %v23459_v54, %v23776_v50  ;;  %v14993_v50 = vld [vmem:[%s25569_s5 + $0x7c0] sm:$0xff] }
 0xcb0   :  { %16600 = vmatprep.subr.bf16.mxu1 %v16599_v10  ;;  %v16605_v10 = vpack.c.bf16 %v14974_v7, %v14973_v37  ;;  %v16609_v37 = vpack.c.bf16 %v14976_v22, %v14975_v44  ;;  %v14979_v22 = vld [vmem:[%s25569_s5 + $0x750] sm:$0xff] }
 0xcb1   :  { %v24372_v36 = vpop.f32.mrb[144].mxu1  ;;  %v11068_v7 = vmax.f32 %v10940_v11, 0.0 }
 0xcb2   :  { %11968 = vmatmul.mubr.f32.gmra.mrb[202].mxu1 %v11064_v57  ;;  %v24380_v60 = vpop.f32.mrb[145].mxu1  ;;  %v11069_v57 = vmax.f32 %v10941_v33, 0.0  ;;  %v16611_v33 = vpack.c.bf16 %v14994_v35, %v14993_v50  ;;  %v14997_v50 = vld [vmem:[%s25569_s5 + $0x7e0] sm:$0xff]  ;;  %v14998_v35 = vld [vmem:[%s25569_s5 + $0x7e8] sm:$0xff] }
 0xcb3   :  { %11972 = vmatprep.mubr.f32.mxu1 %v11067_v24  ;;  %16602 = vmatpush3.bf16.msra.mxu1 %v16601_v46  ;;  %v10943_v24 = vadd.f32 %v23451_v40, %v23804_v32  ;;  %v14977_v32 = vld [vmem:[%s25569_s5 + $0x740] sm:$0xff] }
 0xcb4   :  { %16604 = vmatprep.subr.bf16.mxu1 %v16603_v15 }
 0xcb5   :  { %v24392_v46 = vpop.f32.mrb[146].mxu1  ;;  %v11071_v51 = vmax.f32 %v10943_v24, 0.0 }
 0xcb6   :  { %26017 = vst [vmem:[#allocation13_spill] sm:$0xff] %v24392_v46  ;;  %11973 = vmatmul.mubr.f32.gmra.mrb[204].mxu1 %v11066_v30  ;;  %v24400_v15 = vpop.f32.mrb[147].mxu1  ;;  %v14995_v30 = vld [vmem:[%s25569_s5 + $0x7d0] sm:$0xff] }
 0xcb7   :  { %26018 = vst [vmem:[#allocation14_spill] sm:$0xff] %v24400_v15  ;;  %11977 = vmatprep.mubr.f32.mxu1 %v11069_v57  ;;  %16606 = vmatpush3.bf16.msra.mxu1 %v16605_v10  ;;  %v14996_v10 = vld [vmem:[%s25569_s5 + $0x7d8] sm:$0xff] }
 0xcb8   :  { %16608 = vmatprep.subr.bf16.mxu1 %v16607_v16  ;;  %v16613_v16 = vpack.c.bf16 %v14978_v13, %v14977_v32  ;;  %v16615_v44 = vpack.c.bf16 %v14996_v10, %v14995_v30  ;;  %v14980_v57 = vld [vmem:[%s25569_s5 + $0x758] sm:$0xff]  ;;  %v14981_v32 = vld [vmem:[%s25569_s5 + $0x760] sm:$0xff]  ;;  %v14982_v13 = vld [vmem:[%s25569_s5 + $0x768] sm:$0xff] }
 0xcb9   :  { %v24408_v46 = vpop.f32.mrb[148].mxu1  ;;  %v14999_v30 = vld [vmem:[%s25569_s5 + $0x7f0] sm:$0xff]  ;;  %v15000_v10 = vld [vmem:[%s25569_s5 + $0x7f8] sm:$0xff] }
 0xcba   :  { %26019 = vst [vmem:[#allocation15_spill] sm:$0xff] %v24408_v46  ;;  %11978 = vmatmul.mubr.f32.gmra.mrb[206].mxu1 %v11068_v7  ;;  %v24416_v11 = vpop.f32.mrb[149].mxu1  ;;  %v16617_v7 = vpack.c.bf16 %v14980_v57, %v14979_v22  ;;  %v16621_v22 = vpack.c.bf16 %v14982_v13, %v14981_v32  ;;  %v16623_v57 = vpack.c.bf16 %v15000_v10, %v14999_v30  ;;  %v15001_v10 = vld [vmem:[%s25569_s5 + $0x800] sm:$0xff] }
 0xcbb   :  { %26020 = vst [vmem:[#allocation16_spill] sm:$0xff] %v24416_v11  ;;  %16610 = vmatpush3.bf16.msra.mxu1 %v16609_v37  ;;  %12084 = vmatprep.mubr.f32.mxu1 %v11071_v51  ;;  %v10945_v46 = vadd.f32 %v23451_v40, %v23824_v48  ;;  %v15004_v11 = vld [vmem:[%s25569_s5 + $0x818] sm:$0xff] }
 0xcbc   :  { %16612 = vmatprep.subr.bf16.mxu1 %v16611_v33  ;;  %v16619_v33 = vpack.c.bf16 %v14998_v35, %v14997_v50  ;;  %v14983_v50 = vld [vmem:[%s25569_s5 + $0x770] sm:$0xff]  ;;  %v14984_v35 = vld [vmem:[%s25569_s5 + $0x778] sm:$0xff] }
 0xcbd   :  { %v24424_v24 = vpop.f32.mrb[150].mxu1  ;;  %v16625_v13 = vpack.c.bf16 %v14984_v35, %v14983_v50  ;;  %v11073_v15 = vmax.f32 %v10945_v46, 0.0 }
 0xcbe   :  { %26021 = vst [vmem:[#allocation17_spill] sm:$0xff] %v24424_v24  ;;  %v24432_v37 = vpop.f32.mrb[151].mxu1 }
 0xcbf   :  { %26022 = vst [vmem:[#allocation18_spill] sm:$0xff] %v24432_v37  ;;  %16614 = vmatpush3.bf16.msra.mxu1 %v16613_v16  ;;  %v15017_v37 = vld [vmem:[%s25569_s5 + $0x880] sm:$0xff] }
 0xcc0   :  { %16616 = vmatprep.subr.bf16.mxu1 %v16615_v44 }
 0xcc1   :  { %v15301_v51 = vpop.f32.mrb[152].mxu1 }
 0xcc2   :  { %v15302_v16 = vpop.f32.mrb[153].mxu1 }
 0xcc3   :  { %v24446_v44 = vadd.f32 %v15302_v16, %v15301_v51  ;;  %16618 = vmatpush3.bf16.msra.mxu1 %v16617_v7  ;;  %v15018_v7 = vld [vmem:[%s25569_s5 + $0x888] sm:$0xff]  ;;  %v10942_v51 = vadd.f32 %v23459_v54, %v23796_v18  ;;  %v15020_v18 = vld [vmem:[%s25569_s5 + $0x898] sm:$0xff] }
 0xcc4   :  { %16620 = vmatprep.subr.bf16.mxu1 %v16619_v33  ;;  %v16627_v30 = vpack.c.bf16 %v15018_v7, %v15017_v37  ;;  %v15002_v16 = vld [vmem:[%s25569_s5 + $0x808] sm:$0xff]  ;;  %v10944_v7 = vadd.f32 %v23459_v54, %v23816_v14 }
 0xcc5   :  { %v15304_v24 = vpop.f32.mrb[154].mxu1  ;;  %v16629_v50 = vpack.c.bf16 %v15002_v16, %v15001_v10  ;;  %v11070_v35 = vmax.f32 %v10942_v51, 0.0  ;;  %v15021_v51 = vld [vmem:[%s25569_s5 + $0x8a0] sm:$0xff]  ;;  %v15022_v14 = vld [vmem:[%s25569_s5 + $0x8a8] sm:$0xff] }
 0xcc6   :  { %v15305_v32 = vpop.f32.mrb[155].mxu1  ;;  %v11072_v46 = vmax.f32 %v10944_v7, 0.0 }
 0xcc7   :  { %v24460_v33 = vadd.f32 %v15305_v32, %v15304_v24  ;;  %16622 = vmatpush3.bf16.msra.mxu1 %v16621_v22  ;;  %v15019_v22 = vld [vmem:[%s25569_s5 + $0x890] sm:$0xff] }
 0xcc8   :  { %16624 = vmatprep.subr.bf16.mxu1 %v16623_v57  ;;  %v16631_v48 = vpack.c.bf16 %v15020_v18, %v15019_v22  ;;  %v15003_v32 = vld [vmem:[%s25569_s5 + $0x810] sm:$0xff]  ;;  %v16635_v22 = vpack.c.bf16 %v15022_v14, %v15021_v51  ;;  %v15005_v18 = vld [vmem:[%s25569_s5 + $0x820] sm:$0xff]  ;;  %v10951_v51 = vadd.f32 %v23451_v40, %v23872_v9  ;;  %v15010_v9 = vld [vmem:[%s25569_s5 + $0x848] sm:$0xff] }
 0xcc9   :  { %v15307_v24 = vpop.f32.mrb[156].mxu1  ;;  %v16633_v16 = vpack.c.bf16 %v15004_v11, %v15003_v32  ;;  %v15023_v11 = vld [vmem:[%s25569_s5 + $0x8b0] sm:$0xff]  ;;  %v15025_v14 = vld [vmem:[%s25569_s5 + $0x8c0] sm:$0xff] }
 0xcca   :  { %v15308_v37 = vpop.f32.mrb[157].mxu1 }
 0xccb   :  { %v24478_v57 = vadd.f32 %v15308_v37, %v15307_v24  ;;  %16626 = vmatpush3.bf16.msra.mxu1 %v16625_v13  ;;  %v10947_v24 = vadd.f32 %v23451_v40, %v23840_v47  ;;  %v10946_v47 = vadd.f32 %v23459_v54, %v23832_v39  ;;  %v15006_v37 = vld [vmem:[%s25569_s5 + $0x828] sm:$0xff]  ;;  %v15024_v39 = vld [vmem:[%s25569_s5 + $0x8b8] sm:$0xff] }
 0xccc   :  { %16628 = vmatprep.subr.bf16.mxu1 %v16627_v30  ;;  %v16639_v32 = vpack.c.bf16 %v15024_v39, %v15023_v11  ;;  %v15011_v11 = vld [vmem:[%s25569_s5 + $0x850] sm:$0xff]  ;;  %v15012_v39 = vld [vmem:[%s25569_s5 + $0x858] sm:$0xff] }
 0xccd   :  { %v15310_v13 = vpop.f32.mrb[158].mxu1  ;;  %v11074_v7 = vmax.f32 %v10946_v47, 0.0  ;;  %v15009_v47 = vld [vmem:[%s25569_s5 + $0x840] sm:$0xff] }
 0xcce   :  { %12085 = vmatmul.mubr.f32.vlgmr.msra.gmra.mrb[208].mxu1 %v11070_v35  ;;  %v15311_v30 = vpop.f32.mrb[159].mxu1  ;;  %v11075_v35 = vmax.f32 %v10947_v24, 0.0  ;;  %v15008_v24 = vld [vmem:[%s25569_s5 + $0x838] sm:$0xff] }
 0xccf   :  { %v24496_v10 = vadd.f32 %v15311_v30, %v15310_v13  ;;  %12089 = vmatprep.mubr.f32.mxu1 %v11073_v15  ;;  %16630 = vmatpush3.bf16.msra.mxu1 %v16629_v50  ;;  %v10949_v15 = vadd.f32 %v23451_v40, %v23856_v34  ;;  %v16637_v50 = vpack.c.bf16 %v15006_v37, %v15005_v18  ;;  %v15007_v34 = vld [vmem:[%s25569_s5 + $0x830] sm:$0xff]  ;;  %v15028_v37 = vld [vmem:[%s25569_s5 + $0x8d8] sm:$0xff] }
 0xcd0   :  { %16632 = vmatprep.subr.bf16.mxu1 %v16631_v48  ;;  %v10948_v48 = vadd.f32 %v23459_v54, %v23848_v25  ;;  %v15026_v25 = vld [vmem:[%s25569_s5 + $0x8c8] sm:$0xff]  ;;  %v16641_v30 = vpack.c.bf16 %v15008_v24, %v15007_v34  ;;  %v15027_v18 = vld [vmem:[%s25569_s5 + $0x8d0] sm:$0xff]  ;;  %v15013_v34 = vld [vmem:[%s25569_s5 + $0x860] sm:$0xff] }
 0xcd1   :  { %v11077_v13 = vmax.f32 %v10949_v15, 0.0  ;;  %v16647_v15 = vpack.c.bf16 %v15028_v37, %v15027_v18  ;;  %v15014_v24 = vld [vmem:[%s25569_s5 + $0x868] sm:$0xff]  ;;  %v15049_v37 = vld [vmem:[%s25569_s5 + $0x980] sm:$0xff] }
 0xcd2   :  { %12090 = vmatmul.mubr.f32.gmra.mrb[210].mxu1 %v11072_v46  ;;  %v16643_v46 = vpack.c.bf16 %v15026_v25, %v15025_v14  ;;  %v15032_v14 = vld [vmem:[%s25569_s5 + $0x8f8] sm:$0xff] }
 0xcd3   :  { %12094 = vmatprep.mubr.f32.mxu1 %v11075_v35  ;;  %16634 = vmatpush3.bf16.msra.mxu1 %v16633_v16  ;;  %v11076_v16 = vmax.f32 %v10948_v48, 0.0  ;;  %v16645_v35 = vpack.c.bf16 %v15010_v9, %v15009_v47  ;;  %v16649_v48 = vpack.c.bf16 %v15012_v39, %v15011_v11  ;;  %v15015_v47 = vld [vmem:[%s25569_s5 + $0x870] sm:$0xff]  ;;  %v15016_v9 = vld [vmem:[%s25569_s5 + $0x878] sm:$0xff] }
 0xcd4   :  { %16636 = vmatprep.subr.bf16.mxu1 %v16635_v22  ;;  %v11079_v22 = vmax.f32 %v10951_v51, 0.0  ;;  %v15031_v51 = vld [vmem:[%s25569_s5 + $0x8f0] sm:$0xff]  ;;  %v16657_v39 = vpack.c.bf16 %v15016_v9, %v15015_v47  ;;  %v10955_v9 = vadd.f32 %v23451_v40, %v23908_v2  ;;  %v10954_v2 = vadd.f32 %v23459_v54, %v23900_v27 }
 0xcd5   :  { %v15055_v27 = vld [vmem:[%s25569_s5 + $0x9b0] sm:$0xff] }
 0xcd6   :  { %12095 = vmatmul.mubr.f32.gmra.mrb[212].mxu1 %v11074_v7  ;;  %v15030_v7 = vld [vmem:[%s25569_s5 + $0x8e8] sm:$0xff] }
 0xcd7   :  { %12099 = vmatprep.mubr.f32.mxu1 %v11077_v13  ;;  %16638 = vmatpush3.bf16.msra.mxu1 %v16637_v50  ;;  %v15029_v50 = vld [vmem:[%s25569_s5 + $0x8e0] sm:$0xff] }
 0xcd8   :  { %16640 = vmatprep.subr.bf16.mxu1 %v16639_v32  ;;  %v16651_v32 = vpack.c.bf16 %v15030_v7, %v15029_v50  ;;  %v10950_v50 = vadd.f32 %v23459_v54, %v23864_v62  ;;  %v15051_v62 = vld [vmem:[%s25569_s5 + $0x990] sm:$0xff] }
 0xcda   :  { %12100 = vmatmul.mubr.f32.gmra.mrb[214].mxu1 %v11076_v16  ;;  %v16653_v16 = vpack.c.bf16 %v15014_v24, %v15013_v34 }
 0xcdb   :  { %16642 = vmatpush3.bf16.msra.mxu1 %v16641_v30  ;;  %12206 = vmatprep.mubr.f32.mxu1 %v11079_v22 }
 0xcdc   :  { %16644 = vmatprep.subr.bf16.mxu1 %v16643_v46  ;;  %v16655_v46 = vpack.c.bf16 %v15032_v14, %v15031_v51 }
 0xcdf   :  { %16646 = vmatpush3.bf16.msra.mxu1 %v16645_v35  ;;  %v15050_v35 = vld [vmem:[%s25569_s5 + $0x988] sm:$0xff] }
 0xce0   :  { %16648 = vmatprep.subr.bf16.mxu1 %v16647_v15  ;;  %v16659_v7 = vpack.c.bf16 %v15050_v35, %v15049_v37  ;;  %v15054_v35 = vld [vmem:[%s25569_s5 + $0x9a8] sm:$0xff] }
 0xce1   :  { %v15345_v13 = vpop.f32.mrb[160].mxu1 }
 0xce2   :  { %v15346_v25 = vpop.f32.mrb[161].mxu1 }
 0xce3   :  { %v15347_v30 = vadd.f32 %v15346_v25, %v15345_v13  ;;  %16650 = vmatpush3.bf16.msra.mxu1 %v16649_v48  ;;  %v15034_v48 = vld [vmem:[%s25569_s5 + $0x908] sm:$0xff]  ;;  %v15052_v13 = vld [vmem:[%s25569_s5 + $0x998] sm:$0xff] }
 0xce4   :  { %16652 = vmatprep.subr.bf16.mxu1 %v16651_v32  ;;  %v10953_v32 = vadd.f32 %v23451_v40, %v23888_v17  ;;  %v10952_v17 = vadd.f32 %v23459_v54, %v23880_v4  ;;  %v15053_v4 = vld [vmem:[%s25569_s5 + $0x9a0] sm:$0xff] }
 0xce5   :  { %v24573_v22 = vadd.f32 %v15347_v30, %v24446_v44  ;;  %v15348_v18 = vpop.f32.mrb[162].mxu1  ;;  %v15033_v44 = vld [vmem:[%s25569_s5 + $0x900] sm:$0xff]  ;;  %v11078_v30 = vmax.f32 %v10950_v50, 0.0 }
 0xce6   :  { %v15349_v15 = vpop.f32.mrb[163].mxu1  ;;  %v16661_v25 = vpack.c.bf16 %v15034_v48, %v15033_v44  ;;  %v11081_v47 = vmax.f32 %v10953_v32, 0.0  ;;  %v11080_v50 = vmax.f32 %v10952_v17, 0.0  ;;  %v15038_v44 = vld [vmem:[%s25569_s5 + $0x928] sm:$0xff]  ;;  %v11083_v48 = vmax.f32 %v10955_v9, 0.0  ;;  %v15041_v9 = vld [vmem:[%s25569_s5 + $0x940] sm:$0xff] }
 0xce7   :  { %v15350_v11 = vadd.f32 %v15349_v15, %v15348_v18  ;;  %16654 = vmatpush3.bf16.msra.mxu1 %v16653_v16  ;;  %v15035_v16 = vld [vmem:[%s25569_s5 + $0x910] sm:$0xff]  ;;  %v10957_v32 = vadd.f32 %v23451_v40, %v23928_v41  ;;  %v10959_v17 = vadd.f32 %v23451_v40, %v23948_v1  ;;  %v15042_v1 = vld [vmem:[%s25569_s5 + $0x948] sm:$0xff] }
 0xce8   :  { %16656 = vmatprep.subr.bf16.mxu1 %v16655_v46  ;;  %v15036_v46 = vld [vmem:[%s25569_s5 + $0x918] sm:$0xff] }
 0xce9   :  { %v24592_v34 = vadd.f32 %v15350_v11, %v24460_v33  ;;  %v15351_v24 = vpop.f32.mrb[164].mxu1  ;;  %v16663_v33 = vpack.c.bf16 %v15052_v13, %v15051_v62  ;;  %v15056_v62 = vld [vmem:[%s25569_s5 + $0x9b8] sm:$0xff] }
 0xcea   :  { %v15352_v51 = vpop.f32.mrb[165].mxu1  ;;  %v16671_v41 = vpack.c.bf16 %v15056_v62, %v15055_v27  ;;  %v15063_v62 = vld [vmem:[%s25569_s5 + $0x9f0] sm:$0xff] }
 0xceb   :  { %v15353_v14 = vadd.f32 %v15352_v51, %v15351_v24  ;;  %16658 = vmatpush3.bf16.msra.mxu1 %v16657_v39  ;;  %v16665_v39 = vpack.c.bf16 %v15036_v46, %v15035_v16  ;;  %v11082_v51 = vmax.f32 %v10954_v2, 0.0  ;;  %v15061_v2 = vld [vmem:[%s25569_s5 + $0x9e0] sm:$0xff] }
 0xcec   :  { %16660 = vmatprep.subr.bf16.mxu1 %v16659_v7  ;;  %v15037_v7 = vld [vmem:[%s25569_s5 + $0x920] sm:$0xff] }
 0xced   :  { %v24611_v18 = vadd.f32 %v15353_v14, %v24478_v57  ;;  %v15354_v37 = vpop.f32.mrb[166].mxu1  ;;  %v16667_v57 = vpack.c.bf16 %v15054_v35, %v15053_v4  ;;  %v16669_v13 = vpack.c.bf16 %v15038_v44, %v15037_v7  ;;  %v10956_v14 = vadd.f32 %v23459_v54, %v23920_v26  ;;  %v15058_v26 = vld [vmem:[%s25569_s5 + $0x9c8] sm:$0xff]  ;;  %v15059_v4 = vld [vmem:[%s25569_s5 + $0x9d0] sm:$0xff]  ;;  %v15060_v35 = vld [vmem:[%s25569_s5 + $0x9d8] sm:$0xff] }
 0xcee   :  { %v15355_v15 = vpop.f32.mrb[167].mxu1  ;;  %12207 = vmatmul.mubr.f32.vlgmr.msra.gmra.mrb[216].mxu1 %v11078_v30  ;;  %v11085_v30 = vmax.f32 %v10957_v32, 0.0  ;;  %v15046_v32 = vld [vmem:[%s25569_s5 + $0x968] sm:$0xff] }
 0xcef   :  { %v15356_v11 = vadd.f32 %v15355_v15, %v15354_v37  ;;  %12211 = vmatprep.mubr.f32.mxu1 %v11081_v47  ;;  %16662 = vmatpush3.bf16.msra.mxu1 %v16661_v25  ;;  %v15040_v25 = vld [vmem:[%s25569_s5 + $0x938] sm:$0xff]  ;;  %v11084_v46 = vmax.f32 %v10956_v14, 0.0  ;;  %v11087_v37 = vmax.f32 %v10959_v17, 0.0  ;;  %v16677_v15 = vpack.c.bf16 %v15042_v1, %v15041_v9 }
 0xcf0   :  { %16664 = vmatprep.subr.bf16.mxu1 %v16663_v33  ;;  %v15057_v33 = vld [vmem:[%s25569_s5 + $0x9c0] sm:$0xff]  ;;  %v10958_v1 = vadd.f32 %v23459_v54, %v23940_v3  ;;  %v15083_v3 = vld [vmem:[%s25569_s5 + $0xa90] sm:$0xff] }
 0xcf1   :  { %v24630_v24 = vadd.f32 %v15356_v11, %v24496_v10  ;;  %v15039_v10 = vld [vmem:[%s25569_s5 + $0x930] sm:$0xff]  ;;  %v16675_v47 = vpack.c.bf16 %v15058_v26, %v15057_v33  ;;  %v16679_v11 = vpack.c.bf16 %v15060_v35, %v15059_v4  ;;  %v15081_v26 = vld [vmem:[%s25569_s5 + $0xa80] sm:$0xff]  ;;  %v15066_v4 = vld [vmem:[%s25569_s5 + $0xa08] sm:$0xff]  ;;  %v10961_v35 = vadd.f32 %v23451_v40, %v23968_v8 }
 0xcf2   :  { %12212 = vmatmul.mubr.f32.gmra.mrb[218].mxu1 %v11080_v50  ;;  %v16673_v16 = vpack.c.bf16 %v15040_v25, %v15039_v10  ;;  %v15044_v50 = vld [vmem:[%s25569_s5 + $0x958] sm:$0xff]  ;;  %v15047_v25 = vld [vmem:[%s25569_s5 + $0x970] sm:$0xff]  ;;  %v10960_v8 = vadd.f32 %v23459_v54, %v23960_v31  ;;  %v15085_v31 = vld [vmem:[%s25569_s5 + $0xaa0] sm:$0xff] }
 0xcf3   :  { %12216 = vmatprep.mubr.f32.mxu1 %v11083_v48  ;;  %16666 = vmatpush3.bf16.msra.mxu1 %v16665_v39  ;;  %v15043_v39 = vld [vmem:[%s25569_s5 + $0x950] sm:$0xff]  ;;  %v15045_v48 = vld [vmem:[%s25569_s5 + $0x960] sm:$0xff] }
 0xcf4   :  { %16668 = vmatprep.subr.bf16.mxu1 %v16667_v57  ;;  %v15062_v57 = vld [vmem:[%s25569_s5 + $0x9e8] sm:$0xff]  ;;  %v16681_v7 = vpack.c.bf16 %v15044_v50, %v15043_v39  ;;  %v15084_v39 = vld [vmem:[%s25569_s5 + $0xa98] sm:$0xff] }
 0xcf5   :  { %v16683_v44 = vpack.c.bf16 %v15062_v57, %v15061_v2 }
 0xcf6   :  { %12217 = vmatmul.mubr.f32.gmra.mrb[220].mxu1 %v11082_v51 }
 0xcf7   :  { %12221 = vmatprep.mubr.f32.mxu1 %v11085_v30  ;;  %16670 = vmatpush3.bf16.msra.mxu1 %v16669_v13  ;;  %v15064_v13 = vld [vmem:[%s25569_s5 + $0x9f8] sm:$0xff] }
 0xcf8   :  { %16672 = vmatprep.subr.bf16.mxu1 %v16671_v41  ;;  %v16685_v41 = vpack.c.bf16 %v15046_v32, %v15045_v48  ;;  %v16687_v10 = vpack.c.bf16 %v15064_v13, %v15063_v62  ;;  %v15048_v30 = vld [vmem:[%s25569_s5 + $0x978] sm:$0xff]  ;;  %v11089_v32 = vmax.f32 %v10961_v35, 0.0  ;;  %v10967_v35 = vadd.f32 %v23451_v40, %v24016_v45  ;;  %v15074_v45 = vld [vmem:[%s25569_s5 + $0xa48] sm:$0xff] }
 0xcf9   :  { %v16689_v9 = vpack.c.bf16 %v15048_v30, %v15047_v25  ;;  %v15068_v48 = vld [vmem:[%s25569_s5 + $0xa18] sm:$0xff]  ;;  %v11088_v25 = vmax.f32 %v10960_v8, 0.0  ;;  %v15069_v30 = vld [vmem:[%s25569_s5 + $0xa20] sm:$0xff] }
 0xcfa   :  { %12222 = vmatmul.mubr.f32.gmra.mrb[222].mxu1 %v11084_v46  ;;  %v15092_v8 = vld [vmem:[%s25569_s5 + $0xad8] sm:$0xff] }
 0xcfb   :  { %16674 = vmatpush3.bf16.msra.mxu1 %v16673_v16  ;;  %12328 = vmatprep.mubr.f32.mxu1 %v11087_v37  ;;  %v15082_v16 = vld [vmem:[%s25569_s5 + $0xa88] sm:$0xff] }
 0xcfc   :  { %16676 = vmatprep.subr.bf16.mxu1 %v16675_v47  ;;  %v16691_v37 = vpack.c.bf16 %v15082_v16, %v15081_v26  ;;  %v10965_v16 = vadd.f32 %v23451_v40, %v24000_v43 }
 0xcff   :  { %16678 = vmatpush3.bf16.msra.mxu1 %v16677_v15 }
 0xd00   :  { %16680 = vmatprep.subr.bf16.mxu1 %v16679_v11 }
 0xd01   :  { %v15389_v27 = vpop.f32.mrb[168].mxu1 }
 0xd02   :  { %v15390_v51 = vpop.f32.mrb[169].mxu1 }
 0xd03   :  { %v15391_v14 = vadd.f32 %v15390_v51, %v15389_v27  ;;  %16682 = vmatpush3.bf16.msra.mxu1 %v16681_v7  ;;  %v11086_v7 = vmax.f32 %v10958_v1, 0.0  ;;  %v10963_v27 = vadd.f32 %v23451_v40, %v23984_v59  ;;  %v15086_v51 = vld [vmem:[%s25569_s5 + $0xaa8] sm:$0xff]  ;;  %v10962_v59 = vadd.f32 %v23459_v54, %v23976_v49  ;;  %v15087_v49 = vld [vmem:[%s25569_s5 + $0xab0] sm:$0xff] }
 0xd04   :  { %16684 = vmatprep.subr.bf16.mxu1 %v16683_v44  ;;  %v15067_v44 = vld [vmem:[%s25569_s5 + $0xa10] sm:$0xff] }
 0xd05   :  { %v24697_v17 = vadd.f32 %v15391_v14, %v24573_v22  ;;  %v15392_v33 = vpop.f32.mrb[170].mxu1  ;;  %v15065_v22 = vld [vmem:[%s25569_s5 + $0xa00] sm:$0xff]  ;;  %v11091_v26 = vmax.f32 %v10963_v27, 0.0  ;;  %v11090_v1 = vmax.f32 %v10962_v59, 0.0  ;;  %v15096_v59 = vld [vmem:[%s25569_s5 + $0xaf8] sm:$0xff] }
 0xd06   :  { %v15393_v46 = vpop.f32.mrb[171].mxu1  ;;  %v16693_v57 = vpack.c.bf16 %v15066_v4, %v15065_v22  ;;  %v15072_v22 = vld [vmem:[%s25569_s5 + $0xa38] sm:$0xff]  ;;  %v11093_v4 = vmax.f32 %v10965_v16, 0.0  ;;  %v15093_v27 = vld [vmem:[%s25569_s5 + $0xae0] sm:$0xff]  ;;  %v15079_v16 = vld [vmem:[%s25569_s5 + $0xa70] sm:$0xff] }
 0xd07   :  { %v15394_v47 = vadd.f32 %v15393_v46, %v15392_v33  ;;  %16686 = vmatpush3.bf16.msra.mxu1 %v16685_v41  ;;  %v15070_v33 = vld [vmem:[%s25569_s5 + $0xa28] sm:$0xff] }
 0xd08   :  { %16688 = vmatprep.subr.bf16.mxu1 %v16687_v10  ;;  %v16697_v10 = vpack.c.bf16 %v15068_v48, %v15067_v44  ;;  %v15075_v48 = vld [vmem:[%s25569_s5 + $0xa50] sm:$0xff] }
 0xd09   :  { %v24716_v15 = vadd.f32 %v15394_v47, %v24592_v34  ;;  %v15395_v11 = vpop.f32.mrb[172].mxu1  ;;  %v16695_v34 = vpack.c.bf16 %v15084_v39, %v15083_v3  ;;  %v15088_v47 = vld [vmem:[%s25569_s5 + $0xab8] sm:$0xff] }
 0xd0a   :  { %v15396_v50 = vpop.f32.mrb[173].mxu1  ;;  %v16703_v43 = vpack.c.bf16 %v15088_v47, %v15087_v49  ;;  %v15080_v49 = vld [vmem:[%s25569_s5 + $0xa78] sm:$0xff] }
 0xd0b   :  { %v15397_v2 = vadd.f32 %v15396_v50, %v15395_v11  ;;  %16690 = vmatpush3.bf16.msra.mxu1 %v16689_v9  ;;  %v16701_v9 = vpack.c.bf16 %v15070_v33, %v15069_v30  ;;  %v15089_v11 = vld [vmem:[%s25569_s5 + $0xac0] sm:$0xff] }
 0xd0c   :  { %16692 = vmatprep.subr.bf16.mxu1 %v16691_v37  ;;  %v10964_v37 = vadd.f32 %v23459_v54, %v23992_v6  ;;  %v15090_v6 = vld [vmem:[%s25569_s5 + $0xac8] sm:$0xff] }
 0xd0d   :  { %v24735_v62 = vadd.f32 %v15397_v2, %v24611_v18  ;;  %v15398_v13 = vpop.f32.mrb[174].mxu1  ;;  %v16699_v18 = vpack.c.bf16 %v15086_v51, %v15085_v31  ;;  %v16707_v50 = vpack.c.bf16 %v15090_v6, %v15089_v11  ;;  %v15073_v2 = vld [vmem:[%s25569_s5 + $0xa40] sm:$0xff]  ;;  %v15098_v6 = vld [vmem:[%s25569_s5 + $0xb08] sm:$0xff] }
 0xd0e   :  { %v15399_v14 = vpop.f32.mrb[175].mxu1  ;;  %12329 = vmatmul.mubr.f32.vlgmr.msra.gmra.mrb[224].mxu1 %v11086_v7  ;;  %v11092_v39 = vmax.f32 %v10964_v37, 0.0  ;;  %v15091_v7 = vld [vmem:[%s25569_s5 + $0xad0] sm:$0xff]  ;;  %v15114_v37 = vld [vmem:[%s25569_s5 + $0xb88] sm:$0xff] }
 0xd0f   :  { %v15400_v41 = vadd.f32 %v15399_v14, %v15398_v13  ;;  %12333 = vmatprep.mubr.f32.mxu1 %v11089_v32  ;;  %16694 = vmatpush3.bf16.msra.mxu1 %v16693_v57  ;;  %v11095_v57 = vmax.f32 %v10967_v35, 0.0  ;;  %v16711_v44 = vpack.c.bf16 %v15092_v8, %v15091_v7  ;;  %v15076_v32 = vld [vmem:[%s25569_s5 + $0xa58] sm:$0xff]  ;;  %v15094_v13 = vld [vmem:[%s25569_s5 + $0xae8] sm:$0xff]  ;;  %v15077_v14 = vld [vmem:[%s25569_s5 + $0xa60] sm:$0xff] }
 0xd10   :  { %16696 = vmatprep.subr.bf16.mxu1 %v16695_v34  ;;  %v16709_v34 = vpack.c.bf16 %v15074_v45, %v15073_v2  ;;  %v16713_v31 = vpack.c.bf16 %v15076_v32, %v15075_v48  ;;  %v16715_v51 = vpack.c.bf16 %v15094_v13, %v15093_v27  ;;  %v15115_v45 = vld [vmem:[%s25569_s5 + $0xb90] sm:$0xff]  ;;  %v15100_v13 = vld [vmem:[%s25569_s5 + $0xb18] sm:$0xff] }
 0xd11   :  { %v24754_v46 = vadd.f32 %v15400_v41, %v24630_v24  ;;  %v15071_v24 = vld [vmem:[%s25569_s5 + $0xa30] sm:$0xff]  ;;  %v15078_v41 = vld [vmem:[%s25569_s5 + $0xa68] sm:$0xff] }
 0xd12   :  { %12334 = vmatmul.mubr.f32.gmra.mrb[226].mxu1 %v11088_v25  ;;  %v16705_v3 = vpack.c.bf16 %v15072_v22, %v15071_v24  ;;  %v15095_v25 = vld [vmem:[%s25569_s5 + $0xaf0] sm:$0xff]  ;;  %v16717_v33 = vpack.c.bf16 %v15078_v41, %v15077_v14  ;;  %v16721_v22 = vpack.c.bf16 %v15080_v49, %v15079_v16  ;;  %v26027_v16 = vld [vmem:[#allocation39_spill] sm:$0xff] }
 0xd13   :  { %12338 = vmatprep.mubr.f32.mxu1 %v11091_v26  ;;  %16698 = vmatpush3.bf16.msra.mxu1 %v16697_v10  ;;  %v16719_v26 = vpack.c.bf16 %v15096_v59, %v15095_v25  ;;  %v26025_v48 = vld [vmem:[#allocation37_spill] sm:$0xff]  ;;  %v15117_v25 = vld [vmem:[%s25569_s5 + $0xba0] sm:$0xff]  ;;  %v15118_v59 = vld [vmem:[%s25569_s5 + $0xba8] sm:$0xff] }
 0xd14   :  { %16700 = vmatprep.subr.bf16.mxu1 %v16699_v18  ;;  %v10968_v32 = vadd.f32 %v23459_v54, %v26025_v48  ;;  %v15099_v27 = vld [vmem:[%s25569_s5 + $0xb10] sm:$0xff]  ;;  %v16731_v49 = vpack.c.bf16 %v15118_v59, %v15117_v25  ;;  %v15124_v48 = vld [vmem:[%s25569_s5 + $0xbd8] sm:$0xff]  ;;  %v15109_v25 = vld [vmem:[%s25569_s5 + $0xb60] sm:$0xff] }
 0xd15   :  { %v15110_v59 = vld [vmem:[%s25569_s5 + $0xb68] sm:$0xff] }
 0xd16   :  { %12339 = vmatmul.mubr.f32.gmra.mrb[228].mxu1 %v11090_v1  ;;  %v15113_v1 = vld [vmem:[%s25569_s5 + $0xb80] sm:$0xff] }
 0xd17   :  { %12343 = vmatprep.mubr.f32.mxu1 %v11093_v4  ;;  %16702 = vmatpush3.bf16.msra.mxu1 %v16701_v9  ;;  %v26023_v4 = vld [vmem:[#allocation36_spill] sm:$0xff]  ;;  %v16723_v11 = vpack.c.bf16 %v15114_v37, %v15113_v1 }
 0xd18   :  { %16704 = vmatprep.subr.bf16.mxu1 %v16703_v43  ;;  %v10966_v35 = vadd.f32 %v23459_v54, %v26023_v4  ;;  %v15102_v1 = vld [vmem:[%s25569_s5 + $0xb28] sm:$0xff]  ;;  %v15120_v4 = vld [vmem:[%s25569_s5 + $0xbb8] sm:$0xff] }
 0xd1a   :  { %12344 = vmatmul.mubr.f32.gmra.mrb[230].mxu1 %v11092_v39 }
 0xd1b   :  { %16706 = vmatpush3.bf16.msra.mxu1 %v16705_v3  ;;  %12450 = vmatprep.mubr.f32.mxu1 %v11095_v57  ;;  %v26024_v3 = vld [vmem:[#allocation38_spill] sm:$0xff] }
 0xd1c   :  { %16708 = vmatprep.subr.bf16.mxu1 %v16707_v50  ;;  %v10969_v39 = vadd.f32 %v23451_v40, %v26024_v3  ;;  %v15116_v57 = vld [vmem:[%s25569_s5 + $0xb98] sm:$0xff] }
 0xd1f   :  { %16710 = vmatpush3.bf16.msra.mxu1 %v16709_v34 }
 0xd20   :  { %16712 = vmatprep.subr.bf16.mxu1 %v16711_v44  ;;  %v11094_v44 = vmax.f32 %v10966_v35, 0.0 }
 0xd21   :  { %v15433_v10 = vpop.f32.mrb[176].mxu1 }
 0xd22   :  { %v15434_v18 = vpop.f32.mrb[177].mxu1 }
 0xd23   :  { %v15435_v30 = vadd.f32 %v15434_v18, %v15433_v10  ;;  %16714 = vmatpush3.bf16.msra.mxu1 %v16713_v31  ;;  %v11097_v31 = vmax.f32 %v10969_v39, 0.0  ;;  %v10975_v39 = vadd.f32 %v23451_v40, %v24092_v5  ;;  %v15106_v5 = vld [vmem:[%s25569_s5 + $0xb48] sm:$0xff] }
 0xd24   :  { %16716 = vmatprep.subr.bf16.mxu1 %v16715_v51  ;;  %v26026_v51 = vld [vmem:[#allocation40_spill] sm:$0xff] }
 0xd25   :  { %v24821_v47 = vadd.f32 %v15435_v30, %v24697_v17  ;;  %v15436_v9 = vpop.f32.mrb[178].mxu1  ;;  %v15097_v17 = vld [vmem:[%s25569_s5 + $0xb00] sm:$0xff]  ;;  %v10971_v14 = vadd.f32 %v23451_v40, %v26026_v51  ;;  %v15126_v51 = vld [vmem:[%s25569_s5 + $0xbe8] sm:$0xff] }
 0xd26   :  { %v15437_v43 = vpop.f32.mrb[179].mxu1  ;;  %v16725_v34 = vpack.c.bf16 %v15098_v6, %v15097_v17  ;;  %v10972_v17 = vadd.f32 %v23459_v54, %v24064_v23  ;;  %v15104_v6 = vld [vmem:[%s25569_s5 + $0xb38] sm:$0xff]  ;;  %v15122_v23 = vld [vmem:[%s25569_s5 + $0xbc8] sm:$0xff] }
 0xd27   :  { %v15438_v24 = vadd.f32 %v15437_v43, %v15436_v9  ;;  %16718 = vmatpush3.bf16.msra.mxu1 %v16717_v33  ;;  %v16729_v33 = vpack.c.bf16 %v15100_v13, %v15099_v27  ;;  %v15101_v9 = vld [vmem:[%s25569_s5 + $0xb20] sm:$0xff]  ;;  %v11099_v37 = vmax.f32 %v10971_v14, 0.0  ;;  %v10973_v43 = vadd.f32 %v23451_v40, %v24072_v55  ;;  %v15107_v27 = vld [vmem:[%s25569_s5 + $0xb50] sm:$0xff]  ;;  %v15108_v13 = vld [vmem:[%s25569_s5 + $0xb58] sm:$0xff] }
 0xd28   :  { %16720 = vmatprep.subr.bf16.mxu1 %v16719_v26  ;;  %v11096_v26 = vmax.f32 %v10968_v32, 0.0  ;;  %v16733_v35 = vpack.c.bf16 %v15102_v1, %v15101_v9  ;;  %v16745_v14 = vpack.c.bf16 %v15108_v13, %v15107_v27  ;;  %v15111_v9 = vld [vmem:[%s25569_s5 + $0xb70] sm:$0xff]  ;;  %v15112_v1 = vld [vmem:[%s25569_s5 + $0xb78] sm:$0xff]  ;;  %v15149_v13 = vld [vmem:[%s25569_s5 + $0xca0] sm:$0xff] }
 0xd29   :  { %v24840_v50 = vadd.f32 %v15438_v24, %v24716_v15  ;;  %v15439_v2 = vpop.f32.mrb[180].mxu1  ;;  %v16727_v15 = vpack.c.bf16 %v15116_v57, %v15115_v45  ;;  %v11101_v3 = vmax.f32 %v10973_v43, 0.0  ;;  %v11100_v57 = vmax.f32 %v10972_v17, 0.0 }
 0xd2a   :  { %v15440_v7 = vpop.f32.mrb[181].mxu1  ;;  %v16753_v17 = vpack.c.bf16 %v15112_v1, %v15111_v9  ;;  %v26029_v9 = vld [vmem:[#allocation42_spill] sm:$0xff] }
 0xd2b   :  { %v15441_v8 = vadd.f32 %v15440_v7, %v15439_v2  ;;  %16722 = vmatpush3.bf16.msra.mxu1 %v16721_v22  ;;  %v15119_v22 = vld [vmem:[%s25569_s5 + $0xbb0] sm:$0xff]  ;;  %v15121_v2 = vld [vmem:[%s25569_s5 + $0xbc0] sm:$0xff]  ;;  %v10980_v1 = vadd.f32 %v23459_v54, %v26029_v9 }
 0xd2c   :  { %16724 = vmatprep.subr.bf16.mxu1 %v16723_v11  ;;  %v16735_v55 = vpack.c.bf16 %v15120_v4, %v15119_v22  ;;  %v16739_v7 = vpack.c.bf16 %v15122_v23, %v15121_v2  ;;  %v15145_v22 = vld [vmem:[%s25569_s5 + $0xc80] sm:$0xff]  ;;  %v15146_v4 = vld [vmem:[%s25569_s5 + $0xc88] sm:$0xff]  ;;  %v15148_v23 = vld [vmem:[%s25569_s5 + $0xc98] sm:$0xff] }
 0xd2d   :  { %v24859_v41 = vadd.f32 %v15441_v8, %v24735_v62  ;;  %v15442_v10 = vpop.f32.mrb[182].mxu1  ;;  %v10970_v62 = vadd.f32 %v23459_v54, %v26027_v16  ;;  %v15105_v8 = vld [vmem:[%s25569_s5 + $0xb40] sm:$0xff] }
 0xd2e   :  { %v15443_v18 = vpop.f32.mrb[183].mxu1  ;;  %12451 = vmatmul.mubr.f32.vlgmr.msra.gmra.mrb[232].mxu1 %v11094_v44  ;;  %v15123_v44 = vld [vmem:[%s25569_s5 + $0xbd0] sm:$0xff]  ;;  %v16741_v32 = vpack.c.bf16 %v15106_v5, %v15105_v8 }
 0xd2f   :  { %v15444_v30 = vadd.f32 %v15443_v18, %v15442_v10  ;;  %12455 = vmatprep.mubr.f32.mxu1 %v11097_v31  ;;  %16726 = vmatpush3.bf16.msra.mxu1 %v16725_v34  ;;  %v11098_v11 = vmax.f32 %v10970_v62, 0.0  ;;  %v11103_v34 = vmax.f32 %v10975_v39, 0.0  ;;  %v15125_v31 = vld [vmem:[%s25569_s5 + $0xbe0] sm:$0xff]  ;;  %v16749_v62 = vpack.c.bf16 %v15110_v59, %v15109_v25  ;;  %v26028_v5 = vld [vmem:[#allocation41_spill] sm:$0xff] }
 0xd30   :  { %16728 = vmatprep.subr.bf16.mxu1 %v16727_v15  ;;  %v16743_v15 = vpack.c.bf16 %v15124_v48, %v15123_v44  ;;  %v16747_v10 = vpack.c.bf16 %v15126_v51, %v15125_v31  ;;  %v15132_v44 = vld [vmem:[%s25569_s5 + $0xc18] sm:$0xff]  ;;  %v15150_v31 = vld [vmem:[%s25569_s5 + $0xca8] sm:$0xff]  ;;  %v15133_v59 = vld [vmem:[%s25569_s5 + $0xc20] sm:$0xff] }
 0xd31   :  { %v24878_v24 = vadd.f32 %v15444_v30, %v24754_v46  ;;  %v15103_v46 = vld [vmem:[%s25569_s5 + $0xb30] sm:$0xff] }
 0xd32   :  { %12456 = vmatmul.mubr.f32.gmra.mrb[234].mxu1 %v11096_v26  ;;  %v16737_v45 = vpack.c.bf16 %v15104_v6, %v15103_v46  ;;  %v15127_v30 = vld [vmem:[%s25569_s5 + $0xbf0] sm:$0xff]  ;;  %v16755_v46 = vpack.c.bf16 %v15146_v4, %v15145_v22  ;;  %v15130_v6 = vld [vmem:[%s25569_s5 + $0xc08] sm:$0xff] }
 0xd33   :  { %12460 = vmatprep.mubr.f32.mxu1 %v11099_v37  ;;  %16730 = vmatpush3.bf16.msra.mxu1 %v16729_v33  ;;  %v15128_v33 = vld [vmem:[%s25569_s5 + $0xbf8] sm:$0xff]  ;;  %v26030_v4 = vld [vmem:[#allocation44_spill] sm:$0xff] }
 0xd34   :  { %16732 = vmatprep.subr.bf16.mxu1 %v16731_v49  ;;  %v16751_v49 = vpack.c.bf16 %v15128_v33, %v15127_v30  ;;  %v10981_v33 = vadd.f32 %v23451_v40, %v24144_v61 }
 0xd36   :  { %12461 = vmatmul.mubr.f32.gmra.mrb[236].mxu1 %v11098_v11  ;;  %v11109_v22 = vmax.f32 %v10981_v33, 0.0 }
 0xd37   :  { %12465 = vmatprep.mubr.f32.mxu1 %v11101_v3  ;;  %16734 = vmatpush3.bf16.msra.mxu1 %v16733_v35  ;;  %v10977_v3 = vadd.f32 %v23451_v40, %v24112_v29  ;;  %v10976_v29 = vadd.f32 %v23459_v54, %v26028_v5  ;;  %v15157_v5 = vld [vmem:[%s25569_s5 + $0xce0] sm:$0xff] }
 0xd38   :  { %16736 = vmatprep.subr.bf16.mxu1 %v16735_v55  ;;  %v10974_v55 = vadd.f32 %v23459_v54, %v24084_v53  ;;  %v15147_v53 = vld [vmem:[%s25569_s5 + $0xc90] sm:$0xff] }
 0xd39   :  { %v11105_v48 = vmax.f32 %v10977_v3, 0.0  ;;  %v11104_v25 = vmax.f32 %v10976_v29, 0.0  ;;  %v15138_v3 = vld [vmem:[%s25569_s5 + $0xc48] sm:$0xff] }
 0xd3a   :  { %12466 = vmatmul.mubr.f32.gmra.mrb[238].mxu1 %v11100_v57  ;;  %v11102_v8 = vmax.f32 %v10974_v55, 0.0  ;;  %v15158_v29 = vld [vmem:[%s25569_s5 + $0xce8] sm:$0xff] }
 0xd3b   :  { %16738 = vmatpush3.bf16.msra.mxu1 %v16737_v45  ;;  %12572 = vmatprep.mubr.f32.mxu1 %v11103_v34  ;;  %v15131_v34 = vld [vmem:[%s25569_s5 + $0xc10] sm:$0xff] }
 0xd3c   :  { %16740 = vmatprep.subr.bf16.mxu1 %v16739_v7 }
 0xd3f   :  { %16742 = vmatpush3.bf16.msra.mxu1 %v16741_v32  ;;  %v10979_v32 = vadd.f32 %v23451_v40, %v24128_v63  ;;  %v10978_v63 = vadd.f32 %v23459_v54, %v24120_v58  ;;  %v15151_v58 = vld [vmem:[%s25569_s5 + $0xcb0] sm:$0xff] }
 0xd40   :  { %16744 = vmatprep.subr.bf16.mxu1 %v16743_v15 }
 0xd41   :  { %v15477_v18 = vpop.f32.mrb[184].mxu1  ;;  %v11107_v30 = vmax.f32 %v10979_v32, 0.0 }
 0xd42   :  { %v15478_v26 = vpop.f32.mrb[185].mxu1 }
 0xd43   :  { %v15479_v16 = vadd.f32 %v15478_v26, %v15477_v18  ;;  %16746 = vmatpush3.bf16.msra.mxu1 %v16745_v14  ;;  %v15134_v18 = vld [vmem:[%s25569_s5 + $0xc28] sm:$0xff] }
 0xd44   :  { %16748 = vmatprep.subr.bf16.mxu1 %v16747_v10  ;;  %v16761_v10 = vpack.c.bf16 %v15132_v44, %v15131_v34  ;;  %v16779_v34 = vpack.c.bf16 %v15158_v29, %v15157_v5  ;;  %v15141_v44 = vld [vmem:[%s25569_s5 + $0xc60] sm:$0xff]  ;;  %v15182_v5 = vld [vmem:[%s25569_s5 + $0xda8] sm:$0xff] }
 0xd45   :  { %v24945_v37 = vadd.f32 %v15479_v16, %v24821_v47  ;;  %v15480_v43 = vpop.f32.mrb[186].mxu1  ;;  %v15129_v47 = vld [vmem:[%s25569_s5 + $0xc00] sm:$0xff]  ;;  %v15152_v16 = vld [vmem:[%s25569_s5 + $0xcb8] sm:$0xff] }
 0xd46   :  { %v15481_v35 = vpop.f32.mrb[187].mxu1  ;;  %v16757_v7 = vpack.c.bf16 %v15130_v6, %v15129_v47  ;;  %v16767_v61 = vpack.c.bf16 %v15152_v16, %v15151_v58  ;;  %v15137_v6 = vld [vmem:[%s25569_s5 + $0xc40] sm:$0xff] }
 0xd47   :  { %v15482_v11 = vadd.f32 %v15481_v35, %v15480_v43  ;;  %16750 = vmatpush3.bf16.msra.mxu1 %v16749_v62  ;;  %v16765_v62 = vpack.c.bf16 %v15134_v18, %v15133_v59  ;;  %v15136_v43 = vld [vmem:[%s25569_s5 + $0xc38] sm:$0xff]  ;;  %v10983_v35 = vadd.f32 %v23451_v40, %v26030_v4  ;;  %v15177_v18 = vld [vmem:[%s25569_s5 + $0xd80] sm:$0xff]  ;;  %v15179_v4 = vld [vmem:[%s25569_s5 + $0xd90] sm:$0xff] }
 0xd48   :  { %16752 = vmatprep.subr.bf16.mxu1 %v16751_v49  ;;  %v11106_v49 = vmax.f32 %v10978_v63, 0.0  ;;  %v15144_v63 = vld [vmem:[%s25569_s5 + $0xc78] sm:$0xff] }
 0xd49   :  { %v24964_v39 = vadd.f32 %v15482_v11, %v24840_v50  ;;  %v15483_v2 = vpop.f32.mrb[188].mxu1  ;;  %v16759_v50 = vpack.c.bf16 %v15148_v23, %v15147_v53  ;;  %v15153_v11 = vld [vmem:[%s25569_s5 + $0xcc0] sm:$0xff]  ;;  %v15155_v53 = vld [vmem:[%s25569_s5 + $0xcd0] sm:$0xff]  ;;  %v15156_v23 = vld [vmem:[%s25569_s5 + $0xcd8] sm:$0xff] }
 0xd4a   :  { %v15484_v45 = vpop.f32.mrb[189].mxu1 }
 0xd4b   :  { %v15485_v57 = vadd.f32 %v15484_v45, %v15483_v2  ;;  %16754 = vmatpush3.bf16.msra.mxu1 %v16753_v17  ;;  %v15154_v17 = vld [vmem:[%s25569_s5 + $0xcc8] sm:$0xff]  ;;  %v11111_v2 = vmax.f32 %v10983_v35, 0.0  ;;  %v16773_v45 = vpack.c.bf16 %v15138_v3, %v15137_v6  ;;  %v15180_v35 = vld [vmem:[%s25569_s5 + $0xd98] sm:$0xff]  ;;  %v15163_v3 = vld [vmem:[%s25569_s5 + $0xd10] sm:$0xff] }
 0xd4c   :  { %16756 = vmatprep.subr.bf16.mxu1 %v16755_v46  ;;  %v11108_v46 = vmax.f32 %v10980_v1, 0.0  ;;  %v16771_v47 = vpack.c.bf16 %v15154_v17, %v15153_v11  ;;  %v15162_v1 = vld [vmem:[%s25569_s5 + $0xd08] sm:$0xff] }
 0xd4d   :  { %v24983_v15 = vadd.f32 %v15485_v57, %v24859_v41  ;;  %v15486_v27 = vpop.f32.mrb[190].mxu1  ;;  %v16763_v41 = vpack.c.bf16 %v15150_v31, %v15149_v13  ;;  %v16775_v57 = vpack.c.bf16 %v15156_v23, %v15155_v53  ;;  %v15160_v13 = vld [vmem:[%s25569_s5 + $0xcf8] sm:$0xff]  ;;  %v26034_v23 = vld [vmem:[#allocation4_spill] sm:$0xff] }
 0xd4e   :  { %v15487_v51 = vpop.f32.mrb[191].mxu1  ;;  %12573 = vmatmul.mubr.f32.vlgmr.msra.gmra.mrb[240].mxu1 %v11102_v8  ;;  %v15140_v8 = vld [vmem:[%s25569_s5 + $0xc58] sm:$0xff] }
 0xd4f   :  { %v15488_v14 = vadd.f32 %v15487_v51, %v15486_v27  ;;  %12577 = vmatprep.mubr.f32.mxu1 %v11105_v48  ;;  %16758 = vmatpush3.bf16.msra.mxu1 %v16757_v7  ;;  %v15139_v7 = vld [vmem:[%s25569_s5 + $0xc50] sm:$0xff]  ;;  %v15142_v48 = vld [vmem:[%s25569_s5 + $0xc68] sm:$0xff] }
 0xd50   :  { %16760 = vmatprep.subr.bf16.mxu1 %v16759_v50  ;;  %v16777_v50 = vpack.c.bf16 %v15140_v8, %v15139_v7  ;;  %v15159_v27 = vld [vmem:[%s25569_s5 + $0xcf0] sm:$0xff]  ;;  %v15181_v8 = vld [vmem:[%s25569_s5 + $0xda0] sm:$0xff] }
 0xd51   :  { %v25002_v26 = vadd.f32 %v15488_v14, %v24878_v24  ;;  %v15135_v24 = vld [vmem:[%s25569_s5 + $0xc30] sm:$0xff]  ;;  %v16781_v14 = vpack.c.bf16 %v15142_v48, %v15141_v44  ;;  %v26035_v48 = vld [vmem:[#allocation3_spill] sm:$0xff] }
 0xd52   :  { %12578 = vmatmul.mubr.f32.gmra.mrb[242].mxu1 %v11104_v25  ;;  %v16769_v55 = vpack.c.bf16 %v15136_v43, %v15135_v24  ;;  %v15143_v25 = vld [vmem:[%s25569_s5 + $0xc70] sm:$0xff] }
 0xd53   :  { %12582 = vmatprep.mubr.f32.mxu1 %v11107_v30  ;;  %16762 = vmatpush3.bf16.msra.mxu1 %v16761_v10  ;;  %v16783_v10 = vpack.c.bf16 %v15160_v13, %v15159_v27  ;;  %v15178_v30 = vld [vmem:[%s25569_s5 + $0xd88] sm:$0xff]  ;;  %v16785_v16 = vpack.c.bf16 %v15144_v63, %v15143_v25  ;;  %v15165_v27 = vld [vmem:[%s25569_s5 + $0xd20] sm:$0xff]  ;;  %v15184_v25 = vld [vmem:[%s25569_s5 + $0xdb8] sm:$0xff] }
 0xd54   :  { %16764 = vmatprep.subr.bf16.mxu1 %v16763_v41  ;;  %v16787_v9 = vpack.c.bf16 %v15178_v30, %v15177_v18  ;;  %v15166_v13 = vld [vmem:[%s25569_s5 + $0xd28] sm:$0xff]  ;;  %v10988_v18 = vadd.f32 %v23459_v54, %v24208_v19  ;;  %v15168_v30 = vld [vmem:[%s25569_s5 + $0xd38] sm:$0xff] }
 0xd55   :  { %v16797_v63 = vpack.c.bf16 %v15166_v13, %v15165_v27  ;;  %v15186_v19 = vld [vmem:[%s25569_s5 + $0xdc8] sm:$0xff]  ;;  %v10990_v13 = vadd.f32 %v23459_v54, %v24228_v38  ;;  %v15211_v38 = vld [vmem:[%s25569_s5 + $0xe90] sm:$0xff] }
 0xd56   :  { %12583 = vmatmul.mubr.f32.gmra.mrb[244].mxu1 %v11106_v49 }
 0xd57   :  { %12587 = vmatprep.mubr.f32.mxu1 %v11109_v22  ;;  %16766 = vmatpush3.bf16.msra.mxu1 %v16765_v62  ;;  %v26031_v62 = vld [vmem:[#allocation43_spill] sm:$0xff] }
 0xd58   :  { %16768 = vmatprep.subr.bf16.mxu1 %v16767_v61  ;;  %v10982_v49 = vadd.f32 %v23459_v54, %v26031_v62  ;;  %v26032_v61 = vld [vmem:[#allocation34_spill] sm:$0xff] }
 0xd59   :  { %v10985_v24 = vadd.f32 %v23451_v40, %v26032_v61  ;;  %v15187_v61 = vld [vmem:[%s25569_s5 + $0xdd0] sm:$0xff] }
 0xd5a   :  { %12588 = vmatmul.mubr.f32.gmra.mrb[246].mxu1 %v11108_v46  ;;  %v11110_v46 = vmax.f32 %v10982_v49, 0.0  ;;  %v11116_v49 = vmax.f32 %v10988_v18, 0.0 }
 0xd5b   :  { %16770 = vmatpush3.bf16.msra.mxu1 %v16769_v55  ;;  %12694 = vmatprep.mubr.f32.mxu1 %v11111_v2  ;;  %v15164_v2 = vld [vmem:[%s25569_s5 + $0xd18] sm:$0xff]  ;;  %v11113_v53 = vmax.f32 %v10985_v24, 0.0 }
 0xd5c   :  { %16772 = vmatprep.subr.bf16.mxu1 %v16771_v47  ;;  %v26033_v47 = vld [vmem:[#allocation45_spill] sm:$0xff]  ;;  %v15188_v24 = vld [vmem:[%s25569_s5 + $0xdd8] sm:$0xff] }
 0xd5d   :  { %v10984_v6 = vadd.f32 %v23459_v54, %v26033_v47 }
 0xd5f   :  { %16774 = vmatpush3.bf16.msra.mxu1 %v16773_v45  ;;  %v10987_v45 = vadd.f32 %v23451_v40, %v26034_v23  ;;  %v11112_v44 = vmax.f32 %v10984_v6, 0.0  ;;  %v15173_v6 = vld [vmem:[%s25569_s5 + $0xd60] sm:$0xff] }
 0xd60   :  { %16776 = vmatprep.subr.bf16.mxu1 %v16775_v57 }
 0xd61   :  { %v15521_v32 = vpop.f32.mrb[192].mxu1 }
 0xd62   :  { %v15522_v31 = vpop.f32.mrb[193].mxu1 }
 0xd63   :  { %v15523_v51 = vadd.f32 %v15522_v31, %v15521_v32  ;;  %16778 = vmatpush3.bf16.msra.mxu1 %v16777_v50  ;;  %v16795_v32 = vpack.c.bf16 %v15182_v5, %v15181_v8  ;;  %v11115_v31 = vmax.f32 %v10987_v45, 0.0  ;;  %v15175_v5 = vld [vmem:[%s25569_s5 + $0xd70] sm:$0xff] }
 0xd64   :  { %16780 = vmatprep.subr.bf16.mxu1 %v16779_v34  ;;  %v16793_v34 = vpack.c.bf16 %v15164_v2, %v15163_v3  ;;  %v15191_v2 = vld [vmem:[%s25569_s5 + $0xdf0] sm:$0xff] }
 0xd65   :  { %v25069_v41 = vadd.f32 %v15523_v51, %v24945_v37  ;;  %v15524_v59 = vpop.f32.mrb[194].mxu1  ;;  %v15161_v37 = vld [vmem:[%s25569_s5 + $0xd00] sm:$0xff]  ;;  %v10989_v51 = vadd.f32 %v23451_v40, %v24216_v21 }
 0xd66   :  { %v15525_v33 = vpop.f32.mrb[195].mxu1  ;;  %v16789_v55 = vpack.c.bf16 %v15162_v1, %v15161_v37  ;;  %v15169_v37 = vld [vmem:[%s25569_s5 + $0xd40] sm:$0xff] }
 0xd67   :  { %v15526_v58 = vadd.f32 %v15525_v33, %v15524_v59  ;;  %16782 = vmatpush3.bf16.msra.mxu1 %v16781_v14  ;;  %v11117_v33 = vmax.f32 %v10989_v51, 0.0  ;;  %v15194_v51 = vld [vmem:[%s25569_s5 + $0xe08] sm:$0xff] }
 0xd68   :  { %16784 = vmatprep.subr.bf16.mxu1 %v16783_v10  ;;  %v15183_v10 = vld [vmem:[%s25569_s5 + $0xdb0] sm:$0xff] }
 0xd69   :  { %v25088_v43 = vadd.f32 %v15526_v58, %v24964_v39  ;;  %v15527_v22 = vpop.f32.mrb[196].mxu1  ;;  %v16791_v39 = vpack.c.bf16 %v15180_v35, %v15179_v4  ;;  %v16799_v21 = vpack.c.bf16 %v15184_v25, %v15183_v10  ;;  %v10991_v58 = vadd.f32 %v23451_v40, %v24236_v56  ;;  %v15170_v56 = vld [vmem:[%s25569_s5 + $0xd48] sm:$0xff]  ;;  %v15171_v35 = vld [vmem:[%s25569_s5 + $0xd50] sm:$0xff] }
 0xd6a   :  { %v15528_v11 = vpop.f32.mrb[197].mxu1  ;;  %v16807_v4 = vpack.c.bf16 %v15188_v24, %v15187_v61  ;;  %v10993_v10 = vadd.f32 %v23451_v40, %v24256_v42 }
 0xd6b   :  { %v15529_v17 = vadd.f32 %v15528_v11, %v15527_v22  ;;  %16786 = vmatpush3.bf16.msra.mxu1 %v16785_v16  ;;  %v15185_v16 = vld [vmem:[%s25569_s5 + $0xdc0] sm:$0xff]  ;;  %v11119_v1 = vmax.f32 %v10991_v58, 0.0  ;;  %v16805_v22 = vpack.c.bf16 %v15170_v56, %v15169_v37  ;;  %v15172_v11 = vld [vmem:[%s25569_s5 + $0xd58] sm:$0xff]  ;;  %v15195_v58 = vld [vmem:[%s25569_s5 + $0xe10] sm:$0xff] }
 0xd6c   :  { %16788 = vmatprep.subr.bf16.mxu1 %v16787_v9  ;;  %v16803_v9 = vpack.c.bf16 %v15186_v19, %v15185_v16  ;;  %v15196_v16 = vld [vmem:[%s25569_s5 + $0xe18] sm:$0xff]  ;;  %v11121_v19 = vmax.f32 %v10993_v10, 0.0  ;;  %v15213_v37 = vld [vmem:[%s25569_s5 + $0xea0] sm:$0xff]  ;;  %v15214_v56 = vld [vmem:[%s25569_s5 + $0xea8] sm:$0xff] }
 0xd6d   :  { %v25107_v57 = vadd.f32 %v15529_v17, %v24983_v15  ;;  %v15530_v7 = vpop.f32.mrb[198].mxu1  ;;  %v10986_v15 = vadd.f32 %v23459_v54, %v26035_v48  ;;  %v15189_v17 = vld [vmem:[%s25569_s5 + $0xde0] sm:$0xff]  ;;  %v15210_v48 = vld [vmem:[%s25569_s5 + $0xe88] sm:$0xff]  ;;  %v16825_v24 = vpack.c.bf16 %v15196_v16, %v15195_v58 }
 0xd6e   :  { %v15531_v29 = vpop.f32.mrb[199].mxu1  ;;  %12695 = vmatmul.mubr.f32.vlgmr.msra.gmra.mrb[248].mxu1 %v11110_v46  ;;  %v16809_v46 = vpack.c.bf16 %v15172_v11, %v15171_v35  ;;  %v15198_v35 = vld [vmem:[%s25569_s5 + $0xe28] sm:$0xff]  ;;  %v15221_v10 = vld [vmem:[%s25569_s5 + $0xee0] sm:$0xff] }
 0xd6f   :  { %v15532_v50 = vadd.f32 %v15531_v29, %v15530_v7  ;;  %12699 = vmatprep.mubr.f32.mxu1 %v11113_v53  ;;  %16790 = vmatpush3.bf16.msra.mxu1 %v16789_v55  ;;  %v11114_v59 = vmax.f32 %v10986_v15, 0.0  ;;  %v15190_v55 = vld [vmem:[%s25569_s5 + $0xde8] sm:$0xff]  ;;  %v15192_v53 = vld [vmem:[%s25569_s5 + $0xdf8] sm:$0xff] }
 0xd70   :  { %16792 = vmatprep.subr.bf16.mxu1 %v16791_v39  ;;  %v16811_v47 = vpack.c.bf16 %v15190_v55, %v15189_v17  ;;  %v15174_v39 = vld [vmem:[%s25569_s5 + $0xd68] sm:$0xff]  ;;  %v16815_v8 = vpack.c.bf16 %v15192_v53, %v15191_v2  ;;  %v15176_v29 = vld [vmem:[%s25569_s5 + $0xd78] sm:$0xff]  ;;  %v10997_v17 = vadd.f32 %v23451_v40, %v24288_v52 }
 0xd71   :  { %v25126_v14 = vadd.f32 %v15532_v50, %v25002_v26  ;;  %v15167_v26 = vld [vmem:[%s25569_s5 + $0xd30] sm:$0xff]  ;;  %v16813_v7 = vpack.c.bf16 %v15174_v39, %v15173_v6  ;;  %v16817_v27 = vpack.c.bf16 %v15176_v29, %v15175_v5  ;;  %v26037_v39 = vld [vmem:[#allocation6_spill] sm:$0xff] }
 0xd72   :  { %12700 = vmatmul.mubr.f32.gmra.mrb[250].mxu1 %v11112_v44  ;;  %v16801_v62 = vpack.c.bf16 %v15168_v30, %v15167_v26  ;;  %v15209_v44 = vld [vmem:[%s25569_s5 + $0xe80] sm:$0xff]  ;;  %v11118_v30 = vmax.f32 %v10990_v13, 0.0  ;;  %v15200_v2 = vld [vmem:[%s25569_s5 + $0xe38] sm:$0xff]  ;;  %v11125_v53 = vmax.f32 %v10997_v17, 0.0 }
 0xd73   :  { %12704 = vmatprep.mubr.f32.mxu1 %v11115_v31  ;;  %16794 = vmatpush3.bf16.msra.mxu1 %v16793_v34  ;;  %v16819_v31 = vpack.c.bf16 %v15210_v48, %v15209_v44  ;;  %v15201_v44 = vld [vmem:[%s25569_s5 + $0xe40] sm:$0xff]  ;;  %v15202_v48 = vld [vmem:[%s25569_s5 + $0xe48] sm:$0xff] }
 0xd74   :  { %16796 = vmatprep.subr.bf16.mxu1 %v16795_v32  ;;  %v16837_v13 = vpack.c.bf16 %v15202_v48, %v15201_v44  ;;  %v15245_v44 = vld [vmem:[%s25569_s5 + $0xfa0] sm:$0xff]  ;;  %v15246_v48 = vld [vmem:[%s25569_s5 + $0xfa8] sm:$0xff] }
 0xd76   :  { %12705 = vmatmul.mubr.f32.gmra.mrb[252].mxu1 %v11114_v59  ;;  %v15212_v59 = vld [vmem:[%s25569_s5 + $0xe98] sm:$0xff] }
 0xd77   :  { %12709 = vmatprep.mubr.f32.mxu1 %v11117_v33  ;;  %16798 = vmatpush3.bf16.msra.mxu1 %v16797_v63  ;;  %v26036_v33 = vld [vmem:[#allocation5_spill] sm:$0xff] }
 0xd78   :  { %16800 = vmatprep.subr.bf16.mxu1 %v16799_v21  ;;  %v10992_v42 = vadd.f32 %v23459_v54, %v26036_v33  ;;  %v15224_v33 = vld [vmem:[%s25569_s5 + $0xef8] sm:$0xff] }
 0xd7a   :  { %12710 = vmatmul.mubr.f32.gmra.mrb[254].mxu1 %v11116_v49 }
 0xd7b   :  { %16802 = vmatpush3.bf16.msra.mxu1 %v16801_v62  ;;  %12816 = vmatprep.mubr.f32.mxu1 %v11119_v1  ;;  %v10995_v62 = vadd.f32 %v23451_v40, %v24272_v12  ;;  %v10994_v12 = vadd.f32 %v23459_v54, %v24264_v0  ;;  %v15215_v0 = vld [vmem:[%s25569_s5 + $0xeb0] sm:$0xff] }
 0xd7c   :  { %16804 = vmatprep.subr.bf16.mxu1 %v16803_v9 }
 0xd7d   :  { %v11123_v11 = vmax.f32 %v10995_v62, 0.0  ;;  %v11122_v6 = vmax.f32 %v10994_v12, 0.0  ;;  %v15208_v62 = vld [vmem:[%s25569_s5 + $0xe78] sm:$0xff]  ;;  %v26039_v12 = vld [vmem:[#allocation7_spill] sm:$0xff] }
 0xd7f   :  { %16806 = vmatpush3.bf16.msra.mxu1 %v16805_v22  ;;  %v11120_v22 = vmax.f32 %v10992_v42, 0.0 }
 0xd80   :  { %16808 = vmatprep.subr.bf16.mxu1 %v16807_v4  ;;  %v15197_v4 = vld [vmem:[%s25569_s5 + $0xe20] sm:$0xff] }
 0xd81   :  { %v15565_v3 = vpop.f32.mrb[200].mxu1 }
 0xd82   :  { %v15566_v23 = vpop.f32.mrb[201].mxu1 }
 0xd83   :  { %v15567_v45 = vadd.f32 %v15566_v23, %v15565_v3  ;;  %16810 = vmatpush3.bf16.msra.mxu1 %v16809_v46  ;;  %v15216_v46 = vld [vmem:[%s25569_s5 + $0xeb8] sm:$0xff]  ;;  %v10996_v3 = vadd.f32 %v23459_v54, %v26037_v39  ;;  %v26038_v23 = vld [vmem:[#allocation8_spill] sm:$0xff] }
 0xd84   :  { %16812 = vmatprep.subr.bf16.mxu1 %v16811_v47  ;;  %v16829_v47 = vpack.c.bf16 %v15198_v35, %v15197_v4  ;;  %v16831_v52 = vpack.c.bf16 %v15216_v46, %v15215_v0  ;;  %v15226_v35 = vld [vmem:[%s25569_s5 + $0xf08] sm:$0xff] }
 0xd85   :  { %v25193_v50 = vadd.f32 %v15567_v45, %v25069_v41  ;;  %v15568_v34 = vpop.f32.mrb[202].mxu1  ;;  %v15193_v41 = vld [vmem:[%s25569_s5 + $0xe00] sm:$0xff]  ;;  %v10999_v45 = vadd.f32 %v23451_v40, %v26038_v23  ;;  %v11124_v29 = vmax.f32 %v10996_v3, 0.0  ;;  %v15227_v23 = vld [vmem:[%s25569_s5 + $0xf10] sm:$0xff] }
 0xd86   :  { %v15569_v15 = vpop.f32.mrb[203].mxu1  ;;  %v16821_v26 = vpack.c.bf16 %v15194_v51, %v15193_v41  ;;  %v15203_v41 = vld [vmem:[%s25569_s5 + $0xe50] sm:$0xff]  ;;  %v15204_v51 = vld [vmem:[%s25569_s5 + $0xe58] sm:$0xff] }
 0xd87   :  { %v15570_v32 = vadd.f32 %v15569_v15, %v15568_v34  ;;  %16814 = vmatpush3.bf16.msra.mxu1 %v16813_v7  ;;  %v15217_v7 = vld [vmem:[%s25569_s5 + $0xec0] sm:$0xff]  ;;  %v11127_v15 = vmax.f32 %v10999_v45, 0.0  ;;  %v15228_v45 = vld [vmem:[%s25569_s5 + $0xf18] sm:$0xff] }
 0xd88   :  { %16816 = vmatprep.subr.bf16.mxu1 %v16815_v8  ;;  %v15218_v8 = vld [vmem:[%s25569_s5 + $0xec8] sm:$0xff] }
 0xd89   :  { %v25212_v25 = vadd.f32 %v15570_v32, %v25088_v43  ;;  %v15571_v63 = vpop.f32.mrb[204].mxu1  ;;  %v16823_v43 = vpack.c.bf16 %v15212_v59, %v15211_v38  ;;  %v16835_v34 = vpack.c.bf16 %v15218_v8, %v15217_v7  ;;  %v15219_v32 = vld [vmem:[%s25569_s5 + $0xed0] sm:$0xff]  ;;  %v16841_v38 = vpack.c.bf16 %v15204_v51, %v15203_v41  ;;  %v26042_v8 = vld [vmem:[#allocation12_spill] sm:$0xff]  ;;  %v15229_v51 = vld [vmem:[%s25569_s5 + $0xf20] sm:$0xff] }
 0xd8a   :  { %v15572_v18 = vpop.f32.mrb[205].mxu1  ;;  %v16859_v41 = vpack.c.bf16 %v15246_v48, %v15245_v44  ;;  %v11006_v44 = vadd.f32 %v23459_v54, %v24372_v36  ;;  %v26044_v48 = vld [vmem:[#allocation14_spill] sm:$0xff] }
 0xd8b   :  { %v15573_v21 = vadd.f32 %v15572_v18, %v15571_v63  ;;  %16818 = vmatpush3.bf16.msra.mxu1 %v16817_v27  ;;  %v15220_v27 = vld [vmem:[%s25569_s5 + $0xed8] sm:$0xff]  ;;  %v15222_v63 = vld [vmem:[%s25569_s5 + $0xee8] sm:$0xff]  ;;  %v15205_v18 = vld [vmem:[%s25569_s5 + $0xe60] sm:$0xff] }
 0xd8c   :  { %16820 = vmatprep.subr.bf16.mxu1 %v16819_v31  ;;  %v16839_v31 = vpack.c.bf16 %v15220_v27, %v15219_v32  ;;  %v16843_v59 = vpack.c.bf16 %v15222_v63, %v15221_v10  ;;  %v16857_v27 = vpack.c.bf16 %v15228_v45, %v15227_v23  ;;  %v15230_v10 = vld [vmem:[%s25569_s5 + $0xf28] sm:$0xff]  ;;  %v15240_v23 = vld [vmem:[%s25569_s5 + $0xf78] sm:$0xff] }
 0xd8d   :  { %v25231_v49 = vadd.f32 %v15573_v21, %v25107_v57  ;;  %v15574_v9 = vpop.f32.mrb[206].mxu1  ;;  %v16827_v57 = vpack.c.bf16 %v15214_v56, %v15213_v37  ;;  %v15206_v21 = vld [vmem:[%s25569_s5 + $0xe68] sm:$0xff]  ;;  %v15241_v56 = vld [vmem:[%s25569_s5 + $0xf80] sm:$0xff] }
 0xd8e   :  { %v15575_v1 = vpop.f32.mrb[207].mxu1  ;;  %12817 = vmatmul.mubr.f32.vlgmr.msra.gmra.mrb[0].mxu1 %v11118_v30  ;;  %v15223_v30 = vld [vmem:[%s25569_s5 + $0xef0] sm:$0xff]  ;;  %v16845_v58 = vpack.c.bf16 %v15206_v21, %v15205_v18  ;;  %v15248_v21 = vld [vmem:[%s25569_s5 + $0xfb8] sm:$0xff] }
 0xd8f   :  { %v15576_v61 = vadd.f32 %v15575_v1, %v15574_v9  ;;  %12821 = vmatprep.mubr.f32.mxu1 %v11121_v19  ;;  %16822 = vmatpush3.bf16.msra.mxu1 %v16821_v26  ;;  %v16847_v16 = vpack.c.bf16 %v15224_v33, %v15223_v30  ;;  %v15207_v19 = vld [vmem:[%s25569_s5 + $0xe70] sm:$0xff]  ;;  %v15242_v1 = vld [vmem:[%s25569_s5 + $0xf88] sm:$0xff]  ;;  %v11004_v33 = vadd.f32 %v23459_v54, %v24352_v20 }
 0xd90   :  { %16824 = vmatprep.subr.bf16.mxu1 %v16823_v43  ;;  %v16851_v4 = vpack.c.bf16 %v15242_v1, %v15241_v56  ;;  %v15247_v18 = vld [vmem:[%s25569_s5 + $0xfb0] sm:$0xff]  ;;  %v15250_v20 = vld [vmem:[%s25569_s5 + $0xfc8] sm:$0xff]  ;;  %v15233_v56 = vld [vmem:[%s25569_s5 + $0xf40] sm:$0xff] }
 0xd91   :  { %v25250_v55 = vadd.f32 %v15576_v61, %v25126_v14  ;;  %v15199_v14 = vld [vmem:[%s25569_s5 + $0xe30] sm:$0xff] }
 0xd92   :  { %12822 = vmatmul.mubr.f32.gmra.mrb[2].mxu1 %v11120_v22  ;;  %v16833_v5 = vpack.c.bf16 %v15200_v2, %v15199_v14  ;;  %v16849_v22 = vpack.c.bf16 %v15208_v62, %v15207_v19  ;;  %v26041_v2 = vld [vmem:[#allocation9_spill] sm:$0xff]  ;;  %v11132_v62 = vmax.f32 %v11004_v33, 0.0 }
 0xd93   :  { %12826 = vmatprep.mubr.f32.mxu1 %v11123_v11  ;;  %16826 = vmatpush3.bf16.msra.mxu1 %v16825_v24  ;;  %v26040_v11 = vld [vmem:[#allocation10_spill] sm:$0xff] }
 0xd94   :  { %16828 = vmatprep.subr.bf16.mxu1 %v16827_v57  ;;  %v10998_v57 = vadd.f32 %v23459_v54, %v26039_v12  ;;  %v11001_v17 = vadd.f32 %v23451_v40, %v26040_v11 }
 0xd96   :  { %12827 = vmatmul.mubr.f32.gmra.mrb[4].mxu1 %v11122_v6  ;;  %v15244_v6 = vld [vmem:[%s25569_s5 + $0xf98] sm:$0xff]  ;;  %v11126_v14 = vmax.f32 %v10998_v57, 0.0  ;;  %v11129_v7 = vmax.f32 %v11001_v17, 0.0  ;;  %v15235_v57 = vld [vmem:[%s25569_s5 + $0xf50] sm:$0xff] }
 0xd97   :  { %12831 = vmatprep.mubr.f32.mxu1 %v11125_v53  ;;  %16830 = vmatpush3.bf16.msra.mxu1 %v16829_v47  ;;  %v15243_v47 = vld [vmem:[%s25569_s5 + $0xf90] sm:$0xff]  ;;  %v11000_v53 = vadd.f32 %v23459_v54, %v26041_v2 }
 0xd98   :  { %16832 = vmatprep.subr.bf16.mxu1 %v16831_v52 }
 0xd9a   :  { %12832 = vmatmul.mubr.f32.gmra.mrb[6].mxu1 %v11124_v29 }
 0xd9b   :  { %16834 = vmatpush3.bf16.msra.mxu1 %v16833_v5  ;;  %12938 = vmatprep.mubr.f32.mxu1 %v11127_v15  ;;  %v11003_v5 = vadd.f32 %v23451_v40, %v26042_v8 }
 0xd9c   :  { %16836 = vmatprep.subr.bf16.mxu1 %v16835_v34 }
 0xd9d   :  { %v11131_v63 = vmax.f32 %v11003_v5, 0.0 }
 0xd9f   :  { %16838 = vmatpush3.bf16.msra.mxu1 %v16837_v13  ;;  %v11128_v13 = vmax.f32 %v11000_v53, 0.0 }
 0xda0   :  { %16840 = vmatprep.subr.bf16.mxu1 %v16839_v31  ;;  %v26043_v31 = vld [vmem:[#allocation11_spill] sm:$0xff] }
 0xda1   :  { %v15609_v26 = vpop.f32.mrb[208].mxu1 }
 0xda2   :  { %v15610_v42 = vpop.f32.mrb[209].mxu1 }
 0xda3   :  { %v15611_v43 = vadd.f32 %v15610_v42, %v15609_v26  ;;  %16842 = vmatpush3.bf16.msra.mxu1 %v16841_v38  ;;  %v11005_v38 = vadd.f32 %v23451_v40, %v24360_v28  ;;  %v16861_v26 = vpack.c.bf16 %v15230_v10, %v15229_v51  ;;  %v16863_v28 = vpack.c.bf16 %v15248_v21, %v15247_v18  ;;  %v15232_v42 = vld [vmem:[%s25569_s5 + $0xf38] sm:$0xff]  ;;  %v26046_v10 = vld [vmem:[#allocation16_spill] sm:$0xff] }
 0xda4   :  { %16844 = vmatprep.subr.bf16.mxu1 %v16843_v59 }
 0xda5   :  { %v25317_v9 = vadd.f32 %v15611_v43, %v25193_v50  ;;  %v15612_v37 = vpop.f32.mrb[210].mxu1  ;;  %v15225_v50 = vld [vmem:[%s25569_s5 + $0xf00] sm:$0xff]  ;;  %v11133_v43 = vmax.f32 %v11005_v38, 0.0 }
 0xda6   :  { %v15613_v61 = vpop.f32.mrb[211].mxu1  ;;  %v16853_v52 = vpack.c.bf16 %v15226_v35, %v15225_v50  ;;  %v15253_v50 = vld [vmem:[%s25569_s5 + $0xfe0] sm:$0xff]  ;;  %v15254_v35 = vld [vmem:[%s25569_s5 + $0xfe8] sm:$0xff] }
 0xda7   :  { %v15614_v24 = vadd.f32 %v15613_v61, %v15612_v37  ;;  %16846 = vmatpush3.bf16.msra.mxu1 %v16845_v58  ;;  %v11007_v58 = vadd.f32 %v23451_v40, %v24380_v60  ;;  %v15234_v60 = vld [vmem:[%s25569_s5 + $0xf48] sm:$0xff]  ;;  %v15251_v61 = vld [vmem:[%s25569_s5 + $0xfd0] sm:$0xff]  ;;  %v16875_v17 = vpack.c.bf16 %v15254_v35, %v15253_v50 }
 0xda8   :  { %16848 = vmatprep.subr.bf16.mxu1 %v16847_v16  ;;  %v15249_v16 = vld [vmem:[%s25569_s5 + $0xfc0] sm:$0xff] }
 0xda9   :  { %v25336_v0 = vadd.f32 %v15614_v24, %v25212_v25  ;;  %v15615_v46 = vpop.f32.mrb[212].mxu1  ;;  %v16855_v25 = vpack.c.bf16 %v15244_v6, %v15243_v47  ;;  %v16867_v37 = vpack.c.bf16 %v15250_v20, %v15249_v16  ;;  %v11135_v1 = vmax.f32 %v11007_v58, 0.0  ;;  %v15252_v24 = vld [vmem:[%s25569_s5 + $0xfd8] sm:$0xff]  ;;  %v15238_v47 = vld [vmem:[%s25569_s5 + $0xf68] sm:$0xff]  ;;  %v26049_v58 = vld [vmem:[#allocation17_spill] sm:$0xff] }
 0xdaa   :  { %v15616_v39 = vpop.f32.mrb[213].mxu1  ;;  %v16871_v12 = vpack.c.bf16 %v15252_v24, %v15251_v61 }
 0xdab   :  { %v15617_v3 = vadd.f32 %v15616_v39, %v15615_v46  ;;  %16850 = vmatpush3.bf16.msra.mxu1 %v16849_v22  ;;  %v16869_v22 = vpack.c.bf16 %v15234_v60, %v15233_v56  ;;  %v15237_v46 = vld [vmem:[%s25569_s5 + $0xf60] sm:$0xff]  ;;  %v15255_v39 = vld [vmem:[%s25569_s5 + $0xff0] sm:$0xff] }
 0xdac   :  { %16852 = vmatprep.subr.bf16.mxu1 %v16851_v4  ;;  %v15236_v4 = vld [vmem:[%s25569_s5 + $0xf58] sm:$0xff]  ;;  %v16877_v2 = vpack.c.bf16 %v15238_v47, %v15237_v46 }
 0xdad   :  { %v25355_v29 = vadd.f32 %v15617_v3, %v25231_v49  ;;  %v15618_v34 = vpop.f32.mrb[214].mxu1  ;;  %v11002_v49 = vadd.f32 %v23459_v54, %v26043_v31  ;;  %v16873_v11 = vpack.c.bf16 %v15236_v4, %v15235_v57  ;;  %v15256_v3 = vld [vmem:[%s25569_s5 + $0xff8] sm:$0xff] }
 0xdae   :  { %v15619_v15 = vpop.f32.mrb[215].mxu1  ;;  %12939 = vmatmul.mubr.f32.vlgmr.msra.gmra.mrb[8].mxu1 %v11126_v14  ;;  %v16879_v53 = vpack.c.bf16 %v15256_v3, %v15255_v39 }
 0xdaf   :  { %v15620_v32 = vadd.f32 %v15619_v15, %v15618_v34  ;;  %12943 = vmatprep.mubr.f32.mxu1 %v11129_v7  ;;  %16854 = vmatpush3.bf16.msra.mxu1 %v16853_v52  ;;  %v11130_v30 = vmax.f32 %v11002_v49, 0.0  ;;  %v11009_v15 = vadd.f32 %v23451_v40, %v26044_v48  ;;  %v11134_v49 = vmax.f32 %v11006_v44, 0.0  ;;  %v13102_v44 = vld [vmem:[%s25571_s7 + $0x10] sm:$0xff]  ;;  %v13103_v48 = vld [vmem:[%s25571_s7 + $0x18] sm:$0xff] }
 0xdb0   :  { %16856 = vmatprep.subr.bf16.mxu1 %v16855_v25  ;;  %v15239_v25 = vld [vmem:[%s25569_s5 + $0xf70] sm:$0xff] }
 0xdb1   :  { %v25374_v59 = vadd.f32 %v15620_v32, %v25250_v55  ;;  %v15231_v55 = vld [vmem:[%s25569_s5 + $0xf30] sm:$0xff]  ;;  %v16881_v34 = vpack.c.bf16 %v15240_v23, %v15239_v25  ;;  %v11137_v51 = vmax.f32 %v11009_v15, 0.0  ;;  %v13104_v15 = vld [vmem:[%s25571_s7 + $0x20] sm:$0xff] }
 0xdb2   :  { %12944 = vmatmul.mubr.f32.gmra.mrb[10].mxu1 %v11128_v13  ;;  %v16865_v19 = vpack.c.bf16 %v15232_v42, %v15231_v55 }
 0xdb3   :  { %12948 = vmatprep.mubr.f32.mxu1 %v11131_v63  ;;  %16858 = vmatpush3.bf16.msra.mxu1 %v16857_v27  ;;  %v11011_v63 = vadd.f32 %v23451_v40, %v26046_v10 }
 0xdb4   :  { %16860 = vmatprep.subr.bf16.mxu1 %v16859_v41 }
 0xdb5   :  { %v11139_v33 = vmax.f32 %v11011_v63, 0.0 }
 0xdb6   :  { %12949 = vmatmul.mubr.f32.gmra.mrb[12].mxu1 %v11130_v30 }
 0xdb7   :  { %12953 = vmatprep.mubr.f32.mxu1 %v11133_v43  ;;  %16862 = vmatpush3.bf16.msra.mxu1 %v16861_v26  ;;  %v26047_v26 = vld [vmem:[#allocation15_spill] sm:$0xff] }
 0xdb8   :  { %16864 = vmatprep.subr.bf16.mxu1 %v16863_v28  ;;  %v11010_v30 = vadd.f32 %v23459_v54, %v26047_v26  ;;  %v26048_v28 = vld [vmem:[#allocation18_spill] sm:$0xff] }
 0xdb9   :  { %v11013_v55 = vadd.f32 %v23451_v40, %v26048_v28 }
 0xdba   :  { %12954 = vmatmul.mubr.f32.gmra.mrb[14].mxu1 %v11132_v62  ;;  %v11138_v43 = vmax.f32 %v11010_v30, 0.0 }
 0xdbb   :  { %16866 = vmatpush3.bf16.msra.mxu1 %v16865_v19  ;;  %13060 = vmatprep.mubr.f32.mxu1 %v11135_v1  ;;  %v11141_v16 = vmax.f32 %v11013_v55, 0.0  ;;  %v13112_v55 = vld [vmem:[%s25571_s7 + $0x60] sm:$0xff] }
 0xdbc   :  { %16868 = vmatprep.subr.bf16.mxu1 %v16867_v37 }
 0xdbf   :  { %16870 = vmatpush3.bf16.msra.mxu1 %v16869_v22 }
 0xdc0   :  { %16872 = vmatprep.subr.bf16.mxu1 %v16871_v12 }
 0xdc1   :  { %v15653_v6 = vpop.f32.mrb[216].mxu1 }
 0xdc2   :  { %v15654_v52 = vpop.f32.mrb[217].mxu1 }
 0xdc3   :  { %v15655_v14 = vadd.f32 %v15654_v52, %v15653_v6  ;;  %16874 = vmatpush3.bf16.msra.mxu1 %v16873_v11 }
 0xdc4   :  { %16876 = vmatprep.subr.bf16.mxu1 %v16875_v17 }
 0xdc5   :  { %v12227_v45 = vadd.f32 %v15655_v14, %v25317_v9  ;;  %v15656_v7 = vpop.f32.mrb[218].mxu1  ;;  %v26045_v9 = vld [vmem:[#allocation13_spill] sm:$0xff] }
 0xdc6   :  { %v15657_v8 = vpop.f32.mrb[219].mxu1  ;;  %v11008_v41 = vadd.f32 %v23459_v54, %v26045_v9 }
 0xdc7   :  { %v15658_v5 = vadd.f32 %v15657_v8, %v15656_v7  ;;  %16878 = vmatpush3.bf16.msra.mxu1 %v16877_v2  ;;  %v13100_v7 = vld [vmem:[%s25571_s7] sm:$0xff]  ;;  %v13101_v8 = vld [vmem:[%s25571_s7 + $0x8] sm:$0xff] }
 0xdc8   :  { %16880 = vmatprep.subr.bf16.mxu1 %v16879_v53 }
 0xdc9   :  { %v12228_v32 = vadd.f32 %v15658_v5, %v25336_v0  ;;  %v15659_v27 = vpop.f32.mrb[220].mxu1  ;;  %v11136_v0 = vmax.f32 %v11008_v41, 0.0  ;;  %v16883_v5 = vpack.c.bf16 %v13101_v8, %v13100_v7  ;;  %v13108_v41 = vld [vmem:[%s25571_s7 + $0x40] sm:$0xff] }
 0xdca   :  { %v15660_v13 = vpop.f32.mrb[221].mxu1 }
 0xdcb   :  { %v15661_v31 = vadd.f32 %v15660_v13, %v15659_v27  ;;  %16882 = vmatpush3.bf16.msra.mxu1 %v16881_v34  ;;  %v13105_v27 = vld [vmem:[%s25571_s7 + $0x28] sm:$0xff] }
 0xdcc   :  { %16884 = vmatprep.subr.bf16.mxu1 %v16883_v5  ;;  %v16891_v13 = vpack.c.bf16 %v13105_v27, %v13104_v15 }
 0xdcd   :  { %v12229_v36 = vadd.f32 %v15661_v31, %v25355_v29  ;;  %v15662_v38 = vpop.f32.mrb[222].mxu1  ;;  %v11012_v29 = vadd.f32 %v23459_v54, %v26049_v58  ;;  %v13106_v31 = vld [vmem:[%s25571_s7 + $0x30] sm:$0xff] }
 0xdce   :  { %v15663_v18 = vpop.f32.mrb[223].mxu1  ;;  %13061 = vmatmul.mubr.f32.vlgmr.msra.gmra.mrb[16].mxu1 %v11134_v49  ;;  %v13107_v49 = vld [vmem:[%s25571_s7 + $0x38] sm:$0xff] }
 0xdcf   :  { %v15664_v21 = vadd.f32 %v15663_v18, %v15662_v38  ;;  %13065 = vmatprep.mubr.f32.mxu1 %v11137_v51  ;;  %v11140_v20 = vmax.f32 %v11012_v29, 0.0  ;;  %16886 = vmatpush3.bf16.msra.mxu1 %v16883_v5  ;;  %v16895_v9 = vpack.c.bf16 %v13107_v49, %v13106_v31  ;;  %v13109_v51 = vld [vmem:[%s25571_s7 + $0x48] sm:$0xff]  ;;  %v13110_v18 = vld [vmem:[%s25571_s7 + $0x50] sm:$0xff] }
 0xdd0   :  { %v16899_v10 = vpack.c.bf16 %v13109_v51, %v13108_v41 }
 0xdd1   :  { %v12230_v42 = vadd.f32 %v15664_v21, %v25374_v59  ;;  %v13111_v21 = vld [vmem:[%s25571_s7 + $0x58] sm:$0xff] }
 0xdd2   :  { %13066 = vmatmul.mubr.f32.gmra.mrb[18].mxu1 %v11136_v0  ;;  %v16903_v0 = vpack.c.bf16 %v13111_v21, %v13110_v18 }
 0xdd3   :  { %13070 = vmatprep.mubr.f32.mxu1 %v11139_v33 }
 0xdd6   :  { %13071 = vmatmul.mubr.f32.gmra.mrb[20].mxu1 %v11138_v43 }
 0xdd7   :  { %13075 = vmatprep.mubr.f32.mxu1 %v11141_v16 }
 0xdda   :  { %13076 = vmatmul.mubr.f32.gmra.mrb[22].mxu1 %v11140_v20 }
 0xde1   :  { %v15697_v19 = vpop.f32.mrb[224].mxu1 }
 0xde2   :  { %v15698_v62 = vpop.f32.mrb[225].mxu1 }
 0xde3   :  { %v15699_v37 = vadd.f32 %v15698_v62, %v15697_v19 }
 0xde5   :  { %v12349_v56 = vadd.f32 %v15699_v37, %v12227_v45  ;;  %v15700_v60 = vpop.f32.mrb[226].mxu1  ;;  %v13114_v37 = vld [vmem:[%s25571_s7 + $0x70] sm:$0xff] }
 0xde6   :  { %v15701_v1 = vpop.f32.mrb[227].mxu1 }
 0xde7   :  { %v15702_v40 = vadd.f32 %v15701_v1, %v15700_v60 }
 0xde9   :  { %v12350_v61 = vadd.f32 %v15702_v40, %v12228_v32  ;;  %v15703_v59 = vpop.f32.mrb[228].mxu1  ;;  %v16887_v32 = vpack.c.bf16 %v13103_v48, %v13102_v44  ;;  %v13224_v40 = vld [vmem:[%s25572_s9] sm:$0xff] }
 0xdea   :  { %v15704_v24 = vpop.f32.mrb[229].mxu1 }
 0xdeb   :  { %v15705_v22 = vadd.f32 %v15704_v24, %v15703_v59  ;;  %16888 = vmatprep.subr.bf16.mxu1 %v16887_v32 }
 0xdec   :  { %16890 = vmatpush3.bf16.msra.mxu1 %v16887_v32 }
 0xded   :  { %v12351_v12 = vadd.f32 %v15705_v22, %v12229_v36  ;;  %v15706_v57 = vpop.f32.mrb[230].mxu1  ;;  %16892 = vmatprep.subr.bf16.mxu1 %v16891_v13 }
 0xdee   :  { %v15707_v4 = vpop.f32.mrb[231].mxu1 }
 0xdef   :  { %v15708_v54 = vadd.f32 %v15707_v4, %v15706_v57 }
 0xdf0   :  { %16894 = vmatpush3.bf16.msra.mxu1 %v16891_v13 }
 0xdf1   :  { %v12352_v50 = vadd.f32 %v15708_v54, %v12230_v42  ;;  %16896 = vmatprep.subr.bf16.mxu1 %v16895_v9  ;;  %v13113_v42 = vld [vmem:[%s25571_s7 + $0x68] sm:$0xff] }
 0xdf2   :  { %v16907_v43 = vpack.c.bf16 %v13113_v42, %v13112_v55 }
 0xdf4   :  { %16898 = vmatpush3.bf16.msra.mxu1 %v16895_v9 }
 0xdf5   :  { %16900 = vmatprep.subr.bf16.mxu1 %v16899_v10 }
 0xdf8   :  { %16902 = vmatpush3.bf16.msra.mxu1 %v16899_v10 }
 0xdf9   :  { %16904 = vmatprep.subr.bf16.mxu1 %v16903_v0 }
 0xdfc   :  { %16906 = vmatpush3.bf16.msra.mxu1 %v16903_v0 }
 0xdfd   :  { %16908 = vmatprep.subr.bf16.mxu1 %v16907_v43 }
 0xe00   :  { %16910 = vmatpush3.bf16.msra.mxu1 %v16907_v43 }
 0xe01   :  { %v15741_v35 = vpop.f32.mrb[232].mxu1  ;;  %16035 = vmatprep.subr.mxu1 %v13114_v37 }
 0xe02   :  { %v15742_v11 = vpop.f32.mrb[233].mxu1 }
 0xe03   :  { %v15743_v17 = vadd.f32 %v15742_v11, %v15741_v35 }
 0xe04   :  { %16036 = vmatpush3.msra.mxu1 %v13114_v37 }
 0xe05   :  { %v12471_v46 = vadd.f32 %v15743_v17, %v12349_v56  ;;  %v15744_v47 = vpop.f32.mrb[234].mxu1 }
 0xe06   :  { %v15745_v6 = vpop.f32.mrb[235].mxu1 }
 0xe07   :  { %v15746_v39 = vadd.f32 %v15745_v6, %v15744_v47 }
 0xe09   :  { %v12472_v3 = vadd.f32 %v15746_v39, %v12350_v61  ;;  %v15747_v52 = vpop.f32.mrb[236].mxu1  ;;  %v13225_v61 = vld [vmem:[%s25572_s9 + $0x8] sm:$0xff] }
 0xe0a   :  { %v15748_v14 = vpop.f32.mrb[237].mxu1  ;;  %v25509_v59 = vpack.c.bf16 %v13225_v61, %v13224_v40  ;;  %v13226_v40 = vld [vmem:[%s25572_s9 + $0x10] sm:$0xff]  ;;  %v13227_v61 = vld [vmem:[%s25572_s9 + $0x18] sm:$0xff] }
 0xe0b   :  { %v15749_v2 = vadd.f32 %v15748_v14, %v15747_v52 }
 0xe0c   :  { %16912 = vmatprep.subr.bf16.mxu1 %v25509_v59 }
 0xe0d   :  { %v12473_v53 = vadd.f32 %v15749_v2, %v12351_v12  ;;  %v15750_v25 = vpop.f32.mrb[238].mxu1 }
 0xe0e   :  { %v15751_v23 = vpop.f32.mrb[239].mxu1 }
 0xe0f   :  { %v15752_v45 = vadd.f32 %v15751_v23, %v15750_v25 }
 0xe11   :  { %v12474_v34 = vadd.f32 %v15752_v45, %v12352_v50 }
 0xe21   :  { %v15785_v63 = vpop.f32.mrb[240].mxu1 }
 0xe22   :  { %v15786_v36 = vpop.f32.mrb[241].mxu1 }
 0xe23   :  { %v15787_v38 = vadd.f32 %v15786_v36, %v15785_v63 }
 0xe25   :  { %v12593_v26 = vadd.f32 %v15787_v38, %v12471_v46  ;;  %v15788_v30 = vpop.f32.mrb[242].mxu1 }
 0xe26   :  { %v15789_v33 = vpop.f32.mrb[243].mxu1 }
 0xe27   :  { %v15790_v28 = vadd.f32 %v15789_v33, %v15788_v30 }
 0xe29   :  { %v12594_v58 = vadd.f32 %v15790_v28, %v12472_v3  ;;  %v15791_v29 = vpop.f32.mrb[244].mxu1 }
 0xe2a   :  { %v15792_v16 = vpop.f32.mrb[245].mxu1 }
 0xe2b   :  { %v15793_v20 = vadd.f32 %v15792_v16, %v15791_v29 }
 0xe2d   :  { %v12595_v19 = vadd.f32 %v15793_v20, %v12473_v53  ;;  %v15794_v62 = vpop.f32.mrb[246].mxu1 }
 0xe2e   :  { %v15795_v56 = vpop.f32.mrb[247].mxu1 }
 0xe2f   :  { %v15796_v60 = vadd.f32 %v15795_v56, %v15794_v62 }
 0xe31   :  { %v12596_v1 = vadd.f32 %v15796_v60, %v12474_v34 }
 0xe41   :  { %v15829_v24 = vpop.f32.mrb[248].mxu1 }
 0xe42   :  { %v15830_v22 = vpop.f32.mrb[249].mxu1 }
 0xe43   :  { %v15831_v12 = vadd.f32 %v15830_v22, %v15829_v24 }
 0xe45   :  { %v12715_v57 = vadd.f32 %v15831_v12, %v12593_v26  ;;  %v15832_v4 = vpop.f32.mrb[250].mxu1 }
 0xe46   :  { %v15833_v54 = vpop.f32.mrb[251].mxu1 }
 0xe47   :  { %v15834_v50 = vadd.f32 %v15833_v54, %v15832_v4  ;;  %v16915_v54 = vpack.c.bf16 %v13227_v61, %v13226_v40 }
 0xe49   :  { %v12716_v35 = vadd.f32 %v15834_v50, %v12594_v58  ;;  %v15835_v11 = vpop.f32.mrb[252].mxu1  ;;  %v15257_v58 = vld [vmem:[%s25573_s6] ss:$0 sm:$0xff] }
 0xe4a   :  { %v15836_v17 = vpop.f32.mrb[253].mxu1 }
 0xe4b   :  { %v15837_v46 = vadd.f32 %v15836_v17, %v15835_v11  ;;  %v13229_v11 = vld [vmem:[%s25572_s9 + $0x28] sm:$0xff] }
 0xe4d   :  { %v12717_v47 = vadd.f32 %v15837_v46, %v12595_v19  ;;  %v15838_v6 = vpop.f32.mrb[254].mxu1 }
 0xe4e   :  { %v15839_v39 = vpop.f32.mrb[255].mxu1 }
 0xe4f   :  { %v15840_v3 = vadd.f32 %v15839_v39, %v15838_v6 }
 0xe51   :  { %v12718_v52 = vadd.f32 %v15840_v3, %v12596_v1  ;;  %v13230_v3 = vld [vmem:[%s25572_s9 + $0x30] sm:$0xff] }
 0xe61   :  { %v15873_v14 = vpop.f32.mrb[0].mxu1 }
 0xe62   :  { %v15874_v2 = vpop.f32.mrb[1].mxu1 }
 0xe63   :  { %v15875_v53 = vadd.f32 %v15874_v2, %v15873_v14 }
 0xe65   :  { %v12837_v25 = vadd.f32 %v15875_v53, %v12715_v57  ;;  %v15876_v23 = vpop.f32.mrb[2].mxu1 }
 0xe66   :  { %v15877_v45 = vpop.f32.mrb[3].mxu1 }
 0xe67   :  { %v15878_v7 = vadd.f32 %v15877_v45, %v15876_v23  ;;  %v13234_v45 = vld [vmem:[%s25572_s9 + $0x50] sm:$0xf] }
 0xe69   :  { %v12838_v8 = vadd.f32 %v15878_v7, %v12716_v35  ;;  %v15879_v5 = vpop.f32.mrb[4].mxu1  ;;  %v13228_v35 = vld [vmem:[%s25572_s9 + $0x20] sm:$0xff] }
 0xe6a   :  { %v15880_v34 = vpop.f32.mrb[5].mxu1  ;;  %v16919_v39 = vpack.c.bf16 %v13229_v11, %v13228_v35  ;;  %v15258_v7 = vld [vmem:[%s25574_s8] ss:$0 sm:$0xff] }
 0xe6b   :  { %v15881_v44 = vadd.f32 %v15880_v34, %v15879_v5 }
 0xe6d   :  { %v12839_v48 = vadd.f32 %v15881_v44, %v12717_v47  ;;  %v15882_v15 = vpop.f32.mrb[6].mxu1 }
 0xe6e   :  { %v15883_v32 = vpop.f32.mrb[7].mxu1 }
 0xe6f   :  { %v15884_v27 = vadd.f32 %v15883_v32, %v15882_v15 }
 0xe71   :  { %v12840_v13 = vadd.f32 %v15884_v27, %v12718_v52  ;;  %v13231_v52 = vld [vmem:[%s25572_s9 + $0x38] sm:$0xff] }
 0xe72   :  { %v16923_v53 = vpack.c.bf16 %v13231_v52, %v13230_v3 }
 0xe81   :  { %v15917_v31 = vpop.f32.mrb[8].mxu1 }
 0xe82   :  { %v15918_v49 = vpop.f32.mrb[9].mxu1 }
 0xe83   :  { %v15919_v9 = vadd.f32 %v15918_v49, %v15917_v31 }
 0xe85   :  { %v12959_v41 = vadd.f32 %v15919_v9, %v12837_v25  ;;  %v15920_v51 = vpop.f32.mrb[10].mxu1  ;;  %v13233_v25 = vld [vmem:[%s25572_s9 + $0x48] sm:$0xff] }
 0xe86   :  { %v15921_v10 = vpop.f32.mrb[11].mxu1 }
 0xe87   :  { %v15922_v63 = vadd.f32 %v15921_v10, %v15920_v51 }
 0xe89   :  { %v12960_v36 = vadd.f32 %v15922_v63, %v12838_v8  ;;  %v15923_v38 = vpop.f32.mrb[12].mxu1 }
 0xe8a   :  { %v15924_v18 = vpop.f32.mrb[13].mxu1 }
 0xe8b   :  { %v15925_v21 = vadd.f32 %v15924_v18, %v15923_v38 }
 0xe8d   :  { %v12961_v0 = vadd.f32 %v15925_v21, %v12839_v48  ;;  %v15926_v26 = vpop.f32.mrb[14].mxu1 }
 0xe8e   :  { %v15927_v30 = vpop.f32.mrb[15].mxu1 }
 0xe8f   :  { %v15928_v33 = vadd.f32 %v15927_v30, %v15926_v26 }
 0xe91   :  { %v12962_v28 = vadd.f32 %v15928_v33, %v12840_v13 }
 0xea1   :  { %v15961_v55 = vpop.f32.mrb[16].mxu1 }
 0xea2   :  { %v15962_v42 = vpop.f32.mrb[17].mxu1 }
 0xea3   :  { %v15963_v43 = vadd.f32 %v15962_v42, %v15961_v55 }
 0xea5   :  { %v13081_v29 = vadd.f32 %v15963_v43, %v12959_v41  ;;  %v15964_v16 = vpop.f32.mrb[18].mxu1  ;;  %v15263_v41 = vld [vmem:[%s25575_s10] ss:$0 sm:$0xff] }
 0xea6   :  { %v15965_v20 = vpop.f32.mrb[19].mxu1 }
 0xea7   :  { %v13092_v19 = vadd.f32 %v15257_v58, %v13081_v29  ;;  %v15966_v62 = vadd.f32 %v15965_v20, %v15964_v16 }
 0xea9   :  { %v13096_v37 = vmax.f32 %v13092_v19, 0.0  ;;  %v13082_v56 = vadd.f32 %v15966_v62, %v12960_v36  ;;  %v15967_v60 = vpop.f32.mrb[20].mxu1 }
 0xeaa   :  { %v15968_v1 = vpop.f32.mrb[21].mxu1 }
 0xeab   :  { %v13093_v24 = vadd.f32 %v15257_v58, %v13082_v56  ;;  %v15969_v22 = vadd.f32 %v15968_v1, %v15967_v60  ;;  %16037 = vmatprep.mubr.msk.f32.mxu1 %vm13122_vm2, %v13096_v37 }
 0xead   :  { %v13097_v12 = vmax.f32 %v13093_v24, 0.0  ;;  %v13083_v57 = vadd.f32 %v15969_v22, %v12961_v0  ;;  %v15970_v4 = vpop.f32.mrb[22].mxu1 }
 0xeae   :  { %v15971_v50 = vpop.f32.mrb[23].mxu1 }
 0xeaf   :  { %v13094_v17 = vadd.f32 %v15257_v58, %v13083_v57  ;;  %v15972_v46 = vadd.f32 %v15971_v50, %v15970_v4  ;;  %16038 = vmatmul.mubr.msk.f32.vlgmr.msra.gmra.mrb[24].mxu1 %vm13122_vm2, %v13097_v12 }
 0xeb0   :  { %16914 = vmatpush3.bf16.msra.mxu1 %v25509_v59  ;;  %v13232_v59 = vld [vmem:[%s25572_s9 + $0x40] sm:$0xff] }
 0xeb1   :  { %v13098_v47 = vmax.f32 %v13094_v17, 0.0  ;;  %v13084_v6 = vadd.f32 %v15972_v46, %v12962_v28  ;;  %16916 = vmatprep.subr.bf16.mxu1 %v16915_v54  ;;  %v16927_v23 = vpack.c.bf16 %v13233_v25, %v13232_v59 }
 0xeb3   :  { %v13095_v14 = vadd.f32 %v15257_v58, %v13084_v6  ;;  %16040 = vmatprep.mubr.msk.f32.mxu1 %vm13122_vm2, %v13098_v47 }
 0xeb4   :  { %16918 = vmatpush3.bf16.msra.mxu1 %v16915_v54 }
 0xeb5   :  { %v13099_v2 = vmax.f32 %v13095_v14, 0.0  ;;  %16920 = vmatprep.subr.bf16.mxu1 %v16919_v39 }
 0xeb7   :  { %16041 = vmatmul.mubr.msk.f32.gmra.mrb[26].mxu1 %vm13122_vm2, %v13099_v2 }
 0xeb8   :  { %16922 = vmatpush3.bf16.msra.mxu1 %v16919_v39 }
 0xeb9   :  { %16924 = vmatprep.subr.bf16.mxu1 %v16923_v53 }
 0xebc   :  { %16926 = vmatpush3.bf16.msra.mxu1 %v16923_v53 }
 0xebd   :  { %16928 = vmatprep.subr.bf16.mxu1 %v16927_v23 }
 0xec0   :  { %16930 = vmatpush3.bf16.msra.mxu1 %v16927_v23 }
 0xec1   :  { %16063 = vmatprep.subr.msk.mxu1 %vm13255_vm3, %v13234_v45 }
 0xec4   :  { %16064 = vmatpush3.msk.msra.mxu1 %vm13255_vm3, %v13234_v45 }
 0xf82   :  { %v16039_v8 = vpop.f32.mrb[24].mxu1 }
 0xf83   :  { %v13207_v5 = vadd.f32 %v16039_v8, %v15258_v7  ;;  %v13201_v34 = vpop.f32.mrb[25].mxu1 }
 0xf84   :  { %v13202_v44 = vadd.f32 %v15258_v7, %v13201_v34 }
 0xf85   :  { %v13221_v15 = vmax.f32 %v13207_v5, 0.0 }
 0xf86   :  { %v13220_v48 = vmax.f32 %v13202_v44, 0.0 }
 0xf88   :  { %16065 = vmatprep.mubr.msk.f32.mxu1 %vm13242_vm4, %v13220_v48 }
 0xf89   :  { %16066 = vmatmul.mubr.msk.f32.vlgmr.msra.gmra.mrb[28].mxu1 %vm13242_vm4, %v13221_v15 }
 0xf8a   :  { %v16042_v32 = vpop.f32.mrb[26].mxu1 }
 0xf8b   :  { %v13217_v27 = vadd.f32 %v16042_v32, %v15258_v7  ;;  %v13211_v13 = vpop.f32.mrb[27].mxu1 }
 0xf8c   :  { %v13212_v31 = vadd.f32 %v15258_v7, %v13211_v13 }
 0xf8d   :  { %v13223_v9 = vmax.f32 %v13217_v27, 0.0 }
 0xf8e   :  { %v13222_v49 = vmax.f32 %v13212_v31, 0.0 }
 0xf90   :  { %16068 = vmatprep.mubr.msk.f32.mxu1 %vm13242_vm4, %v13222_v49 }
 0xf91   :  { %16069 = vmatmul.mubr.msk.f32.gmra.mrb[30].mxu1 %vm13242_vm4, %v13223_v9 }
0x105c   :  { %v16067_v51 = vpop.f32.mrb[28].mxu1 }
0x105d   :  { %v13331_v10 = vadd.f32 %v16067_v51, %v15263_v41  ;;  %v13325_v63 = vpop.f32.mrb[29].mxu1 }
0x105e   :  { %v13326_v36 = vadd.f32 %v15263_v41, %v13325_v63 }
0x105f   :  { %13346 = vst.msk [vmem:[%s25576_s11 + $0x8] sm:$0xff] %vm13344_vm5, %v13331_v10 }
0x1060   :  { %13345 = vst.msk [vmem:[%s25576_s11] sm:$0xff] %vm13344_vm5, %v13326_v36 }
0x1064   :  { %v16070_v38 = vpop.f32.mrb[30].mxu1 }
0x1065   :  { %v13341_v18 = vadd.f32 %v16070_v38, %v15263_v41  ;;  %v13335_v21 = vpop.f32.mrb[31].mxu1 }
0x1066   :  { %v13336_v0 = vadd.f32 %v15263_v41, %v13335_v21 }
0x1067   :  { %13348 = vst.msk [vmem:[%s25576_s11 + $0x18] sm:$0xff] %vm13344_vm5, %v13341_v18 }
0x1068   :  { %13347 = vst.msk [vmem:[%s25576_s11 + $0x10] sm:$0xff] %vm13344_vm5, %v13336_v0 }

</bundles_post_ra>
